<compile_context>
chip_gen: v6e
topology: v6e:2x2x1
jax: 0.10.0
libtpu: 0.0.40
codegen_flags: <defaults>
</compile_context>

<pallas_src>
import functools

import jax
import jax.numpy as jnp
from jax.experimental import pallas as pl
from jax.experimental.pallas import tpu as pltpu


# --------------------------------------------------------------------------
# Fused forward kernel
# --------------------------------------------------------------------------

def _make_fused_forward(N, H, W, Cin, C1, C2, NCLS, sigmoid_out_flag):
    HW = H * W
    # Padded-activation layout: image rows flattened, padded by >= one zero
    # image row (plus one element) at top and bottom.  DOFF is rounded up to a
    # multiple of 8 so the interior store is sublane-aligned.
    DOFF = ((W + 1 + 7) // 8) * 8                  # rows of zero padding at top
    PROWS = ((DOFF + HW + W + 1 + 7) // 8) * 8     # total padded rows

    def kernel(x_ref, wb_ref, bb_ref, wfa_ref, bfa_ref, wm_ref, bm_ref,
               wfc_ref, bfc_ref, cls_ref, am_ref, xp_ref, bp_ref, cp_ref):
        f32 = jnp.float32
        bf16 = jnp.bfloat16

        # Column-boundary masks for the dx = -1 / +1 taps (horizontal padding
        # is emulated by zeroing elements that wrapped across image rows).
        col = jax.lax.broadcasted_iota(jnp.int32, (HW, 1), 0) % W
        mask_l = (col != 0).astype(f32)            # kj == 0  (dx = -1)
        mask_r = (col != (W - 1)).astype(f32)      # kj == 2  (dx = +1)

        def pad_store(dst_ref, val):
            # Zero the whole padded scratch, then write the activation block.
            dst_ref[...] = jnp.zeros_like(dst_ref)
            dst_ref[pl.ds(DOFF, HW), :] = val

        def conv3x3(src_ref, w_ref, bias_ref):
            # src_ref: (PROWS, cin) f32 padded activation
            # w_ref  : (9, cin, cout) bf16 taps, bias_ref: (1, cout) f32
            cout = w_ref.shape[-1]
            acc = jnp.zeros((HW, cout), f32)
            for ki in range(3):
                for kj in range(3):
                    start = DOFF + (ki - 1) * W + (kj - 1)
                    tap = src_ref[pl.ds(start, HW), :]
                    if kj == 0:
                        tap = tap * mask_l
                    elif kj == 2:
                        tap = tap * mask_r
                    acc += jnp.dot(tap.astype(bf16), w_ref[ki * 3 + kj],
                                   preferred_element_type=f32)
            return acc + bias_ref[...]

        # ---- basis_branch: conv3x3 + ReLU ---------------------------------
        pad_store(xp_ref, x_ref[...].astype(f32))
        basis = jnp.maximum(conv3x3(xp_ref, wb_ref, bb_ref), 0.0)

        # ---- first_branch (3x3 + ReLU) & am_branch (1x1), one matmul ------
        pad_store(bp_ref, basis)
        fa = conv3x3(bp_ref, wfa_ref, bfa_ref)          # (HW, 2*C1)
        first = jnp.maximum(fa[:, :C1], 0.0)
        am_raw = fa[:, C1:]
        am_sig = jax.nn.sigmoid(am_raw)
        am_ref[...] = am_sig.astype(am_ref.dtype)       # returned attention map

        # ---- connection block: (1 + am) * first ---------------------------
        am_used = am_sig if sigmoid_out_flag else am_raw
        conn = (1.0 + am_used) * first

        # ---- merged_branch: conv3x3 + ReLU + global-avg-pool --------------
        pad_store(cp_ref, conn)
        merged = jnp.maximum(conv3x3(cp_ref, wm_ref, bm_ref), 0.0)  # (HW, C2)
        pooled = jnp.sum(merged, axis=0, keepdims=True) * (1.0 / HW)  # (1, C2)

        # ---- fc + sigmoid ---------------------------------------------------
        logits = jnp.dot(pooled.astype(bf16), wfc_ref[...],
                         preferred_element_type=f32) + bfc_ref[...]
        cls_ref[...] = jax.nn.sigmoid(logits).astype(cls_ref.dtype)

    return pl.pallas_call(
        kernel,
        out_shape=(
            jax.ShapeDtypeStruct((N, 1, NCLS), jnp.float32),
            jax.ShapeDtypeStruct((N, HW, C1), jnp.float32),
        ),
        grid=(N,),
        in_specs=[
            pl.BlockSpec((None, HW, Cin), lambda b: (b, 0, 0)),     # x rows
            pl.BlockSpec((9, Cin, C1), lambda b: (0, 0, 0)),        # basis w
            pl.BlockSpec((1, C1), lambda b: (0, 0)),                # basis b
            pl.BlockSpec((9, C1, 2 * C1), lambda b: (0, 0, 0)),     # first+am w
            pl.BlockSpec((1, 2 * C1), lambda b: (0, 0)),            # first+am b
            pl.BlockSpec((9, C1, C2), lambda b: (0, 0, 0)),         # merged w
            pl.BlockSpec((1, C2), lambda b: (0, 0)),                # merged b
            pl.BlockSpec((C2, NCLS), lambda b: (0, 0)),             # fc w
            pl.BlockSpec((1, NCLS), lambda b: (0, 0)),              # fc b
        ],
        out_specs=(
            pl.BlockSpec((None, 1, NCLS), lambda b: (b, 0, 0)),     # classifier
            pl.BlockSpec((None, HW, C1), lambda b: (b, 0, 0)),      # am sigmoid
        ),
        scratch_shapes=[
            pltpu.VMEM((PROWS, Cin), jnp.float32),   # padded input
            pltpu.VMEM((PROWS, C1), jnp.float32),    # padded basis
            pltpu.VMEM((PROWS, C1), jnp.float32),    # padded connection
        ],
        compiler_params=pltpu.CompilerParams(
            dimension_semantics=("parallel",),       # shard batch over TCs (v7x)
        ),
    )


# --------------------------------------------------------------------------
# Parameters + wrapper (trace-time weight repacking, NCHW external contract)
# --------------------------------------------------------------------------

def init_params(key, c_in=4, c1=8, c2=16, num_classes=10):
    ks = jax.random.split(key, 10)
    s = 0.1
    return {
        "basis_w": jax.random.normal(ks[0], (c1, c_in, 3, 3), jnp.float32) * s,
        "basis_b": jax.random.normal(ks[1], (c1,), jnp.float32) * s,
        "first_w": jax.random.normal(ks[2], (c1, c1, 3, 3), jnp.float32) * s,
        "first_b": jax.random.normal(ks[3], (c1,), jnp.float32) * s,
        "am_w": jax.random.normal(ks[4], (c1, c1, 1, 1), jnp.float32) * s,
        "am_b": jax.random.normal(ks[5], (c1,), jnp.float32) * s,
        "merged_w": jax.random.normal(ks[6], (c2, c1, 3, 3), jnp.float32) * s,
        "merged_b": jax.random.normal(ks[7], (c2,), jnp.float32) * s,
        # PyTorch nn.Linear weight layout: (num_classes, c2)
        "fc_w": jax.random.normal(ks[8], (num_classes, c2), jnp.float32) * s,
        "fc_b": jax.random.normal(ks[9], (num_classes,), jnp.float32) * s,
    }


def _conv_taps(w_oihw):
    """PyTorch conv weight (Cout, Cin, kh, kw) -> (kh*kw, Cin, Cout) tap stack."""
    cout, cin, kh, kw = w_oihw.shape
    return jnp.transpose(w_oihw, (2, 3, 1, 0)).reshape(kh * kw, cin, cout)


def attention_module_forward(params, x_nchw, sigmoid_out_flag=True):
    """Returns (classifier_result_sigmoid, am_out_sigmoid), matching the
    PyTorch module: classifier (N, num_classes), attention map (N, C1, H, W)."""
    N, Cin, H, W = x_nchw.shape
    C1 = params["basis_w"].shape[0]
    C2 = params["merged_w"].shape[0]
    NCLS = params["fc_w"].shape[0]
    HW = H * W
    bf16 = jnp.bfloat16
    f32 = jnp.float32

    # NCHW -> (N, H*W, C) rows for the kernel (channels on lanes).
    x_rows = jnp.transpose(x_nchw, (0, 2, 3, 1)).reshape(N, HW, Cin).astype(f32)

    wb = _conv_taps(params["basis_w"]).astype(bf16)                  # (9,Cin,C1)
    bb = params["basis_b"].reshape(1, C1).astype(f32)

    # Merge first (3x3) and am (1x1, centre tap only) along Cout.
    first_taps = _conv_taps(params["first_w"]).astype(f32)           # (9,C1,C1)
    am_tap = _conv_taps(params["am_w"]).astype(f32)                  # (1,C1,C1)
    am_taps = jnp.zeros((9, C1, C1), f32).at[4].set(am_tap[0])
    wfa = jnp.concatenate([first_taps, am_taps], axis=-1).astype(bf16)  # (9,C1,2C1)
    bfa = jnp.concatenate([params["first_b"], params["am_b"]]).reshape(1, 2 * C1).astype(f32)

    wm = _conv_taps(params["merged_w"]).astype(bf16)                 # (9,C1,C2)
    bm = params["merged_b"].reshape(1, C2).astype(f32)

    wfc = jnp.transpose(params["fc_w"]).astype(bf16)                 # (C2,NCLS)
    bfc = params["fc_b"].reshape(1, NCLS).astype(f32)

    fused = _make_fused_forward(N, H, W, Cin, C1, C2, NCLS, bool(sigmoid_out_flag))
    cls3, am_rows = fused(x_rows, wb, bb, wfa, bfa, wm, bm, wfc, bfc)

    cls_sigmoid = cls3.reshape(N, NCLS)
    am_sig_nchw = jnp.transpose(am_rows.reshape(N, H, W, C1), (0, 3, 1, 2))
    return cls_sigmoid, am_sig_nchw


# --------------------------------------------------------------------------
# Main
# --------------------------------------------------------------------------

if __name__ == "__main__":
    key = jax.random.PRNGKey(0)
    k_param, k_x = jax.random.split(key)

    N, C_IN, H, W = 2, 4, 16, 16
    params = init_params(k_param, c_in=C_IN, c1=8, c2=16, num_classes=10)
    x = jax.random.normal(k_x, (N, C_IN, H, W), jnp.float32)

    fwd = jax.jit(functools.partial(attention_module_forward,
                                    sigmoid_out_flag=True))
    cls_out, am_out = fwd(params, x)
    jax.block_until_ready((cls_out, am_out))

    assert cls_out.shape == (N, 10)
    assert am_out.shape == (N, 8, H, W)
    assert bool(jnp.all(jnp.isfinite(cls_out))) and bool(jnp.all(jnp.isfinite(am_out)))
    print("KERNEL_OK")
</pallas_src>

<mosaic_0001>
module attributes {stable_mosaic.version = 11 : i64} {
  func.func @kernel(%arg0: i32, %arg1: memref<1x256x4xf32, #tpu.memory_space<vmem>>, %arg2: memref<9x4x8xbf16, #tpu.memory_space<vmem>>, %arg3: memref<1x8xf32, #tpu.memory_space<vmem>>, %arg4: memref<9x8x16xbf16, #tpu.memory_space<vmem>>, %arg5: memref<1x16xf32, #tpu.memory_space<vmem>>, %arg6: memref<9x8x16xbf16, #tpu.memory_space<vmem>>, %arg7: memref<1x16xf32, #tpu.memory_space<vmem>>, %arg8: memref<16x10xbf16, #tpu.memory_space<vmem>>, %arg9: memref<1x10xf32, #tpu.memory_space<vmem>>, %arg10: memref<1x1x10xf32, #tpu.memory_space<vmem>>, %arg11: memref<1x256x8xf32, #tpu.memory_space<vmem>>, %arg12: memref<304x4xf32, #tpu.memory_space<vmem>>, %arg13: memref<304x8xf32, #tpu.memory_space<vmem>>, %arg14: memref<304x8xf32, #tpu.memory_space<vmem>>) attributes {dimension_semantics = [#tpu.dimension_semantics<parallel>], iteration_bounds = array<i64: 2>, scalar_prefetch = 0 : i64, scratch_operands = 3 : i64, tpu.core_type = #tpu.core_type<tc>, window_params = [{transform_indices = @transform_0, window_bounds = array<i64: 1, 256, 4>}, {pipeline_mode = #tpu.pipeline_mode<synchronous>, transform_indices = @transform_1, window_bounds = array<i64: 9, 4, 8>}, {pipeline_mode = #tpu.pipeline_mode<synchronous>, transform_indices = @transform_2, window_bounds = array<i64: 1, 8>}, {pipeline_mode = #tpu.pipeline_mode<synchronous>, transform_indices = @transform_3, window_bounds = array<i64: 9, 8, 16>}, {pipeline_mode = #tpu.pipeline_mode<synchronous>, transform_indices = @transform_4, window_bounds = array<i64: 1, 16>}, {pipeline_mode = #tpu.pipeline_mode<synchronous>, transform_indices = @transform_5, window_bounds = array<i64: 9, 8, 16>}, {pipeline_mode = #tpu.pipeline_mode<synchronous>, transform_indices = @transform_6, window_bounds = array<i64: 1, 16>}, {pipeline_mode = #tpu.pipeline_mode<synchronous>, transform_indices = @transform_7, window_bounds = array<i64: 16, 10>}, {pipeline_mode = #tpu.pipeline_mode<synchronous>, transform_indices = @transform_8, window_bounds = array<i64: 1, 10>}, {transform_indices = @transform_9, window_bounds = array<i64: 1, 1, 10>}, {transform_indices = @transform_10, window_bounds = array<i64: 1, 256, 8>}]} {
    %0 = tpu.iota {dimensions = array<i32: 0>} : vector<256x1xi32>
    %c16_i32 = arith.constant 16 : i32
    %c0_i32 = arith.constant 0 : i32
    %1 = arith.cmpi eq, %c16_i32, %c0_i32 : i32
    %c1_i32 = arith.constant 1 : i32
    %2 = arith.select %1, %c1_i32, %c16_i32 : i32
    %3 = vector.broadcast %2 : i32 to vector<256x1xi32>
    %4 = arith.remsi %0, %3 : vector<256x1xi32>
    %c0_i32_0 = arith.constant 0 : i32
    %5 = vector.broadcast %c0_i32_0 : i32 to vector<256x1xi32>
    %6 = arith.cmpi ne, %4, %5 : vector<256x1xi32>
    %c0_i32_1 = arith.constant 0 : i32
    %7 = vector.broadcast %c0_i32_1 : i32 to vector<256x1xi32>
    %8 = arith.cmpi slt, %4, %7 : vector<256x1xi32>
    %c0_i32_2 = arith.constant 0 : i32
    %9 = arith.cmpi slt, %2, %c0_i32_2 : i32
    %10 = vector.broadcast %9 : i1 to vector<256x1xi1>
    %11 = vector.broadcast %10 : vector<256x1xi1> to vector<256x1xi1>
    %12 = arith.xori %8, %11 : vector<256x1xi1>
    %13 = arith.andi %12, %6 : vector<256x1xi1>
    %14 = vector.broadcast %2 : i32 to vector<256x1xi32>
    %15 = arith.addi %4, %14 : vector<256x1xi32>
    %16 = arith.select %13, %15, %4 : vector<256x1xi1>, vector<256x1xi32>
    %c0_i32_3 = arith.constant 0 : i32
    %17 = vector.broadcast %c0_i32_3 : i32 to vector<256x1xi32>
    %18 = arith.cmpi ne, %16, %17 : vector<256x1xi32>
    %19 = arith.extui %18 : vector<256x1xi1> to vector<256x1xi32>
    %20 = arith.sitofp %19 : vector<256x1xi32> to vector<256x1xf32>
    %c15_i32 = arith.constant 15 : i32
    %21 = vector.broadcast %c15_i32 : i32 to vector<256x1xi32>
    %22 = arith.cmpi ne, %16, %21 : vector<256x1xi32>
    %23 = arith.extui %22 : vector<256x1xi1> to vector<256x1xi32>
    %24 = arith.sitofp %23 : vector<256x1xi32> to vector<256x1xf32>
    %c0 = arith.constant 0 : index
    %c0_4 = arith.constant 0 : index
    %c0_5 = arith.constant 0 : index
    %25 = vector.load %arg1[%c0, %c0_4, %c0_5] : memref<1x256x4xf32, #tpu.memory_space<vmem>>, vector<1x256x4xf32>
    %26 = vector.shape_cast %25 : vector<1x256x4xf32> to vector<256x4xf32>
    %cst = arith.constant 0.000000e+00 : f32
    %27 = vector.broadcast %cst : f32 to vector<304x4xf32>
    %c0_6 = arith.constant 0 : index
    %c0_7 = arith.constant 0 : index
    %28 = vector.load %arg12[%c0_6, %c0_7] : memref<304x4xf32, #tpu.memory_space<vmem>>, vector<304x4xf32>
    tpu.vector_store %arg12[%c0_6, %c0_7], %27 {strides = array<i32>} : memref<304x4xf32, #tpu.memory_space<vmem>>, vector<304x4xf32>,
    %c24 = arith.constant 24 : index
    %c0_8 = arith.constant 0 : index
    %29 = vector.load %arg12[%c24, %c0_8] : memref<304x4xf32, #tpu.memory_space<vmem>>, vector<256x4xf32>
    tpu.vector_store %arg12[%c24, %c0_8], %26 {strides = array<i32>} : memref<304x4xf32, #tpu.memory_space<vmem>>, vector<256x4xf32>,
    %cst_9 = arith.constant 0.000000e+00 : f32
    %30 = vector.broadcast %cst_9 : f32 to vector<256x8xf32>
    %c7 = arith.constant 7 : index
    %c0_10 = arith.constant 0 : index
    %31 = vector.load %arg12[%c7, %c0_10] : memref<304x4xf32, #tpu.memory_space<vmem>>, vector<256x4xf32>
    %32 = vector.broadcast %20 : vector<256x1xf32> to vector<256x4xf32>
    %33 = arith.mulf %31, %32 : vector<256x4xf32>
    %34 = arith.truncf %33 : vector<256x4xf32> to vector<256x4xbf16>
    %c0_11 = arith.constant 0 : index
    %c0_12 = arith.constant 0 : index
    %c0_13 = arith.constant 0 : index
    %35 = vector.load %arg2[%c0_11, %c0_12, %c0_13] : memref<9x4x8xbf16, #tpu.memory_space<vmem>>, vector<1x4x8xbf16>
    %36 = vector.shape_cast %35 : vector<1x4x8xbf16> to vector<4x8xbf16>
    %cst_14 = arith.constant dense<0.000000e+00> : vector<256x8xf32>
    %37 = tpu.matmul %34, %36, %cst_14 {dimension_numbers = #tpu.dot_dimension_numbers<[1], [0], [0], [1], [0, 0, 1, 1], [], []>} : vector<256x4xbf16>, vector<4x8xbf16>, vector<256x8xf32> -> vector<256x8xf32>
    %38 = arith.addf %30, %37 : vector<256x8xf32>
    %c8 = arith.constant 8 : index
    %c0_15 = arith.constant 0 : index
    %39 = vector.load %arg12[%c8, %c0_15] : memref<304x4xf32, #tpu.memory_space<vmem>>, vector<256x4xf32>
    %40 = arith.truncf %39 : vector<256x4xf32> to vector<256x4xbf16>
    %c1 = arith.constant 1 : index
    %c0_16 = arith.constant 0 : index
    %c0_17 = arith.constant 0 : index
    %41 = vector.load %arg2[%c1, %c0_16, %c0_17] : memref<9x4x8xbf16, #tpu.memory_space<vmem>>, vector<1x4x8xbf16>
    %42 = vector.shape_cast %41 : vector<1x4x8xbf16> to vector<4x8xbf16>
    %cst_18 = arith.constant dense<0.000000e+00> : vector<256x8xf32>
    %43 = tpu.matmul %40, %42, %cst_18 {dimension_numbers = #tpu.dot_dimension_numbers<[1], [0], [0], [1], [0, 0, 1, 1], [], []>} : vector<256x4xbf16>, vector<4x8xbf16>, vector<256x8xf32> -> vector<256x8xf32>
    %44 = arith.addf %38, %43 : vector<256x8xf32>
    %c9 = arith.constant 9 : index
    %c0_19 = arith.constant 0 : index
    %45 = vector.load %arg12[%c9, %c0_19] : memref<304x4xf32, #tpu.memory_space<vmem>>, vector<256x4xf32>
    %46 = vector.broadcast %24 : vector<256x1xf32> to vector<256x4xf32>
    %47 = arith.mulf %45, %46 : vector<256x4xf32>
    %48 = arith.truncf %47 : vector<256x4xf32> to vector<256x4xbf16>
    %c2 = arith.constant 2 : index
    %c0_20 = arith.constant 0 : index
    %c0_21 = arith.constant 0 : index
    %49 = vector.load %arg2[%c2, %c0_20, %c0_21] : memref<9x4x8xbf16, #tpu.memory_space<vmem>>, vector<1x4x8xbf16>
    %50 = vector.shape_cast %49 : vector<1x4x8xbf16> to vector<4x8xbf16>
    %cst_22 = arith.constant dense<0.000000e+00> : vector<256x8xf32>
    %51 = tpu.matmul %48, %50, %cst_22 {dimension_numbers = #tpu.dot_dimension_numbers<[1], [0], [0], [1], [0, 0, 1, 1], [], []>} : vector<256x4xbf16>, vector<4x8xbf16>, vector<256x8xf32> -> vector<256x8xf32>
    %52 = arith.addf %44, %51 : vector<256x8xf32>
    %c23 = arith.constant 23 : index
    %c0_23 = arith.constant 0 : index
    %53 = vector.load %arg12[%c23, %c0_23] : memref<304x4xf32, #tpu.memory_space<vmem>>, vector<256x4xf32>
    %54 = vector.broadcast %20 : vector<256x1xf32> to vector<256x4xf32>
    %55 = arith.mulf %53, %54 : vector<256x4xf32>
    %56 = arith.truncf %55 : vector<256x4xf32> to vector<256x4xbf16>
    %c3 = arith.constant 3 : index
    %c0_24 = arith.constant 0 : index
    %c0_25 = arith.constant 0 : index
    %57 = vector.load %arg2[%c3, %c0_24, %c0_25] : memref<9x4x8xbf16, #tpu.memory_space<vmem>>, vector<1x4x8xbf16>
    %58 = vector.shape_cast %57 : vector<1x4x8xbf16> to vector<4x8xbf16>
    %cst_26 = arith.constant dense<0.000000e+00> : vector<256x8xf32>
    %59 = tpu.matmul %56, %58, %cst_26 {dimension_numbers = #tpu.dot_dimension_numbers<[1], [0], [0], [1], [0, 0, 1, 1], [], []>} : vector<256x4xbf16>, vector<4x8xbf16>, vector<256x8xf32> -> vector<256x8xf32>
    %60 = arith.addf %52, %59 : vector<256x8xf32>
    %c24_27 = arith.constant 24 : index
    %c0_28 = arith.constant 0 : index
    %61 = vector.load %arg12[%c24_27, %c0_28] : memref<304x4xf32, #tpu.memory_space<vmem>>, vector<256x4xf32>
    %62 = arith.truncf %61 : vector<256x4xf32> to vector<256x4xbf16>
    %c4 = arith.constant 4 : index
    %c0_29 = arith.constant 0 : index
    %c0_30 = arith.constant 0 : index
    %63 = vector.load %arg2[%c4, %c0_29, %c0_30] : memref<9x4x8xbf16, #tpu.memory_space<vmem>>, vector<1x4x8xbf16>
    %64 = vector.shape_cast %63 : vector<1x4x8xbf16> to vector<4x8xbf16>
    %cst_31 = arith.constant dense<0.000000e+00> : vector<256x8xf32>
    %65 = tpu.matmul %62, %64, %cst_31 {dimension_numbers = #tpu.dot_dimension_numbers<[1], [0], [0], [1], [0, 0, 1, 1], [], []>} : vector<256x4xbf16>, vector<4x8xbf16>, vector<256x8xf32> -> vector<256x8xf32>
    %66 = arith.addf %60, %65 : vector<256x8xf32>
    %c25 = arith.constant 25 : index
    %c0_32 = arith.constant 0 : index
    %67 = vector.load %arg12[%c25, %c0_32] : memref<304x4xf32, #tpu.memory_space<vmem>>, vector<256x4xf32>
    %68 = vector.broadcast %24 : vector<256x1xf32> to vector<256x4xf32>
    %69 = arith.mulf %67, %68 : vector<256x4xf32>
    %70 = arith.truncf %69 : vector<256x4xf32> to vector<256x4xbf16>
    %c5 = arith.constant 5 : index
    %c0_33 = arith.constant 0 : index
    %c0_34 = arith.constant 0 : index
    %71 = vector.load %arg2[%c5, %c0_33, %c0_34] : memref<9x4x8xbf16, #tpu.memory_space<vmem>>, vector<1x4x8xbf16>
    %72 = vector.shape_cast %71 : vector<1x4x8xbf16> to vector<4x8xbf16>
    %cst_35 = arith.constant dense<0.000000e+00> : vector<256x8xf32>
    %73 = tpu.matmul %70, %72, %cst_35 {dimension_numbers = #tpu.dot_dimension_numbers<[1], [0], [0], [1], [0, 0, 1, 1], [], []>} : vector<256x4xbf16>, vector<4x8xbf16>, vector<256x8xf32> -> vector<256x8xf32>
    %74 = arith.addf %66, %73 : vector<256x8xf32>
    %c39 = arith.constant 39 : index
    %c0_36 = arith.constant 0 : index
    %75 = vector.load %arg12[%c39, %c0_36] : memref<304x4xf32, #tpu.memory_space<vmem>>, vector<256x4xf32>
    %76 = vector.broadcast %20 : vector<256x1xf32> to vector<256x4xf32>
    %77 = arith.mulf %75, %76 : vector<256x4xf32>
    %78 = arith.truncf %77 : vector<256x4xf32> to vector<256x4xbf16>
    %c6 = arith.constant 6 : index
    %c0_37 = arith.constant 0 : index
    %c0_38 = arith.constant 0 : index
    %79 = vector.load %arg2[%c6, %c0_37, %c0_38] : memref<9x4x8xbf16, #tpu.memory_space<vmem>>, vector<1x4x8xbf16>
    %80 = vector.shape_cast %79 : vector<1x4x8xbf16> to vector<4x8xbf16>
    %cst_39 = arith.constant dense<0.000000e+00> : vector<256x8xf32>
    %81 = tpu.matmul %78, %80, %cst_39 {dimension_numbers = #tpu.dot_dimension_numbers<[1], [0], [0], [1], [0, 0, 1, 1], [], []>} : vector<256x4xbf16>, vector<4x8xbf16>, vector<256x8xf32> -> vector<256x8xf32>
    %82 = arith.addf %74, %81 : vector<256x8xf32>
    %c40 = arith.constant 40 : index
    %c0_40 = arith.constant 0 : index
    %83 = vector.load %arg12[%c40, %c0_40] : memref<304x4xf32, #tpu.memory_space<vmem>>, vector<256x4xf32>
    %84 = arith.truncf %83 : vector<256x4xf32> to vector<256x4xbf16>
    %c7_41 = arith.constant 7 : index
    %c0_42 = arith.constant 0 : index
    %c0_43 = arith.constant 0 : index
    %85 = vector.load %arg2[%c7_41, %c0_42, %c0_43] : memref<9x4x8xbf16, #tpu.memory_space<vmem>>, vector<1x4x8xbf16>
    %86 = vector.shape_cast %85 : vector<1x4x8xbf16> to vector<4x8xbf16>
    %cst_44 = arith.constant dense<0.000000e+00> : vector<256x8xf32>
    %87 = tpu.matmul %84, %86, %cst_44 {dimension_numbers = #tpu.dot_dimension_numbers<[1], [0], [0], [1], [0, 0, 1, 1], [], []>} : vector<256x4xbf16>, vector<4x8xbf16>, vector<256x8xf32> -> vector<256x8xf32>
    %88 = arith.addf %82, %87 : vector<256x8xf32>
    %c41 = arith.constant 41 : index
    %c0_45 = arith.constant 0 : index
    %89 = vector.load %arg12[%c41, %c0_45] : memref<304x4xf32, #tpu.memory_space<vmem>>, vector<256x4xf32>
    %90 = vector.broadcast %24 : vector<256x1xf32> to vector<256x4xf32>
    %91 = arith.mulf %89, %90 : vector<256x4xf32>
    %92 = arith.truncf %91 : vector<256x4xf32> to vector<256x4xbf16>
    %c8_46 = arith.constant 8 : index
    %c0_47 = arith.constant 0 : index
    %c0_48 = arith.constant 0 : index
    %93 = vector.load %arg2[%c8_46, %c0_47, %c0_48] : memref<9x4x8xbf16, #tpu.memory_space<vmem>>, vector<1x4x8xbf16>
    %94 = vector.shape_cast %93 : vector<1x4x8xbf16> to vector<4x8xbf16>
    %cst_49 = arith.constant dense<0.000000e+00> : vector<256x8xf32>
    %95 = tpu.matmul %92, %94, %cst_49 {dimension_numbers = #tpu.dot_dimension_numbers<[1], [0], [0], [1], [0, 0, 1, 1], [], []>} : vector<256x4xbf16>, vector<4x8xbf16>, vector<256x8xf32> -> vector<256x8xf32>
    %96 = arith.addf %88, %95 : vector<256x8xf32>
    %c0_50 = arith.constant 0 : index
    %c0_51 = arith.constant 0 : index
    %97 = vector.load %arg3[%c0_50, %c0_51] : memref<1x8xf32, #tpu.memory_space<vmem>>, vector<1x8xf32>
    %98 = vector.broadcast %97 : vector<1x8xf32> to vector<256x8xf32>
    %99 = arith.addf %96, %98 : vector<256x8xf32>
    %cst_52 = arith.constant 0.000000e+00 : f32
    %100 = vector.broadcast %cst_52 : f32 to vector<256x8xf32>
    %101 = arith.maximumf %99, %100 : vector<256x8xf32>
    %cst_53 = arith.constant 0.000000e+00 : f32
    %102 = vector.broadcast %cst_53 : f32 to vector<304x8xf32>
    %c0_54 = arith.constant 0 : index
    %c0_55 = arith.constant 0 : index
    %103 = vector.load %arg13[%c0_54, %c0_55] : memref<304x8xf32, #tpu.memory_space<vmem>>, vector<304x8xf32>
    tpu.vector_store %arg13[%c0_54, %c0_55], %102 {strides = array<i32>} : memref<304x8xf32, #tpu.memory_space<vmem>>, vector<304x8xf32>,
    %c24_56 = arith.constant 24 : index
    %c0_57 = arith.constant 0 : index
    %104 = vector.load %arg13[%c24_56, %c0_57] : memref<304x8xf32, #tpu.memory_space<vmem>>, vector<256x8xf32>
    tpu.vector_store %arg13[%c24_56, %c0_57], %101 {strides = array<i32>} : memref<304x8xf32, #tpu.memory_space<vmem>>, vector<256x8xf32>,
    %cst_58 = arith.constant 0.000000e+00 : f32
    %105 = vector.broadcast %cst_58 : f32 to vector<256x16xf32>
    %c7_59 = arith.constant 7 : index
    %c0_60 = arith.constant 0 : index
    %106 = vector.load %arg13[%c7_59, %c0_60] : memref<304x8xf32, #tpu.memory_space<vmem>>, vector<256x8xf32>
    %107 = vector.broadcast %20 : vector<256x1xf32> to vector<256x8xf32>
    %108 = arith.mulf %106, %107 : vector<256x8xf32>
    %109 = arith.truncf %108 : vector<256x8xf32> to vector<256x8xbf16>
    %c0_61 = arith.constant 0 : index
    %c0_62 = arith.constant 0 : index
    %c0_63 = arith.constant 0 : index
    %110 = vector.load %arg4[%c0_61, %c0_62, %c0_63] : memref<9x8x16xbf16, #tpu.memory_space<vmem>>, vector<1x8x16xbf16>
    %111 = vector.shape_cast %110 : vector<1x8x16xbf16> to vector<8x16xbf16>
    %cst_64 = arith.constant dense<0.000000e+00> : vector<256x16xf32>
    %112 = tpu.matmul %109, %111, %cst_64 {dimension_numbers = #tpu.dot_dimension_numbers<[1], [0], [0], [1], [0, 0, 1, 1], [], []>} : vector<256x8xbf16>, vector<8x16xbf16>, vector<256x16xf32> -> vector<256x16xf32>
    %113 = arith.addf %105, %112 : vector<256x16xf32>
    %c8_65 = arith.constant 8 : index
    %c0_66 = arith.constant 0 : index
    %114 = vector.load %arg13[%c8_65, %c0_66] : memref<304x8xf32, #tpu.memory_space<vmem>>, vector<256x8xf32>
    %115 = arith.truncf %114 : vector<256x8xf32> to vector<256x8xbf16>
    %c1_67 = arith.constant 1 : index
    %c0_68 = arith.constant 0 : index
    %c0_69 = arith.constant 0 : index
    %116 = vector.load %arg4[%c1_67, %c0_68, %c0_69] : memref<9x8x16xbf16, #tpu.memory_space<vmem>>, vector<1x8x16xbf16>
    %117 = vector.shape_cast %116 : vector<1x8x16xbf16> to vector<8x16xbf16>
    %cst_70 = arith.constant dense<0.000000e+00> : vector<256x16xf32>
    %118 = tpu.matmul %115, %117, %cst_70 {dimension_numbers = #tpu.dot_dimension_numbers<[1], [0], [0], [1], [0, 0, 1, 1], [], []>} : vector<256x8xbf16>, vector<8x16xbf16>, vector<256x16xf32> -> vector<256x16xf32>
    %119 = arith.addf %113, %118 : vector<256x16xf32>
    %c9_71 = arith.constant 9 : index
    %c0_72 = arith.constant 0 : index
    %120 = vector.load %arg13[%c9_71, %c0_72] : memref<304x8xf32, #tpu.memory_space<vmem>>, vector<256x8xf32>
    %121 = vector.broadcast %24 : vector<256x1xf32> to vector<256x8xf32>
    %122 = arith.mulf %120, %121 : vector<256x8xf32>
    %123 = arith.truncf %122 : vector<256x8xf32> to vector<256x8xbf16>
    %c2_73 = arith.constant 2 : index
    %c0_74 = arith.constant 0 : index
    %c0_75 = arith.constant 0 : index
    %124 = vector.load %arg4[%c2_73, %c0_74, %c0_75] : memref<9x8x16xbf16, #tpu.memory_space<vmem>>, vector<1x8x16xbf16>
    %125 = vector.shape_cast %124 : vector<1x8x16xbf16> to vector<8x16xbf16>
    %cst_76 = arith.constant dense<0.000000e+00> : vector<256x16xf32>
    %126 = tpu.matmul %123, %125, %cst_76 {dimension_numbers = #tpu.dot_dimension_numbers<[1], [0], [0], [1], [0, 0, 1, 1], [], []>} : vector<256x8xbf16>, vector<8x16xbf16>, vector<256x16xf32> -> vector<256x16xf32>
    %127 = arith.addf %119, %126 : vector<256x16xf32>
    %c23_77 = arith.constant 23 : index
    %c0_78 = arith.constant 0 : index
    %128 = vector.load %arg13[%c23_77, %c0_78] : memref<304x8xf32, #tpu.memory_space<vmem>>, vector<256x8xf32>
    %129 = vector.broadcast %20 : vector<256x1xf32> to vector<256x8xf32>
    %130 = arith.mulf %128, %129 : vector<256x8xf32>
    %131 = arith.truncf %130 : vector<256x8xf32> to vector<256x8xbf16>
    %c3_79 = arith.constant 3 : index
    %c0_80 = arith.constant 0 : index
    %c0_81 = arith.constant 0 : index
    %132 = vector.load %arg4[%c3_79, %c0_80, %c0_81] : memref<9x8x16xbf16, #tpu.memory_space<vmem>>, vector<1x8x16xbf16>
    %133 = vector.shape_cast %132 : vector<1x8x16xbf16> to vector<8x16xbf16>
    %cst_82 = arith.constant dense<0.000000e+00> : vector<256x16xf32>
    %134 = tpu.matmul %131, %133, %cst_82 {dimension_numbers = #tpu.dot_dimension_numbers<[1], [0], [0], [1], [0, 0, 1, 1], [], []>} : vector<256x8xbf16>, vector<8x16xbf16>, vector<256x16xf32> -> vector<256x16xf32>
    %135 = arith.addf %127, %134 : vector<256x16xf32>
    %c24_83 = arith.constant 24 : index
    %c0_84 = arith.constant 0 : index
    %136 = vector.load %arg13[%c24_83, %c0_84] : memref<304x8xf32, #tpu.memory_space<vmem>>, vector<256x8xf32>
    %137 = arith.truncf %136 : vector<256x8xf32> to vector<256x8xbf16>
    %c4_85 = arith.constant 4 : index
    %c0_86 = arith.constant 0 : index
    %c0_87 = arith.constant 0 : index
    %138 = vector.load %arg4[%c4_85, %c0_86, %c0_87] : memref<9x8x16xbf16, #tpu.memory_space<vmem>>, vector<1x8x16xbf16>
    %139 = vector.shape_cast %138 : vector<1x8x16xbf16> to vector<8x16xbf16>
    %cst_88 = arith.constant dense<0.000000e+00> : vector<256x16xf32>
    %140 = tpu.matmul %137, %139, %cst_88 {dimension_numbers = #tpu.dot_dimension_numbers<[1], [0], [0], [1], [0, 0, 1, 1], [], []>} : vector<256x8xbf16>, vector<8x16xbf16>, vector<256x16xf32> -> vector<256x16xf32>
    %141 = arith.addf %135, %140 : vector<256x16xf32>
    %c25_89 = arith.constant 25 : index
    %c0_90 = arith.constant 0 : index
    %142 = vector.load %arg13[%c25_89, %c0_90] : memref<304x8xf32, #tpu.memory_space<vmem>>, vector<256x8xf32>
    %143 = vector.broadcast %24 : vector<256x1xf32> to vector<256x8xf32>
    %144 = arith.mulf %142, %143 : vector<256x8xf32>
    %145 = arith.truncf %144 : vector<256x8xf32> to vector<256x8xbf16>
    %c5_91 = arith.constant 5 : index
    %c0_92 = arith.constant 0 : index
    %c0_93 = arith.constant 0 : index
    %146 = vector.load %arg4[%c5_91, %c0_92, %c0_93] : memref<9x8x16xbf16, #tpu.memory_space<vmem>>, vector<1x8x16xbf16>
    %147 = vector.shape_cast %146 : vector<1x8x16xbf16> to vector<8x16xbf16>
    %cst_94 = arith.constant dense<0.000000e+00> : vector<256x16xf32>
    %148 = tpu.matmul %145, %147, %cst_94 {dimension_numbers = #tpu.dot_dimension_numbers<[1], [0], [0], [1], [0, 0, 1, 1], [], []>} : vector<256x8xbf16>, vector<8x16xbf16>, vector<256x16xf32> -> vector<256x16xf32>
    %149 = arith.addf %141, %148 : vector<256x16xf32>
    %c39_95 = arith.constant 39 : index
    %c0_96 = arith.constant 0 : index
    %150 = vector.load %arg13[%c39_95, %c0_96] : memref<304x8xf32, #tpu.memory_space<vmem>>, vector<256x8xf32>
    %151 = vector.broadcast %20 : vector<256x1xf32> to vector<256x8xf32>
    %152 = arith.mulf %150, %151 : vector<256x8xf32>
    %153 = arith.truncf %152 : vector<256x8xf32> to vector<256x8xbf16>
    %c6_97 = arith.constant 6 : index
    %c0_98 = arith.constant 0 : index
    %c0_99 = arith.constant 0 : index
    %154 = vector.load %arg4[%c6_97, %c0_98, %c0_99] : memref<9x8x16xbf16, #tpu.memory_space<vmem>>, vector<1x8x16xbf16>
    %155 = vector.shape_cast %154 : vector<1x8x16xbf16> to vector<8x16xbf16>
    %cst_100 = arith.constant dense<0.000000e+00> : vector<256x16xf32>
    %156 = tpu.matmul %153, %155, %cst_100 {dimension_numbers = #tpu.dot_dimension_numbers<[1], [0], [0], [1], [0, 0, 1, 1], [], []>} : vector<256x8xbf16>, vector<8x16xbf16>, vector<256x16xf32> -> vector<256x16xf32>
    %157 = arith.addf %149, %156 : vector<256x16xf32>
    %c40_101 = arith.constant 40 : index
    %c0_102 = arith.constant 0 : index
    %158 = vector.load %arg13[%c40_101, %c0_102] : memref<304x8xf32, #tpu.memory_space<vmem>>, vector<256x8xf32>
    %159 = arith.truncf %158 : vector<256x8xf32> to vector<256x8xbf16>
    %c7_103 = arith.constant 7 : index
    %c0_104 = arith.constant 0 : index
    %c0_105 = arith.constant 0 : index
    %160 = vector.load %arg4[%c7_103, %c0_104, %c0_105] : memref<9x8x16xbf16, #tpu.memory_space<vmem>>, vector<1x8x16xbf16>
    %161 = vector.shape_cast %160 : vector<1x8x16xbf16> to vector<8x16xbf16>
    %cst_106 = arith.constant dense<0.000000e+00> : vector<256x16xf32>
    %162 = tpu.matmul %159, %161, %cst_106 {dimension_numbers = #tpu.dot_dimension_numbers<[1], [0], [0], [1], [0, 0, 1, 1], [], []>} : vector<256x8xbf16>, vector<8x16xbf16>, vector<256x16xf32> -> vector<256x16xf32>
    %163 = arith.addf %157, %162 : vector<256x16xf32>
    %c41_107 = arith.constant 41 : index
    %c0_108 = arith.constant 0 : index
    %164 = vector.load %arg13[%c41_107, %c0_108] : memref<304x8xf32, #tpu.memory_space<vmem>>, vector<256x8xf32>
    %165 = vector.broadcast %24 : vector<256x1xf32> to vector<256x8xf32>
    %166 = arith.mulf %164, %165 : vector<256x8xf32>
    %167 = arith.truncf %166 : vector<256x8xf32> to vector<256x8xbf16>
    %c8_109 = arith.constant 8 : index
    %c0_110 = arith.constant 0 : index
    %c0_111 = arith.constant 0 : index
    %168 = vector.load %arg4[%c8_109, %c0_110, %c0_111] : memref<9x8x16xbf16, #tpu.memory_space<vmem>>, vector<1x8x16xbf16>
    %169 = vector.shape_cast %168 : vector<1x8x16xbf16> to vector<8x16xbf16>
    %cst_112 = arith.constant dense<0.000000e+00> : vector<256x16xf32>
    %170 = tpu.matmul %167, %169, %cst_112 {dimension_numbers = #tpu.dot_dimension_numbers<[1], [0], [0], [1], [0, 0, 1, 1], [], []>} : vector<256x8xbf16>, vector<8x16xbf16>, vector<256x16xf32> -> vector<256x16xf32>
    %171 = arith.addf %163, %170 : vector<256x16xf32>
    %c0_113 = arith.constant 0 : index
    %c0_114 = arith.constant 0 : index
    %172 = vector.load %arg5[%c0_113, %c0_114] : memref<1x16xf32, #tpu.memory_space<vmem>>, vector<1x16xf32>
    %173 = vector.broadcast %172 : vector<1x16xf32> to vector<256x16xf32>
    %174 = arith.addf %171, %173 : vector<256x16xf32>
    %175 = vector.extract_strided_slice %174 {offsets = [0, 0], sizes = [256, 8], strides = [1, 1]} : vector<256x16xf32> to vector<256x8xf32>
    %cst_115 = arith.constant 0.000000e+00 : f32
    %176 = vector.broadcast %cst_115 : f32 to vector<256x8xf32>
    %177 = arith.maximumf %175, %176 : vector<256x8xf32>
    %178 = vector.extract_strided_slice %174 {offsets = [0, 8], sizes = [256, 8], strides = [1, 1]} : vector<256x16xf32> to vector<256x8xf32>
    %179 = arith.negf %178 : vector<256x8xf32>
    %180 = math.exp %179 : vector<256x8xf32>
    %cst_116 = arith.constant 1.000000e+00 : f32
    %181 = vector.broadcast %cst_116 : f32 to vector<256x8xf32>
    %182 = arith.addf %181, %180 : vector<256x8xf32>
    %183 = arith.divf %181, %182 : vector<256x8xf32>
    %c0_117 = arith.constant 0 : index
    %c0_118 = arith.constant 0 : index
    %c0_119 = arith.constant 0 : index
    %184 = vector.load %arg11[%c0_117, %c0_118, %c0_119] : memref<1x256x8xf32, #tpu.memory_space<vmem>>, vector<1x256x8xf32>
    %185 = vector.shape_cast %184 : vector<1x256x8xf32> to vector<256x8xf32>
    %186 = vector.shape_cast %183 : vector<256x8xf32> to vector<1x256x8xf32>
    tpu.vector_store %arg11[%c0_117, %c0_118, %c0_119], %186 {strides = array<i32>} : memref<1x256x8xf32, #tpu.memory_space<vmem>>, vector<1x256x8xf32>,
    %cst_120 = arith.constant 1.000000e+00 : f32
    %187 = vector.broadcast %cst_120 : f32 to vector<256x8xf32>
    %188 = arith.addf %187, %183 : vector<256x8xf32>
    %189 = arith.mulf %188, %177 : vector<256x8xf32>
    %cst_121 = arith.constant 0.000000e+00 : f32
    %190 = vector.broadcast %cst_121 : f32 to vector<304x8xf32>
    %c0_122 = arith.constant 0 : index
    %c0_123 = arith.constant 0 : index
    %191 = vector.load %arg14[%c0_122, %c0_123] : memref<304x8xf32, #tpu.memory_space<vmem>>, vector<304x8xf32>
    tpu.vector_store %arg14[%c0_122, %c0_123], %190 {strides = array<i32>} : memref<304x8xf32, #tpu.memory_space<vmem>>, vector<304x8xf32>,
    %c24_124 = arith.constant 24 : index
    %c0_125 = arith.constant 0 : index
    %192 = vector.load %arg14[%c24_124, %c0_125] : memref<304x8xf32, #tpu.memory_space<vmem>>, vector<256x8xf32>
    tpu.vector_store %arg14[%c24_124, %c0_125], %189 {strides = array<i32>} : memref<304x8xf32, #tpu.memory_space<vmem>>, vector<256x8xf32>,
    %cst_126 = arith.constant 0.000000e+00 : f32
    %193 = vector.broadcast %cst_126 : f32 to vector<256x16xf32>
    %c7_127 = arith.constant 7 : index
    %c0_128 = arith.constant 0 : index
    %194 = vector.load %arg14[%c7_127, %c0_128] : memref<304x8xf32, #tpu.memory_space<vmem>>, vector<256x8xf32>
    %195 = vector.broadcast %20 : vector<256x1xf32> to vector<256x8xf32>
    %196 = arith.mulf %194, %195 : vector<256x8xf32>
    %197 = arith.truncf %196 : vector<256x8xf32> to vector<256x8xbf16>
    %c0_129 = arith.constant 0 : index
    %c0_130 = arith.constant 0 : index
    %c0_131 = arith.constant 0 : index
    %198 = vector.load %arg6[%c0_129, %c0_130, %c0_131] : memref<9x8x16xbf16, #tpu.memory_space<vmem>>, vector<1x8x16xbf16>
    %199 = vector.shape_cast %198 : vector<1x8x16xbf16> to vector<8x16xbf16>
    %cst_132 = arith.constant dense<0.000000e+00> : vector<256x16xf32>
    %200 = tpu.matmul %197, %199, %cst_132 {dimension_numbers = #tpu.dot_dimension_numbers<[1], [0], [0], [1], [0, 0, 1, 1], [], []>} : vector<256x8xbf16>, vector<8x16xbf16>, vector<256x16xf32> -> vector<256x16xf32>
    %201 = arith.addf %193, %200 : vector<256x16xf32>
    %c8_133 = arith.constant 8 : index
    %c0_134 = arith.constant 0 : index
    %202 = vector.load %arg14[%c8_133, %c0_134] : memref<304x8xf32, #tpu.memory_space<vmem>>, vector<256x8xf32>
    %203 = arith.truncf %202 : vector<256x8xf32> to vector<256x8xbf16>
    %c1_135 = arith.constant 1 : index
    %c0_136 = arith.constant 0 : index
    %c0_137 = arith.constant 0 : index
    %204 = vector.load %arg6[%c1_135, %c0_136, %c0_137] : memref<9x8x16xbf16, #tpu.memory_space<vmem>>, vector<1x8x16xbf16>
    %205 = vector.shape_cast %204 : vector<1x8x16xbf16> to vector<8x16xbf16>
    %cst_138 = arith.constant dense<0.000000e+00> : vector<256x16xf32>
    %206 = tpu.matmul %203, %205, %cst_138 {dimension_numbers = #tpu.dot_dimension_numbers<[1], [0], [0], [1], [0, 0, 1, 1], [], []>} : vector<256x8xbf16>, vector<8x16xbf16>, vector<256x16xf32> -> vector<256x16xf32>
    %207 = arith.addf %201, %206 : vector<256x16xf32>
    %c9_139 = arith.constant 9 : index
    %c0_140 = arith.constant 0 : index
    %208 = vector.load %arg14[%c9_139, %c0_140] : memref<304x8xf32, #tpu.memory_space<vmem>>, vector<256x8xf32>
    %209 = vector.broadcast %24 : vector<256x1xf32> to vector<256x8xf32>
    %210 = arith.mulf %208, %209 : vector<256x8xf32>
    %211 = arith.truncf %210 : vector<256x8xf32> to vector<256x8xbf16>
    %c2_141 = arith.constant 2 : index
    %c0_142 = arith.constant 0 : index
    %c0_143 = arith.constant 0 : index
    %212 = vector.load %arg6[%c2_141, %c0_142, %c0_143] : memref<9x8x16xbf16, #tpu.memory_space<vmem>>, vector<1x8x16xbf16>
    %213 = vector.shape_cast %212 : vector<1x8x16xbf16> to vector<8x16xbf16>
    %cst_144 = arith.constant dense<0.000000e+00> : vector<256x16xf32>
    %214 = tpu.matmul %211, %213, %cst_144 {dimension_numbers = #tpu.dot_dimension_numbers<[1], [0], [0], [1], [0, 0, 1, 1], [], []>} : vector<256x8xbf16>, vector<8x16xbf16>, vector<256x16xf32> -> vector<256x16xf32>
    %215 = arith.addf %207, %214 : vector<256x16xf32>
    %c23_145 = arith.constant 23 : index
    %c0_146 = arith.constant 0 : index
    %216 = vector.load %arg14[%c23_145, %c0_146] : memref<304x8xf32, #tpu.memory_space<vmem>>, vector<256x8xf32>
    %217 = vector.broadcast %20 : vector<256x1xf32> to vector<256x8xf32>
    %218 = arith.mulf %216, %217 : vector<256x8xf32>
    %219 = arith.truncf %218 : vector<256x8xf32> to vector<256x8xbf16>
    %c3_147 = arith.constant 3 : index
    %c0_148 = arith.constant 0 : index
    %c0_149 = arith.constant 0 : index
    %220 = vector.load %arg6[%c3_147, %c0_148, %c0_149] : memref<9x8x16xbf16, #tpu.memory_space<vmem>>, vector<1x8x16xbf16>
    %221 = vector.shape_cast %220 : vector<1x8x16xbf16> to vector<8x16xbf16>
    %cst_150 = arith.constant dense<0.000000e+00> : vector<256x16xf32>
    %222 = tpu.matmul %219, %221, %cst_150 {dimension_numbers = #tpu.dot_dimension_numbers<[1], [0], [0], [1], [0, 0, 1, 1], [], []>} : vector<256x8xbf16>, vector<8x16xbf16>, vector<256x16xf32> -> vector<256x16xf32>
    %223 = arith.addf %215, %222 : vector<256x16xf32>
    %c24_151 = arith.constant 24 : index
    %c0_152 = arith.constant 0 : index
    %224 = vector.load %arg14[%c24_151, %c0_152] : memref<304x8xf32, #tpu.memory_space<vmem>>, vector<256x8xf32>
    %225 = arith.truncf %224 : vector<256x8xf32> to vector<256x8xbf16>
    %c4_153 = arith.constant 4 : index
    %c0_154 = arith.constant 0 : index
    %c0_155 = arith.constant 0 : index
    %226 = vector.load %arg6[%c4_153, %c0_154, %c0_155] : memref<9x8x16xbf16, #tpu.memory_space<vmem>>, vector<1x8x16xbf16>
    %227 = vector.shape_cast %226 : vector<1x8x16xbf16> to vector<8x16xbf16>
    %cst_156 = arith.constant dense<0.000000e+00> : vector<256x16xf32>
    %228 = tpu.matmul %225, %227, %cst_156 {dimension_numbers = #tpu.dot_dimension_numbers<[1], [0], [0], [1], [0, 0, 1, 1], [], []>} : vector<256x8xbf16>, vector<8x16xbf16>, vector<256x16xf32> -> vector<256x16xf32>
    %229 = arith.addf %223, %228 : vector<256x16xf32>
    %c25_157 = arith.constant 25 : index
    %c0_158 = arith.constant 0 : index
    %230 = vector.load %arg14[%c25_157, %c0_158] : memref<304x8xf32, #tpu.memory_space<vmem>>, vector<256x8xf32>
    %231 = vector.broadcast %24 : vector<256x1xf32> to vector<256x8xf32>
    %232 = arith.mulf %230, %231 : vector<256x8xf32>
    %233 = arith.truncf %232 : vector<256x8xf32> to vector<256x8xbf16>
    %c5_159 = arith.constant 5 : index
    %c0_160 = arith.constant 0 : index
    %c0_161 = arith.constant 0 : index
    %234 = vector.load %arg6[%c5_159, %c0_160, %c0_161] : memref<9x8x16xbf16, #tpu.memory_space<vmem>>, vector<1x8x16xbf16>
    %235 = vector.shape_cast %234 : vector<1x8x16xbf16> to vector<8x16xbf16>
    %cst_162 = arith.constant dense<0.000000e+00> : vector<256x16xf32>
    %236 = tpu.matmul %233, %235, %cst_162 {dimension_numbers = #tpu.dot_dimension_numbers<[1], [0], [0], [1], [0, 0, 1, 1], [], []>} : vector<256x8xbf16>, vector<8x16xbf16>, vector<256x16xf32> -> vector<256x16xf32>
    %237 = arith.addf %229, %236 : vector<256x16xf32>
    %c39_163 = arith.constant 39 : index
    %c0_164 = arith.constant 0 : index
    %238 = vector.load %arg14[%c39_163, %c0_164] : memref<304x8xf32, #tpu.memory_space<vmem>>, vector<256x8xf32>
    %239 = vector.broadcast %20 : vector<256x1xf32> to vector<256x8xf32>
    %240 = arith.mulf %238, %239 : vector<256x8xf32>
    %241 = arith.truncf %240 : vector<256x8xf32> to vector<256x8xbf16>
    %c6_165 = arith.constant 6 : index
    %c0_166 = arith.constant 0 : index
    %c0_167 = arith.constant 0 : index
    %242 = vector.load %arg6[%c6_165, %c0_166, %c0_167] : memref<9x8x16xbf16, #tpu.memory_space<vmem>>, vector<1x8x16xbf16>
    %243 = vector.shape_cast %242 : vector<1x8x16xbf16> to vector<8x16xbf16>
    %cst_168 = arith.constant dense<0.000000e+00> : vector<256x16xf32>
    %244 = tpu.matmul %241, %243, %cst_168 {dimension_numbers = #tpu.dot_dimension_numbers<[1], [0], [0], [1], [0, 0, 1, 1], [], []>} : vector<256x8xbf16>, vector<8x16xbf16>, vector<256x16xf32> -> vector<256x16xf32>
    %245 = arith.addf %237, %244 : vector<256x16xf32>
    %c40_169 = arith.constant 40 : index
    %c0_170 = arith.constant 0 : index
    %246 = vector.load %arg14[%c40_169, %c0_170] : memref<304x8xf32, #tpu.memory_space<vmem>>, vector<256x8xf32>
    %247 = arith.truncf %246 : vector<256x8xf32> to vector<256x8xbf16>
    %c7_171 = arith.constant 7 : index
    %c0_172 = arith.constant 0 : index
    %c0_173 = arith.constant 0 : index
    %248 = vector.load %arg6[%c7_171, %c0_172, %c0_173] : memref<9x8x16xbf16, #tpu.memory_space<vmem>>, vector<1x8x16xbf16>
    %249 = vector.shape_cast %248 : vector<1x8x16xbf16> to vector<8x16xbf16>
    %cst_174 = arith.constant dense<0.000000e+00> : vector<256x16xf32>
    %250 = tpu.matmul %247, %249, %cst_174 {dimension_numbers = #tpu.dot_dimension_numbers<[1], [0], [0], [1], [0, 0, 1, 1], [], []>} : vector<256x8xbf16>, vector<8x16xbf16>, vector<256x16xf32> -> vector<256x16xf32>
    %251 = arith.addf %245, %250 : vector<256x16xf32>
    %c41_175 = arith.constant 41 : index
    %c0_176 = arith.constant 0 : index
    %252 = vector.load %arg14[%c41_175, %c0_176] : memref<304x8xf32, #tpu.memory_space<vmem>>, vector<256x8xf32>
    %253 = vector.broadcast %24 : vector<256x1xf32> to vector<256x8xf32>
    %254 = arith.mulf %252, %253 : vector<256x8xf32>
    %255 = arith.truncf %254 : vector<256x8xf32> to vector<256x8xbf16>
    %c8_177 = arith.constant 8 : index
    %c0_178 = arith.constant 0 : index
    %c0_179 = arith.constant 0 : index
    %256 = vector.load %arg6[%c8_177, %c0_178, %c0_179] : memref<9x8x16xbf16, #tpu.memory_space<vmem>>, vector<1x8x16xbf16>
    %257 = vector.shape_cast %256 : vector<1x8x16xbf16> to vector<8x16xbf16>
    %cst_180 = arith.constant dense<0.000000e+00> : vector<256x16xf32>
    %258 = tpu.matmul %255, %257, %cst_180 {dimension_numbers = #tpu.dot_dimension_numbers<[1], [0], [0], [1], [0, 0, 1, 1], [], []>} : vector<256x8xbf16>, vector<8x16xbf16>, vector<256x16xf32> -> vector<256x16xf32>
    %259 = arith.addf %251, %258 : vector<256x16xf32>
    %c0_181 = arith.constant 0 : index
    %c0_182 = arith.constant 0 : index
    %260 = vector.load %arg7[%c0_181, %c0_182] : memref<1x16xf32, #tpu.memory_space<vmem>>, vector<1x16xf32>
    %261 = vector.broadcast %260 : vector<1x16xf32> to vector<256x16xf32>
    %262 = arith.addf %259, %261 : vector<256x16xf32>
    %cst_183 = arith.constant 0.000000e+00 : f32
    %263 = vector.broadcast %cst_183 : f32 to vector<256x16xf32>
    %264 = arith.maximumf %262, %263 : vector<256x16xf32>
    %cst_184 = arith.constant dense<0.000000e+00> : vector<16xf32>
    %265 = vector.multi_reduction <add>, %264, %cst_184 [0] : vector<256x16xf32> to vector<16xf32>
    %266 = vector.shape_cast %265 : vector<16xf32> to vector<1x16xf32>
    %cst_185 = arith.constant 3.906250e-03 : f32
    %267 = vector.broadcast %cst_185 : f32 to vector<1x16xf32>
    %268 = arith.mulf %266, %267 : vector<1x16xf32>
    %269 = arith.truncf %268 : vector<1x16xf32> to vector<1x16xbf16>
    %c0_186 = arith.constant 0 : index
    %c0_187 = arith.constant 0 : index
    %270 = vector.load %arg8[%c0_186, %c0_187] : memref<16x10xbf16, #tpu.memory_space<vmem>>, vector<16x10xbf16>
    %cst_188 = arith.constant dense<0.000000e+00> : vector<1x10xf32>
    %271 = tpu.matmul %269, %270, %cst_188 {dimension_numbers = #tpu.dot_dimension_numbers<[1], [0], [0], [1], [0, 0, 1, 1], [], []>} : vector<1x16xbf16>, vector<16x10xbf16>, vector<1x10xf32> -> vector<1x10xf32>
    %c0_189 = arith.constant 0 : index
    %c0_190 = arith.constant 0 : index
    %272 = vector.load %arg9[%c0_189, %c0_190] : memref<1x10xf32, #tpu.memory_space<vmem>>, vector<1x10xf32>
    %273 = arith.addf %271, %272 : vector<1x10xf32>
    %274 = arith.negf %273 : vector<1x10xf32>
    %275 = math.exp %274 : vector<1x10xf32>
    %cst_191 = arith.constant 1.000000e+00 : f32
    %276 = vector.broadcast %cst_191 : f32 to vector<1x10xf32>
    %277 = arith.addf %276, %275 : vector<1x10xf32>
    %278 = arith.divf %276, %277 : vector<1x10xf32>
    %c0_192 = arith.constant 0 : index
    %c0_193 = arith.constant 0 : index
    %c0_194 = arith.constant 0 : index
    %279 = vector.load %arg10[%c0_192, %c0_193, %c0_194] : memref<1x1x10xf32, #tpu.memory_space<vmem>>, vector<1x1x10xf32>
    %280 = vector.shape_cast %279 : vector<1x1x10xf32> to vector<1x10xf32>
    %281 = vector.shape_cast %278 : vector<1x10xf32> to vector<1x1x10xf32>
    tpu.vector_store %arg10[%c0_192, %c0_193, %c0_194], %281 {strides = array<i32>} : memref<1x1x10xf32, #tpu.memory_space<vmem>>, vector<1x1x10xf32>,
    return
  }
  func.func @transform_0(%arg0: i32) -> (i32, i32, i32) {
    %c0_i32 = arith.constant 0 : i32
    %c0_i32_0 = arith.constant 0 : i32
    %c0_i32_1 = arith.constant 0 : i32
    return %arg0, %c0_i32, %c0_i32_0 : i32, i32, i32
  }
  func.func @transform_1(%arg0: i32) -> (i32, i32, i32) {
    %c0_i32 = arith.constant 0 : i32
    %c0_i32_0 = arith.constant 0 : i32
    %c0_i32_1 = arith.constant 0 : i32
    %c0_i32_2 = arith.constant 0 : i32
    return %c0_i32, %c0_i32_0, %c0_i32_1 : i32, i32, i32
  }
  func.func @transform_2(%arg0: i32) -> (i32, i32) {
    %c0_i32 = arith.constant 0 : i32
    %c0_i32_0 = arith.constant 0 : i32
    %c0_i32_1 = arith.constant 0 : i32
    return %c0_i32, %c0_i32_0 : i32, i32
  }
  func.func @transform_3(%arg0: i32) -> (i32, i32, i32) {
    %c0_i32 = arith.constant 0 : i32
    %c0_i32_0 = arith.constant 0 : i32
    %c0_i32_1 = arith.constant 0 : i32
    %c0_i32_2 = arith.constant 0 : i32
    return %c0_i32, %c0_i32_0, %c0_i32_1 : i32, i32, i32
  }
  func.func @transform_4(%arg0: i32) -> (i32, i32) {
    %c0_i32 = arith.constant 0 : i32
    %c0_i32_0 = arith.constant 0 : i32
    %c0_i32_1 = arith.constant 0 : i32
    return %c0_i32, %c0_i32_0 : i32, i32
  }
  func.func @transform_5(%arg0: i32) -> (i32, i32, i32) {
    %c0_i32 = arith.constant 0 : i32
    %c0_i32_0 = arith.constant 0 : i32
    %c0_i32_1 = arith.constant 0 : i32
    %c0_i32_2 = arith.constant 0 : i32
    return %c0_i32, %c0_i32_0, %c0_i32_1 : i32, i32, i32
  }
  func.func @transform_6(%arg0: i32) -> (i32, i32) {
    %c0_i32 = arith.constant 0 : i32
    %c0_i32_0 = arith.constant 0 : i32
    %c0_i32_1 = arith.constant 0 : i32
    return %c0_i32, %c0_i32_0 : i32, i32
  }
  func.func @transform_7(%arg0: i32) -> (i32, i32) {
    %c0_i32 = arith.constant 0 : i32
    %c0_i32_0 = arith.constant 0 : i32
    %c0_i32_1 = arith.constant 0 : i32
    return %c0_i32, %c0_i32_0 : i32, i32
  }
  func.func @transform_8(%arg0: i32) -> (i32, i32) {
    %c0_i32 = arith.constant 0 : i32
    %c0_i32_0 = arith.constant 0 : i32
    %c0_i32_1 = arith.constant 0 : i32
    return %c0_i32, %c0_i32_0 : i32, i32
  }
  func.func @transform_9(%arg0: i32) -> (i32, i32, i32) {
    %c0_i32 = arith.constant 0 : i32
    %c0_i32_0 = arith.constant 0 : i32
    %c0_i32_1 = arith.constant 0 : i32
    return %arg0, %c0_i32, %c0_i32_0 : i32, i32, i32
  }
  func.func @transform_10(%arg0: i32) -> (i32, i32, i32) {
    %c0_i32 = arith.constant 0 : i32
    %c0_i32_0 = arith.constant 0 : i32
    %c0_i32_1 = arith.constant 0 : i32
    return %arg0, %c0_i32, %c0_i32_0 : i32, i32, i32
  }
}

</mosaic_0001>

<bundles_post_ra>
// kernel: attention_module_forward.1
= control target key start
LH: loop header
LB: loop body
LE: loop exit
PB: predicated region body
PF: predicated region fallthrough
CT: control target
= control target key end

     0   :  { %16 = vsyncpa [#allocation6], 0  ;;  %s18170_s0 = inlined_call_operand.vmem [shape: f32[2,256,4], index: 0, kind: input, shape index: {}]   ;;  %s18171_s1 = inlined_call_operand.vmem [shape: bf16[9,4,8], index: 1, kind: input, shape index: {}]   ;;  %s18172_s2 = inlined_call_operand.vmem [shape: f32[1,8], index: 2, kind: input, shape index: {}]   ;;  %s18173_s3 = inlined_call_operand.vmem [shape: bf16[9,8,16], index: 3, kind: input, shape index: {}]   ;;  %s18174_s4 = inlined_call_operand.vmem [shape: f32[1,16], index: 4, kind: input, shape index: {}]   ;;  %s18175_s5 = inlined_call_operand.vmem [shape: bf16[9,8,16], index: 5, kind: input, shape index: {}]   ;;  %s18176_s6 = inlined_call_operand.vmem [shape: f32[1,16], index: 6, kind: input, shape index: {}]   ;;  %s18177_s7 = inlined_call_operand.vmem [shape: bf16[16,10], index: 7, kind: input, shape index: {}]   ;;  %s18178_s8 = inlined_call_operand.vmem [shape: f32[1,10], index: 8, kind: input, shape index: {}]   ;;  %s18179_s9 = inlined_call_operand.hbm [shape: f32[2,1,10], index: 9, kind: output, shape index: {0}]   ;;  %s18180_s10 = inlined_call_operand.vmem [shape: f32[2,256,8], index: 10, kind: output, shape index: {1}]  }
   0x1   :  { %18 = vsyncpa [#allocation6 + $0x1], 0  ;;  %s12915_s13 = smov 0   ;;  %s12917_s14 = smov 0  }
   0x2   :  { %s12919_s15 = smov 0   ;;  %s12921_s16 = smov 0  }
   0x3 LB: > { %s12936_s17 = sadd.s32 4294967295, %s12853_s16   ;;  %s10663_s18 = sadd.s32 4294967294, %s12853_s16   ;;  %s12853_s16 = sphi %s12921_s16, %s19378_s16   ;;  %s12849_s15 = sphi %s12919_s15, %s19377_s15   ;;  %s12845_s14 = sphi %s12917_s14, %s19376_s14   ;;  %s12841_s13 = sphi %s12915_s13, %s19375_s13  }
   0x4   : > { %s12940_s19 = sadd.s32 1, %s12853_s16   ;;  %s225_s20 = sadd.s32 1, %s12849_s15 }
   0x5   : > { %s222_s21 = ssub.s32 %s12853_s16, %s12940_s19  ;;  %p235_p0 = scmp.ne.s32.totalorder %s12849_s15, %s12845_s14 }
   0x6   : > { %p223_p1 = scmp.eq.s32.totalorder %s222_s21, 0  ;;  %p236_p2 = scmp.eq.s32.totalorder %s12936_s17, 1 }
   0x7   : > { %p241_p3 = scmp.ne.s32.totalorder %s12845_s14, %s12841_s13  ;;  %p242_p4 = scmp.eq.s32.totalorder %s10663_s18, 1 }
   0x8   : > { %s12951_s22 = scalar_select %p223_p1, %s12849_s15, %s225_s20  }
   0x9   : > { %p12953_p5 = por %p236_p2, %p235_p0  ;;  %p12957_p6 = por %p242_p4, %p241_p3 }
   0xa   : > { %p10666_p7 = scmp.ge.s32.totalorder %s12853_s16, 1  ;;  %p318_p8 = scmp.lt.s32.totalorder %s12853_s16, 3 }
   0xc   : > { %p319_p9 = pnand %p10666_p7, %p318_p8 }
   0xe   : > { %322 = sbr.rel (%p319_p9) target bundleno = 2053 (0x805), region = 56 }
  0x13   : > { %v10703_v0 = vld [vmem:[%s18171_s1 + $0x2] sm:$0x3]  ;;  %vm1262_vm0 = vcmask 1041408   ;;  %vm1012_vm1 = vcmask 31744   ;;  %p360_p10 = scmp.lt.s32.totalorder %s12936_s17, 1  ;;  %v18185_v2 = vmov 0.0   ;;  %v371_v21 = vlaneseq }
  0x14   : > { %12589 = vmatprep.subr.msk.bf16.mxu0 %vm1262_vm0, %v10703_v0  ;;  %v1264_v1 = vsel %vm1262_vm0, %v10703_v0, 0  ;;  %12590 = vmatprep.subr.msk.bf16.mxu1 %vm1262_vm0, %v10703_v0  ;;  %1014 = vst.msk [vmem:[#allocation2 + $0x8] sm:$0xff] %vm1012_vm1, %v18185_v2  ;;  %1015 = vst.msk [vmem:[#allocation2 + $0x10] sm:$0xff] %vm1012_vm1, %v18185_v2  ;;  %v13049_v3 = vld [vmem:[%s18171_s1 + $0x4] sm:$0x3]  ;;  %s12856_s20 = smov 8  }
  0x15   : > { %1013 = vst.msk [vmem:[#allocation2] sm:$0xff] %vm1012_vm1, %v18185_v2  ;;  %1016 = vst.msk [vmem:[#allocation2 + $0x18] sm:$0xff] %vm1012_vm1, %v18185_v2  ;;  %v13054_v4 = vld [vmem:[%s18171_s1] sm:$0x3]  ;;  %11664 = vmatpush3.bf16.msra.mxu0 %v1264_v1  ;;  %12588 = vmatpush3.bf16.msra.mxu1 %v1264_v1  ;;  %s13059_s11 = scalar_select %p360_p10, %s12936_s17, 1  ;;  %v13118_v34 = vshrl.u32 %v371_v21, 7 }
  0x16   : > { %1017 = vst.msk [vmem:[#allocation2 + $0x20] sm:$0xff] %vm1012_vm1, %v18185_v2  ;;  %1018 = vst.msk [vmem:[#allocation2 + $0x28] sm:$0xff] %vm1012_vm1, %v18185_v2  ;;  %12592 = vmatprep.subr.msk.bf16.mxu0 %vm1262_vm0, %v13049_v3  ;;  %12591 = vmatprep.subr.msk.bf16.mxu1 %vm1262_vm0, %v13054_v4  ;;  %v13123_v35 = vld [vmem:[%s18171_s1 + $0x8] sm:$0x3]  ;;  %v1770_v38 = vsel %vm1262_vm0, %v13049_v3, 0  ;;  %v1476_v48 = vsel %vm1262_vm0, %v13054_v4, 0 }
  0x17   : > { %1019 = vst.msk [vmem:[#allocation2 + $0x30] sm:$0xff] %vm1012_vm1, %v18185_v2  ;;  %1020 = vst.msk [vmem:[#allocation2 + $0x38] sm:$0xff] %vm1012_vm1, %v18185_v2  ;;  %s11200_s12 = sshll.u32 %s13059_s11, 8  ;;  %v13140_v49 = vld [vmem:[%s18171_s1 + $0x6] sm:$0x3]  ;;  %v408_v54 = vand.u32 15, %v13118_v34 }
  0x18   : > { %1021 = vst.msk [vmem:[#allocation2 + $0x40] sm:$0xff] %vm1012_vm1, %v18185_v2  ;;  %1022 = vst.msk [vmem:[#allocation2 + $0x48] sm:$0xff] %vm1012_vm1, %v18185_v2  ;;  %s13071_s21 = scalar_lea.vmem %s18170_s0, %s11200_s12  ;;  %v374_v63 = vadd.s32 16, %v13118_v34  ;;  %v376_v4 = vadd.s32 32, %v13118_v34  ;;  %s12857_s28 = smov 120  }
  0x19   : > { %1023 = vst.msk [vmem:[#allocation2 + $0x50] sm:$0xff] %vm1012_vm1, %v18185_v2  ;;  %1024 = vst.msk [vmem:[#allocation2 + $0x58] sm:$0xff] %vm1012_vm1, %v18185_v2  ;;  %v980_v5 = vld [vmem:[%s13071_s21] sm:$0xff]  ;;  %v981_v6 = vld [vmem:[%s13071_s21 + $0x8] sm:$0xff]  ;;  %vm788_vm2 = vcmp.ne.s32.totalorder %v408_v54, 0  ;;  %s17028_s29 = scalar_lea.vmem %s18180_s10, %s11200_s12  ;;  %s351_s18 = sand.u32 1, %s12845_s14  }
  0x1a   : > { %1025 = vst.msk [vmem:[#allocation2 + $0x60] sm:$0xff] %vm1012_vm1, %v18185_v2  ;;  %1026 = vst.msk [vmem:[#allocation2 + $0x68] sm:$0xff] %vm1012_vm1, %v18185_v2  ;;  %v998_v7 = vld [vmem:[%s13071_s21 + $0x90] sm:$0xff]  ;;  %v999_v8 = vld [vmem:[%s13071_s21 + $0x98] sm:$0xff]  ;;  %s12859_s12 = smov [#allocation5]  }
  0x1b   : > { %1027 = vst.msk [vmem:[#allocation2 + $0x70] sm:$0xff] %vm1012_vm1, %v18185_v2  ;;  %1028 = vst.msk [vmem:[#allocation2 + $0x78] sm:$0xff] %vm1012_vm1, %v18185_v2  ;;  %v1000_v9 = vld [vmem:[%s13071_s21 + $0xa0] sm:$0xff]  ;;  %v1001_v10 = vld [vmem:[%s13071_s21 + $0xa8] sm:$0xff]  ;;  %s12797_s30 = sshll.u32 %s12859_s12, 4  ;;  %s12798_s30 = int_to_ptr.vmem [resolvable:$false] %s12797_s30 }
  0x1c   : > { %1029 = vst.msk [vmem:[#allocation2 + $0x80] sm:$0xff] %vm1012_vm1, %v18185_v2  ;;  %1030 = vst.msk [vmem:[#allocation2 + $0x88] sm:$0xff] %vm1012_vm1, %v18185_v2  ;;  %v1164_v11 = vld [vmem:[#allocation2 + $0x8] sm:$0xff]  ;;  %v1165_v12 = vld [vmem:[#allocation2 + $0x10] sm:$0xff] }
  0x1d   : > { %1031 = vst.msk [vmem:[#allocation2 + $0x90] sm:$0xff] %vm1012_vm1, %v18185_v2  ;;  %1032 = vst.msk [vmem:[#allocation2 + $0x98] sm:$0xff] %vm1012_vm1, %v18185_v2  ;;  %v982_v13 = vld [vmem:[%s13071_s21 + $0x10] sm:$0xff]  ;;  %v1196_v14 = vpack.c.bf16 %v1165_v12, %v1164_v11  ;;  %v983_v15 = vld [vmem:[%s13071_s21 + $0x18] sm:$0xff] }
  0x1e   : > { %1033 = vst.msk [vmem:[#allocation2 + $0xa0] sm:$0xff] %vm1012_vm1, %v18185_v2  ;;  %1034 = vst.msk [vmem:[#allocation2 + $0xa8] sm:$0xff] %vm1012_vm1, %v18185_v2  ;;  %v984_v16 = vld [vmem:[%s13071_s21 + $0x20] sm:$0xff]  ;;  %v985_v17 = vld [vmem:[%s13071_s21 + $0x28] sm:$0xff] }
  0x1f   : > { %1035 = vst.msk [vmem:[#allocation2 + $0xb0] sm:$0xff] %vm1012_vm1, %v18185_v2  ;;  %1036 = vst.msk [vmem:[#allocation2 + $0xb8] sm:$0xff] %vm1012_vm1, %v18185_v2  ;;  %v1002_v18 = vld [vmem:[%s13071_s21 + $0xb0] sm:$0xff]  ;;  %v1003_v19 = vld [vmem:[%s13071_s21 + $0xb8] sm:$0xff]  ;;  %11665 = vmatprep.mubr.msk.bf16.mxu0 %vm1012_vm1, %v1196_v14 }
  0x20   : > { %1037 = vst.msk [vmem:[#allocation2 + $0xc0] sm:$0xff] %vm1012_vm1, %v18185_v2  ;;  %1038 = vst.msk [vmem:[#allocation2 + $0xc8] sm:$0xff] %vm1012_vm1, %v18185_v2  ;;  %v1004_v20 = vld [vmem:[%s13071_s21 + $0xc0] sm:$0xff]  ;;  %v1005_v22 = vld [vmem:[%s13071_s21 + $0xc8] sm:$0xff] }
  0x21   : > { %1039 = vst.msk [vmem:[#allocation2 + $0xd0] sm:$0xff] %vm1012_vm1, %v18185_v2  ;;  %1040 = vst.msk [vmem:[#allocation2 + $0xd8] sm:$0xff] %vm1012_vm1, %v18185_v2  ;;  %v986_v23 = vld [vmem:[%s13071_s21 + $0x30] sm:$0xff]  ;;  %v987_v24 = vld [vmem:[%s13071_s21 + $0x38] sm:$0xff] }
  0x22   : > { %1041 = vst.msk [vmem:[#allocation2 + $0xe0] sm:$0xff] %vm1012_vm1, %v18185_v2  ;;  %1042 = vst.msk [vmem:[#allocation2 + $0xe8] sm:$0xff] %vm1012_vm1, %v18185_v2  ;;  %v988_v25 = vld [vmem:[%s13071_s21 + $0x40] sm:$0xff]  ;;  %v989_v26 = vld [vmem:[%s13071_s21 + $0x48] sm:$0xff] }
  0x23   : > { %1043 = vst.msk [vmem:[#allocation2 + $0xf0] sm:$0xff] %vm1012_vm1, %v18185_v2  ;;  %1044 = vst.msk [vmem:[#allocation2 + $0xf8] sm:$0xff] %vm1012_vm1, %v18185_v2  ;;  %v1006_v27 = vld [vmem:[%s13071_s21 + $0xd0] sm:$0xff]  ;;  %v1007_v28 = vld [vmem:[%s13071_s21 + $0xd8] sm:$0xff] }
  0x24   : > { %1045 = vst.msk [vmem:[#allocation2 + $0x100] sm:$0xff] %vm1012_vm1, %v18185_v2  ;;  %1046 = vst.msk [vmem:[#allocation2 + $0x108] sm:$0xff] %vm1012_vm1, %v18185_v2  ;;  %v1008_v29 = vld [vmem:[%s13071_s21 + $0xe0] sm:$0xff]  ;;  %v1009_v30 = vld [vmem:[%s13071_s21 + $0xe8] sm:$0xff] }
  0x25   : > { %1047 = vst.msk [vmem:[#allocation2 + $0x110] sm:$0xff] %vm1012_vm1, %v18185_v2  ;;  %1048 = vst.msk [vmem:[#allocation2 + $0x118] sm:$0xff] %vm1012_vm1, %v18185_v2  ;;  %v990_v44 = vld [vmem:[%s13071_s21 + $0x50] sm:$0xff]  ;;  %v991_v45 = vld [vmem:[%s13071_s21 + $0x58] sm:$0xff] }
  0x26   : > { %1049 = vst.msk [vmem:[#allocation2 + $0x120] sm:$0xff] %vm1012_vm1, %v18185_v2  ;;  %1050 = vst.msk [vmem:[#allocation2 + $0x128] sm:$0xff] %vm1012_vm1, %v18185_v2  ;;  %v992_v1 = vld [vmem:[%s13071_s21 + $0x60] sm:$0xff]  ;;  %v993_v3 = vld [vmem:[%s13071_s21 + $0x68] sm:$0xff] }
  0x27   : > { %1051 = vst.msk [vmem:[#allocation2 + $0x18] sm:$0xff] %vm1012_vm1, %v980_v5  ;;  %1052 = vst.msk [vmem:[#allocation2 + $0x20] sm:$0xff] %vm1012_vm1, %v981_v6  ;;  %v995_v11 = vld [vmem:[%s13071_s21 + $0x78] sm:$0xff]  ;;  %v996_v12 = vld [vmem:[%s13071_s21 + $0x80] sm:$0xff] }
  0x28   : > { %1069 = vst.msk [vmem:[#allocation2 + $0xa8] sm:$0xff] %vm1012_vm1, %v998_v7  ;;  %1070 = vst.msk [vmem:[#allocation2 + $0xb0] sm:$0xff] %vm1012_vm1, %v999_v8  ;;  %v1083_v7 = vld [vmem:[#allocation2 + $0x7] sm:$0xff]  ;;  %v994_v8 = vld [vmem:[%s13071_s21 + $0x70] sm:$0xff] }
  0x29   : > { %1071 = vst.msk [vmem:[#allocation2 + $0xb8] sm:$0xff] %vm1012_vm1, %v1000_v9  ;;  %1072 = vst.msk [vmem:[#allocation2 + $0xc0] sm:$0xff] %vm1012_vm1, %v1001_v10  ;;  %v13175_v9 = vsel %vm788_vm2, 1.0, %v18185_v2  ;;  %v422_v10 = vand.u32 15, %v374_v63 }
  0x2a   : > { %1053 = vst.msk [vmem:[#allocation2 + $0x28] sm:$0xff] %vm1012_vm1, %v982_v13  ;;  %1054 = vst.msk [vmem:[#allocation2 + $0x30] sm:$0xff] %vm1012_vm1, %v983_v15  ;;  %v997_v13 = vld [vmem:[%s13071_s21 + $0x88] sm:$0xff] }
  0x2b   : > { %1055 = vst.msk [vmem:[#allocation2 + $0x38] sm:$0xff] %vm1012_vm1, %v984_v16  ;;  %1056 = vst.msk [vmem:[#allocation2 + $0x40] sm:$0xff] %vm1012_vm1, %v985_v17  ;;  %v436_v16 = vand.u32 15, %v376_v4  ;;  %vm790_vm3 = vcmp.ne.s32.totalorder %v422_v10, 0  ;;  %v379_v4 = vadd.s32 56, %v13118_v34 }
  0x2c   : > { %1073 = vst.msk [vmem:[#allocation2 + $0xc8] sm:$0xff] %vm1012_vm1, %v1002_v18  ;;  %1074 = vst.msk [vmem:[#allocation2 + $0xd0] sm:$0xff] %vm1012_vm1, %v1003_v19  ;;  %v378_v19 = vadd.s32 48, %v13118_v34 }
  0x2d   : > { %1075 = vst.msk [vmem:[#allocation2 + $0xd8] sm:$0xff] %vm1012_vm1, %v1004_v20  ;;  %1076 = vst.msk [vmem:[#allocation2 + $0xe0] sm:$0xff] %vm1012_vm1, %v1005_v22  ;;  %v373_v20 = vadd.s32 8, %v13118_v34  ;;  %vm792_vm4 = vcmp.ne.s32.totalorder %v436_v16, 0  ;;  %v388_v16 = vadd.s32 128, %v13118_v34 }
  0x2e   : > { %1057 = vst.msk [vmem:[#allocation2 + $0x48] sm:$0xff] %vm1012_vm1, %v986_v23  ;;  %1058 = vst.msk [vmem:[#allocation2 + $0x50] sm:$0xff] %vm1012_vm1, %v987_v24  ;;  %v1166_v31 = vld [vmem:[#allocation2 + $0x18] sm:$0xff]  ;;  %v1167_v32 = vld [vmem:[#allocation2 + $0x20] sm:$0xff]  ;;  %v1115_v23 = vmul.f32 %v13175_v9, %v1083_v7  ;;  %v380_v24 = vadd.s32 64, %v13118_v34 }
  0x2f   : > { %1059 = vst.msk [vmem:[#allocation2 + $0x58] sm:$0xff] %vm1012_vm1, %v988_v25  ;;  %1060 = vst.msk [vmem:[#allocation2 + $0x60] sm:$0xff] %vm1012_vm1, %v989_v26  ;;  %v1184_v33 = vld [vmem:[#allocation2 + $0xa8] sm:$0xff]  ;;  %v13125_v36 = vpack.c.bf16 %v1167_v32, %v1166_v31  ;;  %v1185_v37 = vld [vmem:[#allocation2 + $0xb0] sm:$0xff]  ;;  %v13201_v32 = vsel %vm790_vm3, 1.0, %v18185_v2 }
  0x30   : > { %1077 = vst.msk [vmem:[#allocation2 + $0xe8] sm:$0xff] %vm1012_vm1, %v1006_v27  ;;  %1078 = vst.msk [vmem:[#allocation2 + $0xf0] sm:$0xff] %vm1012_vm1, %v1007_v28  ;;  %v1186_v39 = vld [vmem:[#allocation2 + $0xb8] sm:$0xff]  ;;  %v1187_v40 = vld [vmem:[#allocation2 + $0xc0] sm:$0xff]  ;;  %v1206_v41 = vpack.c.bf16 %v1185_v37, %v1184_v33  ;;  %v464_v37 = vand.u32 15, %v380_v24 }
  0x31   : > { %1079 = vst.msk [vmem:[#allocation2 + $0xf8] sm:$0xff] %vm1012_vm1, %v1008_v29  ;;  %1080 = vst.msk [vmem:[#allocation2 + $0x100] sm:$0xff] %vm1012_vm1, %v1009_v30  ;;  %v1207_v42 = vpack.c.bf16 %v1187_v40, %v1186_v39  ;;  %v1168_v43 = vld [vmem:[#allocation2 + $0x28] sm:$0xff]  ;;  %11666 = vmatmul.mubr.msk.bf16.vlgmr.msra.gmra.mxu0 %vm1012_vm1, %v13125_v36  ;;  %v1169_v46 = vld [vmem:[#allocation2 + $0x30] sm:$0xff]  ;;  %v450_v29 = vand.u32 15, %v378_v19  ;;  %v415_v30 = vand.u32 15, %v373_v20 }
  0x32   : > { %18471 = vst [vmem:[#allocation8_spill] sm:$0xff] %v13125_v36  ;;  %v1170_v47 = vld [vmem:[#allocation2 + $0x38] sm:$0xff]  ;;  %1061 = vst.msk [vmem:[#allocation2 + $0x68] sm:$0xff] %vm1012_vm1, %v990_v44  ;;  %11685 = vmatprep.mubr.msk.bf16.mxu1 %vm1012_vm1, %v1206_v41  ;;  %11732 = vmatpush3.bf16.msra.mxu0 %v1770_v38  ;;  %v13143_v50 = vpack.c.bf16 %v1169_v46, %v1168_v43  ;;  %v1171_v51 = vld [vmem:[#allocation2 + $0x40] sm:$0xff]  ;;  %v375_v38 = vadd.s32 24, %v13118_v34  ;;  %v13209_v39 = vsel %vm792_vm4, 1.0, %v18185_v2 }
  0x33   : > { %1062 = vst.msk [vmem:[#allocation2 + $0x70] sm:$0xff] %vm1012_vm1, %v991_v45  ;;  %v1188_v52 = vld [vmem:[#allocation2 + $0xc8] sm:$0xff]  ;;  %v1189_v53 = vld [vmem:[#allocation2 + $0xd0] sm:$0xff]  ;;  %11686 = vmatmul.mubr.msk.bf16.vlgmr.msra.gmra.mxu1 %vm1012_vm1, %v1207_v42  ;;  %12594 = vmatprep.subr.msk.bf16.mxu0 %vm1262_vm0, %v13123_v35  ;;  %v13153_v60 = vpack.c.bf16 %v1171_v51, %v1170_v47  ;;  %1063 = vst.msk [vmem:[#allocation2 + $0x78] sm:$0xff] %vm1012_vm1, %v992_v1  ;;  %v382_v41 = vadd.s32 80, %v13118_v34  ;;  %vm794_vm5 = vcmp.ne.s32.totalorder %v450_v29, 0 }
  0x34   : > { %18472 = vst [vmem:[#allocation9_spill] sm:$0xff] %v13143_v50  ;;  %v13147_v55 = vpack.c.bf16 %v1189_v53, %v1188_v52  ;;  %11669 = vmatprep.mubr.msk.bf16.mxu0 %vm1012_vm1, %v13143_v50  ;;  %v1190_v58 = vld [vmem:[#allocation2 + $0xd8] sm:$0xff]  ;;  %v1191_v59 = vld [vmem:[#allocation2 + $0xe0] sm:$0xff]  ;;  %11698 = vmatpush3.bf16.msra.mxu1 %v1476_v48  ;;  %1064 = vst.msk [vmem:[#allocation2 + $0x80] sm:$0xff] %vm1012_vm1, %v993_v3  ;;  %vm885_vm6 = vcmp.ne.s32.totalorder %v415_v30, 15  ;;  %vm796_vm7 = vcmp.ne.s32.totalorder %v464_v37, 0 }
  0x35   : > { %v1172_v56 = vld [vmem:[#allocation2 + $0x48] sm:$0xff]  ;;  %v1173_v57 = vld [vmem:[#allocation2 + $0x50] sm:$0xff]  ;;  %18474 = vst [vmem:[#allocation11_spill] sm:$0xff] %v13153_v60  ;;  %12593 = vmatprep.subr.msk.bf16.mxu1 %vm1262_vm0, %v13140_v49  ;;  %v13165_v5 = vpack.c.bf16 %v1191_v59, %v1190_v58  ;;  %18478 = vst [vmem:[#allocation15_spill] sm:$0xff] %v13175_v9  ;;  %v429_v51 = vand.u32 15, %v375_v38  ;;  %v377_v52 = vadd.s32 40, %v13118_v34 }
  0x36   : > { %18473 = vst [vmem:[#allocation10_spill] sm:$0xff] %v13147_v55  ;;  %11689 = vmatprep.mubr.msk.bf16.mxu1 %vm1012_vm1, %v13147_v55  ;;  %v13160_v0 = vpack.c.bf16 %v1173_v57, %v1172_v56  ;;  %1065 = vst.msk [vmem:[#allocation2 + $0x88] sm:$0xff] %vm1012_vm1, %v994_v8  ;;  %v1174_v14 = vld [vmem:[#allocation2 + $0x58] sm:$0xff]  ;;  %v1175_v15 = vld [vmem:[#allocation2 + $0x60] sm:$0xff]  ;;  %v478_v56 = vand.u32 15, %v382_v41  ;;  %v384_v57 = vadd.s32 96, %v13118_v34 }
  0x37   : > { %v1192_v61 = vld [vmem:[#allocation2 + $0xe8] sm:$0xff]  ;;  %v1193_v62 = vld [vmem:[#allocation2 + $0xf0] sm:$0xff]  ;;  %18476 = vst [vmem:[#allocation13_spill] sm:$0xff] %v13165_v5  ;;  %1066 = vst.msk [vmem:[#allocation2 + $0x90] sm:$0xff] %vm1012_vm1, %v995_v11  ;;  %v13194_v25 = vpack.c.bf16 %v1175_v15, %v1174_v14  ;;  %v13234_v59 = vsel %vm794_vm5, 1.0, %v18185_v2  ;;  %v13240_v63 = vsel %vm885_vm6, 1.0, %v18185_v2 }
  0x38   : > { %18475 = vst [vmem:[#allocation12_spill] sm:$0xff] %v13160_v0  ;;  %v13169_v6 = vpack.c.bf16 %v1193_v62, %v1192_v61  ;;  %1067 = vst.msk [vmem:[#allocation2 + $0x98] sm:$0xff] %vm1012_vm1, %v996_v12  ;;  %v1194_v21 = vld [vmem:[#allocation2 + $0xf8] sm:$0xff]  ;;  %v1195_v22 = vld [vmem:[#allocation2 + $0x100] sm:$0xff]  ;;  %v2096_v61 = vsel %vm1262_vm0, %v13140_v49, 0  ;;  %v13243_v3 = vsel %vm796_vm7, 1.0, %v18185_v2 }
  0x39   : > { %11670 = vmatmul.mubr.msk.bf16.gmra.mxu0 %vm1012_vm1, %v13153_v60  ;;  %1068 = vst.msk [vmem:[#allocation2 + $0xa0] sm:$0xff] %vm1012_vm1, %v997_v13  ;;  %v1176_v17 = vld [vmem:[#allocation2 + $0x68] sm:$0xff]  ;;  %18479 = vst [vmem:[#allocation16_spill] sm:$0xff] %v13194_v25  ;;  %v13198_v28 = vpack.c.bf16 %v1195_v22, %v1194_v21  ;;  %v13203_v33 = vld [vmem:[#allocation2 + $0x17] sm:$0xff]  ;;  %vm13249_vm8 = vcmp.ne.s32.totalorder %v429_v51, 15  ;;  %v443_v49 = vand.u32 15, %v377_v52 }
  0x3a   : > { %18477 = vst [vmem:[#allocation14_spill] sm:$0xff] %v13169_v6  ;;  %11673 = vmatprep.mubr.msk.bf16.mxu0 %vm1012_vm1, %v13160_v0  ;;  %v1177_v18 = vld [vmem:[#allocation2 + $0x70] sm:$0xff]  ;;  %18482 = vst [vmem:[#allocation19_spill] sm:$0xff] %v13201_v32  ;;  %v13211_v40 = vld [vmem:[#allocation2 + $0x27] sm:$0xff]  ;;  %v1117_v44 = vmul.f32 %v13201_v32, %v13203_v33  ;;  %v386_v11 = vadd.s32 112, %v13118_v34  ;;  %vm13258_vm9 = vcmp.ne.s32.totalorder %v478_v56, 0 }
  0x3b   : > { %11690 = vmatmul.mubr.msk.bf16.gmra.mxu1 %vm1012_vm1, %v13165_v5  ;;  %v1084_v26 = vld [vmem:[#allocation2 + $0xf] sm:$0xff]  ;;  %v13196_v27 = vpack.c.bf16 %v1177_v18, %v1176_v17  ;;  %18481 = vst [vmem:[#allocation18_spill] sm:$0xff] %v13198_v28  ;;  %18483 = vst [vmem:[#allocation20_spill] sm:$0xff] %v13203_v33  ;;  %v1178_v42 = vld [vmem:[#allocation2 + $0x78] sm:$0xff]  ;;  %v1119_v48 = vmul.f32 %v13209_v39, %v13211_v40  ;;  %v492_v14 = vand.u32 15, %v384_v57  ;;  %v381_v15 = vadd.s32 72, %v13118_v34 }
  0x3c   : > { %11693 = vmatprep.mubr.msk.bf16.mxu1 %vm1012_vm1, %v13169_v6  ;;  %v1147_v31 = vpack.c.bf16 %v1084_v26, %v1115_v23  ;;  %18484 = vst [vmem:[#allocation21_spill] sm:$0xff] %v13209_v39  ;;  %v1179_v43 = vld [vmem:[#allocation2 + $0x80] sm:$0xff]  ;;  %v13228_v54 = vld [vmem:[#allocation2 + $0x2f] sm:$0xff]  ;;  %18488 = vst [vmem:[#allocation25_spill] sm:$0xff] %v13234_v59  ;;  %v383_v20 = vadd.s32 88, %v13118_v34  ;;  %v390_v21 = vadd.s32 144, %v13118_v34 }
  0x3d   : > { %18480 = vst [vmem:[#allocation17_spill] sm:$0xff] %v13196_v27  ;;  %v1180_v45 = vld [vmem:[#allocation2 + $0x88] sm:$0xff]  ;;  %v13221_v47 = vld [vmem:[#allocation2 + $0x1f] sm:$0xff]  ;;  %v13226_v53 = vpack.c.bf16 %v1179_v43, %v1178_v42  ;;  %18489 = vst [vmem:[#allocation26_spill] sm:$0xff] %v13240_v63  ;;  %v1149_v7 = vpack.c.bf16 %v13228_v54, %v1119_v48  ;;  %v13280_v26 = vsel %vm13249_vm8, 1.0, %v18185_v2  ;;  %v13284_v29 = vsel %vm1262_vm0, %v13123_v35, 0 }
  0x3e   : > { %v1181_v46 = vld [vmem:[#allocation2 + $0x90] sm:$0xff]  ;;  %18485 = vst [vmem:[#allocation22_spill] sm:$0xff] %v13221_v47  ;;  %v1148_v62 = vpack.c.bf16 %v13221_v47, %v1117_v44  ;;  %18490 = vst [vmem:[#allocation27_spill] sm:$0xff] %v13243_v3  ;;  %v13256_v12 = vld [vmem:[#allocation2 + $0x47] sm:$0xff]  ;;  %v457_v30 = vand.u32 15, %v379_v4  ;;  %v13294_v38 = vsel %vm13258_vm9, 1.0, %v18185_v2 }
  0x3f   : > { %18486 = vst [vmem:[#allocation23_spill] sm:$0xff] %v13226_v53  ;;  %v13231_v58 = vpack.c.bf16 %v1181_v46, %v1180_v45  ;;  %v1640_v1 = vld [vmem:[#allocation2 + $0x11] sm:$0xff]  ;;  %v13272_v22 = vld [vmem:[%s18171_s1 + $0xa] sm:$0x3]  ;;  %18496 = vst [vmem:[#allocation29_spill] sm:$0xff] %v13280_v26  ;;  %v1123_v37 = vmul.f32 %v13243_v3, %v13256_v12  ;;  %vm889_vm10 = vcmp.ne.s32.totalorder %v443_v49, 15 }
  0x40   : > { %v13247_v8 = vld [vmem:[#allocation2 + $0x37] sm:$0xff]  ;;  %v1183_v18 = vld [vmem:[#allocation2 + $0xa0] sm:$0xff]  ;;  %v1672_v19 = vmul.f32 %v13240_v63, %v1640_v1  ;;  %18495 = vst [vmem:[#allocation28_spill] sm:$0xff] %v13272_v22  ;;  %v1639_v24 = vld [vmem:[#allocation2 + $0x9] sm:$0xff]  ;;  %v506_v41 = vand.u32 15, %v386_v11  ;;  %vm13300_vm11 = vcmp.ne.s32.totalorder %v492_v14, 0 }
  0x41   : > { %11674 = vmatmul.mubr.msk.bf16.gmra.mxu0 %vm1012_vm1, %v13194_v25  ;;  %18487 = vst [vmem:[#allocation24_spill] sm:$0xff] %v13231_v58  ;;  %v1182_v17 = vld [vmem:[#allocation2 + $0x98] sm:$0xff]  ;;  %v1121_v23 = vmul.f32 %v13234_v59, %v13247_v8  ;;  %18497 = vst [vmem:[#allocation30_spill] sm:$0xff] %v13294_v38  ;;  %v13298_v35 = vld [vmem:[#allocation2 + $0x4f] sm:$0xff]  ;;  %v471_v44 = vand.u32 15, %v381_v15  ;;  %v520_v45 = vand.u32 15, %v388_v16 }
  0x42   : > { %11677 = vmatprep.mubr.msk.bf16.mxu0 %vm1012_vm1, %v13196_v27  ;;  %v13296_v42 = vpack.c.bf16 %v1183_v18, %v1182_v17  ;;  %v1703_v46 = vpack.c.bf16 %v1672_v19, %v1639_v24  ;;  %v13306_v48 = vld [vmem:[#allocation2 + $0x21] sm:$0xff]  ;;  %v485_v51 = vand.u32 15, %v383_v20  ;;  %v534_v52 = vand.u32 15, %v390_v21  ;;  %v13319_v49 = vld [vmem:[#allocation2 + $0x57] sm:$0xff]  ;;  %v13368_v43 = vld [vmem:[#allocation2 + $0x29] sm:$0xff] }
  0x43   : > { %11694 = vmatmul.mubr.msk.bf16.gmra.mxu1 %vm1012_vm1, %v13198_v28  ;;  %v385_v56 = vadd.s32 104, %v13118_v34  ;;  %v392_v1 = vadd.s32 160, %v13118_v34  ;;  %v387_v4 = vadd.s32 120, %v13118_v34  ;;  %v1151_v10 = vpack.c.bf16 %v13298_v35, %v1123_v37  ;;  %v13339_v16 = vld [vmem:[#allocation2 + $0x67] sm:$0xff]  ;;  %v1011_v20 = vld [vmem:[%s13071_s21 + $0xf8] sm:$0xff]  ;;  %18516 = vst [vmem:[#allocation35_spill] sm:$0xff] %v13368_v43 }
  0x44   : > { %11699 = vmatprep.mubr.msk.bf16.mxu1 %vm1012_vm1, %v1147_v31  ;;  %v13287_v31 = vld [vmem:[#allocation2 + $0x3f] sm:$0xff]  ;;  %18498 = vst [vmem:[#allocation31_spill] sm:$0xff] %v13296_v42  ;;  %v13324_v11 = vsel %vm13300_vm11, 1.0, %v18185_v2  ;;  %vm13326_vm12 = vcmp.ne.s32.totalorder %v457_v30, 15  ;;  %vm13330_vm13 = vcmp.ne.s32.totalorder %v506_v41, 0  ;;  %v1674_v15 = vmul.f32 %v13280_v26, %v13306_v48  ;;  %1082 = vst.msk [vmem:[#allocation2 + $0x110] sm:$0xff] %vm1012_vm1, %v1011_v20 }
  0x45   : > { %v1150_v57 = vpack.c.bf16 %v13287_v31, %v1121_v23  ;;  %18502 = vst [vmem:[#allocation33_spill] sm:$0xff] %v13324_v11  ;;  %vm13341_vm14 = vcmp.ne.s32.totalorder %v471_v44, 15  ;;  %vm13345_vm15 = vcmp.ne.s32.totalorder %v520_v45, 0  ;;  %v394_v19 = vadd.s32 176, %v13118_v34  ;;  %v13352_v21 = vld [vmem:[#allocation2 + $0x19] sm:$0xff]  ;;  %v13484_v50 = vld [vmem:[#allocation2 + $0x49] sm:$0xff] }
  0x46   : > { %18511 = vst [vmem:[#allocation34_spill] sm:$0xff] %v13352_v21  ;;  %vm13356_vm2 = vcmp.ne.s32.totalorder %v485_v51, 15  ;;  %vm13360_vm3 = vcmp.ne.s32.totalorder %v534_v52, 0  ;;  %v499_v37 = vand.u32 15, %v385_v56  ;;  %v1125_v41 = vmul.f32 %v13294_v38, %v13319_v49  ;;  %v13372_v51 = vld [vmem:[#allocation2 + $0x5f] sm:$0xff]  ;;  %v13403_v6 = vld [vmem:[#allocation2 + $0x77] sm:$0xff] }
  0x47   : > { %v548_v44 = vand.u32 15, %v392_v1  ;;  %v513_v45 = vand.u32 15, %v387_v4  ;;  %v1127_v52 = vmul.f32 %v13324_v11, %v13339_v16  ;;  %v13379_v56 = vsel %vm13326_vm12, 1.0, %v18185_v2  ;;  %18522 = vst [vmem:[#allocation41_spill] sm:$0xff] %v13403_v6  ;;  %18543 = vst [vmem:[#allocation53_spill] sm:$0xff] %v13484_v50  ;;  %v13486_v36 = vld [vmem:[#allocation2 + $0x8f] sm:$0xff] }
  0x48   : > { %18517 = vst [vmem:[#allocation36_spill] sm:$0xff] %v13379_v56  ;;  %v396_v1 = vadd.s32 192, %v13118_v34  ;;  %v1704_v4 = vpack.c.bf16 %v1674_v15, %v13352_v21  ;;  %v13395_v20 = vsel %vm13341_vm14, 1.0, %v18185_v2  ;;  %v13400_v13 = vsel %vm13345_vm15, 1.0, %v18185_v2  ;;  %18544 = vst [vmem:[#allocation54_spill] sm:$0xff] %v13486_v36  ;;  %v13505_v33 = vld [vmem:[#allocation2 + $0x59] sm:$0xff] }
  0x49   : > { %11678 = vmatmul.mubr.msk.bf16.gmra.mxu0 %vm1012_vm1, %v13226_v53  ;;  %18520 = vst [vmem:[#allocation39_spill] sm:$0xff] %v13395_v20  ;;  %18521 = vst [vmem:[#allocation40_spill] sm:$0xff] %v13400_v13  ;;  %v562_v14 = vand.u32 15, %v394_v19  ;;  %v13408_v15 = vsel %vm13356_vm2, 1.0, %v18185_v2  ;;  %v13413_v17 = vsel %vm13360_vm3, 1.0, %v18185_v2  ;;  %vm13415_vm4 = vcmp.ne.s32.totalorder %v499_v37, 15 }
  0x4a   : > { %11681 = vmatprep.mubr.msk.bf16.mxu0 %vm1012_vm1, %v13231_v58  ;;  %18523 = vst [vmem:[#allocation42_spill] sm:$0xff] %v13408_v15  ;;  %18524 = vst [vmem:[#allocation43_spill] sm:$0xff] %v13413_v17  ;;  %v1152_v18 = vpack.c.bf16 %v13372_v51, %v1125_v41  ;;  %v13420_v19 = vld [vmem:[#allocation2 + $0x51] sm:$0xff]  ;;  %vm13424_vm5 = vcmp.ne.s32.totalorder %v548_v44, 0  ;;  %vm13428_vm6 = vcmp.ne.s32.totalorder %v513_v45, 15  ;;  %v576_v58 = vand.u32 15, %v396_v1 }
  0x4b   : > { %11700 = vmatmul.mubr.msk.bf16.vlgmr.msra.gmra.mxu1 %vm1012_vm1, %v1148_v62  ;;  %v13313_v62 = vld [vmem:[#allocation2 + $0x31] sm:$0xff]  ;;  %v391_v44 = vadd.s32 152, %v13118_v34  ;;  %v13443_v45 = vld [vmem:[%s18171_s1 + $0xc] sm:$0x3]  ;;  %v18535_v53 = vmov 0.0   ;;  %vm13457_vm7 = vcmp.ne.s32.totalorder %v562_v14, 0  ;;  %v1680_v0 = vmul.f32 %v13395_v20, %v13420_v19 }
  0x4c   : > { %11703 = vmatprep.mubr.msk.bf16.mxu1 %vm1012_vm1, %v1149_v7  ;;  %11766 = vmatpush3.bf16.msra.mxu1 %v2096_v61  ;;  %v13311_v61 = vsel %vm889_vm10, 1.0, %v18185_v2  ;;  %v1010_v7 = vld [vmem:[%s13071_s21 + $0xf0] sm:$0xff]  ;;  %18533 = vst [vmem:[#allocation46_spill] sm:$0xff] %v13443_v45  ;;  %v13453_v27 = vsel %vm13415_vm4, 1.0, %v18535_v53  ;;  %v13472_v60 = vsel %vm13424_vm5, 1.0, %v18535_v53  ;;  %v13474_v14 = vld [vmem:[#allocation2 + $0xa7] sm:$0xff] }
  0x4d   : > { %12595 = vmatprep.subr.msk.bf16.mxu1 %vm1262_vm0, %v13272_v22  ;;  %18501 = vst [vmem:[#allocation32_spill] sm:$0xff] %v13311_v61  ;;  %1081 = vst.msk [vmem:[#allocation2 + $0x108] sm:$0xff] %vm1012_vm1, %v1010_v7  ;;  %v1676_v23 = vmul.f32 %v13311_v61, %v13313_v62  ;;  %v13388_v7 = vld [vmem:[#allocation2 + $0x6f] sm:$0xff]  ;;  %v13437_v41 = vld [vmem:[#allocation2 + $0x97] sm:$0xff]  ;;  %v393_v47 = vadd.s32 168, %v13118_v34  ;;  %vm13513_vm9 = vcmp.ne.s32.totalorder %v576_v58, 0 }
  0x4e   : > { %18519 = vst [vmem:[#allocation38_spill] sm:$0xff] %v13388_v7  ;;  %v1153_v37 = vpack.c.bf16 %v13388_v7, %v1127_v52  ;;  %18532 = vst [vmem:[#allocation45_spill] sm:$0xff] %v13437_v41  ;;  %v13455_v1 = vld [vmem:[#allocation2 + $0x71] sm:$0xff]  ;;  %v13494_v22 = vmul.f32 %v13413_v17, %v13437_v41  ;;  %v13533_v58 = vsel %vm13457_vm7, 1.0, %v18535_v53  ;;  %v13547_v7 = vadd.s32 208, %v13118_v34  ;;  %s11197_s21 = sshll.u32 %s12936_s17, 4 }
  0x4f   : > { %v1705_v28 = vpack.c.bf16 %v1676_v23, %v13368_v43  ;;  %v13422_v23 = vld [vmem:[#allocation2 + $0x87] sm:$0xff]  ;;  %18536 = vst [vmem:[#allocation48_spill] sm:$0xff] %v13453_v27  ;;  %18540 = vst [vmem:[#allocation50_spill] sm:$0xff] %v13472_v60  ;;  %v13511_v17 = vmul.f32 %v13453_v27, %v13455_v1  ;;  %v555_v24 = vand.u32 15, %v393_v47  ;;  %vm10430_vm7 = vcmask 130048   ;;  %s18135_s27 = scalar_lea.hbm %s18179_s9, %s11197_s21  ;;  %s12799_s17 = scalar_lea.vmem %s12798_s30, 32 }
  0x50   : > { %18527 = vst [vmem:[#allocation44_spill] sm:$0xff] %v13422_v23  ;;  %v1131_v5 = vmul.f32 %v13400_v13, %v13422_v23  ;;  %18541 = vst [vmem:[#allocation51_spill] sm:$0xff] %v13474_v14  ;;  %v13507_v13 = vld [vmem:[#allocation2 + $0x9f] sm:$0xff]  ;;  %v13539_v23 = vld [vmem:[#allocation2 + $0xb7] sm:$0xff] }
  0x51   : > { %11682 = vmatmul.mubr.msk.bf16.gmra.mxu0 %vm1012_vm1, %v13296_v42  ;;  %v13435_v42 = vld [vmem:[#allocation2 + $0x61] sm:$0xff]  ;;  %18547 = vst [vmem:[#allocation55_spill] sm:$0xff] %v13505_v33  ;;  %18551 = vst [vmem:[#allocation57_spill] sm:$0xff] %v13533_v58  ;;  %v13573_v47 = vmul.f32 %v13533_v58, %v13539_v23  ;;  %vm13595_vm11 = vcmp.ne.s32.totalorder %v555_v24, 15  ;;  %v13613_v24 = vmul.f32 %v13379_v56, %v13420_v19 }
  0x52   : > { %11733 = vmatprep.mubr.msk.bf16.mxu0 %vm1012_vm1, %v1703_v46  ;;  %v389_v46 = vadd.s32 136, %v13118_v34  ;;  %v13490_v55 = vmul.f32 %v13408_v15, %v13435_v42  ;;  %18553 = vst [vmem:[#allocation59_spill] sm:$0xff] %v13539_v23 }
  0x53   : > { %11704 = vmatmul.mubr.msk.bf16.gmra.mxu1 %vm1012_vm1, %v1150_v57  ;;  %v13384_v57 = vsel %vm13330_vm13, 1.0, %v18185_v2  ;;  %18562 = vst [vmem:[#allocation66_spill] sm:$0xff] %v13613_v24 }
  0x54   : > { %11707 = vmatprep.mubr.msk.bf16.mxu1 %vm1012_vm1, %v1151_v10  ;;  %18518 = vst [vmem:[#allocation37_spill] sm:$0xff] %v13384_v57  ;;  %v13390_v10 = vld [vmem:[#allocation2 + $0x41] sm:$0xff]  ;;  %v527_v30 = vand.u32 15, %v389_v46  ;;  %v13446_v46 = vld [vmem:[#allocation2 + $0x39] sm:$0xff]  ;;  %v1129_v52 = vmul.f32 %v13384_v57, %v13403_v6  ;;  %v541_v57 = vand.u32 15, %v391_v44  ;;  %v1707_v44 = vpack.c.bf16 %v1680_v0, %v13484_v50 }
  0x55   : > { %v1678_v2 = vmul.f32 %v13379_v56, %v13390_v10  ;;  %18534 = vst [vmem:[#allocation47_spill] sm:$0xff] %v13446_v46  ;;  %v1708_v25 = vpack.c.bf16 %v13490_v55, %v13505_v33  ;;  %v1156_v0 = vpack.c.bf16 %v13507_v13, %v13494_v22  ;;  %v13563_v6 = vadd.s32 224, %v13118_v34 }
  0x56   : > { %vm13496_vm8 = vcmp.ne.s32.totalorder %v527_v30, 15  ;;  %vm903_vm10 = vcmp.ne.s32.totalorder %v541_v57, 15  ;;  %v395_v55 = vadd.s32 184, %v13118_v34  ;;  %v13589_v30 = vmul.f32 %v13240_v63, %v13306_v48 }
  0x57   : > { %v13593_v58 = vsel %vm903_vm10, 1.0, %v18535_v53  ;;  %v604_v48 = vand.u32 15, %v13563_v6  ;;  %v13625_v6 = vmul.f32 %v13395_v20, %v13435_v42  ;;  %v13646_v63 = vmul.f32 %v13209_v39, %v13256_v12  ;;  %v1658_v20 = vld [vmem:[#allocation2 + $0xa1] sm:$0xff] }
  0x58   : > { %18556 = vst [vmem:[#allocation62_spill] sm:$0xff] %v13589_v30  ;;  %18557 = vst [vmem:[#allocation63_spill] sm:$0xff] %v13593_v58  ;;  %v13827_v30 = vld [vmem:[#allocation2 + $0xf7] sm:$0xff] }
  0x59   : > { %11734 = vmatmul.mubr.msk.bf16.vlgmr.msra.gmra.mxu0 %vm1012_vm1, %v1704_v4  ;;  %v13463_v4 = vld [vmem:[#allocation2 + $0x7f] sm:$0xff]  ;;  %18564 = vst [vmem:[#allocation68_spill] sm:$0xff] %v13625_v6  ;;  %18567 = vst [vmem:[#allocation71_spill] sm:$0xff] %v13646_v63  ;;  %vm13730_vm14 = vcmp.ne.s32.totalorder %v604_v48, 0 }
  0x5a   : > { %11800 = vmatpush3.bf16.msra.mxu0 %v13284_v29  ;;  %11737 = vmatprep.mubr.msk.bf16.mxu0 %vm1012_vm1, %v1705_v28  ;;  %18539 = vst [vmem:[#allocation49_spill] sm:$0xff] %v13463_v4  ;;  %v13479_v29 = vsel %vm13428_vm6, 1.0, %v18535_v53  ;;  %v13481_v28 = vld [vmem:[#allocation2 + $0x81] sm:$0xff]  ;;  %v1154_v41 = vpack.c.bf16 %v13463_v4, %v1129_v52  ;;  %v1155_v52 = vpack.c.bf16 %v13486_v36, %v1131_v5  ;;  %v13537_v4 = vld [vmem:[#allocation2 + $0x79] sm:$0xff]  ;;  %v13556_v5 = vsel %vm13513_vm9, 1.0, %v18535_v53 }
  0x5b   : > { %18542 = vst [vmem:[#allocation52_spill] sm:$0xff] %v13479_v29  ;;  %11708 = vmatmul.mubr.msk.bf16.gmra.mxu1 %vm1012_vm1, %v1152_v18  ;;  %12596 = vmatprep.subr.msk.bf16.mxu0 %vm1262_vm0, %v13443_v45  ;;  %v1706_v18 = vpack.c.bf16 %v1678_v2, %v13446_v46  ;;  %v13518_v45 = vld [vmem:[#allocation2 + $0x69] sm:$0xff]  ;;  %v13524_v2 = vmul.f32 %v13472_v60, %v13474_v14  ;;  %18552 = vst [vmem:[#allocation58_spill] sm:$0xff] %v13537_v4  ;;  %v13544_v60 = vsel %vm13496_vm8, 1.0, %v18535_v53  ;;  %v1656_v14 = vld [vmem:[#allocation2 + $0x91] sm:$0xff]  ;;  %vm12858_vm6 = vmmov 0  }
  0x5c   : > { %11711 = vmatprep.mubr.msk.bf16.mxu1 %vm1012_vm1, %v1153_v37  ;;  %18550 = vst [vmem:[#allocation56_spill] sm:$0xff] %v13518_v45  ;;  %v13520_v37 = vld [vmem:[#allocation2 + $0xaf] sm:$0xff]  ;;  %v13528_v11 = vmul.f32 %v13479_v29, %v13481_v28  ;;  %18554 = vst [vmem:[#allocation60_spill] sm:$0xff] %v13544_v60  ;;  %v13558_v36 = vld [vmem:[#allocation2 + $0xc7] sm:$0xff]  ;;  %v1709_v38 = vpack.c.bf16 %v13511_v17, %v13518_v45  ;;  %v13576_v17 = vmul.f32 %v13544_v60, %v1656_v14  ;;  %vm10560_vm8 = vcmask 73728  }
  0x5d   : > { %18555 = vst [vmem:[#allocation61_spill] sm:$0xff] %v13556_v5  ;;  %v1157_v22 = vpack.c.bf16 %v13520_v37, %v13524_v2  ;;  %v13581_v57 = vmul.f32 %v13556_v5, %v13558_v36  ;;  %v13585_v2 = vadd.s32 200, %v13118_v34  ;;  %v13601_v5 = vmul.f32 %v13280_v26, %v13313_v62  ;;  %v18576_v45 = vld [vmem:[#allocation30_spill] sm:$0xff]  ;;  %v13750_v6 = vld [vmem:[#allocation2 + $0xb9] sm:$0xff] }
  0x5e   : > { %v13638_v26 = vmul.f32 %v13408_v15, %v13455_v1  ;;  %v13650_v19 = vmul.f32 %v13453_v27, %v13481_v28  ;;  %v13658_v62 = vmul.f32 %v13234_v59, %v13319_v49  ;;  %v13661_v42 = vmul.f32 %v13479_v29, %v1656_v14  ;;  %v13664_v15 = vld [vmem:[#allocation2 + $0x89] sm:$0xff]  ;;  %v1660_v28 = vld [vmem:[#allocation2 + $0xb1] sm:$0xff]  ;;  %v13678_v14 = vld [vmem:[#allocation2 + $0x99] sm:$0xff]  ;;  %18598 = vst [vmem:[#allocation81_spill] sm:$0xff] %v13750_v6 }
  0x5f   : > { %18560 = vst [vmem:[#allocation64_spill] sm:$0xff] %v13601_v5  ;;  %18571 = vst [vmem:[#allocation75_spill] sm:$0xff] %v13664_v15  ;;  %v13672_v1 = vmul.f32 %v13243_v3, %v13339_v16  ;;  %v18575_v29 = vld [vmem:[#allocation41_spill] sm:$0xff]  ;;  %v18602_v43 = vpack.c.bf16 %v13528_v11, %v13537_v4  ;;  %v13778_v33 = vsel %vm13730_vm14, 1.0, %v18535_v53  ;;  %v401_v11 = vadd.s32 232, %v13118_v34 }
  0x60   : > { %18566 = vst [vmem:[#allocation70_spill] sm:$0xff] %v13638_v26  ;;  %18568 = vst [vmem:[#allocation72_spill] sm:$0xff] %v13650_v19  ;;  %v13686_v56 = vmul.f32 %v18576_v45, %v18575_v29  ;;  %v13689_v19 = vmul.f32 %v13593_v58, %v1660_v28  ;;  %v18584_v26 = vld [vmem:[#allocation33_spill] sm:$0xff] }
  0x61   : > { %11738 = vmatmul.mubr.msk.bf16.gmra.mxu0 %vm1012_vm1, %v1706_v18  ;;  %v590_v18 = vand.u32 15, %v13547_v7  ;;  %v13605_v7 = vmul.f32 %v13311_v61, %v13390_v10  ;;  %v13621_v10 = vmul.f32 %v13175_v9, %v13211_v40  ;;  %18569 = vst [vmem:[#allocation73_spill] sm:$0xff] %v13658_v62  ;;  %18570 = vst [vmem:[#allocation74_spill] sm:$0xff] %v13661_v42  ;;  %v18583_v42 = vld [vmem:[#allocation44_spill] sm:$0xff]  ;;  %v18588_v62 = vld [vmem:[#allocation49_spill] sm:$0xff] }
  0x62   : > { %11741 = vmatprep.mubr.msk.bf16.mxu0 %vm1012_vm1, %v1707_v44  ;;  %18572 = vst [vmem:[#allocation76_spill] sm:$0xff] %v13672_v1  ;;  %v13675_v61 = vmul.f32 %v13544_v60, %v1658_v20  ;;  %18574 = vst [vmem:[#allocation78_spill] sm:$0xff] %v13678_v14  ;;  %v13692_v60 = vld [vmem:[#allocation2 + $0xa9] sm:$0xff]  ;;  %v13704_v63 = vmul.f32 %v18584_v26, %v18583_v42  ;;  %v1662_v1 = vld [vmem:[#allocation2 + $0xc1] sm:$0xff] }
  0x63   : > { %11712 = vmatmul.mubr.msk.bf16.gmra.mxu1 %vm1012_vm1, %v1154_v41  ;;  %18561 = vst [vmem:[#allocation65_spill] sm:$0xff] %v13605_v7  ;;  %v569_v41 = vand.u32 15, %v395_v55  ;;  %18563 = vst [vmem:[#allocation67_spill] sm:$0xff] %v13621_v10  ;;  %v13634_v55 = vmul.f32 %v13201_v32, %v13247_v8  ;;  %vm13713_vm13 = vcmp.ne.s32.totalorder %v590_v18, 0  ;;  %v18590_v18 = vld [vmem:[#allocation54_spill] sm:$0xff]  ;;  %v1664_v44 = vld [vmem:[#allocation2 + $0xd1] sm:$0xff]  ;;  %v1690_v10 = vmul.f32 %v13593_v58, %v1658_v20 }
  0x64   : > { %11715 = vmatprep.mubr.msk.bf16.mxu1 %vm1012_vm1, %v1155_v52  ;;  %v13628_v52 = vadd.s32 216, %v13118_v34  ;;  %18573 = vst [vmem:[#allocation77_spill] sm:$0xff] %v13675_v61  ;;  %18577 = vst [vmem:[#allocation41_spill] sm:$0xff] %v13686_v56  ;;  %v18596_v56 = vld [vmem:[#allocation37_spill] sm:$0xff]  ;;  %v13760_v46 = vsel %vm13713_vm13, 1.0, %v18535_v53  ;;  %v13780_v58 = vld [vmem:[#allocation2 + $0xe7] sm:$0xff] }
  0x65   : > { %18565 = vst [vmem:[#allocation69_spill] sm:$0xff] %v13634_v55  ;;  %18578 = vst [vmem:[#allocation79_spill] sm:$0xff] %v13689_v19  ;;  %vm13694_vm12 = vcmp.ne.s32.totalorder %v569_v41, 15  ;;  %v13707_v55 = vld [vmem:[#allocation2 + $0xbf] sm:$0xff]  ;;  %v13711_v41 = vld [vmem:[#allocation2 + $0xcf] sm:$0xff]  ;;  %v1712_v50 = vpack.c.bf16 %v1690_v10, %v13678_v14 }
  0x66   : > { %18579 = vst [vmem:[#allocation80_spill] sm:$0xff] %v13692_v60  ;;  %v13737_v61 = vsel %vm13694_vm12, 1.0, %v18535_v53  ;;  %v18595_v19 = vld [vmem:[#allocation45_spill] sm:$0xff]  ;;  %v1159_v48 = vpack.c.bf16 %v13711_v41, %v13581_v57  ;;  %18600 = vst [vmem:[#allocation83_spill] sm:$0xff] %v13760_v46 }
  0x67   : > { %18593 = vst [vmem:[#allocation49_spill] sm:$0xff] %v13737_v61  ;;  %v13744_v24 = vmul.f32 %v18596_v56, %v18595_v19  ;;  %v13762_v7 = vld [vmem:[#allocation2 + $0xd7] sm:$0xff]  ;;  %18603 = vst [vmem:[#allocation85_spill] sm:$0xff] %v13778_v33  ;;  %v1666_v57 = vld [vmem:[#allocation2 + $0xe1] sm:$0xff]  ;;  %v1694_v14 = vmul.f32 %v13737_v61, %v1662_v1 }
  0x69   : > { %11742 = vmatmul.mubr.msk.bf16.gmra.mxu0 %vm1012_vm1, %v1708_v25  ;;  %v18582_v25 = vld [vmem:[#allocation38_spill] sm:$0xff]  ;;  %18597 = vst [vmem:[#allocation45_spill] sm:$0xff] %v13744_v24 }
  0x6a   : > { %11745 = vmatprep.mubr.msk.bf16.mxu0 %vm1012_vm1, %v1709_v38  ;;  %18585 = vst [vmem:[#allocation38_spill] sm:$0xff] %v13704_v63  ;;  %v597_v38 = vand.u32 15, %v13628_v52  ;;  %v13754_v63 = vmul.f32 %v13737_v61, %v1664_v44  ;;  %v18605_v52 = vld [vmem:[#allocation51_spill] sm:$0xff] }
  0x6b   : > { %11716 = vmatmul.mubr.msk.bf16.gmra.mxu1 %vm1012_vm1, %v1156_v0  ;;  %v1711_v0 = vpack.c.bf16 %v13576_v17, %v13664_v15  ;;  %v402_v17 = vadd.s32 240, %v13118_v34  ;;  %v583_v15 = vand.u32 15, %v13585_v2  ;;  %v1158_v2 = vpack.c.bf16 %v13707_v55, %v13573_v47  ;;  %v13764_v47 = vld [vmem:[#allocation2 + $0xc9] sm:$0xff] }
  0x6c   : > { %11719 = vmatprep.mubr.msk.bf16.mxu1 %vm1012_vm1, %v1157_v22  ;;  %v13724_v22 = vsel %vm13595_vm11, 1.0, %v18535_v53  ;;  %18599 = vst [vmem:[#allocation82_spill] sm:$0xff] %v13754_v63  ;;  %18601 = vst [vmem:[#allocation84_spill] sm:$0xff] %v13764_v47  ;;  %vm911_vm2 = vcmp.ne.s32.totalorder %v597_v38, 15  ;;  %v18606_v38 = vld [vmem:[#allocation40_spill] sm:$0xff] }
  0x6d   : > { %18589 = vst [vmem:[#allocation44_spill] sm:$0xff] %v13724_v22  ;;  %v13740_v27 = vmul.f32 %v13724_v22, %v1662_v1  ;;  %v1692_v20 = vmul.f32 %v13724_v22, %v1660_v28  ;;  %v618_v5 = vand.u32 15, %v402_v17  ;;  %vm909_vm15 = vcmp.ne.s32.totalorder %v583_v15, 15  ;;  %v13791_v28 = vld [vmem:[#allocation2 + $0xdf] sm:$0xff]  ;;  %v13796_v15 = vld [vmem:[#allocation2 + $0xef] sm:$0xff] }
  0x6e   : > { %v1143_v17 = vmul.f32 %v13778_v33, %v13780_v58  ;;  %v13803_v22 = vmul.f32 %v18606_v38, %v18605_v52  ;;  %v13806_v10 = vsel %vm911_vm2, 1.0, %v18535_v53  ;;  %v1668_v63 = vld [vmem:[#allocation2 + $0xf1] sm:$0xff]  ;;  %v13829_v52 = vld [vmem:[#allocation2 + $0xe9] sm:$0xff] }
  0x6f   : > { %18594 = vst [vmem:[#allocation54_spill] sm:$0xff] %v13740_v27  ;;  %vm818_vm3 = vcmp.ne.s32.totalorder %v618_v5, 0  ;;  %18608 = vst [vmem:[#allocation88_spill] sm:$0xff] %v13806_v10  ;;  %v13821_v4 = vmul.f32 %v13806_v10, %v1668_v63  ;;  %v18614_v1 = vld [vmem:[#allocation20_spill] sm:$0xff] }
  0x70   : > { %18607 = vst [vmem:[#allocation87_spill] sm:$0xff] %v13803_v22  ;;  %v13825_v21 = vsel %vm818_vm3, 1.0, %v18535_v53 }
  0x71   : > { %11746 = vmatmul.mubr.msk.bf16.gmra.mxu0 %vm1012_vm1, %v18602_v43  ;;  %v1141_v43 = vmul.f32 %v13760_v46, %v13762_v7  ;;  %18612 = vst [vmem:[#allocation91_spill] sm:$0xff] %v13821_v4  ;;  %18613 = vst [vmem:[#allocation92_spill] sm:$0xff] %v13825_v21 }
  0x72   : > { %11749 = vmatprep.mubr.msk.bf16.mxu0 %vm1012_vm1, %v1711_v0  ;;  %v1713_v0 = vpack.c.bf16 %v1692_v20, %v13692_v60  ;;  %v18610_v20 = vld [vmem:[#allocation43_spill] sm:$0xff]  ;;  %v13816_v60 = vld [vmem:[#allocation2 + $0xd9] sm:$0xff] }
  0x73   : > { %11720 = vmatmul.mubr.msk.bf16.gmra.mxu1 %vm1012_vm1, %v1158_v2  ;;  %v13799_v2 = vsel %vm909_vm15, 1.0, %v18535_v53  ;;  %v13813_v27 = vmul.f32 %v18610_v20, %v13539_v23  ;;  %v1160_v5 = vpack.c.bf16 %v13791_v28, %v1141_v43  ;;  %v1145_v43 = vmul.f32 %v13825_v21, %v13827_v30 }
  0x74   : > { %11723 = vmatprep.mubr.msk.bf16.mxu1 %vm1012_vm1, %v1159_v48  ;;  %18604 = vst [vmem:[#allocation86_spill] sm:$0xff] %v13799_v2  ;;  %v611_v48 = vand.u32 15, %v401_v11  ;;  %v13809_v24 = vmul.f32 %v13799_v2, %v1666_v57  ;;  %v1161_v11 = vpack.c.bf16 %v13796_v15, %v1143_v17  ;;  %v1696_v22 = vmul.f32 %v13799_v2, %v1664_v44  ;;  %v1670_v44 = vld [vmem:[#allocation2 + $0x101] sm:$0xff] }
  0x75   : > { %18611 = vst [vmem:[#allocation90_spill] sm:$0xff] %v13813_v27  ;;  %v1997_v23 = vmul.f32 %v13175_v9, %v18614_v1  ;;  %v1714_v17 = vpack.c.bf16 %v1694_v14, %v13750_v6  ;;  %v13867_v9 = vld [vmem:[#allocation2 + $0xf9] sm:$0xff]  ;;  %v18618_v27 = vld [vmem:[#allocation22_spill] sm:$0xff]  ;;  %v1698_v21 = vmul.f32 %v13806_v10, %v1666_v57 }
  0x76   : > { %18609 = vst [vmem:[#allocation89_spill] sm:$0xff] %v13809_v24  ;;  %vm913_vm4 = vcmp.ne.s32.totalorder %v611_v48, 15  ;;  %v403_v24 = vadd.s32 248, %v13118_v34  ;;  %v18616_v48 = vld [vmem:[#allocation50_spill] sm:$0xff]  ;;  %v1715_v2 = vpack.c.bf16 %v1696_v22, %v13764_v47 }
  0x77   : > { %v2029_v6 = vpack.c.bf16 %v18618_v27, %v1997_v23  ;;  %v2001_v27 = vmul.f32 %v13209_v39, %v13247_v8  ;;  %v1716_v23 = vpack.c.bf16 %v1698_v21, %v13816_v60 }
  0x78   : > { %v625_v14 = vand.u32 15, %v403_v24 }
  0x79   : > { %11750 = vmatmul.mubr.msk.bf16.gmra.mxu0 %vm1012_vm1, %v1712_v50  ;;  %v13846_v50 = vld [vmem:[#allocation2 + $0xff] sm:$0xff]  ;;  %v2031_v21 = vpack.c.bf16 %v13287_v31, %v2001_v27  ;;  %v2003_v27 = vmul.f32 %v13234_v59, %v13256_v12  ;;  %v18705_v59 = vld [vmem:[#allocation36_spill] sm:$0xff] }
  0x7a   : > { %11753 = vmatprep.mubr.msk.bf16.mxu0 %vm1012_vm1, %v1713_v0  ;;  %v13852_v0 = vsel %vm913_vm4, 1.0, %v18535_v53  ;;  %v1162_v1 = vpack.c.bf16 %v13846_v50, %v1145_v43  ;;  %v1999_v43 = vmul.f32 %v13201_v32, %v13211_v40  ;;  %vm915_vm5 = vcmp.ne.s32.totalorder %v625_v14, 15 }
  0x7b   : > { %11724 = vmatmul.mubr.msk.bf16.gmra.mxu1 %vm1012_vm1, %v1160_v5  ;;  %18615 = vst [vmem:[#allocation20_spill] sm:$0xff] %v13852_v0  ;;  %v13856_v5 = vmul.f32 %v18616_v48, %v13558_v36  ;;  %v13860_v34 = vmul.f32 %v13852_v0, %v1670_v44  ;;  %v1700_v24 = vmul.f32 %v13852_v0, %v1668_v63  ;;  %v13893_v63 = vsel %vm915_vm5, 1.0, %v18535_v53 }
  0x7c   : > { %11727 = vmatprep.mubr.msk.bf16.mxu1 %vm1012_vm1, %v1161_v11  ;;  %v18617_v11 = vld [vmem:[#allocation57_spill] sm:$0xff]  ;;  %18620 = vst [vmem:[#allocation22_spill] sm:$0xff] %v13893_v63  ;;  %v13897_v40 = vmul.f32 %v13760_v46, %v13827_v30  ;;  %v1702_v14 = vmul.f32 %v13893_v63, %v1670_v44  ;;  %v2005_v44 = vmul.f32 %v13243_v3, %v13319_v49  ;;  %v18622_v49 = vld [vmem:[#allocation8_spill] sm:$0xff] }
  0x7d   : > { %v13864_v61 = vmul.f32 %v18617_v11, %v13762_v7  ;;  %v2985_v4 = vpack.c.bf16 %v13711_v41, %v13856_v5  ;;  %v2663_v22 = vpack.c.bf16 %v13860_v34, %v13867_v9  ;;  %v3237_v5 = vld [vmem:[#allocation2 + $0x28] sm:$0xff] }
  0x7f   : > { %v18699_v34 = vpack.c.bf16 %v13791_v28, %v13864_v61 }
  0x81   : > { %11754 = vmatmul.mubr.msk.bf16.gmra.mxu0 %vm1012_vm1, %v1714_v17  ;;  %v18619_v17 = vld [vmem:[#allocation61_spill] sm:$0xff] }
  0x82   : > { %11757 = vmatprep.mubr.msk.bf16.mxu0 %vm1012_vm1, %v1715_v2  ;;  %v13889_v57 = vmul.f32 %v18619_v17, %v13780_v58  ;;  %v1717_v2 = vpack.c.bf16 %v1700_v24, %v13829_v52  ;;  %v18621_v24 = vld [vmem:[#allocation28_spill] sm:$0xff] }
  0x83   : > { %11728 = vmatmul.mubr.msk.bf16.gmra.mxu1 %vm1012_vm1, %v1162_v1  ;;  %v2716_v47 = vsel %vm1262_vm0, %v18621_v24, 0  ;;  %v1718_v24 = vpack.c.bf16 %v1702_v14, %v13867_v9  ;;  %v13927_v1 = vld [vmem:[#allocation2 + $0x10f] sm:$0xff]  ;;  %v2009_v14 = vmul.f32 %v18584_v26, %v18575_v29  ;;  %v2011_v29 = vmul.f32 %v18596_v56, %v18583_v42 }
  0x84   : > { %11767 = vmatprep.mubr.msk.bf16.mxu1 %vm1012_vm1, %v2029_v6  ;;  %v2030_v6 = vpack.c.bf16 %v13228_v54, %v1999_v43  ;;  %v2987_v8 = vpack.c.bf16 %v13796_v15, %v13889_v57  ;;  %v13913_v43 = vld [vmem:[%s18171_s1 + $0xe] sm:$0x3] }
  0x85   : > { %v18628_v42 = vld [vmem:[#allocation51_spill] sm:$0xff] }
  0x89   : > { %11758 = vmatmul.mubr.msk.bf16.gmra.mxu0 %vm1012_vm1, %v1716_v23  ;;  %v1995_v23 = vld [vmem:[#allocation2 + $0x107] sm:$0xff] }
  0x8a   : > { %11761 = vmatprep.mubr.msk.bf16.mxu0 %vm1012_vm1, %v1717_v2  ;;  %v13925_v2 = vmul.f32 %v13778_v33, %v1995_v23 }
  0x8b   : > { %11768 = vmatmul.mubr.msk.bf16.vlgmr.msra.gmra.mxu1 %vm1012_vm1, %v2030_v6  ;;  %v2032_v6 = vpack.c.bf16 %v13298_v35, %v2003_v27  ;;  %v18623_v27 = vld [vmem:[#allocation46_spill] sm:$0xff] }
  0x8c   : > { %11771 = vmatprep.mubr.msk.bf16.mxu1 %vm1012_vm1, %v2031_v21  ;;  %11834 = vmatpush3.bf16.msra.mxu1 %v2716_v47  ;;  %v2033_v47 = vpack.c.bf16 %v13372_v51, %v2005_v44  ;;  %v2007_v21 = vmul.f32 %v18576_v45, %v13339_v16  ;;  %v3042_v12 = vsel %vm1262_vm0, %v18623_v27, 0  ;;  %v18625_v16 = vld [vmem:[#allocation11_spill] sm:$0xff]  ;;  %v18627_v27 = vld [vmem:[#allocation16_spill] sm:$0xff] }
  0x8d   : > { %12597 = vmatprep.subr.msk.bf16.mxu1 %vm1262_vm0, %v13913_v43  ;;  %v3540_v45 = vld [vmem:[#allocation2 + $0x71] sm:$0xff] }
  0x8e   : > { %v2034_v44 = vpack.c.bf16 %v18582_v25, %v2007_v21  ;;  %v2036_v21 = vpack.c.bf16 %v18590_v18, %v2011_v29  ;;  %v18630_v29 = vld [vmem:[#allocation17_spill] sm:$0xff] }
  0x91   : > { %11762 = vmatmul.mubr.msk.bf16.gmra.mxu0 %vm1012_vm1, %v1718_v24  ;;  %v2035_v24 = vpack.c.bf16 %v18588_v62, %v2009_v14  ;;  %v18626_v14 = vld [vmem:[#allocation12_spill] sm:$0xff] }
  0x92   : > { %11801 = vmatprep.mubr.msk.bf16.mxu0 %vm1012_vm1, %v18622_v49  ;;  %v13949_v49 = vld [vmem:[%s18171_s1 + $0x10] sm:$0x3] }
  0x93   : > { %11772 = vmatmul.mubr.msk.bf16.gmra.mxu1 %vm1012_vm1, %v2032_v6  ;;  %v18624_v6 = vld [vmem:[#allocation9_spill] sm:$0xff] }
  0x94   : > { %11775 = vmatprep.mubr.msk.bf16.mxu1 %vm1012_vm1, %v2033_v47  ;;  %v2013_v47 = vmul.f32 %v18606_v38, %v18595_v19 }
  0x99   : > { %11802 = vmatmul.mubr.msk.bf16.vlgmr.msra.gmra.mxu0 %vm1012_vm1, %v18624_v6 }
  0x9a   : > { %11868 = vmatpush3.bf16.msra.mxu0 %v3042_v12  ;;  %11805 = vmatprep.mubr.msk.bf16.mxu0 %vm1012_vm1, %v18625_v16  ;;  %v2037_v12 = vpack.c.bf16 %v13507_v13, %v2013_v47  ;;  %v18631_v47 = vld [vmem:[#allocation23_spill] sm:$0xff] }
  0x9b   : > { %11776 = vmatmul.mubr.msk.bf16.gmra.mxu1 %vm1012_vm1, %v2034_v44  ;;  %12598 = vmatprep.subr.msk.bf16.mxu0 %vm1262_vm0, %v13949_v49  ;;  %v2015_v44 = vmul.f32 %v18610_v20, %v18628_v42  ;;  %v18632_v42 = vld [vmem:[#allocation24_spill] sm:$0xff] }
  0x9c   : > { %11779 = vmatprep.mubr.msk.bf16.mxu1 %vm1012_vm1, %v2035_v24  ;;  %v18629_v24 = vld [vmem:[#allocation59_spill] sm:$0xff] }
  0x9d   : > { %v2017_v19 = vmul.f32 %v18616_v48, %v18629_v24  ;;  %v2038_v6 = vpack.c.bf16 %v13520_v37, %v2015_v44  ;;  %v18633_v44 = vld [vmem:[#allocation31_spill] sm:$0xff] }
  0x9e   : > { %v2309_v24 = vld [vmem:[#allocation2 + $0xa8] sm:$0xff]  ;;  %v3536_v20 = vld [vmem:[#allocation2 + $0x51] sm:$0xff] }
  0x9f   : > { %v2039_v16 = vpack.c.bf16 %v13707_v55, %v2017_v19  ;;  %v2310_v19 = vld [vmem:[#allocation2 + $0xb0] sm:$0xff] }
  0xa1   : > { %11806 = vmatmul.mubr.msk.bf16.gmra.mxu0 %vm1012_vm1, %v18626_v14 }
  0xa2   : > { %11809 = vmatprep.mubr.msk.bf16.mxu0 %vm1012_vm1, %v18627_v27 }
  0xa3   : > { %11780 = vmatmul.mubr.msk.bf16.gmra.mxu1 %vm1012_vm1, %v2036_v21  ;;  %v2019_v21 = vmul.f32 %v18617_v11, %v13558_v36  ;;  %v2023_v36 = vmul.f32 %v13760_v46, %v13780_v58  ;;  %v18634_v58 = vld [vmem:[#allocation92_spill] sm:$0xff]  ;;  %v3531_v46 = vld [vmem:[#allocation2 + $0x29] sm:$0xff] }
  0xa4   : > { %11783 = vmatprep.mubr.msk.bf16.mxu1 %vm1012_vm1, %v2037_v12  ;;  %v2021_v12 = vmul.f32 %v18619_v17, %v13762_v7  ;;  %v2025_v7 = vmul.f32 %v13778_v33, %v13827_v30  ;;  %v2942_v33 = vld [vmem:[#allocation2 + $0x11f] sm:$0xff] }
  0xa5   : > { %v2040_v14 = vpack.c.bf16 %v13711_v41, %v2019_v21  ;;  %v2042_v21 = vpack.c.bf16 %v13796_v15, %v2023_v36  ;;  %v18640_v36 = vld [vmem:[#allocation14_spill] sm:$0xff] }
  0xa6   : > { %v2041_v27 = vpack.c.bf16 %v13791_v28, %v2021_v12  ;;  %v2043_v12 = vpack.c.bf16 %v13846_v50, %v2025_v7  ;;  %v2322_v7 = vld [vmem:[#allocation2 + $0x110] sm:$0xff]  ;;  %v3241_v28 = vld [vmem:[#allocation2 + $0x48] sm:$0xff] }
  0xa9   : > { %11810 = vmatmul.mubr.msk.bf16.gmra.mxu0 %vm1012_vm1, %v18630_v29  ;;  %v13999_v29 = vpack.c.bf16 %v2310_v19, %v2309_v24  ;;  %v18638_v24 = vld [vmem:[#allocation34_spill] sm:$0xff] }
  0xaa   : > { %11813 = vmatprep.mubr.msk.bf16.mxu0 %vm1012_vm1, %v18631_v47 }
  0xab   : > { %11784 = vmatmul.mubr.msk.bf16.gmra.mxu1 %vm1012_vm1, %v2038_v6  ;;  %v2311_v6 = vld [vmem:[#allocation2 + $0xb8] sm:$0xff] }
  0xac   : > { %11787 = vmatprep.mubr.msk.bf16.mxu1 %vm1012_vm1, %v2039_v16  ;;  %v2312_v16 = vld [vmem:[#allocation2 + $0xc0] sm:$0xff] }
  0xad   : > { %v14001_v47 = vpack.c.bf16 %v2312_v16, %v2311_v6  ;;  %v18641_v6 = vld [vmem:[#allocation18_spill] sm:$0xff] }
  0xae   : > { %v2321_v16 = vld [vmem:[#allocation2 + $0x108] sm:$0xff] }
  0xb1   : > { %11814 = vmatmul.mubr.msk.bf16.gmra.mxu0 %vm1012_vm1, %v18632_v42  ;;  %v18636_v42 = vld [vmem:[#allocation13_spill] sm:$0xff] }
  0xb2   : > { %11817 = vmatprep.mubr.msk.bf16.mxu0 %vm1012_vm1, %v18633_v44  ;;  %v18637_v44 = vld [vmem:[#allocation62_spill] sm:$0xff] }
  0xb3   : > { %11788 = vmatmul.mubr.msk.bf16.gmra.mxu1 %vm1012_vm1, %v2040_v14  ;;  %v2027_v14 = vmul.f32 %v18634_v58, %v1995_v23  ;;  %v18639_v19 = vpack.c.bf16 %v18637_v44, %v18638_v24  ;;  %v3336_v23 = vsel %vm1262_vm0, %v13913_v43, 0  ;;  %v14036_v44 = vpack.c.bf16 %v2322_v7, %v2321_v16  ;;  %v18648_v43 = vld [vmem:[#allocation67_spill] sm:$0xff]  ;;  %v18656_v16 = vld [vmem:[#allocation69_spill] sm:$0xff] }
  0xb4   : > { %11791 = vmatprep.mubr.msk.bf16.mxu1 %vm1012_vm1, %v2041_v27  ;;  %v18635_v27 = vld [vmem:[#allocation10_spill] sm:$0xff]  ;;  %v18649_v24 = vpack.c.bf16 %v13228_v54, %v18648_v43  ;;  %v18657_v7 = vpack.c.bf16 %v13287_v31, %v18656_v16  ;;  %v18658_v54 = vld [vmem:[#allocation71_spill] sm:$0xff]  ;;  %v18666_v31 = vld [vmem:[#allocation73_spill] sm:$0xff] }
  0xb5   : > { %v2044_v30 = vpack.c.bf16 %v13927_v1, %v2027_v14  ;;  %v18674_v16 = vld [vmem:[#allocation78_spill] sm:$0xff] }
  0xb9   : > { %11818 = vmatmul.mubr.msk.bf16.gmra.mxu0 %vm1012_vm1, %v13999_v29 }
  0xba   : > { %11821 = vmatprep.mubr.msk.bf16.mxu0 %vm1012_vm1, %v14001_v47 }
  0xbb   : > { %11792 = vmatmul.mubr.msk.bf16.gmra.mxu1 %vm1012_vm1, %v2042_v21  ;;  %v18642_v21 = vld [vmem:[#allocation64_spill] sm:$0xff] }
  0xbc   : > { %11795 = vmatprep.mubr.msk.bf16.mxu1 %vm1012_vm1, %v2043_v12  ;;  %v18643_v12 = vld [vmem:[#allocation35_spill] sm:$0xff] }
  0xbd   : > { %v18644_v14 = vpack.c.bf16 %v18642_v21, %v18643_v12  ;;  %v18653_v21 = vld [vmem:[#allocation68_spill] sm:$0xff]  ;;  %v18654_v12 = vld [vmem:[#allocation55_spill] sm:$0xff] }
  0xc1   : > { %11822 = vmatmul.mubr.msk.bf16.gmra.mxu0 %vm1012_vm1, %v18635_v27  ;;  %v18646_v27 = vld [vmem:[#allocation47_spill] sm:$0xff] }
  0xc2   : > { %11825 = vmatprep.mubr.msk.bf16.mxu0 %vm1012_vm1, %v18636_v42 }
  0xc3   : > { %11796 = vmatmul.mubr.msk.bf16.gmra.mxu1 %vm1012_vm1, %v2044_v30  ;;  %v18645_v30 = vld [vmem:[#allocation65_spill] sm:$0xff] }
  0xc4   : > { %11835 = vmatprep.mubr.msk.bf16.mxu1 %vm1012_vm1, %v18639_v19  ;;  %v18647_v42 = vpack.c.bf16 %v18645_v30, %v18646_v27  ;;  %v18650_v19 = vld [vmem:[#allocation66_spill] sm:$0xff]  ;;  %v18659_v30 = vpack.c.bf16 %v13298_v35, %v18658_v54  ;;  %v18676_v54 = vld [vmem:[#allocation41_spill] sm:$0xff] }
  0xc5   : > { %v18660_v27 = vld [vmem:[#allocation70_spill] sm:$0xff] }
  0xc9   : > { %11826 = vmatmul.mubr.msk.bf16.gmra.mxu0 %vm1012_vm1, %v18640_v36  ;;  %v18651_v36 = vld [vmem:[#allocation53_spill] sm:$0xff] }
  0xca   : > { %11829 = vmatprep.mubr.msk.bf16.mxu0 %vm1012_vm1, %v18641_v6  ;;  %v18652_v6 = vpack.c.bf16 %v18650_v19, %v18651_v36  ;;  %v18664_v19 = vld [vmem:[#allocation58_spill] sm:$0xff] }
  0xcb   : > { %11836 = vmatmul.mubr.msk.bf16.vlgmr.msra.gmra.mxu1 %vm1012_vm1, %v18644_v14  ;;  %v18655_v14 = vpack.c.bf16 %v18653_v21, %v18654_v12  ;;  %v18670_v21 = vld [vmem:[#allocation74_spill] sm:$0xff]  ;;  %v18671_v12 = vld [vmem:[#allocation75_spill] sm:$0xff] }
  0xcc   : > { %11839 = vmatprep.mubr.msk.bf16.mxu1 %vm1012_vm1, %v18647_v42  ;;  %11902 = vmatpush3.bf16.msra.mxu1 %v3336_v23  ;;  %v3662_v23 = vsel %vm1262_vm0, %v13949_v49, 0  ;;  %v18661_v42 = vld [vmem:[#allocation56_spill] sm:$0xff]  ;;  %v18667_v49 = vpack.c.bf16 %v13372_v51, %v18666_v31  ;;  %v18677_v51 = vpack.c.bf16 %v18588_v62, %v18676_v54  ;;  %v18686_v62 = vld [vmem:[#allocation45_spill] sm:$0xff]  ;;  %vm4178_vm0 = vcmask 1043456  }
  0xcd   : > { %v18662_v43 = vpack.c.bf16 %v18660_v27, %v18661_v42  ;;  %v18680_v27 = vld [vmem:[#allocation79_spill] sm:$0xff]  ;;  %v18681_v42 = vld [vmem:[#allocation80_spill] sm:$0xff] }
  0xd1   : > { %11830 = vmatmul.mubr.msk.bf16.gmra.mxu0 %vm1012_vm1, %v14036_v44 }
  0xd2   : > { %11869 = vmatprep.mubr.msk.bf16.mxu0 %vm1012_vm1, %v18649_v24  ;;  %v18663_v24 = vld [vmem:[#allocation72_spill] sm:$0xff] }
  0xd3   : > { %11840 = vmatmul.mubr.msk.bf16.gmra.mxu1 %vm1012_vm1, %v18652_v6  ;;  %v18665_v36 = vpack.c.bf16 %v18663_v24, %v18664_v19  ;;  %v18668_v6 = vld [vmem:[#allocation76_spill] sm:$0xff]  ;;  %v18683_v24 = vld [vmem:[#allocation54_spill] sm:$0xff]  ;;  %v18684_v19 = vld [vmem:[#allocation81_spill] sm:$0xff] }
  0xd4   : > { %11843 = vmatprep.mubr.msk.bf16.mxu1 %vm1012_vm1, %v18655_v14  ;;  %v18669_v35 = vpack.c.bf16 %v18582_v25, %v18668_v6  ;;  %v18672_v14 = vpack.c.bf16 %v18670_v21, %v18671_v12  ;;  %v18690_v21 = vld [vmem:[#allocation82_spill] sm:$0xff]  ;;  %v18691_v12 = vld [vmem:[#allocation84_spill] sm:$0xff] }
  0xd9   : > { %11870 = vmatmul.mubr.msk.bf16.vlgmr.msra.gmra.mxu0 %vm1012_vm1, %v18657_v7 }
  0xda   : > { %11936 = vmatpush3.bf16.msra.mxu0 %v3662_v23  ;;  %11873 = vmatprep.mubr.msk.bf16.mxu0 %vm1012_vm1, %v18659_v30  ;;  %v18673_v23 = vld [vmem:[#allocation77_spill] sm:$0xff]  ;;  %v18678_v30 = vld [vmem:[#allocation38_spill] sm:$0xff] }
  0xdb   : > { %11844 = vmatmul.mubr.msk.bf16.gmra.mxu1 %vm1012_vm1, %v18662_v43  ;;  %v18675_v7 = vpack.c.bf16 %v18673_v23, %v18674_v16  ;;  %v18679_v25 = vpack.c.bf16 %v18590_v18, %v18678_v30  ;;  %v18682_v43 = vpack.c.bf16 %v18680_v27, %v18681_v42  ;;  %v18688_v18 = vld [vmem:[#allocation87_spill] sm:$0xff]  ;;  %v18693_v16 = vld [vmem:[#allocation89_spill] sm:$0xff]  ;;  %v18695_v42 = vld [vmem:[#allocation90_spill] sm:$0xff] }
  0xdc   : > { %11847 = vmatprep.mubr.msk.bf16.mxu1 %vm1012_vm1, %v18665_v36  ;;  %v18685_v36 = vpack.c.bf16 %v18683_v24, %v18684_v19  ;;  %v18689_v6 = vpack.c.bf16 %v13520_v37, %v18688_v18  ;;  %v14130_v30 = vld [vmem:[#allocation2 + $0x111] sm:$0xff] }
  0xdd   : > { %v18697_v24 = vld [vmem:[#allocation91_spill] sm:$0xff] }
  0xde   : > { %v18698_v19 = vpack.c.bf16 %v18697_v24, %v13829_v52  ;;  %v3238_v52 = vld [vmem:[#allocation2 + $0x30] sm:$0xff] }
  0xdf   : > { %v2941_v24 = vld [vmem:[#allocation2 + $0x117] sm:$0xff] }
  0xe1   : > { %11874 = vmatmul.mubr.msk.bf16.gmra.mxu0 %vm1012_vm1, %v18667_v49  ;;  %v18687_v49 = vpack.c.bf16 %v13507_v13, %v18686_v62  ;;  %v2648_v62 = vmul.f32 %v13893_v63, %v14130_v30 }
  0xe2   : > { %11877 = vmatprep.mubr.msk.bf16.mxu0 %vm1012_vm1, %v18669_v35 }
  0xe3   : > { %11848 = vmatmul.mubr.msk.bf16.gmra.mxu1 %vm1012_vm1, %v18672_v14  ;;  %v18692_v14 = vpack.c.bf16 %v18690_v21, %v18691_v12  ;;  %v3269_v21 = vpack.c.bf16 %v3238_v52, %v3237_v5 }
  0xe4   : > { %11851 = vmatprep.mubr.msk.bf16.mxu1 %vm1012_vm1, %v18675_v7  ;;  %v18694_v7 = vpack.c.bf16 %v18693_v16, %v13816_v60  ;;  %v3239_v16 = vld [vmem:[#allocation2 + $0x38] sm:$0xff] }
  0xe9   : > { %11878 = vmatmul.mubr.msk.bf16.gmra.mxu0 %vm1012_vm1, %v18677_v51 }
  0xea   : > { %11881 = vmatprep.mubr.msk.bf16.mxu0 %vm1012_vm1, %v18679_v25 }
  0xeb   : > { %11852 = vmatmul.mubr.msk.bf16.gmra.mxu1 %vm1012_vm1, %v18682_v43  ;;  %v18696_v43 = vpack.c.bf16 %v13707_v55, %v18695_v42  ;;  %v14158_v55 = vld [vmem:[#allocation2 + $0x109] sm:$0xff] }
  0xec   : > { %11855 = vmatprep.mubr.msk.bf16.mxu1 %vm1012_vm1, %v18685_v36 }
  0xf1   : > { %v11667_v31 = vpop.f32.mrf.mxu0  ;;  %11882 = vmatmul.mubr.msk.bf16.gmra.mxu0 %vm1012_vm1, %v18687_v49 }
  0xf2   : > { %11885 = vmatprep.mubr.msk.bf16.mxu0 %vm1012_vm1, %v18689_v6  ;;  %v2664_v6 = vpack.c.bf16 %v2648_v62, %v14158_v55 }
  0xf3   : > { %v14110_v35 = vpop.f32.mrf.mxu1  ;;  %11856 = vmatmul.mubr.msk.bf16.gmra.mxu1 %vm1012_vm1, %v18692_v14  ;;  %v14116_v23 = vpop.f32.mrf.mxu0 }
  0xf4   : > { %11859 = vmatprep.mubr.msk.bf16.mxu1 %vm1012_vm1, %v18694_v7  ;;  %v3240_v7 = vld [vmem:[#allocation2 + $0x40] sm:$0xff] }
  0xf5   : > { %v14122_v13 = vpop.f32.mrf.mxu1  ;;  %v14124_v54 = vpop.f32.mrf.mxu0 }
  0xf7   : > { %v14126_v37 = vpop.f32.mrf.mxu1  ;;  %v14128_v51 = vpop.f32.mrf.mxu0 }
  0xf9   : > { %v14132_v25 = vpop.f32.mrf.mxu1  ;;  %v14134_v27 = vpop.f32.mrf.mxu0  ;;  %11886 = vmatmul.mubr.msk.bf16.gmra.mxu0 %vm1012_vm1, %v18696_v43  ;;  %v3242_v43 = vld [vmem:[#allocation2 + $0x50] sm:$0xff] }
  0xfa   : > { %11889 = vmatprep.mubr.msk.bf16.mxu0 %vm1012_vm1, %v2985_v4  ;;  %v3271_v62 = vpack.c.bf16 %v3242_v43, %v3241_v28 }
  0xfb   : > { %v14144_v60 = vpop.f32.mrf.mxu1  ;;  %11860 = vmatmul.mubr.msk.bf16.gmra.mxu1 %vm1012_vm1, %v18698_v19  ;;  %v14150_v36 = vpop.f32.mrf.mxu0  ;;  %v3532_v19 = vld [vmem:[#allocation2 + $0x31] sm:$0xff] }
  0xfc   : > { %11863 = vmatprep.mubr.msk.bf16.mxu1 %vm1012_vm1, %v2663_v22 }
  0xfd   : > { %v14160_v4 = vpop.f32.mrf.mxu1  ;;  %v14162_v41 = vpop.f32.mrf.mxu0 }
  0xff   : > { %v14164_v49 = vpop.f32.mrf.mxu1  ;;  %v14166_v18 = vpop.f32.mrf.mxu0 }
 0x101   : > { %v14169_v12 = vpop.f32.mrf.mxu1  ;;  %v14171_v9 = vpop.f32.mrf.mxu0  ;;  %11890 = vmatmul.mubr.msk.bf16.gmra.mxu0 %vm1012_vm1, %v18699_v34  ;;  %v18701_v34 = vpack.c.bf16 %v13927_v1, %v13925_v2  ;;  %v3245_v2 = vld [vmem:[#allocation2 + $0x68] sm:$0xff] }
 0x102   : > { %11893 = vmatprep.mubr.msk.bf16.mxu0 %vm1012_vm1, %v2987_v8  ;;  %v3270_v8 = vpack.c.bf16 %v3240_v7, %v3239_v16  ;;  %v18702_v16 = vld [vmem:[#allocation26_spill] sm:$0xff] }
 0x103   : > { %v14181_v22 = vpop.f32.mrf.mxu1  ;;  %11864 = vmatmul.mubr.msk.bf16.gmra.mxu1 %vm1012_vm1, %v2664_v6  ;;  %v14184_v14 = vpop.f32.mrf.mxu0  ;;  %v18700_v6 = vpack.c.bf16 %v13846_v50, %v13897_v40  ;;  %v3564_v7 = vmul.f32 %v18702_v16, %v3532_v19  ;;  %v3243_v50 = vld [vmem:[#allocation2 + $0x58] sm:$0xff]  ;;  %v3244_v40 = vld [vmem:[#allocation2 + $0x60] sm:$0xff] }
 0x104   : > { %11903 = vmatprep.mubr.msk.bf16.mxu1 %vm1012_vm1, %v3269_v21  ;;  %v2973_v21 = vmul.f32 %v18634_v58, %v2941_v24  ;;  %v3534_v16 = vld [vmem:[#allocation2 + $0x41] sm:$0xff]  ;;  %v3272_v48 = vpack.c.bf16 %v3244_v40, %v3243_v50  ;;  %v3247_v40 = vld [vmem:[#allocation2 + $0x78] sm:$0xff] }
 0x105   : > { %v14187_v42 = vpop.f32.mrf.mxu1  ;;  %v14189_v61 = vpop.f32.mrf.mxu0  ;;  %v3595_v19 = vpack.c.bf16 %v3564_v7, %v3531_v46  ;;  %v3533_v46 = vld [vmem:[#allocation2 + $0x39] sm:$0xff] }
 0x106   : > { %v2990_v1 = vpack.c.bf16 %v2942_v33, %v2973_v21  ;;  %v18703_v33 = vld [vmem:[#allocation29_spill] sm:$0xff] }
 0x107   : > { %v14191_v15 = vpop.f32.mrf.mxu1  ;;  %v14193_v57 = vpop.f32.mrf.mxu0  ;;  %v3566_v21 = vmul.f32 %v18703_v33, %v3534_v16 }
 0x109   : > { %v14195_v5 = vpop.f32.mrf.mxu1  ;;  %v14197_v52 = vpop.f32.mrf.mxu0  ;;  %11894 = vmatmul.mubr.msk.bf16.gmra.mxu0 %vm1012_vm1, %v18700_v6 }
 0x10a   : > { %11897 = vmatprep.mubr.msk.bf16.mxu0 %vm1012_vm1, %v18701_v34  ;;  %v3246_v34 = vld [vmem:[#allocation2 + $0x70] sm:$0xff] }
 0x10b   : > { %v11701_v28 = vpop.f32.mrf.mxu1  ;;  %11904 = vmatmul.mubr.msk.bf16.vlgmr.msra.gmra.mxu1 %vm1012_vm1, %v3270_v8  ;;  %v14210_v43 = vpop.f32.mrf.mxu0 }
 0x10c   : > { %v1521_v17 = vadd.f32 %v11701_v28, %v11667_v31  ;;  %11907 = vmatprep.mubr.msk.bf16.mxu1 %vm1012_vm1, %v3271_v62  ;;  %v3273_v62 = vpack.c.bf16 %v3246_v34, %v3245_v2  ;;  %v3249_v34 = vld [vmem:[#allocation2 + $0x88] sm:$0xff] }
 0x10d   : > { %v1512_v24 = vpop.f32.mrf.mxu1  ;;  %v14213_v6 = vpop.f32.mrf.mxu0 }
 0x10e   : > { %v1513_v58 = vadd.f32 %v1512_v24, %v14116_v23  ;;  %v18704_v23 = vld [vmem:[#allocation32_spill] sm:$0xff] }
 0x10f   : > { %v11702_v11 = vpop.f32.mrf.mxu1  ;;  %v14216_v8 = vpop.f32.mrf.mxu0  ;;  %v3568_v7 = vmul.f32 %v18704_v23, %v3536_v20  ;;  %v3538_v23 = vld [vmem:[#allocation2 + $0x61] sm:$0xff] }
 0x110   : > { %v1524_v31 = vadd.f32 %v11702_v11, %v14124_v54  ;;  %v3535_v11 = vld [vmem:[#allocation2 + $0x49] sm:$0xff] }
 0x111   : > { %v1515_v28 = vpop.f32.mrf.mxu1  ;;  %v14219_v38 = vpop.f32.mrf.mxu0  ;;  %11898 = vmatmul.mubr.msk.bf16.gmra.mxu0 %vm1012_vm1, %v2990_v1  ;;  %v3248_v1 = vld [vmem:[#allocation2 + $0x80] sm:$0xff] }
 0x112   : > { %v1516_v56 = vadd.f32 %v1515_v28, %v14128_v51  ;;  %11937 = vmatprep.mubr.msk.bf16.mxu0 %vm1012_vm1, %v3595_v19  ;;  %v3596_v51 = vpack.c.bf16 %v3566_v21, %v3533_v46  ;;  %v3250_v19 = vld [vmem:[#allocation2 + $0x90] sm:$0xff]  ;;  %v3597_v28 = vpack.c.bf16 %v3568_v7, %v3535_v11  ;;  %v3274_v26 = vpack.c.bf16 %v3248_v1, %v3247_v40 }
 0x113   : > { %v11705_v24 = vpop.f32.mrf.mxu1  ;;  %11908 = vmatmul.mubr.msk.bf16.gmra.mxu1 %vm1012_vm1, %v3272_v48  ;;  %v14227_v50 = vpop.f32.mrf.mxu0  ;;  %v3570_v21 = vmul.f32 %v18705_v59, %v3538_v23  ;;  %v18706_v7 = vld [vmem:[#allocation39_spill] sm:$0xff]  ;;  %v3251_v23 = vld [vmem:[#allocation2 + $0x98] sm:$0xff] }
 0x114   : > { %v1537_v54 = vadd.f32 %v11705_v24, %v14134_v27  ;;  %11911 = vmatprep.mubr.msk.bf16.mxu1 %vm1012_vm1, %v3273_v62  ;;  %v3275_v62 = vpack.c.bf16 %v3250_v19, %v3249_v34  ;;  %v3572_v11 = vmul.f32 %v18706_v7, %v3540_v45  ;;  %v3539_v1 = vld [vmem:[#allocation2 + $0x69] sm:$0xff]  ;;  %v3544_v59 = vld [vmem:[#allocation2 + $0x91] sm:$0xff] }
 0x115   : > { %v1528_v16 = vpop.f32.mrf.mxu1  ;;  %v14231_v2 = vpop.f32.mrf.mxu0 }
 0x116   : > { %v1529_v20 = vadd.f32 %v1528_v16, %v14150_v36  ;;  %v3537_v36 = vld [vmem:[#allocation2 + $0x59] sm:$0xff]  ;;  %v3599_v45 = vpack.c.bf16 %v3572_v11, %v3539_v1 }
 0x117   : > { %v11706_v48 = vpop.f32.mrf.mxu1  ;;  %v14234_v33 = vpop.f32.mrf.mxu0  ;;  %v18708_v11 = vld [vmem:[#allocation48_spill] sm:$0xff] }
 0x118   : > { %v1540_v27 = vadd.f32 %v11706_v48, %v14162_v41  ;;  %v3542_v48 = vld [vmem:[#allocation2 + $0x81] sm:$0xff]  ;;  %v3576_v1 = vmul.f32 %v18708_v11, %v3544_v59 }
 0x119   : > { %v1531_v24 = vpop.f32.mrf.mxu1  ;;  %v11735_v3 = vpop.f32.mrf.mxu0  ;;  %11938 = vmatmul.mubr.msk.bf16.vlgmr.msra.gmra.mxu0 %vm1012_vm1, %v3596_v51  ;;  %v3598_v51 = vpack.c.bf16 %v3570_v21, %v3537_v36  ;;  %v3541_v36 = vld [vmem:[#allocation2 + $0x79] sm:$0xff] }
 0x11a   : > { %v1532_v46 = vadd.f32 %v1531_v24, %v14166_v18  ;;  %v14240_v39 = vadd.f32 %v11735_v3, %v1521_v17  ;;  %11941 = vmatprep.mubr.msk.bf16.mxu0 %vm1012_vm1, %v3597_v28  ;;  %v3252_v18 = vld [vmem:[#allocation2 + $0xa0] sm:$0xff] }
 0x11b   : > { %v11709_v40 = vpop.f32.mrf.mxu1  ;;  %11912 = vmatmul.mubr.msk.bf16.gmra.mxu1 %vm1012_vm1, %v3274_v26  ;;  %v1806_v41 = vpop.f32.mrf.mxu0  ;;  %v3276_v7 = vpack.c.bf16 %v3252_v18, %v3251_v23 }
 0x11c   : > { %v1553_v16 = vadd.f32 %v11709_v40, %v14171_v9  ;;  %v14246_v34 = vadd.f32 %v1806_v41, %v1513_v58  ;;  %11915 = vmatprep.mubr.msk.bf16.mxu1 %vm1012_vm1, %v3275_v62  ;;  %v18707_v41 = vld [vmem:[#allocation42_spill] sm:$0xff] }
 0x11d   : > { %v1544_v3 = vpop.f32.mrf.mxu1  ;;  %v11736_v17 = vpop.f32.mrf.mxu0  ;;  %v3574_v21 = vmul.f32 %v18707_v41, %v3542_v48 }
 0x11e   : > { %v1545_v19 = vadd.f32 %v1544_v3, %v14184_v14  ;;  %v14250_v28 = vadd.f32 %v11736_v17, %v1524_v31 }
 0x11f   : > { %v11710_v26 = vpop.f32.mrf.mxu1  ;;  %v1809_v24 = vpop.f32.mrf.mxu0  ;;  %v3600_v17 = vpack.c.bf16 %v3574_v21, %v3541_v36  ;;  %v18709_v21 = vld [vmem:[#allocation52_spill] sm:$0xff] }
 0x120   : > { %v1556_v58 = vadd.f32 %v11710_v26, %v14189_v61  ;;  %v14253_v9 = vadd.f32 %v1809_v24, %v1516_v56  ;;  %v3543_v61 = vld [vmem:[#allocation2 + $0x89] sm:$0xff] }
 0x121   : > { %v1547_v62 = vpop.f32.mrf.mxu1  ;;  %v11739_v40 = vpop.f32.mrf.mxu0  ;;  %11942 = vmatmul.mubr.msk.bf16.gmra.mxu0 %vm1012_vm1, %v3598_v51  ;;  %v3257_v51 = vld [vmem:[#allocation2 + $0xc8] sm:$0xff]  ;;  %v3601_v26 = vpack.c.bf16 %v3576_v1, %v3543_v61  ;;  %v3545_v1 = vld [vmem:[#allocation2 + $0x99] sm:$0xff] }
 0x122   : > { %v1548_v14 = vadd.f32 %v1547_v62, %v14193_v57  ;;  %v14258_v31 = vadd.f32 %v11739_v40, %v1537_v54  ;;  %11945 = vmatprep.mubr.msk.bf16.mxu0 %vm1012_vm1, %v3599_v45  ;;  %v3258_v45 = vld [vmem:[#allocation2 + $0xd0] sm:$0xff] }
 0x123   : > { %v11713_v23 = vpop.f32.mrf.mxu1  ;;  %11916 = vmatmul.mubr.msk.bf16.gmra.mxu1 %vm1012_vm1, %v3276_v7  ;;  %v1822_v56 = vpop.f32.mrf.mxu0  ;;  %v3546_v7 = vld [vmem:[#allocation2 + $0xa1] sm:$0xff]  ;;  %v3548_v40 = vld [vmem:[#allocation2 + $0xb1] sm:$0xff] }
 0x124   : > { %v1569_v18 = vadd.f32 %v11713_v23, %v14197_v52  ;;  %v14264_v3 = vadd.f32 %v1822_v56, %v1529_v20  ;;  %11919 = vmatprep.mubr.msk.bf16.mxu1 %vm1012_vm1, %v13999_v29  ;;  %v3279_v29 = vpack.c.bf16 %v3258_v45, %v3257_v51  ;;  %v3578_v36 = vmul.f32 %v18709_v21, %v3546_v7  ;;  %v18710_v61 = vld [vmem:[#allocation60_spill] sm:$0xff] }
 0x125   : > { %v1560_v57 = vpop.f32.mrf.mxu1  ;;  %v11740_v54 = vpop.f32.mrf.mxu0 }
 0x126   : > { %v1561_v48 = vadd.f32 %v1560_v57, %v14210_v43  ;;  %v14269_v59 = vadd.f32 %v11740_v54, %v1540_v27  ;;  %v3547_v54 = vld [vmem:[#allocation2 + $0xa9] sm:$0xff] }
 0x127   : > { %v11714_v24 = vpop.f32.mrf.mxu1  ;;  %v1825_v62 = vpop.f32.mrf.mxu0 }
 0x128   : > { %v14272_v52 = vadd.f32 %v11714_v24, %v14213_v6  ;;  %v14274_v20 = vadd.f32 %v1825_v62, %v1532_v46  ;;  %v3580_v6 = vmul.f32 %v18710_v61, %v3548_v40  ;;  %v3261_v24 = vld [vmem:[#allocation2 + $0xe8] sm:$0xff]  ;;  %v3262_v62 = vld [vmem:[#allocation2 + $0xf0] sm:$0xff] }
 0x129   : > { %v1563_v23 = vpop.f32.mrf.mxu1  ;;  %v11743_v56 = vpop.f32.mrf.mxu0  ;;  %11946 = vmatmul.mubr.msk.bf16.gmra.mxu0 %vm1012_vm1, %v3600_v17 }
 0x12a   : > { %v14279_v43 = vadd.f32 %v1563_v23, %v14216_v8  ;;  %v14281_v27 = vadd.f32 %v11743_v56, %v1553_v16  ;;  %11949 = vmatprep.mubr.msk.bf16.mxu0 %vm1012_vm1, %v3601_v26  ;;  %v3259_v8 = vld [vmem:[#allocation2 + $0xd8] sm:$0xff]  ;;  %v3260_v16 = vld [vmem:[#allocation2 + $0xe0] sm:$0xff]  ;;  %v3602_v26 = vpack.c.bf16 %v3578_v36, %v3545_v1 }
 0x12b   : > { %v11717_v57 = vpop.f32.mrf.mxu1  ;;  %11920 = vmatmul.mubr.msk.bf16.gmra.mxu1 %vm1012_vm1, %v14001_v47  ;;  %v1838_v46 = vpop.f32.mrf.mxu0  ;;  %v3603_v47 = vpack.c.bf16 %v3580_v6, %v3547_v54  ;;  %v3550_v56 = vld [vmem:[#allocation2 + $0xc1] sm:$0xff] }
 0x12c   : > { %v1585_v17 = vadd.f32 %v11717_v57, %v14219_v38  ;;  %v14288_v51 = vadd.f32 %v1838_v46, %v1545_v19  ;;  %11923 = vmatprep.mubr.msk.bf16.mxu1 %vm1012_vm1, %v3279_v29  ;;  %v3280_v38 = vpack.c.bf16 %v3260_v16, %v3259_v8  ;;  %v3552_v19 = vld [vmem:[#allocation2 + $0xd1] sm:$0xff]  ;;  %v3281_v46 = vpack.c.bf16 %v3262_v62, %v3261_v24  ;;  %v10856_v36 = vld [vmem:[%s18173_s3 + $0x4] sm:$0xf] }
 0x12d   : > { %v1576_v45 = vpop.f32.mrf.mxu1  ;;  %v11744_v7 = vpop.f32.mrf.mxu0  ;;  %12599 = vmatprep.subr.msk.bf16.mxu1 %vm4178_vm0, %v10856_v36  ;;  %v3264_v24 = vld [vmem:[#allocation2 + $0x100] sm:$0xff] }
 0x12e   : > { %v1577_v40 = vadd.f32 %v1576_v45, %v14227_v50  ;;  %v14292_v23 = vadd.f32 %v11744_v7, %v1556_v58  ;;  %v18711_v58 = vld [vmem:[#allocation63_spill] sm:$0xff] }
 0x12f   : > { %v11718_v61 = vpop.f32.mrf.mxu1  ;;  %v1841_v21 = vpop.f32.mrf.mxu0  ;;  %v3582_v6 = vmul.f32 %v18711_v58, %v3550_v56  ;;  %v3551_v45 = vld [vmem:[#allocation2 + $0xc9] sm:$0xff] }
 0x130   : > { %v1588_v57 = vadd.f32 %v11718_v61, %v14231_v2  ;;  %v14295_v29 = vadd.f32 %v1841_v21, %v1548_v14  ;;  %v3549_v2 = vld [vmem:[#allocation2 + $0xb9] sm:$0xff]  ;;  %v4180_v61 = vsel %vm4178_vm0, %v10856_v36, 0 }
 0x131   : > { %v14300_v1 = vpop.f32.mrf.mxu1  ;;  %v11747_v50 = vpop.f32.mrf.mxu0  ;;  %11950 = vmatmul.mubr.msk.bf16.gmra.mxu0 %vm1012_vm1, %v3602_v26  ;;  %v18712_v14 = vld [vmem:[#allocation44_spill] sm:$0xff]  ;;  %11970 = vmatpush3.bf16.msra.mxu1 %v4180_v61  ;;  %v3604_v56 = vpack.c.bf16 %v3582_v6, %v3549_v2 }
 0x132   : > { %v14305_v54 = vadd.f32 %v11747_v50, %v1569_v18  ;;  %11953 = vmatprep.mubr.msk.bf16.mxu0 %vm1012_vm1, %v3603_v47  ;;  %v3584_v21 = vmul.f32 %v18712_v14, %v3552_v19  ;;  %v3263_v18 = vld [vmem:[#allocation2 + $0xf8] sm:$0xff]  ;;  %v3554_v50 = vld [vmem:[#allocation2 + $0xe1] sm:$0xff] }
 0x133   : > { %v11721_v8 = vpop.f32.mrf.mxu1  ;;  %11924 = vmatmul.mubr.msk.bf16.gmra.mxu1 %vm1012_vm1, %v3280_v38  ;;  %v1854_v16 = vpop.f32.mrf.mxu0  ;;  %v3553_v2 = vld [vmem:[#allocation2 + $0xd9] sm:$0xff] }
 0x134   : > { %v1601_v7 = vadd.f32 %v11721_v8, %v14110_v35  ;;  %v14312_v26 = vadd.f32 %v1854_v16, %v1561_v48  ;;  %11927 = vmatprep.mubr.msk.bf16.mxu1 %vm1012_vm1, %v3281_v46  ;;  %v3605_v38 = vpack.c.bf16 %v3584_v21, %v3551_v45  ;;  %v3282_v35 = vpack.c.bf16 %v3264_v24, %v3263_v18  ;;  %v3556_v48 = vld [vmem:[#allocation2 + $0xf1] sm:$0xff]  ;;  %v18714_v21 = vld [vmem:[#allocation86_spill] sm:$0xff] }
 0x135   : > { %v1592_v62 = vpop.f32.mrf.mxu1  ;;  %v11748_v47 = vpop.f32.mrf.mxu0  ;;  %v3588_v45 = vmul.f32 %v18714_v21, %v3556_v48  ;;  %v3267_v24 = vld [vmem:[#allocation2 + $0x118] sm:$0xff] }
 0x136   : > { %v1593_v19 = vadd.f32 %v1592_v62, %v14122_v13  ;;  %v14317_v36 = vadd.f32 %v11748_v47, %v14272_v52  ;;  %v18713_v13 = vld [vmem:[#allocation49_spill] sm:$0xff] }
 0x137   : > { %v11722_v14 = vpop.f32.mrf.mxu1  ;;  %v1857_v58 = vpop.f32.mrf.mxu0  ;;  %v3586_v6 = vmul.f32 %v18713_v13, %v3554_v50 }
 0x138   : > { %v1604_v8 = vadd.f32 %v11722_v14, %v14126_v37  ;;  %v14321_v46 = vadd.f32 %v1857_v58, %v14279_v43  ;;  %v3555_v43 = vld [vmem:[#allocation2 + $0xe9] sm:$0xff] }
 0x139   : > { %v14323_v61 = vpop.f32.mrf.mxu1  ;;  %v11751_v16 = vpop.f32.mrf.mxu0  ;;  %11954 = vmatmul.mubr.msk.bf16.gmra.mxu0 %vm1012_vm1, %v3604_v56  ;;  %v3606_v56 = vpack.c.bf16 %v3586_v6, %v3553_v2  ;;  %v3607_v48 = vpack.c.bf16 %v3588_v45, %v3555_v43 }
 0x13a   : > { %v14327_v52 = vadd.f32 %v11751_v16, %v1585_v17  ;;  %11957 = vmatprep.mubr.msk.bf16.mxu0 %vm1012_vm1, %v3605_v38  ;;  %v3268_v17 = vld [vmem:[#allocation2 + $0x120] sm:$0xff] }
 0x13b   : > { %v11725_v18 = vpop.f32.mrf.mxu1  ;;  %11928 = vmatmul.mubr.msk.bf16.gmra.mxu1 %vm1012_vm1, %v3282_v35  ;;  %v1870_v37 = vpop.f32.mrf.mxu0  ;;  %v3558_v35 = vld [vmem:[#allocation2 + $0x101] sm:$0xff] }
 0x13c   : > { %v1617_v58 = vadd.f32 %v11725_v18, %v14144_v60  ;;  %v14333_v14 = vadd.f32 %v1870_v37, %v1577_v40  ;;  %11931 = vmatprep.mubr.msk.bf16.mxu1 %vm1012_vm1, %v14036_v44  ;;  %v3284_v60 = vpack.c.bf16 %v3268_v17, %v3267_v24  ;;  %v3590_v37 = vmul.f32 %v13806_v10, %v3558_v35 }
 0x13d   : > { %v1608_v62 = vpop.f32.mrf.mxu1  ;;  %v11752_v47 = vpop.f32.mrf.mxu0 }
 0x13e   : > { %v1609_v38 = vadd.f32 %v1608_v62, %v14160_v4  ;;  %v14338_v50 = vadd.f32 %v11752_v47, %v1588_v57  ;;  %v3557_v4 = vld [vmem:[#allocation2 + $0xf9] sm:$0xff]  ;;  %v3592_v57 = vmul.f32 %v13852_v0, %v14130_v30 }
 0x13f   : > { %v11726_v16 = vpop.f32.mrf.mxu1  ;;  %v14340_v21 = vpop.f32.mrf.mxu0  ;;  %v3608_v62 = vpack.c.bf16 %v3590_v37, %v3557_v4 }
 0x140   : > { %v1620_v40 = vadd.f32 %v11726_v16, %v14164_v49 }
 0x141   : > { %v14343_v18 = vpop.f32.mrf.mxu1  ;;  %v11755_v44 = vpop.f32.mrf.mxu0  ;;  %11958 = vmatmul.mubr.msk.bf16.gmra.mxu0 %vm1012_vm1, %v3606_v56  ;;  %v3609_v56 = vpack.c.bf16 %v3592_v57, %v14158_v55 }
 0x142   : > { %v14347_v6 = vadd.f32 %v11755_v44, %v1601_v7  ;;  %11961 = vmatprep.mubr.msk.bf16.mxu0 %vm1012_vm1, %v3607_v48  ;;  %v3562_v48 = vld [vmem:[#allocation2 + $0x121] sm:$0xff] }
 0x143   : > { %v11729_v2 = vpop.f32.mrf.mxu1  ;;  %11932 = vmatmul.mubr.msk.bf16.gmra.mxu1 %vm1012_vm1, %v3284_v60  ;;  %v1886_v45 = vpop.f32.mrf.mxu0 }
 0x144   : > { %v1633_v49 = vadd.f32 %v11729_v2, %v14181_v22  ;;  %v14354_v43 = vadd.f32 %v1886_v45, %v1593_v19  ;;  %v3594_v19 = vmul.f32 %v13893_v63, %v3562_v48 }
 0x145   : > { %v1624_v24 = vpop.f32.mrf.mxu1  ;;  %v11756_v17 = vpop.f32.mrf.mxu0 }
 0x146   : > { %v1625_v7 = vadd.f32 %v1624_v24, %v14187_v42  ;;  %v14357_v47 = vadd.f32 %v11756_v17, %v1604_v8  ;;  %v3561_v42 = vld [vmem:[#allocation2 + $0x119] sm:$0xff] }
 0x147   : > { %v11730_v35 = vpop.f32.mrf.mxu1  ;;  %v14360_v30 = vpop.f32.mrf.mxu0  ;;  %v3610_v2 = vpack.c.bf16 %v3594_v19, %v3561_v42 }
 0x148   : > { %v1636_v16 = vadd.f32 %v11730_v35, %v14191_v15 }
 0x149   : > { %v14363_v60 = vpop.f32.mrf.mxu1  ;;  %v11759_v22 = vpop.f32.mrf.mxu0  ;;  %11962 = vmatmul.mubr.msk.bf16.gmra.mxu0 %vm1012_vm1, %v3608_v62 }
 0x14a   : > { %v14367_v44 = vadd.f32 %v11759_v22, %v1617_v58  ;;  %11965 = vmatprep.mubr.msk.bf16.mxu0 %vm1012_vm1, %v3609_v56 }
 0x14b   : > { %v11769_v8 = vpop.f32.mrf.mxu1  ;;  %v1902_v55 = vpop.f32.mrf.mxu0 }
 0x14c   : > { %v2261_v37 = vadd.f32 %v11769_v8, %v14240_v39  ;;  %v14371_v4 = vadd.f32 %v1902_v55, %v1609_v38 }
 0x14d   : > { %v2132_v57 = vpop.f32.mrf.mxu1  ;;  %v11760_v15 = vpop.f32.mrf.mxu0 }
 0x14e   : > { %v2259_v45 = vadd.f32 %v2132_v57, %v14246_v34  ;;  %v14374_v24 = vadd.f32 %v11760_v15, %v1620_v40 }
 0x14f   : > { %v11770_v17 = vpop.f32.mrf.mxu1  ;;  %v14376_v62 = vpop.f32.mrf.mxu0 }
 0x150   : > { %v2262_v58 = vadd.f32 %v11770_v17, %v14250_v28 }
 0x151   : > { %v14379_v56 = vpop.f32.mrf.mxu1  ;;  %v11763_v48 = vpop.f32.mrf.mxu0  ;;  %11966 = vmatmul.mubr.msk.bf16.gmra.mxu0 %vm1012_vm1, %v3610_v2  ;;  %vm3928_vm1 = vcmask 64512  }
 0x152   : > { %v14382_v39 = vadd.f32 %v11763_v48, %v1633_v49  ;;  %3934 = vst.msk [vmem:[#allocation3 + $0x28] sm:$0xff] %vm3928_vm1, %v18535_v53  ;;  %3929 = vst.msk [vmem:[#allocation3] sm:$0xff] %vm3928_vm1, %v18535_v53 }
 0x153   : > { %v11773_v38 = vpop.f32.mrf.mxu1  ;;  %v1918_v35 = vpop.f32.mrf.mxu0  ;;  %3930 = vst.msk [vmem:[#allocation3 + $0x8] sm:$0xff] %vm3928_vm1, %v18535_v53  ;;  %3931 = vst.msk [vmem:[#allocation3 + $0x10] sm:$0xff] %vm3928_vm1, %v18535_v53 }
 0x154   : > { %v14385_v22 = vadd.f32 %v11773_v38, %v14258_v31  ;;  %v14387_v34 = vadd.f32 %v1918_v35, %v1625_v7  ;;  %3932 = vst.msk [vmem:[#allocation3 + $0x18] sm:$0xff] %vm3928_vm1, %v18535_v53  ;;  %3933 = vst.msk [vmem:[#allocation3 + $0x20] sm:$0xff] %vm3928_vm1, %v18535_v53 }
 0x155   : > { %v2148_v40 = vpop.f32.mrf.mxu1  ;;  %v11764_v19 = vpop.f32.mrf.mxu0  ;;  %3935 = vst.msk [vmem:[#allocation3 + $0x30] sm:$0xff] %vm3928_vm1, %v18535_v53  ;;  %3936 = vst.msk [vmem:[#allocation3 + $0x38] sm:$0xff] %vm3928_vm1, %v18535_v53 }
 0x156   : > { %v14390_v42 = vadd.f32 %v2148_v40, %v14264_v3  ;;  %v14392_v28 = vadd.f32 %v11764_v19, %v1636_v16  ;;  %3937 = vst.msk [vmem:[#allocation3 + $0x40] sm:$0xff] %vm3928_vm1, %v18535_v53  ;;  %3938 = vst.msk [vmem:[#allocation3 + $0x48] sm:$0xff] %vm3928_vm1, %v18535_v53 }
 0x157   : > { %v11774_v8 = vpop.f32.mrf.mxu1  ;;  %v14394_v55 = vpop.f32.mrf.mxu0  ;;  %3939 = vst.msk [vmem:[#allocation3 + $0x50] sm:$0xff] %vm3928_vm1, %v18535_v53  ;;  %3940 = vst.msk [vmem:[#allocation3 + $0x58] sm:$0xff] %vm3928_vm1, %v18535_v53 }
 0x158   : > { %v14397_v49 = vadd.f32 %v11774_v8, %v14269_v59  ;;  %3941 = vst.msk [vmem:[#allocation3 + $0x60] sm:$0xff] %vm3928_vm1, %v18535_v53  ;;  %3942 = vst.msk [vmem:[#allocation3 + $0x68] sm:$0xff] %vm3928_vm1, %v18535_v53 }
 0x159   : > { %v14399_v57 = vpop.f32.mrf.mxu1  ;;  %v11803_v15 = vpop.f32.mrf.mxu0  ;;  %3943 = vst.msk [vmem:[#allocation3 + $0x70] sm:$0xff] %vm3928_vm1, %v18535_v53  ;;  %3944 = vst.msk [vmem:[#allocation3 + $0x78] sm:$0xff] %vm3928_vm1, %v18535_v53 }
 0x15a   : > { %v14401_v31 = vadd.f32 %v11803_v15, %v2261_v37  ;;  %3945 = vst.msk [vmem:[#allocation3 + $0x80] sm:$0xff] %vm3928_vm1, %v18535_v53  ;;  %3946 = vst.msk [vmem:[#allocation3 + $0x88] sm:$0xff] %vm3928_vm1, %v18535_v53  ;;  %v4081_v10 = vld [vmem:[#allocation3 + $0x10] sm:$0xff] }
 0x15b   : > { %v11777_v7 = vpop.f32.mrf.mxu1  ;;  %v2426_v2 = vpop.f32.mrf.mxu0  ;;  %3947 = vst.msk [vmem:[#allocation3 + $0x90] sm:$0xff] %vm3928_vm1, %v18535_v53  ;;  %3948 = vst.msk [vmem:[#allocation3 + $0x98] sm:$0xff] %vm3928_vm1, %v18535_v53  ;;  %v4000_v13 = vld [vmem:[#allocation3 + $0xf] sm:$0xff] }
 0x15c   : > { %v14404_v17 = vadd.f32 %v11777_v7, %v14281_v27  ;;  %v14406_v3 = vadd.f32 %v2426_v2, %v2259_v45  ;;  %3949 = vst.msk [vmem:[#allocation3 + $0xa0] sm:$0xff] %vm3928_vm1, %v18535_v53  ;;  %3950 = vst.msk [vmem:[#allocation3 + $0xa8] sm:$0xff] %vm3928_vm1, %v18535_v53 }
 0x15d   : > { %v2164_v16 = vpop.f32.mrf.mxu1  ;;  %v11804_v48 = vpop.f32.mrf.mxu0  ;;  %3951 = vst.msk [vmem:[#allocation3 + $0xb0] sm:$0xff] %vm3928_vm1, %v18535_v53  ;;  %3952 = vst.msk [vmem:[#allocation3 + $0xb8] sm:$0xff] %vm3928_vm1, %v18535_v53 }
 0x15e   : > { %v14409_v38 = vadd.f32 %v2164_v16, %v14288_v51  ;;  %v14411_v35 = vadd.f32 %v11804_v48, %v2262_v58  ;;  %3953 = vst.msk [vmem:[#allocation3 + $0xc0] sm:$0xff] %vm3928_vm1, %v18535_v53  ;;  %3954 = vst.msk [vmem:[#allocation3 + $0xc8] sm:$0xff] %vm3928_vm1, %v18535_v53 }
 0x15f   : > { %v14413_v59 = vpop.f32.mrf.mxu1  ;;  %v14415_v40 = vpop.f32.mrf.mxu0  ;;  %3955 = vst.msk [vmem:[#allocation3 + $0xd0] sm:$0xff] %vm3928_vm1, %v18535_v53  ;;  %3956 = vst.msk [vmem:[#allocation3 + $0xd8] sm:$0xff] %vm3928_vm1, %v18535_v53 }
 0x160   : > { %3957 = vst.msk [vmem:[#allocation3 + $0xe0] sm:$0xff] %vm3928_vm1, %v18535_v53  ;;  %3958 = vst.msk [vmem:[#allocation3 + $0xe8] sm:$0xff] %vm3928_vm1, %v18535_v53  ;;  %v2270_v27 = vadd.f32 %v14413_v59, %v14292_v23 }
 0x161   : > { %3959 = vst.msk [vmem:[#allocation3 + $0xf0] sm:$0xff] %vm3928_vm1, %v18535_v53  ;;  %3960 = vst.msk [vmem:[#allocation3 + $0xf8] sm:$0xff] %vm3928_vm1, %v18535_v53  ;;  %v14571_v51 = vpop.f32.mrf.mxu1  ;;  %v11807_v37 = vpop.f32.mrf.mxu0 }
 0x162   : > { %3961 = vst.msk [vmem:[#allocation3 + $0x100] sm:$0xff] %vm3928_vm1, %v18535_v53  ;;  %3962 = vst.msk [vmem:[#allocation3 + $0x108] sm:$0xff] %vm3928_vm1, %v18535_v53  ;;  %v14574_v45 = vadd.f32 %v11807_v37, %v14385_v22 }
 0x163   : > { %3963 = vst.msk [vmem:[#allocation3 + $0x110] sm:$0xff] %vm3928_vm1, %v18535_v53  ;;  %3964 = vst.msk [vmem:[#allocation3 + $0x118] sm:$0xff] %vm3928_vm1, %v18535_v53  ;;  %v11781_v58 = vpop.f32.mrf.mxu1  ;;  %v2442_v19 = vpop.f32.mrf.mxu0 }
 0x164   : > { %3965 = vst.msk [vmem:[#allocation3 + $0x120] sm:$0xff] %vm3928_vm1, %v18535_v53  ;;  %3966 = vst.msk [vmem:[#allocation3 + $0x128] sm:$0xff] %vm3928_vm1, %v18535_v53  ;;  %v2273_v8 = vadd.f32 %v11781_v58, %v14305_v54  ;;  %v14578_v15 = vadd.f32 %v2442_v19, %v14390_v42  ;;  %v3999_v19 = vld [vmem:[#allocation3 + $0x7] sm:$0xff] }
 0x165   : > { %7388 = vst.msk [vmem:[#allocation4] sm:$0xff] %vm3928_vm1, %v18535_v53  ;;  %7389 = vst.msk [vmem:[#allocation4 + $0x8] sm:$0xff] %vm3928_vm1, %v18535_v53  ;;  %v2180_v7 = vpop.f32.mrf.mxu1  ;;  %v11808_v2 = vpop.f32.mrf.mxu0 }
 0x166   : > { %7390 = vst.msk [vmem:[#allocation4 + $0x10] sm:$0xff] %vm3928_vm1, %v18535_v53  ;;  %7391 = vst.msk [vmem:[#allocation4 + $0x18] sm:$0xff] %vm3928_vm1, %v18535_v53  ;;  %v2271_v16 = vadd.f32 %v2180_v7, %v14312_v26  ;;  %v14582_v48 = vadd.f32 %v11808_v2, %v14397_v49  ;;  %v4079_v49 = vld [vmem:[%s18173_s3] sm:$0xf]  ;;  %v18715_v7 = vld [vmem:[#allocation15_spill] sm:$0xff] }
 0x167   : > { %7392 = vst.msk [vmem:[#allocation4 + $0x20] sm:$0xff] %vm3928_vm1, %v18535_v53  ;;  %7393 = vst.msk [vmem:[#allocation4 + $0x28] sm:$0xff] %vm3928_vm1, %v18535_v53  ;;  %v11782_v23 = vpop.f32.mrf.mxu1  ;;  %v14584_v59 = vpop.f32.mrf.mxu0  ;;  %12600 = vmatprep.subr.msk.bf16.mxu0 %vm4178_vm0, %v4079_v49 }
 0x168   : > { %7394 = vst.msk [vmem:[#allocation4 + $0x30] sm:$0xff] %vm3928_vm1, %v18535_v53  ;;  %7395 = vst.msk [vmem:[#allocation4 + $0x38] sm:$0xff] %vm3928_vm1, %v18535_v53  ;;  %v2274_v22 = vadd.f32 %v11782_v23, %v14317_v36  ;;  %v4031_v36 = vmul.f32 %v18715_v7, %v3999_v19 }
 0x169   : > { %7396 = vst.msk [vmem:[#allocation4 + $0x40] sm:$0xff] %vm3928_vm1, %v18535_v53  ;;  %7397 = vst.msk [vmem:[#allocation4 + $0x48] sm:$0xff] %vm3928_vm1, %v18535_v53  ;;  %v14587_v37 = vpop.f32.mrf.mxu1 }
 0x16a   : > { %7398 = vst.msk [vmem:[#allocation4 + $0x50] sm:$0xff] %vm3928_vm1, %v18535_v53  ;;  %7399 = vst.msk [vmem:[#allocation4 + $0x58] sm:$0xff] %vm3928_vm1, %v18535_v53 }
 0x16b   : > { %7400 = vst.msk [vmem:[#allocation4 + $0x60] sm:$0xff] %vm3928_vm1, %v18535_v53  ;;  %7401 = vst.msk [vmem:[#allocation4 + $0x68] sm:$0xff] %vm3928_vm1, %v18535_v53  ;;  %v11785_v42 = vpop.f32.mrf.mxu1 }
 0x16c   : > { %7402 = vst.msk [vmem:[#allocation4 + $0x70] sm:$0xff] %vm3928_vm1, %v18535_v53  ;;  %7403 = vst.msk [vmem:[#allocation4 + $0x78] sm:$0xff] %vm3928_vm1, %v18535_v53  ;;  %v2277_v63 = vadd.f32 %v11785_v42, %v14327_v52 }
 0x16d   : > { %7404 = vst.msk [vmem:[#allocation4 + $0x80] sm:$0xff] %vm3928_vm1, %v18535_v53  ;;  %7405 = vst.msk [vmem:[#allocation4 + $0x88] sm:$0xff] %vm3928_vm1, %v18535_v53  ;;  %v2196_v2 = vpop.f32.mrf.mxu1 }
 0x16e   : > { %7406 = vst.msk [vmem:[#allocation4 + $0x90] sm:$0xff] %vm3928_vm1, %v18535_v53  ;;  %7407 = vst.msk [vmem:[#allocation4 + $0x98] sm:$0xff] %vm3928_vm1, %v18535_v53  ;;  %v2275_v52 = vadd.f32 %v2196_v2, %v14333_v14 }
 0x16f   : > { %7408 = vst.msk [vmem:[#allocation4 + $0xa0] sm:$0xff] %vm3928_vm1, %v18535_v53  ;;  %7409 = vst.msk [vmem:[#allocation4 + $0xa8] sm:$0xff] %vm3928_vm1, %v18535_v53  ;;  %v11786_v11 = vpop.f32.mrf.mxu1 }
 0x170   : > { %7410 = vst.msk [vmem:[#allocation4 + $0xb0] sm:$0xff] %vm3928_vm1, %v18535_v53  ;;  %7411 = vst.msk [vmem:[#allocation4 + $0xb8] sm:$0xff] %vm3928_vm1, %v18535_v53  ;;  %v2278_v19 = vadd.f32 %v11786_v11, %v14338_v50  ;;  %v14623_v50 = vld [vmem:[%s18173_s3 + $0x8] sm:$0xf] }
 0x171   : > { %7412 = vst.msk [vmem:[#allocation4 + $0xc0] sm:$0xff] %vm3928_vm1, %v18535_v53  ;;  %7413 = vst.msk [vmem:[#allocation4 + $0xc8] sm:$0xff] %vm3928_vm1, %v18535_v53  ;;  %12601 = vmatprep.subr.msk.bf16.mxu1 %vm4178_vm0, %v14623_v50 }
 0x172   : > { %7414 = vst.msk [vmem:[#allocation4 + $0xd0] sm:$0xff] %vm3928_vm1, %v18535_v53  ;;  %7415 = vst.msk [vmem:[#allocation4 + $0xd8] sm:$0xff] %vm3928_vm1, %v18535_v53 }
 0x173   : > { %7416 = vst.msk [vmem:[#allocation4 + $0xe0] sm:$0xff] %vm3928_vm1, %v18535_v53  ;;  %7417 = vst.msk [vmem:[#allocation4 + $0xe8] sm:$0xff] %vm3928_vm1, %v18535_v53 }
 0x174   : > { %7418 = vst.msk [vmem:[#allocation4 + $0xf0] sm:$0xff] %vm3928_vm1, %v18535_v53  ;;  %7419 = vst.msk [vmem:[#allocation4 + $0xf8] sm:$0xff] %vm3928_vm1, %v18535_v53 }
 0x175   : > { %7420 = vst.msk [vmem:[#allocation4 + $0x100] sm:$0xff] %vm3928_vm1, %v18535_v53  ;;  %7421 = vst.msk [vmem:[#allocation4 + $0x108] sm:$0xff] %vm3928_vm1, %v18535_v53 }
 0x176   : > { %7422 = vst.msk [vmem:[#allocation4 + $0x110] sm:$0xff] %vm3928_vm1, %v18535_v53  ;;  %7423 = vst.msk [vmem:[#allocation4 + $0x118] sm:$0xff] %vm3928_vm1, %v18535_v53 }
 0x177   : > { %7424 = vst.msk [vmem:[#allocation4 + $0x120] sm:$0xff] %vm3928_vm1, %v18535_v53  ;;  %7425 = vst.msk [vmem:[#allocation4 + $0x128] sm:$0xff] %vm3928_vm1, %v18535_v53  ;;  %v11811_v53 = vpop.f32.mrf.mxu0 }
 0x178   : > { %v14590_v54 = vadd.f32 %v11811_v53, %v14404_v17  ;;  %v4392_v53 = vsel %vm4178_vm0, %v4079_v49, 0  ;;  %v4080_v17 = vld [vmem:[#allocation3 + $0x8] sm:$0xff]  ;;  %v14610_v49 = vpop.f32.mrf.mxu1  ;;  %18720 = vst [vmem:[#allocation11_spill] sm:$0xff] %v14623_v50 }
 0x179   : > { %v2458_v58 = vpop.f32.mrf.mxu0  ;;  %12004 = vmatpush3.bf16.msra.mxu0 %v4392_v53 }
 0x17a   : > { %v14594_v26 = vadd.f32 %v2458_v58, %v14409_v38  ;;  %v4112_v38 = vpack.c.bf16 %v4081_v10, %v4080_v17  ;;  %v4063_v58 = vpack.c.bf16 %v4000_v13, %v4031_v36  ;;  %v11789_v14 = vpop.f32.mrf.mxu1 }
 0x17b   : > { %v11812_v23 = vpop.f32.mrf.mxu0  ;;  %v2281_v2 = vadd.f32 %v11789_v14, %v14347_v6 }
 0x17c   : > { %v14603_v42 = vadd.f32 %v11812_v23, %v2270_v27  ;;  %11971 = vmatprep.mubr.msk.bf16.mxu1 %vm3928_vm1, %v4112_v38  ;;  %12005 = vmatprep.mubr.msk.bf16.mxu0 %vm3928_vm1, %v4063_v58  ;;  %v2212_v13 = vpop.f32.mrf.mxu1 }
 0x17d   : > { %v14605_v0 = vpop.f32.mrf.mxu0  ;;  %v2279_v23 = vadd.f32 %v2212_v13, %v14354_v43 }
 0x17e   : > { %18716 = vst [vmem:[#allocation28_spill] sm:$0xff] %v14603_v42  ;;  %v11790_v53 = vpop.f32.mrf.mxu1 }
 0x17f   : > { %v11815_v41 = vpop.f32.mrf.mxu0  ;;  %v2282_v6 = vadd.f32 %v11790_v53, %v14357_v47 }
 0x180   : > { %v14612_v7 = vadd.f32 %v11815_v41, %v2273_v8  ;;  %v14630_v8 = vpop.f32.mrf.mxu1 }
 0x181   : > { %v2474_v27 = vpop.f32.mrf.mxu0  ;;  %18721 = vst [vmem:[#allocation12_spill] sm:$0xff] %v14630_v8 }
 0x182   : > { %18717 = vst [vmem:[#allocation8_spill] sm:$0xff] %v14612_v7  ;;  %v14615_v10 = vadd.f32 %v2474_v27, %v2271_v16  ;;  %v11793_v43 = vpop.f32.mrf.mxu1 }
 0x183   : > { %v11816_v36 = vpop.f32.mrf.mxu0  ;;  %v2285_v38 = vadd.f32 %v11793_v43, %v14367_v44 }
 0x184   : > { %18718 = vst [vmem:[#allocation46_spill] sm:$0xff] %v14615_v10  ;;  %v14618_v11 = vadd.f32 %v11816_v36, %v2274_v22  ;;  %v2228_v14 = vpop.f32.mrf.mxu1 }
 0x185   : > { %v14625_v41 = vpop.f32.mrf.mxu0  ;;  %v2283_v13 = vadd.f32 %v2228_v14, %v14371_v4 }
 0x186   : > { %18719 = vst [vmem:[#allocation9_spill] sm:$0xff] %v14618_v11  ;;  %v11794_v32 = vpop.f32.mrf.mxu1 }
 0x187   : > { %v11819_v16 = vpop.f32.mrf.mxu0  ;;  %v2286_v47 = vadd.f32 %v11794_v32, %v14374_v24 }
 0x188   : > { %v14632_v17 = vadd.f32 %v11819_v16, %v2277_v63  ;;  %v14643_v53 = vpop.f32.mrf.mxu1 }
 0x189   : > { %v2490_v22 = vpop.f32.mrf.mxu0  ;;  %18726 = vst [vmem:[#allocation23_spill] sm:$0xff] %v14643_v53 }
 0x18a   : > { %18722 = vst [vmem:[#allocation16_spill] sm:$0xff] %v14632_v17  ;;  %v14635_v58 = vadd.f32 %v2490_v22, %v2275_v52  ;;  %v11797_v17 = vpop.f32.mrf.mxu1 }
 0x18b   : > { %v11820_v27 = vpop.f32.mrf.mxu0  ;;  %v2289_v52 = vadd.f32 %v11797_v17, %v14382_v39 }
 0x18c   : > { %18723 = vst [vmem:[#allocation51_spill] sm:$0xff] %v14635_v58  ;;  %v14638_v36 = vadd.f32 %v11820_v27, %v2278_v19  ;;  %v2244_v22 = vpop.f32.mrf.mxu1 }
 0x18d   : > { %v14640_v11 = vpop.f32.mrf.mxu0  ;;  %v2287_v19 = vadd.f32 %v2244_v22, %v14387_v34 }
 0x18e   : > { %18724 = vst [vmem:[#allocation59_spill] sm:$0xff] %v14638_v36  ;;  %18725 = vst [vmem:[#allocation17_spill] sm:$0xff] %v14640_v11  ;;  %v11798_v27 = vpop.f32.mrf.mxu1 }
 0x18f   : > { %v11823_v63 = vpop.f32.mrf.mxu0  ;;  %v2290_v32 = vadd.f32 %v11798_v27, %v14392_v28 }
 0x190   : > { %v14645_v16 = vadd.f32 %v11823_v63, %v2281_v2  ;;  %v14656_v24 = vpop.f32.mrf.mxu1 }
 0x191   : > { %v2506_v44 = vpop.f32.mrf.mxu0  ;;  %18731 = vst [vmem:[#allocation62_spill] sm:$0xff] %v14656_v24 }
 0x192   : > { %18727 = vst [vmem:[#allocation24_spill] sm:$0xff] %v14645_v16  ;;  %v14648_v43 = vadd.f32 %v2506_v44, %v2279_v23  ;;  %v14660_v16 = vpop.f32.mrf.mxu1 }
 0x193   : > { %v11824_v4 = vpop.f32.mrf.mxu0 }
 0x194   : > { %18728 = vst [vmem:[#allocation31_spill] sm:$0xff] %v14648_v43  ;;  %v14651_v14 = vadd.f32 %v11824_v4, %v2282_v6  ;;  %v14664_v17 = vpop.f32.mrf.mxu1 }
 0x195   : > { %v14653_v36 = vpop.f32.mrf.mxu0 }
 0x196   : > { %18729 = vst [vmem:[#allocation10_spill] sm:$0xff] %v14651_v14  ;;  %18730 = vst [vmem:[#allocation13_spill] sm:$0xff] %v14653_v36  ;;  %v14668_v44 = vpop.f32.mrf.mxu1 }
 0x197   : > { %v11827_v2 = vpop.f32.mrf.mxu0 }
 0x198   : > { %v14658_v63 = vadd.f32 %v11827_v2, %v2285_v38  ;;  %v14672_v28 = vpop.f32.mrf.mxu1 }
 0x199   : > { %v2522_v39 = vpop.f32.mrf.mxu0 }
 0x19a   : > { %18732 = vst [vmem:[#allocation34_spill] sm:$0xff] %v14658_v63  ;;  %v14662_v23 = vadd.f32 %v2522_v39, %v2283_v13  ;;  %v14676_v38 = vpop.f32.mrf.mxu1 }
 0x19b   : > { %v11828_v34 = vpop.f32.mrf.mxu0 }
 0x19c   : > { %18733 = vst [vmem:[#allocation14_spill] sm:$0xff] %v14662_v23  ;;  %v14666_v6 = vadd.f32 %v11828_v34, %v2286_v47  ;;  %v14680_v13 = vpop.f32.mrf.mxu1 }
 0x19d   : > { %v14670_v22 = vpop.f32.mrf.mxu0 }
 0x19e   : > { %18734 = vst [vmem:[#allocation18_spill] sm:$0xff] %v14666_v6  ;;  %18735 = vst [vmem:[#allocation64_spill] sm:$0xff] %v14670_v22  ;;  %v14684_v47 = vpop.f32.mrf.mxu1 }
 0x19f   : > { %v11831_v4 = vpop.f32.mrf.mxu0 }
 0x1a0   : > { %v14674_v27 = vadd.f32 %v11831_v4, %v2289_v52  ;;  %v14688_v6 = vpop.f32.mrf.mxu1 }
 0x1a1   : > { %v2538_v2 = vpop.f32.mrf.mxu0 }
 0x1a2   : > { %18736 = vst [vmem:[#allocation35_spill] sm:$0xff] %v14674_v27  ;;  %v14678_v63 = vadd.f32 %v2538_v2, %v2287_v19  ;;  %v14692_v52 = vpop.f32.mrf.mxu1 }
 0x1a3   : > { %v11832_v39 = vpop.f32.mrf.mxu0 }
 0x1a4   : > { %18737 = vst [vmem:[#allocation65_spill] sm:$0xff] %v14678_v63  ;;  %v14682_v23 = vadd.f32 %v11832_v39, %v2290_v32  ;;  %v14696_v27 = vpop.f32.mrf.mxu1 }
 0x1a5   : > { %v14686_v34 = vpop.f32.mrf.mxu0  ;;  %18740 = vst [vmem:[#allocation66_spill] sm:$0xff] %v14696_v27 }
 0x1a6   : > { %18738 = vst [vmem:[#allocation47_spill] sm:$0xff] %v14682_v23  ;;  %18739 = vst [vmem:[#allocation67_spill] sm:$0xff] %v14686_v34  ;;  %v14700_v2 = vpop.f32.mrf.mxu1 }
 0x1a7   : > { %v14690_v22 = vpop.f32.mrf.mxu0  ;;  %18741 = vst [vmem:[#allocation53_spill] sm:$0xff] %v14700_v2 }
 0x1a8   : > { %v14704_v39 = vpop.f32.mrf.mxu1 }
 0x1a9   : > { %v14694_v4 = vpop.f32.mrf.mxu0  ;;  %18742 = vst [vmem:[#allocation68_spill] sm:$0xff] %v14704_v39  ;;  %v14727_v39 = vld [vmem:[%s18173_s3 + $0xc] sm:$0xf] }
 0x1aa   : > { %v14708_v63 = vpop.f32.mrf.mxu1  ;;  %18748 = vst [vmem:[#allocation72_spill] sm:$0xff] %v14727_v39  ;;  %12602 = vmatprep.subr.msk.bf16.mxu0 %vm4178_vm0, %v14727_v39 }
 0x1ab   : > { %v14698_v19 = vpop.f32.mrf.mxu0  ;;  %18743 = vst [vmem:[#allocation55_spill] sm:$0xff] %v14708_v63 }
 0x1ac   : > { %v14712_v14 = vpop.f32.mrf.mxu1 }
 0x1ad   : > { %v14702_v32 = vpop.f32.mrf.mxu0  ;;  %18744 = vst [vmem:[#allocation69_spill] sm:$0xff] %v14712_v14 }
 0x1ae   : > { %v14716_v24 = vpop.f32.mrf.mxu1 }
 0x1af   : > { %v14706_v23 = vpop.f32.mrf.mxu0  ;;  %18745 = vst [vmem:[#allocation71_spill] sm:$0xff] %v14716_v24 }
 0x1b0   : > { %v14720_v10 = vpop.f32.mrf.mxu1 }
 0x1b1   : > { %v14710_v34 = vpop.f32.mrf.mxu0  ;;  %18746 = vst [vmem:[#allocation70_spill] sm:$0xff] %v14720_v10 }
 0x1b2   : > { %v14729_v63 = vpop.f32.mrf.mxu1 }
 0x1b3   : > { %v14714_v43 = vpop.f32.mrf.mxu0  ;;  %18749 = vst [vmem:[#allocation58_spill] sm:$0xff] %v14729_v63 }
 0x1b4   : > { %v14735_v14 = vpop.f32.mrf.mxu1 }
 0x1b5   : > { %v14718_v58 = vpop.f32.mrf.mxu0  ;;  %18751 = vst [vmem:[#allocation76_spill] sm:$0xff] %v14735_v14 }
 0x1b6   : > { %v14739_v53 = vpop.f32.mrf.mxu1 }
 0x1b7   : > { %v14722_v7 = vpop.f32.mrf.mxu0  ;;  %18753 = vst [vmem:[#allocation75_spill] sm:$0xff] %v14739_v53 }
 0x1b8   : > { %18747 = vst [vmem:[#allocation56_spill] sm:$0xff] %v14722_v7  ;;  %v14743_v2 = vpop.f32.mrf.mxu1 }
 0x1b9   : > { %v14731_v36 = vpop.f32.mrf.mxu0  ;;  %18755 = vst [vmem:[#allocation78_spill] sm:$0xff] %v14743_v2 }
 0x1ba   : > { %18750 = vst [vmem:[#allocation73_spill] sm:$0xff] %v14731_v36  ;;  %v14747_v11 = vpop.f32.mrf.mxu1 }
 0x1bb   : > { %v14737_v24 = vpop.f32.mrf.mxu0  ;;  %18757 = vst [vmem:[#allocation38_spill] sm:$0xff] %v14747_v11 }
 0x1bc   : > { %18752 = vst [vmem:[#allocation74_spill] sm:$0xff] %v14737_v24  ;;  %v14751_v36 = vpop.f32.mrf.mxu1 }
 0x1bd   : > { %v14741_v10 = vpop.f32.mrf.mxu0  ;;  %18759 = vst [vmem:[#allocation80_spill] sm:$0xff] %v14751_v36 }
 0x1be   : > { %18754 = vst [vmem:[#allocation77_spill] sm:$0xff] %v14741_v10  ;;  %v14755_v39 = vpop.f32.mrf.mxu1 }
 0x1bf   : > { %v14745_v42 = vpop.f32.mrf.mxu0  ;;  %18761 = vst [vmem:[#allocation81_spill] sm:$0xff] %v14755_v39 }
 0x1c0   : > { %18756 = vst [vmem:[#allocation41_spill] sm:$0xff] %v14745_v42  ;;  %v14759_v24 = vpop.f32.mrf.mxu1 }
 0x1c1   : > { %v14749_v63 = vpop.f32.mrf.mxu0  ;;  %18763 = vst [vmem:[#allocation87_spill] sm:$0xff] %v14759_v24 }
 0x1c2   : > { %18758 = vst [vmem:[#allocation79_spill] sm:$0xff] %v14749_v63  ;;  %v14763_v10 = vpop.f32.mrf.mxu1 }
 0x1c3   : > { %v14753_v8 = vpop.f32.mrf.mxu0  ;;  %18765 = vst [vmem:[#allocation84_spill] sm:$0xff] %v14763_v10 }
 0x1c4   : > { %18760 = vst [vmem:[#allocation54_spill] sm:$0xff] %v14753_v8  ;;  %v14767_v42 = vpop.f32.mrf.mxu1 }
 0x1c5   : > { %v14757_v14 = vpop.f32.mrf.mxu0  ;;  %18767 = vst [vmem:[#allocation90_spill] sm:$0xff] %v14767_v42 }
 0x1c6   : > { %18762 = vst [vmem:[#allocation45_spill] sm:$0xff] %v14757_v14  ;;  %v14771_v63 = vpop.f32.mrf.mxu1 }
 0x1c7   : > { %v14761_v53 = vpop.f32.mrf.mxu0  ;;  %18769 = vst [vmem:[#allocation93_spill] sm:$0xff] %v14771_v63 }
 0x1c8   : > { %18764 = vst [vmem:[#allocation82_spill] sm:$0xff] %v14761_v53  ;;  %v14775_v8 = vpop.f32.mrf.mxu1 }
 0x1c9   : > { %v14765_v2 = vpop.f32.mrf.mxu0  ;;  %18771 = vst [vmem:[#allocation95_spill] sm:$0xff] %v14775_v8 }
 0x1ca   : > { %18766 = vst [vmem:[#allocation89_spill] sm:$0xff] %v14765_v2  ;;  %v14779_v14 = vpop.f32.mrf.mxu1 }
 0x1cb   : > { %v14769_v11 = vpop.f32.mrf.mxu0  ;;  %18773 = vst [vmem:[#allocation97_spill] sm:$0xff] %v14779_v14 }
 0x1cc   : > { %18768 = vst [vmem:[#allocation91_spill] sm:$0xff] %v14769_v11  ;;  %v14783_v53 = vpop.f32.mrf.mxu1 }
 0x1cd   : > { %v14773_v36 = vpop.f32.mrf.mxu0  ;;  %18775 = vst [vmem:[#allocation99_spill] sm:$0xff] %v14783_v53 }
 0x1ce   : > { %18770 = vst [vmem:[#allocation94_spill] sm:$0xff] %v14773_v36  ;;  %v14787_v2 = vpop.f32.mrf.mxu1 }
 0x1cf   : > { %v14777_v39 = vpop.f32.mrf.mxu0  ;;  %18777 = vst [vmem:[#allocation101_spill] sm:$0xff] %v14787_v2 }
 0x1d0   : > { %18772 = vst [vmem:[#allocation96_spill] sm:$0xff] %v14777_v39  ;;  %v14791_v11 = vpop.f32.mrf.mxu1 }
 0x1d1   : > { %v14781_v24 = vpop.f32.mrf.mxu0  ;;  %18779 = vst [vmem:[#allocation103_spill] sm:$0xff] %v14791_v11  ;;  %v2881_v11 = vadd.f32 %v14660_v16, %v14401_v31  ;;  %v2882_v16 = vadd.f32 %v14668_v44, %v14411_v35 }
 0x1d2   : > { %18774 = vst [vmem:[#allocation98_spill] sm:$0xff] %v14781_v24  ;;  %v11905_v36 = vpop.f32.mrf.mxu1 }
 0x1d3   : > { %v14785_v10 = vpop.f32.mrf.mxu0  ;;  %v3208_v35 = vadd.f32 %v14698_v19, %v2882_v16 }
 0x1d4   : > { %18776 = vst [vmem:[#allocation100_spill] sm:$0xff] %v14785_v10  ;;  %v3372_v39 = vpop.f32.mrf.mxu1 }
 0x1d5   : > { %v14789_v42 = vpop.f32.mrf.mxu0 }
 0x1d6   : > { %18778 = vst [vmem:[#allocation102_spill] sm:$0xff] %v14789_v42  ;;  %v11906_v14 = vpop.f32.mrf.mxu1 }
 0x1d7   : > { %v14793_v63 = vpop.f32.mrf.mxu0  ;;  %v3502_v44 = vadd.f32 %v11906_v14, %v3208_v35 }
 0x1d8   : > { %18780 = vst [vmem:[#allocation104_spill] sm:$0xff] %v14793_v63  ;;  %v3375_v53 = vpop.f32.mrf.mxu1 }
 0x1d9   : > { %v14795_v8 = vpop.f32.mrf.mxu0 }
 0x1da   : > { %18781 = vst [vmem:[#allocation105_spill] sm:$0xff] %v14795_v8  ;;  %v11909_v10 = vpop.f32.mrf.mxu1  ;;  %v2260_v8 = vadd.f32 %v14379_v56, %v14253_v9  ;;  %v1596_v56 = vadd.f32 %v14323_v61, %v14132_v25  ;;  %v1628_v61 = vadd.f32 %v14363_v60, %v14195_v5  ;;  %v2883_v5 = vadd.f32 %v14680_v13, %v14578_v15 }
 0x1db   : > { %v14797_v50 = vpop.f32.mrf.mxu0 }
 0x1dc   : > { %18782 = vst [vmem:[#allocation106_spill] sm:$0xff] %v14797_v50  ;;  %v3388_v42 = vpop.f32.mrf.mxu1  ;;  %v2879_v50 = vadd.f32 %v14664_v17, %v14406_v3  ;;  %v2554_v31 = vadd.f32 %v14415_v40, %v2260_v8  ;;  %v14839_v25 = vadd.f32 %v14360_v30, %v1596_v56  ;;  %v14861_v19 = vadd.f32 %v14394_v55, %v1628_v61 }
 0x1dd   : > { %v14799_v24 = vpop.f32.mrf.mxu0  ;;  %v2268_v55 = vadd.f32 %v14571_v51, %v14295_v29 }
 0x1de   : > { %18783 = vst [vmem:[#allocation107_spill] sm:$0xff] %v14799_v24  ;;  %v3207_v24 = vadd.f32 %v14690_v22, %v2881_v11  ;;  %v14816_v27 = vpop.f32.mrf.mxu1  ;;  %v2880_v40 = vadd.f32 %v14672_v28, %v2554_v31 }
 0x1df   : > { %v14801_v7 = vpop.f32.mrf.mxu0 }
 0x1e0   : > { %18784 = vst [vmem:[#allocation108_spill] sm:$0xff] %v14801_v7  ;;  %v1580_v7 = vadd.f32 %v14300_v1, %v14234_v33  ;;  %v3501_v9 = vadd.f32 %v11905_v36, %v3207_v24  ;;  %v14827_v11 = vpop.f32.mrf.mxu1  ;;  %v14832_v1 = vld [vmem:[%s18172_s2] ss:$0 sm:$0xff]  ;;  %v1612_v36 = vadd.f32 %v14343_v18, %v14169_v12  ;;  %v3206_v17 = vadd.f32 %v14702_v32, %v2880_v40 }
 0x1e1   : > { %v14803_v2 = vpop.f32.mrf.mxu0  ;;  %v2264_v18 = vadd.f32 %v14399_v57, %v14274_v20  ;;  %v2886_v20 = vadd.f32 %v14684_v47, %v14582_v48  ;;  %v3209_v57 = vadd.f32 %v14710_v34, %v2883_v5  ;;  %v18794_v5 = vld [vmem:[#allocation73_spill] sm:$0xff] }
 0x1e2   : > { %18785 = vst [vmem:[#allocation109_spill] sm:$0xff] %v14803_v2  ;;  %v1950_v3 = vadd.f32 %v14340_v21, %v1580_v7  ;;  %v2885_v21 = vadd.f32 %v14676_v38, %v14574_v45  ;;  %v14845_v7 = vpop.f32.mrf.mxu1  ;;  %v14850_v12 = vadd.f32 %v14376_v62, %v1612_v36  ;;  %v3500_v28 = vadd.f32 %v3375_v53, %v3206_v17  ;;  %v18791_v17 = vld [vmem:[#allocation17_spill] sm:$0xff] }
 0x1e3   : > { %v14807_v63 = vpop.f32.mrf.mxu0  ;;  %v2558_v62 = vadd.f32 %v14584_v59, %v2264_v18  ;;  %v2272_v59 = vadd.f32 %v14587_v37, %v14321_v46  ;;  %v3212_v47 = vadd.f32 %v14714_v43, %v2886_v20  ;;  %v2889_v46 = vadd.f32 %v14692_v52, %v14590_v54  ;;  %v18788_v54 = vld [vmem:[#allocation56_spill] sm:$0xff]  ;;  %v18796_v20 = vld [vmem:[#allocation13_spill] sm:$0xff] }
 0x1e4   : > { %18786 = vst [vmem:[#allocation110_spill] sm:$0xff] %v14807_v63  ;;  %v3205_v63 = vadd.f32 %v14694_v4, %v2879_v50  ;;  %v3211_v30 = vadd.f32 %v14706_v23, %v2885_v21  ;;  %v14857_v60 = vpop.f32.mrf.mxu1  ;;  %v2276_v29 = vadd.f32 %v14610_v49, %v1950_v3  ;;  %v18787_v49 = vld [vmem:[#allocation66_spill] sm:$0xff] }
 0x1e5   : > { %v14818_v2 = vpop.f32.mrf.mxu0  ;;  %v2884_v48 = vadd.f32 %v14688_v6, %v2558_v62  ;;  %v2887_v3 = vadd.f32 %v18787_v49, %v14594_v26  ;;  %v3215_v52 = vadd.f32 %v18788_v54, %v2889_v46  ;;  %v18804_v46 = vld [vmem:[#allocation71_spill] sm:$0xff] }
 0x1e6   : > { %v3499_v8 = vadd.f32 %v3372_v39, %v3205_v63  ;;  %v14867_v15 = vpop.f32.mrf.mxu1  ;;  %v3505_v13 = vadd.f32 %v11909_v10, %v3211_v30  ;;  %v3503_v10 = vadd.f32 %v3388_v42, %v3209_v57  ;;  %v3506_v42 = vadd.f32 %v14816_v27, %v3212_v47 }
 0x1e7   : > { %v11939_v33 = vpop.f32.mrf.mxu0  ;;  %v3210_v51 = vadd.f32 %v14718_v58, %v2884_v48  ;;  %v3213_v30 = vadd.f32 %v18794_v5, %v2887_v3 }
 0x1e8   : > { %v3827_v50 = vadd.f32 %v11939_v33, %v3501_v9  ;;  %v14877_v34 = vpop.f32.mrf.mxu1  ;;  %v2562_v33 = vadd.f32 %v14605_v0, %v2268_v55  ;;  %v14892_v0 = vadd.f32 %v14625_v41, %v2272_v59 }
 0x1e9   : > { %v3698_v24 = vpop.f32.mrf.mxu0  ;;  %v3504_v36 = vadd.f32 %v14827_v11, %v3210_v51  ;;  %v3507_v55 = vadd.f32 %v14857_v60, %v3213_v30 }
 0x1ea   : > { %v3866_v63 = vadd.f32 %v14832_v1, %v3827_v50  ;;  %v3825_v22 = vadd.f32 %v3698_v24, %v3499_v8  ;;  %v14886_v37 = vpop.f32.mrf.mxu1  ;;  %v18789_v50 = vld [vmem:[#allocation11_spill] sm:$0xff]  ;;  %v18790_v24 = vld [vmem:[#allocation12_spill] sm:$0xff] }
 0x1eb   : > { %v11940_v45 = vpop.f32.mrf.mxu0  ;;  %v14901_v27 = vsel %vm4178_vm0, %v18789_v50, 0  ;;  %v2280_v26 = vadd.f32 %v18790_v24, %v14839_v25  ;;  %v18795_v25 = vld [vmem:[#allocation23_spill] sm:$0xff] }
 0x1ec   : > { %v3898_v38 = vmax.f32 %v3866_v63, 0.0  ;;  %v3864_v14 = vadd.f32 %v14832_v1, %v3825_v22  ;;  %v3828_v4 = vadd.f32 %v11940_v45, %v3502_v44  ;;  %v14897_v58 = vpop.f32.mrf.mxu1  ;;  %v14909_v44 = vadd.f32 %v18791_v17, %v2276_v29  ;;  %v18792_v63 = vld [vmem:[#allocation28_spill] sm:$0xff]  ;;  %v18793_v22 = vld [vmem:[#allocation53_spill] sm:$0xff]  ;;  %v18807_v50 = vld [vmem:[#allocation79_spill] sm:$0xff] }
 0x1ed   : > { %v3701_v23 = vpop.f32.mrf.mxu0  ;;  %v2890_v18 = vadd.f32 %v18793_v22, %v18792_v63  ;;  %v14921_v62 = vadd.f32 %v18795_v25, %v14850_v12  ;;  %v14924_v57 = vadd.f32 %v18796_v20, %v2280_v26  ;;  %v18803_v29 = vld [vmem:[#allocation9_spill] sm:$0xff]  ;;  %v18808_v26 = vld [vmem:[#allocation19_spill] sm:$0xff]  ;;  %v18809_v63 = vld [vmem:[#allocation72_spill] sm:$0xff] }
 0x1ee   : > { %3969 = vst.msk [vmem:[#allocation3 + $0x28] sm:$0xff] %vm3928_vm1, %v3898_v38  ;;  %v3896_v53 = vmax.f32 %v3864_v14, 0.0  ;;  %v3867_v32 = vadd.f32 %v14832_v1, %v3828_v4  ;;  %v3826_v39 = vadd.f32 %v3701_v23, %v3500_v28  ;;  %v14914_v45 = vpop.f32.mrf.mxu1  ;;  %v3509_v28 = vadd.f32 %v14845_v7, %v3215_v52  ;;  %v18797_v23 = vld [vmem:[#allocation68_spill] sm:$0xff]  ;;  %v18806_v52 = vld [vmem:[#allocation41_spill] sm:$0xff] }
 0x1ef   : > { %v11943_v31 = vpop.f32.mrf.mxu0  ;;  %v2894_v51 = vadd.f32 %v18804_v46, %v18803_v29  ;;  %v5012_v22 = vsel %vm4178_vm0, %v18809_v63, 0  ;;  %v18820_v63 = vld [vmem:[#allocation75_spill] sm:$0xff] }
 0x1f0   : > { %3967 = vst.msk [vmem:[#allocation3 + $0x18] sm:$0xff] %vm3928_vm1, %v3896_v53  ;;  %v3899_v16 = vmax.f32 %v3867_v32, 0.0  ;;  %v3865_v9 = vadd.f32 %v14832_v1, %v3826_v39  ;;  %v3831_v56 = vadd.f32 %v11943_v31, %v3505_v13  ;;  %v2888_v13 = vadd.f32 %v18797_v23, %v2562_v33  ;;  %v18798_v53 = vld [vmem:[#allocation74_spill] sm:$0xff]  ;;  %v14928_v39 = vpop.f32.mrf.mxu1  ;;  %v18799_v31 = vld [vmem:[#allocation8_spill] sm:$0xff] }
 0x1f1   : > { %v3714_v43 = vpop.f32.mrf.mxu0  ;;  %v3216_v32 = vadd.f32 %v18798_v53, %v2890_v18 }
 0x1f2   : > { %3970 = vst.msk [vmem:[#allocation3 + $0x30] sm:$0xff] %vm3928_vm1, %v3899_v16  ;;  %v3897_v6 = vmax.f32 %v3865_v9, 0.0  ;;  %v3870_v40 = vadd.f32 %v14832_v1, %v3831_v56  ;;  %v3829_v35 = vadd.f32 %v3714_v43, %v3503_v10  ;;  %v18800_v10 = vld [vmem:[#allocation55_spill] sm:$0xff]  ;;  %v18801_v9 = vld [vmem:[#allocation46_spill] sm:$0xff]  ;;  %v18802_v56 = vld [vmem:[#allocation69_spill] sm:$0xff]  ;;  %v14942_v60 = vpop.f32.mrf.mxu1 }
 0x1f3   : > { %v11944_v8 = vpop.f32.mrf.mxu0  ;;  %v2893_v16 = vadd.f32 %v18800_v10, %v18799_v31  ;;  %v2891_v33 = vadd.f32 %v18802_v56, %v18801_v9  ;;  %v18805_v43 = vld [vmem:[#allocation77_spill] sm:$0xff]  ;;  %v14988_v56 = vld [vmem:[%s18173_s3 + $0x10] sm:$0xf] }
 0x1f4   : > { %3968 = vst.msk [vmem:[#allocation3 + $0x20] sm:$0xff] %vm3928_vm1, %v3897_v6  ;;  %v3902_v61 = vmax.f32 %v3870_v40, 0.0  ;;  %v3868_v41 = vadd.f32 %v14832_v1, %v3829_v35  ;;  %v3832_v21 = vadd.f32 %v11944_v8, %v3506_v42  ;;  %v3214_v42 = vadd.f32 %v18805_v43, %v2888_v13  ;;  %v18810_v13 = vld [vmem:[#allocation21_spill] sm:$0xff] }
 0x1f5   : > { %v3717_v11 = vpop.f32.mrf.mxu0  ;;  %v3510_v40 = vadd.f32 %v14867_v15, %v3216_v32  ;;  %v3219_v8 = vadd.f32 %v18806_v52, %v2893_v16  ;;  %v4084_v23 = vld [vmem:[#allocation3 + $0x28] sm:$0xff] }
 0x1f6   : > { %3973 = vst.msk [vmem:[#allocation3 + $0x48] sm:$0xff] %vm3928_vm1, %v3902_v61  ;;  %v3900_v38 = vmax.f32 %v3868_v41, 0.0  ;;  %v3871_v14 = vadd.f32 %v14832_v1, %v3832_v21  ;;  %v3830_v4 = vadd.f32 %v3717_v11, %v3504_v36  ;;  %v3217_v36 = vadd.f32 %v18807_v50, %v2891_v33  ;;  %v14949_v61 = vpop.f32.mrf.mxu1 }
 0x1f7   : > { %v11947_v7 = vpop.f32.mrf.mxu0  ;;  %v14933_v12 = vld [vmem:[#allocation3 + $0x17] sm:$0xff]  ;;  %v3508_v18 = vadd.f32 %v14877_v34, %v3214_v42  ;;  %v18814_v42 = vld [vmem:[#allocation16_spill] sm:$0xff] }
 0x1f8   : > { %3971 = vst.msk [vmem:[#allocation3 + $0x38] sm:$0xff] %vm3928_vm1, %v3900_v38  ;;  %v3903_v59 = vmax.f32 %v3871_v14, 0.0  ;;  %v3869_v48 = vadd.f32 %v14832_v1, %v3830_v4  ;;  %v3835_v47 = vadd.f32 %v11947_v7, %v3509_v28  ;;  %v4033_v15 = vmul.f32 %v18808_v26, %v14933_v12  ;;  %v4082_v28 = vld [vmem:[#allocation3 + $0x18] sm:$0xff]  ;;  %v14963_v14 = vpop.f32.mrf.mxu1 }
 0x1f9   : > { %v3730_v6 = vpop.f32.mrf.mxu0  ;;  %v4085_v54 = vld [vmem:[#allocation3 + $0x30] sm:$0xff]  ;;  %v3513_v38 = vadd.f32 %v14886_v37, %v3219_v8  ;;  %v3511_v33 = vadd.f32 %v14897_v58, %v3217_v36 }
 0x1fa   : > { %3974 = vst.msk [vmem:[#allocation3 + $0x50] sm:$0xff] %vm3928_vm1, %v3903_v59  ;;  %v3901_v35 = vmax.f32 %v3869_v48, 0.0  ;;  %v3874_v49 = vadd.f32 %v14832_v1, %v3835_v47  ;;  %v3833_v3 = vadd.f32 %v3730_v6, %v3507_v55  ;;  %v14972_v55 = vpack.c.bf16 %v4085_v54, %v4084_v23  ;;  %v14974_v37 = vld [vmem:[#allocation3 + $0x2f] sm:$0xff]  ;;  %v14979_v10 = vpop.f32.mrf.mxu1 }
 0x1fb   : > { %v11948_v41 = vpop.f32.mrf.mxu0  ;;  %v4083_v21 = vld [vmem:[#allocation3 + $0x20] sm:$0xff]  ;;  %v18812_v59 = vld [vmem:[#allocation70_spill] sm:$0xff]  ;;  %v18818_v58 = vld [vmem:[#allocation45_spill] sm:$0xff] }
 0x1fc   : > { %v14951_v24 = vld [vmem:[#allocation3 + $0x1f] sm:$0xff]  ;;  %v14955_v17 = vld [vmem:[#allocation3 + $0x27] sm:$0xff]  ;;  %3972 = vst.msk [vmem:[#allocation3 + $0x40] sm:$0xff] %vm3928_vm1, %v3901_v35  ;;  %v3906_v5 = vmax.f32 %v3874_v49, 0.0  ;;  %v3872_v30 = vadd.f32 %v14832_v1, %v3833_v3  ;;  %v3836_v11 = vadd.f32 %v11948_v41, %v3510_v40  ;;  %v14965_v25 = vpack.c.bf16 %v4083_v21, %v4082_v28  ;;  %18811 = vst [vmem:[#allocation66_spill] sm:$0xff] %v14972_v55  ;;  %v15008_v52 = vpop.f32.mrf.mxu1 }
 0x1fd   : > { %v3733_v4 = vpop.f32.mrf.mxu0  ;;  %v4064_v20 = vpack.c.bf16 %v14951_v24, %v4033_v15  ;;  %v4035_v34 = vmul.f32 %v18810_v13, %v14955_v17  ;;  %v2892_v48 = vadd.f32 %v18812_v59, %v14892_v0  ;;  %v18813_v47 = vld [vmem:[#allocation54_spill] sm:$0xff]  ;;  %v14993_v0 = vld [vmem:[%s18173_s3 + $0x14] sm:$0xf]  ;;  %v18816_v35 = vld [vmem:[#allocation51_spill] sm:$0xff] }
 0x1fe   : > { %3977 = vst.msk [vmem:[#allocation3 + $0x68] sm:$0xff] %vm3928_vm1, %v3906_v5  ;;  %v3904_v53 = vmax.f32 %v3872_v30, 0.0  ;;  %v3875_v32 = vadd.f32 %v14832_v1, %v3836_v11  ;;  %v3834_v7 = vadd.f32 %v3733_v4, %v3508_v18  ;;  %v3220_v31 = vadd.f32 %v18813_v47, %v2894_v51  ;;  %11972 = vmatmul.mubr.msk.bf16.vlgmr.msra.gmra.mxu1 %vm3928_vm1, %v14965_v25  ;;  %v18815_v6 = vld [vmem:[#allocation58_spill] sm:$0xff]  ;;  %v18817_v49 = vld [vmem:[#allocation76_spill] sm:$0xff]  ;;  %v18819_v15 = vld [vmem:[#allocation59_spill] sm:$0xff]  ;;  %v15022_v11 = vpop.f32.mrf.mxu1 }
 0x1ff   : > { %12006 = vmatmul.mubr.msk.bf16.vlgmr.msra.gmra.mxu0 %vm3928_vm1, %v4064_v20  ;;  %v11951_v16 = vpop.f32.mrf.mxu0  ;;  %v4065_v9 = vpack.c.bf16 %v14974_v37, %v4035_v34  ;;  %12038 = vmatpush3.bf16.msra.mxu1 %v14901_v27  ;;  %v15001_v43 = vld [vmem:[#allocation3 + $0x37] sm:$0xff]  ;;  %v2897_v40 = vadd.f32 %v18815_v6, %v18814_v42  ;;  %v2895_v3 = vadd.f32 %v18817_v49, %v18816_v35  ;;  %v18822_v30 = vld [vmem:[#allocation89_spill] sm:$0xff] }
 0x200   : > { %3975 = vst.msk [vmem:[#allocation3 + $0x58] sm:$0xff] %vm3928_vm1, %v3904_v53  ;;  %v3907_v29 = vmax.f32 %v3875_v32, 0.0  ;;  %v3873_v46 = vadd.f32 %v14832_v1, %v3834_v7  ;;  %v3839_v51 = vadd.f32 %v11951_v16, %v3513_v38  ;;  %11975 = vmatprep.mubr.msk.bf16.mxu1 %vm3928_vm1, %v14972_v55  ;;  %v3218_v54 = vadd.f32 %v18818_v58, %v2892_v48  ;;  %v18821_v5 = vld [vmem:[#allocation82_spill] sm:$0xff]  ;;  %v18823_v20 = vld [vmem:[#allocation25_spill] sm:$0xff] }
 0x201   : > { %12009 = vmatprep.mubr.msk.bf16.mxu0 %vm3928_vm1, %v4065_v9  ;;  %v3746_v8 = vpop.f32.mrf.mxu0  ;;  %12072 = vmatpush3.bf16.msra.mxu0 %v5012_v22  ;;  %v3514_v27 = vadd.f32 %v14914_v45, %v3220_v31  ;;  %v4089_v21 = vld [vmem:[#allocation3 + $0x50] sm:$0xff]  ;;  %v2898_v18 = vadd.f32 %v18820_v63, %v18819_v15  ;;  %v3223_v22 = vadd.f32 %v18821_v5, %v2897_v40  ;;  %v4086_v48 = vld [vmem:[#allocation3 + $0x38] sm:$0xff]  ;;  %v15034_v31 = vpop.f32.mrf.mxu1 }
 0x202   : > { %3978 = vst.msk [vmem:[#allocation3 + $0x70] sm:$0xff] %vm3928_vm1, %v3907_v29  ;;  %v3905_v50 = vmax.f32 %v3873_v46, 0.0  ;;  %v3878_v36 = vadd.f32 %v14832_v1, %v3839_v51  ;;  %v3837_v41 = vadd.f32 %v3746_v8, %v3511_v33  ;;  %12603 = vmatprep.subr.msk.bf16.mxu1 %vm4178_vm0, %v14988_v56  ;;  %12604 = vmatprep.subr.msk.bf16.mxu0 %vm4178_vm0, %v14993_v0  ;;  %v4088_v29 = vld [vmem:[#allocation3 + $0x48] sm:$0xff]  ;;  %v18825_v46 = vld [vmem:[#allocation27_spill] sm:$0xff]  ;;  %v18827_v35 = vld [vmem:[#allocation78_spill] sm:$0xff] }
 0x203   : > { %v3221_v45 = vadd.f32 %v18822_v30, %v2895_v3  ;;  %v11952_v28 = vpop.f32.mrf.mxu0  ;;  %v4087_v38 = vld [vmem:[#allocation3 + $0x40] sm:$0xff]  ;;  %v4037_v23 = vmul.f32 %v18823_v20, %v15001_v43  ;;  %v3512_v53 = vadd.f32 %v14928_v39, %v3218_v54  ;;  %v3517_v47 = vadd.f32 %v14942_v60, %v3223_v22  ;;  %v15045_v60 = vld [vmem:[#allocation3 + $0x4f] sm:$0xff]  ;;  %v15050_v54 = vpop.f32.mrf.mxu1 }
 0x204   : > { %v15024_v4 = vld [vmem:[#allocation3 + $0x3f] sm:$0xff]  ;;  %v15028_v34 = vld [vmem:[#allocation3 + $0x47] sm:$0xff]  ;;  %3976 = vst.msk [vmem:[#allocation3 + $0x60] sm:$0xff] %vm3928_vm1, %v3905_v50  ;;  %v3910_v32 = vmax.f32 %v3878_v36, 0.0  ;;  %v3876_v7 = vadd.f32 %v14832_v1, %v3837_v41  ;;  %v3840_v59 = vadd.f32 %v11952_v28, %v3514_v27  ;;  %v15036_v9 = vpack.c.bf16 %v4087_v38, %v4086_v48  ;;  %v18829_v15 = vld [vmem:[#allocation62_spill] sm:$0xff] }
 0x205   : > { %v3749_v16 = vpop.f32.mrf.mxu0  ;;  %v4066_v33 = vpack.c.bf16 %v15024_v4, %v4037_v23  ;;  %v4039_v39 = vmul.f32 %v18825_v46, %v15028_v34  ;;  %v15043_v40 = vpack.c.bf16 %v4089_v21, %v4088_v29  ;;  %v2896_v49 = vadd.f32 %v18827_v35, %v14909_v44  ;;  %v18828_v3 = vld [vmem:[#allocation91_spill] sm:$0xff]  ;;  %v18831_v5 = vld [vmem:[#allocation38_spill] sm:$0xff]  ;;  %v15072_v23 = vpop.f32.mrf.mxu1  ;;  %v18837_v29 = vld [vmem:[#allocation96_spill] sm:$0xff] }
 0x206   : > { %18824 = vst [vmem:[#allocation56_spill] sm:$0xff] %v15036_v9  ;;  %3981 = vst.msk [vmem:[#allocation3 + $0x88] sm:$0xff] %vm3928_vm1, %v3910_v32  ;;  %v3908_v51 = vmax.f32 %v3876_v7, 0.0  ;;  %v3879_v42 = vadd.f32 %v14832_v1, %v3840_v59  ;;  %v3838_v6 = vadd.f32 %v3749_v16, %v3512_v53  ;;  %v3224_v58 = vadd.f32 %v18828_v3, %v2898_v18  ;;  %v18830_v18 = vld [vmem:[#allocation24_spill] sm:$0xff]  ;;  %v18832_v30 = vld [vmem:[#allocation31_spill] sm:$0xff] }
 0x207   : > { %18826 = vst [vmem:[#allocation11_spill] sm:$0xff] %v15043_v40  ;;  %11976 = vmatmul.mubr.msk.bf16.gmra.mxu1 %vm3928_vm1, %v15036_v9  ;;  %12010 = vmatmul.mubr.msk.bf16.gmra.mxu0 %vm3928_vm1, %v4066_v33  ;;  %v11955_v8 = vpop.f32.mrf.mxu0  ;;  %v4067_v27 = vpack.c.bf16 %v15045_v60, %v4039_v39  ;;  %v3515_v50 = vadd.f32 %v14949_v61, %v3221_v45  ;;  %v15061_v21 = vld [vmem:[#allocation3 + $0x57] sm:$0xff]  ;;  %v18833_v61 = vld [vmem:[#allocation80_spill] sm:$0xff]  ;;  %v18836_v16 = vld [vmem:[#allocation81_spill] sm:$0xff] }
 0x208   : > { %3979 = vst.msk [vmem:[#allocation3 + $0x78] sm:$0xff] %vm3928_vm1, %v3908_v51  ;;  %v3911_v36 = vmax.f32 %v3879_v42, 0.0  ;;  %v3877_v41 = vadd.f32 %v14832_v1, %v3838_v6  ;;  %v3843_v44 = vadd.f32 %v11955_v8, %v3517_v47  ;;  %11979 = vmatprep.mubr.msk.bf16.mxu1 %vm3928_vm1, %v15043_v40  ;;  %v15065_v63 = vadd.f32 %v18829_v15, %v14861_v19  ;;  %v18834_v28 = vld [vmem:[#allocation94_spill] sm:$0xff]  ;;  %v15082_v6 = vpop.f32.mrf.mxu1  ;;  %v15344_v55 = vld [vmem:[#allocation3 + $0x41] sm:$0xff] }
 0x209   : > { %v2901_v22 = vadd.f32 %v18831_v5, %v18830_v18  ;;  %v2899_v45 = vadd.f32 %v18833_v61, %v18832_v30  ;;  %v3222_v38 = vadd.f32 %v18834_v28, %v2896_v49  ;;  %12013 = vmatprep.mubr.msk.bf16.mxu0 %vm3928_vm1, %v4067_v27  ;;  %v3762_v53 = vpop.f32.mrf.mxu0  ;;  %v3518_v32 = vadd.f32 %v14963_v14, %v3224_v58  ;;  %v4093_v48 = vld [vmem:[#allocation3 + $0x70] sm:$0xff]  ;;  %v4092_v61 = vld [vmem:[#allocation3 + $0x68] sm:$0xff] }
 0x20a   : > { %3982 = vst.msk [vmem:[#allocation3 + $0x90] sm:$0xff] %vm3928_vm1, %v3911_v36  ;;  %v3909_v7 = vmax.f32 %v3877_v41, 0.0  ;;  %v3882_v19 = vadd.f32 %v14832_v1, %v3843_v44  ;;  %v3841_v59 = vadd.f32 %v3762_v53, %v3515_v50  ;;  %v18835_v47 = vld [vmem:[#allocation10_spill] sm:$0xff]  ;;  %v15094_v18 = vpop.f32.mrf.mxu1 }
 0x20b   : > { %v2902_v33 = vadd.f32 %v18836_v16, %v18835_v47  ;;  %v3227_v39 = vadd.f32 %v18837_v29, %v2901_v22  ;;  %v18838_v51 = vld [vmem:[#allocation98_spill] sm:$0xff]  ;;  %v11956_v35 = vpop.f32.mrf.mxu0  ;;  %v4091_v49 = vld [vmem:[#allocation3 + $0x60] sm:$0xff]  ;;  %v3516_v27 = vadd.f32 %v14979_v10, %v3222_v38 }
 0x20c   : > { %v3225_v42 = vadd.f32 %v18838_v51, %v2899_v45  ;;  %v15084_v3 = vld [vmem:[#allocation3 + $0x5f] sm:$0xff]  ;;  %v18839_v14 = vld [vmem:[#allocation30_spill] sm:$0xff]  ;;  %v15088_v8 = vld [vmem:[#allocation3 + $0x67] sm:$0xff]  ;;  %3980 = vst.msk [vmem:[#allocation3 + $0x80] sm:$0xff] %vm3928_vm1, %v3909_v7  ;;  %v3914_v50 = vmax.f32 %v3882_v19, 0.0  ;;  %v3880_v36 = vadd.f32 %v14832_v1, %v3841_v59  ;;  %v3844_v41 = vadd.f32 %v11956_v35, %v3518_v32  ;;  %v15117_v35 = vpop.f32.mrf.mxu1 }
 0x20d   : > { %v4041_v58 = vmul.f32 %v18839_v14, %v15061_v21  ;;  %v4090_v44 = vld [vmem:[#allocation3 + $0x58] sm:$0xff]  ;;  %v3521_v15 = vadd.f32 %v15008_v52, %v3227_v39  ;;  %v3765_v5 = vpop.f32.mrf.mxu0  ;;  %v18841_v45 = vld [vmem:[#allocation33_spill] sm:$0xff]  ;;  %v15103_v32 = vpack.c.bf16 %v4093_v48, %v4092_v61  ;;  %v18844_v59 = vld [vmem:[#allocation100_spill] sm:$0xff] }
 0x20e   : > { %v15096_v22 = vpack.c.bf16 %v4091_v49, %v4090_v44  ;;  %v4043_v10 = vmul.f32 %v18841_v45, %v15088_v8  ;;  %3985 = vst.msk [vmem:[#allocation3 + $0xa8] sm:$0xff] %vm3928_vm1, %v3914_v50  ;;  %v3912_v28 = vmax.f32 %v3880_v36, 0.0  ;;  %v3883_v38 = vadd.f32 %v14832_v1, %v3844_v41  ;;  %v15105_v52 = vld [vmem:[#allocation3 + $0x6f] sm:$0xff]  ;;  %v18843_v7 = vld [vmem:[#allocation87_spill] sm:$0xff]  ;;  %v18845_v49 = vld [vmem:[#allocation64_spill] sm:$0xff] }
 0x20f   : > { %v4068_v30 = vpack.c.bf16 %v15084_v3, %v4041_v58  ;;  %v3842_v53 = vadd.f32 %v3765_v5, %v3516_v27  ;;  %18842 = vst [vmem:[#allocation17_spill] sm:$0xff] %v15103_v32  ;;  %v2900_v19 = vadd.f32 %v18843_v7, %v14924_v57  ;;  %v3228_v47 = vadd.f32 %v18844_v59, %v2902_v33  ;;  %v11959_v16 = vpop.f32.mrf.mxu0  ;;  %v15121_v33 = vld [vmem:[#allocation3 + $0x77] sm:$0xff]  ;;  %v18847_v50 = vld [vmem:[#allocation84_spill] sm:$0xff] }
 0x210   : > { %18840 = vst [vmem:[#allocation12_spill] sm:$0xff] %v15096_v22  ;;  %11980 = vmatmul.mubr.msk.bf16.gmra.mxu1 %vm3928_vm1, %v15096_v22  ;;  %v4069_v29 = vpack.c.bf16 %v15105_v52, %v4043_v10  ;;  %v3519_v39 = vadd.f32 %v15022_v11, %v3225_v42  ;;  %3983 = vst.msk [vmem:[#allocation3 + $0x98] sm:$0xff] %vm3928_vm1, %v3912_v28  ;;  %v3915_v48 = vmax.f32 %v3883_v38, 0.0  ;;  %v18846_v27 = vld [vmem:[#allocation34_spill] sm:$0xff]  ;;  %v18853_v59 = vld [vmem:[#allocation104_spill] sm:$0xff] }
 0x211   : > { %12014 = vmatmul.mubr.msk.bf16.gmra.mxu0 %vm3928_vm1, %v4068_v30  ;;  %v3881_v51 = vadd.f32 %v14832_v1, %v3842_v53  ;;  %v3847_v57 = vadd.f32 %v11959_v16, %v3521_v15  ;;  %11983 = vmatprep.mubr.msk.bf16.mxu1 %vm3928_vm1, %v15103_v32  ;;  %v2578_v58 = vadd.f32 %v18845_v49, %v14921_v62  ;;  %v18848_v11 = vld [vmem:[#allocation14_spill] sm:$0xff]  ;;  %v3778_v30 = vpop.f32.mrf.mxu0  ;;  %v18852_v53 = vld [vmem:[#allocation93_spill] sm:$0xff] }
 0x212   : > { %v2905_v36 = vadd.f32 %v18847_v50, %v18846_v27  ;;  %v18849_v42 = vld [vmem:[#allocation90_spill] sm:$0xff]  ;;  %12017 = vmatprep.mubr.msk.bf16.mxu0 %vm3928_vm1, %v4069_v29  ;;  %v3522_v15 = vadd.f32 %v15034_v31, %v3228_v47  ;;  %3986 = vst.msk [vmem:[#allocation3 + $0xb0] sm:$0xff] %vm3928_vm1, %v3915_v48  ;;  %v3845_v28 = vadd.f32 %v3778_v30, %v3519_v39  ;;  %v18854_v49 = vld [vmem:[#allocation105_spill] sm:$0xff] }
 0x213   : > { %v2903_v41 = vadd.f32 %v18849_v42, %v18848_v11  ;;  %v18850_v44 = vld [vmem:[#allocation102_spill] sm:$0xff]  ;;  %v3913_v61 = vmax.f32 %v3881_v51, 0.0  ;;  %v3886_v10 = vadd.f32 %v14832_v1, %v3847_v57  ;;  %v4095_v50 = vld [vmem:[#allocation3 + $0x80] sm:$0xff]  ;;  %v18855_v31 = vld [vmem:[#allocation37_spill] sm:$0xff]  ;;  %v11933_v57 = vpop.f32.mrf.mxu1 }
 0x214   : > { %v3226_v5 = vadd.f32 %v18850_v44, %v2900_v19  ;;  %v4097_v62 = vld [vmem:[#allocation3 + $0x90] sm:$0xff]  ;;  %v3231_v16 = vadd.f32 %v18853_v59, %v2905_v36  ;;  %v11960_v19 = vpop.f32.mrf.mxu0  ;;  %v15138_v29 = vld [vmem:[#allocation3 + $0x7f] sm:$0xff]  ;;  %v4045_v47 = vmul.f32 %v18855_v31, %v15121_v33  ;;  %v15142_v48 = vld [vmem:[#allocation3 + $0x87] sm:$0xff]  ;;  %v3884_v11 = vadd.f32 %v14832_v1, %v3845_v28 }
 0x215   : > { %v18851_v38 = vld [vmem:[#allocation18_spill] sm:$0xff]  ;;  %v3229_v27 = vadd.f32 %v18854_v49, %v2903_v41  ;;  %3984 = vst.msk [vmem:[#allocation3 + $0xa0] sm:$0xff] %vm3928_vm1, %v3913_v61  ;;  %v3918_v39 = vmax.f32 %v3886_v10, 0.0  ;;  %v3848_v36 = vadd.f32 %v11960_v19, %v3522_v15  ;;  %v18857_v59 = vld [vmem:[#allocation40_spill] sm:$0xff] }
 0x216   : > { %v2906_v7 = vadd.f32 %v18852_v53, %v18851_v38  ;;  %v3520_v51 = vadd.f32 %v15050_v54, %v3226_v5  ;;  %v4094_v42 = vld [vmem:[#allocation3 + $0x78] sm:$0xff]  ;;  %v3525_v41 = vadd.f32 %v15072_v23, %v3231_v16  ;;  %v3781_v44 = vpop.f32.mrf.mxu0  ;;  %v4070_v38 = vpack.c.bf16 %v15138_v29, %v4045_v47  ;;  %v4096_v53 = vld [vmem:[#allocation3 + $0x88] sm:$0xff] }
 0x217   : > { %v15148_v30 = vpack.c.bf16 %v4095_v50, %v4094_v42  ;;  %v4047_v49 = vmul.f32 %v18857_v59, %v15142_v48  ;;  %3989 = vst.msk [vmem:[#allocation3 + $0xc8] sm:$0xff] %vm3928_vm1, %v3918_v39  ;;  %v3916_v54 = vmax.f32 %v3884_v11, 0.0  ;;  %v3887_v5 = vadd.f32 %v14832_v1, %v3848_v36  ;;  %v15157_v15 = vld [vmem:[#allocation3 + $0x8f] sm:$0xff]  ;;  %v18860_v23 = vld [vmem:[#allocation95_spill] sm:$0xff] }
 0x218   : > { %v3846_v61 = vadd.f32 %v3781_v44, %v3520_v51  ;;  %v15155_v10 = vpack.c.bf16 %v4097_v62, %v4096_v53  ;;  %18859 = vst [vmem:[#allocation73_spill] sm:$0xff] %v15157_v15  ;;  %v2904_v28 = vadd.f32 %v18860_v23, %v2578_v58  ;;  %v18861_v16 = vld [vmem:[#allocation106_spill] sm:$0xff]  ;;  %v11963_v50 = vpop.f32.mrf.mxu0  ;;  %v3523_v39 = vadd.f32 %v15082_v6, %v3229_v27  ;;  %v3484_v62 = vpop.f32.mrf.mxu1  ;;  %v18863_v44 = vld [vmem:[#allocation35_spill] sm:$0xff]  ;;  %v4100_v32 = vld [vmem:[#allocation3 + $0xa8] sm:$0xff] }
 0x219   : > { %18856 = vst [vmem:[#allocation28_spill] sm:$0xff] %v15148_v30  ;;  %v3232_v19 = vadd.f32 %v18861_v16, %v2906_v7  ;;  %11984 = vmatmul.mubr.msk.bf16.gmra.mxu1 %vm3928_vm1, %v15148_v30  ;;  %12018 = vmatmul.mubr.msk.bf16.gmra.mxu0 %vm3928_vm1, %v4070_v38  ;;  %v4071_v47 = vpack.c.bf16 %v15157_v15, %v4047_v49  ;;  %3987 = vst.msk [vmem:[#allocation3 + $0xb8] sm:$0xff] %vm3928_vm1, %v3916_v54  ;;  %v3919_v51 = vmax.f32 %v3887_v5, 0.0  ;;  %v15170_v58 = vld [vmem:[#allocation3 + $0x97] sm:$0xff]  ;;  %v18864_v38 = vld [vmem:[#allocation97_spill] sm:$0xff] }
 0x21a   : > { %18858 = vst [vmem:[#allocation53_spill] sm:$0xff] %v15155_v10  ;;  %v3885_v11 = vadd.f32 %v14832_v1, %v3846_v61  ;;  %v3851_v36 = vadd.f32 %v11963_v50, %v3525_v41  ;;  %11987 = vmatprep.mubr.msk.bf16.mxu1 %vm3928_vm1, %v15155_v10  ;;  %v18862_v7 = vld [vmem:[#allocation67_spill] sm:$0xff]  ;;  %v2909_v53 = vadd.f32 %v18864_v38, %v18863_v44  ;;  %v18865_v49 = vld [vmem:[#allocation65_spill] sm:$0xff]  ;;  %v3794_v5 = vpop.f32.mrf.mxu0  ;;  %v18870_v30 = vld [vmem:[#allocation108_spill] sm:$0xff] }
 0x21b   : > { %v2582_v42 = vadd.f32 %v18862_v7, %v15065_v63  ;;  %v18866_v6 = vld [vmem:[#allocation99_spill] sm:$0xff]  ;;  %12021 = vmatprep.mubr.msk.bf16.mxu0 %vm3928_vm1, %v4071_v47  ;;  %v3526_v41 = vadd.f32 %v15094_v18, %v3232_v19  ;;  %3990 = vst.msk [vmem:[#allocation3 + $0xd0] sm:$0xff] %vm3928_vm1, %v3919_v51  ;;  %v3849_v50 = vadd.f32 %v3794_v5, %v3523_v39  ;;  %v4101_v7 = vld [vmem:[#allocation3 + $0xb0] sm:$0xff] }
 0x21c   : > { %v2907_v27 = vadd.f32 %v18866_v6, %v18865_v49  ;;  %v18867_v54 = vld [vmem:[#allocation107_spill] sm:$0xff]  ;;  %v3917_v61 = vmax.f32 %v3885_v11, 0.0  ;;  %v3890_v16 = vadd.f32 %v14832_v1, %v3851_v36  ;;  %v18869_v44 = vld [vmem:[#allocation101_spill] sm:$0xff]  ;;  %v3235_v49 = vadd.f32 %v18870_v30, %v2909_v53  ;;  %v11964_v6 = vpop.f32.mrf.mxu0  ;;  %v11934_v11 = vpop.f32.mrf.mxu1  ;;  %v18875_v22 = vld [vmem:[#allocation50_spill] sm:$0xff] }
 0x21d   : > { %v3230_v23 = vadd.f32 %v18867_v54, %v2904_v28  ;;  %v4098_v63 = vld [vmem:[#allocation3 + $0x98] sm:$0xff]  ;;  %v4099_v47 = vld [vmem:[#allocation3 + $0xa0] sm:$0xff]  ;;  %v3888_v36 = vadd.f32 %v14832_v1, %v3849_v50  ;;  %v18874_v30 = vld [vmem:[#allocation109_spill] sm:$0xff]  ;;  %v15203_v50 = vpack.c.bf16 %v4101_v7, %v4100_v32 }
 0x21e   : > { %v18868_v10 = vld [vmem:[#allocation47_spill] sm:$0xff]  ;;  %v15191_v51 = vld [vmem:[#allocation3 + $0xa7] sm:$0xff]  ;;  %3988 = vst.msk [vmem:[#allocation3 + $0xc0] sm:$0xff] %vm3928_vm1, %v3917_v61  ;;  %v3922_v39 = vmax.f32 %v3890_v16, 0.0  ;;  %v15195_v5 = vpack.c.bf16 %v4099_v47, %v4098_v63  ;;  %v3529_v53 = vadd.f32 %v11933_v57, %v3235_v49  ;;  %v18879_v57 = vld [vmem:[#allocation110_spill] sm:$0xff] }
 0x21f   : > { %v2910_v38 = vadd.f32 %v18869_v44, %v18868_v10  ;;  %v3524_v28 = vadd.f32 %v15117_v35, %v3230_v23  ;;  %v15187_v54 = vld [vmem:[#allocation3 + $0x9f] sm:$0xff]  ;;  %v3852_v10 = vadd.f32 %v11964_v6, %v3526_v41  ;;  %v3233_v35 = vadd.f32 %v18874_v30, %v2907_v27  ;;  %v3797_v23 = vpop.f32.mrf.mxu0  ;;  %18876 = vst [vmem:[#allocation68_spill] sm:$0xff] %v15203_v50  ;;  %v15205_v41 = vld [vmem:[#allocation3 + $0xaf] sm:$0xff] }
 0x220   : > { %18871 = vst [vmem:[#allocation23_spill] sm:$0xff] %v15187_v54  ;;  %v18872_v18 = vld [vmem:[#allocation43_spill] sm:$0xff]  ;;  %18873 = vst [vmem:[#allocation13_spill] sm:$0xff] %v15195_v5  ;;  %v4051_v40 = vmul.f32 %v18875_v22, %v15191_v51  ;;  %v3920_v9 = vmax.f32 %v3888_v36, 0.0 }
 0x221   : > { %v4049_v19 = vmul.f32 %v18872_v18, %v15170_v58  ;;  %3993 = vst.msk [vmem:[#allocation3 + $0xe8] sm:$0xff] %vm3928_vm1, %v3922_v39  ;;  %v3891_v61 = vadd.f32 %v14832_v1, %v3852_v10  ;;  %v3850_v16 = vadd.f32 %v3797_v23, %v3524_v28  ;;  %18877 = vst [vmem:[#allocation74_spill] sm:$0xff] %v15205_v41  ;;  %v18878_v63 = vld [vmem:[#allocation103_spill] sm:$0xff]  ;;  %11988 = vmatmul.mubr.msk.bf16.gmra.mxu1 %vm3928_vm1, %v15195_v5  ;;  %v11967_v6 = vpop.f32.mrf.mxu0  ;;  %v3487_v39 = vpop.f32.mrf.mxu1  ;;  %v15335_v5 = vld [vmem:[#allocation3 + $0x29] sm:$0xff] }
 0x222   : > { %v2908_v27 = vadd.f32 %v18878_v63, %v2582_v42  ;;  %v3236_v49 = vadd.f32 %v18879_v57, %v2910_v38  ;;  %v4073_v47 = vpack.c.bf16 %v15205_v41, %v4051_v40  ;;  %3991 = vst.msk [vmem:[#allocation3 + $0xd8] sm:$0xff] %vm3928_vm1, %v3920_v9  ;;  %v3855_v28 = vadd.f32 %v11967_v6, %v3529_v53  ;;  %v15217_v42 = vld [vmem:[#allocation3 + $0xb7] sm:$0xff] }
 0x223   : > { %v4072_v44 = vpack.c.bf16 %v15187_v54, %v4049_v19  ;;  %v3527_v19 = vadd.f32 %v3484_v62, %v3233_v35  ;;  %v3923_v32 = vmax.f32 %v3891_v61, 0.0  ;;  %v3889_v7 = vadd.f32 %v14832_v1, %v3850_v16  ;;  %11991 = vmatprep.mubr.msk.bf16.mxu1 %vm3928_vm1, %v15203_v50  ;;  %v3810_v36 = vpop.f32.mrf.mxu0  ;;  %v4102_v30 = vld [vmem:[#allocation3 + $0xb8] sm:$0xff]  ;;  %v4105_v35 = vld [vmem:[#allocation3 + $0xd0] sm:$0xff]  ;;  %v15290_v50 = vld [vmem:[#allocation3 + $0x21] sm:$0xff] }
 0x224   : > { %v3234_v38 = vadd.f32 %v14818_v2, %v2908_v27  ;;  %v3530_v10 = vadd.f32 %v11934_v11, %v3236_v49  ;;  %v3894_v9 = vadd.f32 %v14832_v1, %v3855_v28  ;;  %v18881_v16 = vld [vmem:[#allocation57_spill] sm:$0xff] }
 0x225   : > { %12022 = vmatmul.mubr.msk.bf16.gmra.mxu0 %vm3928_vm1, %v4072_v44  ;;  %3994 = vst.msk [vmem:[#allocation3 + $0xf0] sm:$0xff] %vm3928_vm1, %v3923_v32  ;;  %v3921_v40 = vmax.f32 %v3889_v7, 0.0  ;;  %v3853_v62 = vadd.f32 %v3810_v36, %v3527_v19  ;;  %v11968_v23 = vpop.f32.mrf.mxu0  ;;  %v4103_v44 = vld [vmem:[#allocation3 + $0xc0] sm:$0xff]  ;;  %v4053_v2 = vmul.f32 %v18881_v16, %v15217_v42  ;;  %v4104_v19 = vld [vmem:[#allocation3 + $0xc8] sm:$0xff] }
 0x226   : > { %12025 = vmatprep.mubr.msk.bf16.mxu0 %vm3928_vm1, %v4073_v47  ;;  %v3528_v53 = vadd.f32 %v3487_v39, %v3234_v38  ;;  %v15223_v61 = vld [vmem:[#allocation3 + $0xbf] sm:$0xff]  ;;  %v15227_v63 = vld [vmem:[#allocation3 + $0xc7] sm:$0xff]  ;;  %v3926_v11 = vmax.f32 %v3894_v9, 0.0  ;;  %v3856_v57 = vadd.f32 %v11968_v23, %v3530_v10  ;;  %v15231_v49 = vpack.c.bf16 %v4103_v44, %v4102_v30 }
 0x227   : > { %18880 = vst [vmem:[#allocation8_spill] sm:$0xff] %v15223_v61  ;;  %3992 = vst.msk [vmem:[#allocation3 + $0xe0] sm:$0xff] %vm3928_vm1, %v3921_v40  ;;  %v3892_v27 = vadd.f32 %v14832_v1, %v3853_v62  ;;  %v3813_v6 = vpop.f32.mrf.mxu0  ;;  %v4074_v47 = vpack.c.bf16 %v15223_v61, %v4053_v2  ;;  %v18883_v39 = vld [vmem:[#allocation61_spill] sm:$0xff]  ;;  %v15238_v36 = vpack.c.bf16 %v4105_v35, %v4104_v19  ;;  %v18885_v23 = vld [vmem:[#allocation83_spill] sm:$0xff] }
 0x228   : > { %18882 = vst [vmem:[#allocation55_spill] sm:$0xff] %v15231_v49  ;;  %v4055_v32 = vmul.f32 %v18883_v39, %v15227_v63  ;;  %3997 = vst.msk [vmem:[#allocation3 + $0x108] sm:$0xff] %vm3928_vm1, %v3926_v11  ;;  %v3895_v28 = vadd.f32 %v14832_v1, %v3856_v57  ;;  %v3854_v38 = vadd.f32 %v3813_v6, %v3528_v53  ;;  %v15240_v40 = vld [vmem:[#allocation3 + $0xcf] sm:$0xff] }
 0x229   : > { %v3924_v7 = vmax.f32 %v3892_v27, 0.0  ;;  %18884 = vst [vmem:[#allocation46_spill] sm:$0xff] %v15238_v36  ;;  %11992 = vmatmul.mubr.msk.bf16.gmra.mxu1 %vm3928_vm1, %v15231_v49  ;;  %v15246_v9 = vld [vmem:[#allocation3 + $0xd7] sm:$0xff] }
 0x22a   : > { %v4075_v10 = vpack.c.bf16 %v15240_v40, %v4055_v32  ;;  %v3927_v62 = vmax.f32 %v3895_v28, 0.0  ;;  %v3893_v30 = vadd.f32 %v14832_v1, %v3854_v38  ;;  %11995 = vmatprep.mubr.msk.bf16.mxu1 %vm3928_vm1, %v15238_v36  ;;  %v4106_v53 = vld [vmem:[#allocation3 + $0xd8] sm:$0xff]  ;;  %v4057_v44 = vmul.f32 %v18885_v23, %v15246_v9  ;;  %v4108_v32 = vld [vmem:[#allocation3 + $0xe8] sm:$0xff] }
 0x22b   : > { %3995 = vst.msk [vmem:[#allocation3 + $0xf8] sm:$0xff] %vm3928_vm1, %v3924_v7  ;;  %v18892_v36 = vld [vmem:[#allocation15_spill] sm:$0xff] }
 0x22c   : > { %3998 = vst.msk [vmem:[#allocation3 + $0x110] sm:$0xff] %vm3928_vm1, %v3927_v62  ;;  %v3925_v35 = vmax.f32 %v3893_v30, 0.0  ;;  %v4109_v2 = vld [vmem:[#allocation3 + $0xf0] sm:$0xff]  ;;  %v18889_v30 = vld [vmem:[#allocation92_spill] sm:$0xff]  ;;  %v4913_v49 = vmul.f32 %v18892_v36, %v14933_v12  ;;  %v4915_v12 = vmul.f32 %v18808_v26, %v14955_v17  ;;  %v15327_v26 = vmul.f32 %v18872_v18, %v15217_v42 }
 0x22d   : > { %12026 = vmatmul.mubr.msk.bf16.gmra.mxu0 %vm3928_vm1, %v4074_v47  ;;  %v18887_v47 = vld [vmem:[#allocation85_spill] sm:$0xff]  ;;  %v15268_v28 = vpack.c.bf16 %v4109_v2, %v4108_v32  ;;  %v15331_v36 = vmul.f32 %v18875_v22, %v15227_v63  ;;  %v4917_v17 = vmul.f32 %v18810_v13, %v15001_v43 }
 0x22e   : > { %12029 = vmatprep.mubr.msk.bf16.mxu0 %vm3928_vm1, %v4075_v10  ;;  %v4107_v11 = vld [vmem:[#allocation3 + $0xe0] sm:$0xff]  ;;  %3996 = vst.msk [vmem:[#allocation3 + $0x100] sm:$0xff] %vm3928_vm1, %v3925_v35  ;;  %v15266_v7 = vld [vmem:[#allocation3 + $0xef] sm:$0xff]  ;;  %18898 = vst [vmem:[#allocation72_spill] sm:$0xff] %v15327_v26 }
 0x22f   : > { %v15256_v27 = vld [vmem:[#allocation3 + $0xdf] sm:$0xff]  ;;  %v15258_v57 = vld [vmem:[#allocation3 + $0xe7] sm:$0xff]  ;;  %v15261_v1 = vpack.c.bf16 %v4107_v11, %v4106_v53  ;;  %18888 = vst [vmem:[#allocation9_spill] sm:$0xff] %v15268_v28  ;;  %v4556_v62 = vld [vmem:[#allocation3 + $0x11] sm:$0xff]  ;;  %v4947_v43 = vpack.c.bf16 %v15024_v4, %v4917_v17 }
 0x230   : > { %v4076_v6 = vpack.c.bf16 %v15256_v27, %v4057_v44  ;;  %v4059_v19 = vmul.f32 %v18887_v47, %v15258_v57  ;;  %v4555_v53 = vld [vmem:[#allocation3 + $0x9] sm:$0xff]  ;;  %v18890_v44 = vld [vmem:[#allocation26_spill] sm:$0xff]  ;;  %18899 = vst [vmem:[#allocation70_spill] sm:$0xff] %v15331_v36 }
 0x231   : > { %18886 = vst [vmem:[#allocation69_spill] sm:$0xff] %v15261_v1  ;;  %11996 = vmatmul.mubr.msk.bf16.gmra.mxu1 %vm3928_vm1, %v15261_v1  ;;  %v4588_v2 = vmul.f32 %v18890_v44, %v4556_v62  ;;  %v15295_v62 = vld [vmem:[#allocation3 + $0x31] sm:$0xff]  ;;  %v18901_v4 = vld [vmem:[#allocation36_spill] sm:$0xff] }
 0x232   : > { %v4077_v38 = vpack.c.bf16 %v15266_v7, %v4059_v19  ;;  %v15274_v10 = vld [vmem:[#allocation3 + $0xf7] sm:$0xff]  ;;  %11999 = vmatprep.mubr.msk.bf16.mxu1 %vm3928_vm1, %v15268_v28  ;;  %v4594_v17 = vmul.f32 %v18901_v4, %v15344_v55  ;;  %v15393_v36 = vld [vmem:[#allocation3 + $0x49] sm:$0xff] }
 0x233   : > { %v4061_v35 = vmul.f32 %v18889_v30, %v15274_v10  ;;  %v4110_v11 = vld [vmem:[#allocation3 + $0xf8] sm:$0xff]  ;;  %v4619_v28 = vpack.c.bf16 %v4588_v2, %v4555_v53  ;;  %v15307_v53 = vmul.f32 %v18841_v45, %v15142_v48  ;;  %v15311_v2 = vmul.f32 %v18855_v31, %v15170_v58 }
 0x234   : > { %v15399_v13 = vld [vmem:[#allocation3 + $0x111] sm:$0xff] }
 0x235   : > { %12030 = vmatmul.mubr.msk.bf16.gmra.mxu0 %vm3928_vm1, %v4076_v6  ;;  %v4111_v19 = vld [vmem:[#allocation3 + $0x100] sm:$0xff]  ;;  %18895 = vst [vmem:[#allocation77_spill] sm:$0xff] %v15307_v53  ;;  %18896 = vst [vmem:[#allocation41_spill] sm:$0xff] %v15311_v2 }
 0x236   : > { %12033 = vmatprep.mubr.msk.bf16.mxu0 %vm3928_vm1, %v4077_v38  ;;  %v15282_v32 = vld [vmem:[#allocation3 + $0xff] sm:$0xff]  ;;  %v15284_v1 = vpack.c.bf16 %v4111_v19, %v4110_v11  ;;  %v4945_v38 = vpack.c.bf16 %v14951_v24, %v4913_v49  ;;  %v15317_v19 = vmul.f32 %v18857_v59, %v15191_v51  ;;  %v15339_v53 = vld [vmem:[#allocation3 + $0x107] sm:$0xff]  ;;  %18903 = vst [vmem:[#allocation16_spill] sm:$0xff] %v15399_v13 }
 0x237   : > { %v4078_v6 = vpack.c.bf16 %v15282_v32, %v4061_v35  ;;  %v18893_v35 = vld [vmem:[#allocation29_spill] sm:$0xff]  ;;  %v18894_v24 = vld [vmem:[#allocation32_spill] sm:$0xff] }
 0x238   : > { %18891 = vst [vmem:[#allocation71_spill] sm:$0xff] %v15284_v1  ;;  %v4590_v11 = vmul.f32 %v18893_v35, %v15290_v50  ;;  %v4592_v49 = vmul.f32 %v18894_v24, %v15295_v62  ;;  %18897 = vst [vmem:[#allocation79_spill] sm:$0xff] %v15317_v19  ;;  %v5632_v24 = vsel %vm4178_vm0, %v14993_v0, 0  ;;  %v15365_v0 = vld [vmem:[%s18173_s3 + $0x1c] sm:$0xf] }
 0x239   : > { %12000 = vmatmul.mubr.msk.bf16.gmra.mxu1 %vm3928_vm1, %v15284_v1  ;;  %v4946_v1 = vpack.c.bf16 %v14974_v37, %v4915_v12  ;;  %v15355_v12 = vld [vmem:[#allocation3 + $0x51] sm:$0xff]  ;;  %v18902_v37 = vld [vmem:[#allocation39_spill] sm:$0xff] }
 0x23a   : > { %12039 = vmatprep.mubr.msk.bf16.mxu1 %vm3928_vm1, %v4619_v28  ;;  %v5306_v28 = vsel %vm4178_vm0, %v14988_v56, 0  ;;  %v4621_v2 = vpack.c.bf16 %v4592_v49, %v15335_v5  ;;  %v15360_v49 = vld [vmem:[%s18173_s3 + $0x18] sm:$0xf] }
 0x23d   : > { %12034 = vmatmul.mubr.msk.bf16.gmra.mxu0 %vm3928_vm1, %v4078_v6  ;;  %v15319_v6 = vld [vmem:[#allocation3 + $0x19] sm:$0xff] }
 0x23e   : > { %12073 = vmatprep.mubr.msk.bf16.mxu0 %vm3928_vm1, %v4945_v38  ;;  %v4620_v56 = vpack.c.bf16 %v4590_v11, %v15319_v6  ;;  %v15377_v11 = vld [vmem:[#allocation3 + $0x10f] sm:$0xff] }
 0x241   : > { %12040 = vmatmul.mubr.msk.bf16.vlgmr.msra.gmra.mxu1 %vm3928_vm1, %v4620_v56  ;;  %v4919_v56 = vmul.f32 %v18823_v20, %v15028_v34  ;;  %v4921_v34 = vmul.f32 %v18825_v46, %v15061_v21  ;;  %v15397_v20 = vld [vmem:[#allocation3 + $0x61] sm:$0xff] }
 0x242   : > { %12106 = vmatpush3.bf16.msra.mxu1 %v5306_v28  ;;  %12043 = vmatprep.mubr.msk.bf16.mxu1 %vm3928_vm1, %v4621_v2  ;;  %v4596_v28 = vmul.f32 %v18902_v37, %v15355_v12  ;;  %v15403_v2 = vld [vmem:[#allocation3 + $0x71] sm:$0xff] }
 0x243   : > { %12605 = vmatprep.subr.msk.bf16.mxu1 %vm4178_vm0, %v15360_v49  ;;  %v4949_v19 = vpack.c.bf16 %v15084_v3, %v4921_v34  ;;  %v4923_v3 = vmul.f32 %v18839_v14, %v15088_v8  ;;  %v15417_v34 = vld [vmem:[#allocation3 + $0x109] sm:$0xff] }
 0x244   : > { %v4623_v26 = vpack.c.bf16 %v4596_v28, %v15393_v36  ;;  %v15427_v14 = vld [vmem:[#allocation3 + $0x69] sm:$0xff] }
 0x245   : > { %12074 = vmatmul.mubr.msk.bf16.vlgmr.msra.gmra.mxu0 %vm3928_vm1, %v4946_v1  ;;  %v15370_v1 = vmul.f32 %v18887_v47, %v15339_v53  ;;  %v4950_v8 = vpack.c.bf16 %v15105_v52, %v4923_v3  ;;  %v18908_v52 = vld [vmem:[#allocation52_spill] sm:$0xff] }
 0x246   : > { %12077 = vmatprep.mubr.msk.bf16.mxu0 %vm3928_vm1, %v4947_v43  ;;  %12140 = vmatpush3.bf16.msra.mxu0 %v5632_v24  ;;  %v15387_v43 = vld [vmem:[#allocation3 + $0x39] sm:$0xff]  ;;  %v4948_v24 = vpack.c.bf16 %v15045_v60, %v4919_v56 }
 0x247   : > { %18900 = vst [vmem:[#allocation54_spill] sm:$0xff] %v15370_v1  ;;  %12606 = vmatprep.subr.msk.bf16.mxu0 %vm4178_vm0, %v15365_v0  ;;  %v4622_v38 = vpack.c.bf16 %v4594_v17, %v15387_v43  ;;  %v18904_v60 = vld [vmem:[#allocation42_spill] sm:$0xff]  ;;  %v18905_v17 = vld [vmem:[#allocation20_spill] sm:$0xff] }
 0x248   : > { %v4598_v21 = vmul.f32 %v18904_v60, %v15397_v20  ;;  %v15413_v56 = vmul.f32 %v18905_v17, %v15399_v13 }
 0x249   : > { %12044 = vmatmul.mubr.msk.bf16.gmra.mxu1 %vm3928_vm1, %v4622_v38  ;;  %v18907_v38 = vld [vmem:[#allocation48_spill] sm:$0xff] }
 0x24a   : > { %12047 = vmatprep.mubr.msk.bf16.mxu1 %vm3928_vm1, %v4623_v26  ;;  %18906 = vst [vmem:[#allocation58_spill] sm:$0xff] %v15413_v56  ;;  %v4600_v28 = vmul.f32 %v18907_v38, %v15403_v2  ;;  %v15431_v38 = vld [vmem:[#allocation3 + $0x81] sm:$0xff]  ;;  %v15435_v26 = vld [vmem:[#allocation3 + $0x91] sm:$0xff] }
 0x24b   : > { %v15455_v56 = vld [vmem:[#allocation3 + $0xa1] sm:$0xff] }
 0x24c   : > { %v4625_v46 = vpack.c.bf16 %v4600_v28, %v15427_v14  ;;  %v15445_v28 = vld [vmem:[#allocation3 + $0x79] sm:$0xff] }
 0x24d   : > { %12078 = vmatmul.mubr.msk.bf16.gmra.mxu0 %vm3928_vm1, %v4948_v24  ;;  %v15421_v24 = vld [vmem:[#allocation3 + $0x59] sm:$0xff] }
 0x24e   : > { %12081 = vmatprep.mubr.msk.bf16.mxu0 %vm3928_vm1, %v4949_v19  ;;  %v4925_v19 = vmul.f32 %v18841_v45, %v15121_v33  ;;  %v4624_v1 = vpack.c.bf16 %v4598_v21, %v15421_v24  ;;  %v4602_v33 = vmul.f32 %v18908_v52, %v15431_v38  ;;  %v4927_v21 = vmul.f32 %v18855_v31, %v15142_v48  ;;  %v15459_v48 = vld [vmem:[#allocation3 + $0xb1] sm:$0xff]  ;;  %v15475_v31 = vld [vmem:[#allocation3 + $0xa9] sm:$0xff] }
 0x250   : > { %v4951_v13 = vpack.c.bf16 %v15138_v29, %v4925_v19  ;;  %v18909_v29 = vld [vmem:[#allocation60_spill] sm:$0xff]  ;;  %v4626_v19 = vpack.c.bf16 %v4602_v33, %v15445_v28 }
 0x251   : > { %12048 = vmatmul.mubr.msk.bf16.gmra.mxu1 %vm3928_vm1, %v4624_v1  ;;  %v4604_v3 = vmul.f32 %v18909_v29, %v15435_v26  ;;  %v4929_v1 = vmul.f32 %v18857_v59, %v15170_v58  ;;  %v18910_v58 = vld [vmem:[#allocation63_spill] sm:$0xff] }
 0x252   : > { %12051 = vmatprep.mubr.msk.bf16.mxu1 %vm3928_vm1, %v4625_v46  ;;  %v4952_v46 = vpack.c.bf16 %v15157_v15, %v4927_v21  ;;  %v4606_v33 = vmul.f32 %v18910_v58, %v15455_v56  ;;  %v4931_v21 = vmul.f32 %v18872_v18, %v15191_v51  ;;  %v15469_v59 = vld [vmem:[#allocation3 + $0x99] sm:$0xff]  ;;  %v15479_v15 = vld [vmem:[#allocation3 + $0xc1] sm:$0xff]  ;;  %v15483_v51 = vld [vmem:[#allocation3 + $0xd1] sm:$0xff] }
 0x253   : > { %v4953_v45 = vpack.c.bf16 %v15187_v54, %v4929_v1  ;;  %v15499_v18 = vld [vmem:[#allocation3 + $0xc9] sm:$0xff] }
 0x255   : > { %12082 = vmatmul.mubr.msk.bf16.gmra.mxu0 %vm3928_vm1, %v4950_v8  ;;  %v15451_v8 = vld [vmem:[#allocation3 + $0x89] sm:$0xff] }
 0x256   : > { %12085 = vmatprep.mubr.msk.bf16.mxu0 %vm3928_vm1, %v4951_v13  ;;  %v4627_v13 = vpack.c.bf16 %v4604_v3, %v15451_v8  ;;  %v18911_v3 = vld [vmem:[#allocation44_spill] sm:$0xff] }
 0x257   : > { %v4608_v1 = vmul.f32 %v18911_v3, %v15459_v48 }
 0x259   : > { %12052 = vmatmul.mubr.msk.bf16.gmra.mxu1 %vm3928_vm1, %v4626_v19  ;;  %v4933_v19 = vmul.f32 %v18875_v22, %v15217_v42  ;;  %v18912_v42 = vld [vmem:[#allocation49_spill] sm:$0xff]  ;;  %v15493_v22 = vld [vmem:[#allocation3 + $0xb9] sm:$0xff] }
 0x25a   : > { %12055 = vmatprep.mubr.msk.bf16.mxu1 %vm3928_vm1, %v4627_v13  ;;  %v4954_v13 = vpack.c.bf16 %v15205_v41, %v4931_v21  ;;  %v4935_v21 = vmul.f32 %v18881_v16, %v15227_v63  ;;  %v15503_v41 = vld [vmem:[#allocation3 + $0xe1] sm:$0xff]  ;;  %v15507_v63 = vld [vmem:[#allocation3 + $0xf1] sm:$0xff] }
 0x25b   : > { %v4955_v54 = vpack.c.bf16 %v15223_v61, %v4933_v19 }
 0x25d   : > { %12086 = vmatmul.mubr.msk.bf16.gmra.mxu0 %vm3928_vm1, %v4952_v46  ;;  %v4628_v46 = vpack.c.bf16 %v4606_v33, %v15469_v59  ;;  %v4610_v33 = vmul.f32 %v18912_v42, %v15479_v15 }
 0x25e   : > { %12089 = vmatprep.mubr.msk.bf16.mxu0 %vm3928_vm1, %v4953_v45  ;;  %v4629_v45 = vpack.c.bf16 %v4608_v1, %v15475_v31  ;;  %v18913_v1 = vld [vmem:[#allocation86_spill] sm:$0xff] }
 0x25f   : > { %v4612_v19 = vmul.f32 %v18913_v1, %v15483_v51 }
 0x261   : > { %12056 = vmatmul.mubr.msk.bf16.gmra.mxu1 %vm3928_vm1, %v4628_v46  ;;  %v4937_v46 = vmul.f32 %v18883_v39, %v15246_v9  ;;  %v18914_v9 = vld [vmem:[#allocation88_spill] sm:$0xff] }
 0x262   : > { %12059 = vmatprep.mubr.msk.bf16.mxu1 %vm3928_vm1, %v4629_v45  ;;  %v4956_v45 = vpack.c.bf16 %v15240_v40, %v4935_v21  ;;  %v4939_v21 = vmul.f32 %v18885_v23, %v15258_v57  ;;  %v15527_v39 = vld [vmem:[#allocation3 + $0x101] sm:$0xff]  ;;  %v18915_v57 = vld [vmem:[#allocation22_spill] sm:$0xff] }
 0x263   : > { %v4957_v61 = vpack.c.bf16 %v15256_v27, %v4937_v46  ;;  %v4616_v27 = vmul.f32 %v18905_v17, %v15507_v63  ;;  %v4941_v46 = vmul.f32 %v18887_v47, %v15274_v10  ;;  %v4618_v10 = vmul.f32 %v18915_v57, %v15527_v39 }
 0x265   : > { %12090 = vmatmul.mubr.msk.bf16.gmra.mxu0 %vm3928_vm1, %v4954_v13  ;;  %v4630_v13 = vpack.c.bf16 %v4610_v33, %v15493_v22  ;;  %v4614_v33 = vmul.f32 %v18914_v9, %v15503_v41  ;;  %v4959_v16 = vpack.c.bf16 %v15282_v32, %v4941_v46  ;;  %v15539_v32 = vld [vmem:[#allocation3 + $0xf9] sm:$0xff] }
 0x266   : > { %12093 = vmatprep.mubr.msk.bf16.mxu0 %vm3928_vm1, %v4955_v54  ;;  %v4631_v54 = vpack.c.bf16 %v4612_v19, %v15499_v18  ;;  %v15517_v19 = vld [vmem:[#allocation3 + $0xd9] sm:$0xff] }
 0x269   : > { %12060 = vmatmul.mubr.msk.bf16.gmra.mxu1 %vm3928_vm1, %v4630_v13  ;;  %v4632_v13 = vpack.c.bf16 %v4614_v33, %v15517_v19  ;;  %v5534_v33 = vmul.f32 %v18890_v44, %v15290_v50  ;;  %v5536_v50 = vmul.f32 %v18893_v35, %v15295_v62  ;;  %v15565_v62 = vld [vmem:[%s18173_s3 + $0x20] sm:$0xf] }
 0x26a   : > { %12063 = vmatprep.mubr.msk.bf16.mxu1 %vm3928_vm1, %v4631_v54  ;;  %v15523_v54 = vld [vmem:[#allocation3 + $0xe9] sm:$0xff] }
 0x26b   : > { %v5565_v46 = vpack.c.bf16 %v5534_v33, %v15319_v6  ;;  %v5958_v6 = vsel %vm4178_vm0, %v15360_v49, 0  ;;  %v5542_v49 = vmul.f32 %v18902_v37, %v15397_v20  ;;  %v5544_v20 = vmul.f32 %v18904_v60, %v15403_v2 }
 0x26c   : > { %v5548_v2 = vmul.f32 %v18908_v52, %v15435_v26  ;;  %v5552_v26 = vmul.f32 %v18910_v58, %v15459_v48  ;;  %v5556_v48 = vmul.f32 %v18912_v42, %v15483_v51  ;;  %v5560_v51 = vmul.f32 %v18914_v9, %v15507_v63 }
 0x26d   : > { %12094 = vmatmul.mubr.msk.bf16.gmra.mxu0 %vm3928_vm1, %v4956_v45  ;;  %v4958_v45 = vpack.c.bf16 %v15266_v7, %v4939_v21  ;;  %v4943_v7 = vmul.f32 %v18889_v30, %v15339_v53  ;;  %v4634_v21 = vpack.c.bf16 %v4618_v10, %v15539_v32  ;;  %v18919_v10 = vld [vmem:[#allocation11_spill] sm:$0xff] }
 0x26e   : > { %12097 = vmatprep.mubr.msk.bf16.mxu0 %vm3928_vm1, %v4957_v61  ;;  %v4633_v61 = vpack.c.bf16 %v4616_v27, %v15523_v54 }
 0x26f   : > { %v4960_v27 = vpack.c.bf16 %v15377_v11, %v4943_v7  ;;  %v18920_v7 = vld [vmem:[#allocation12_spill] sm:$0xff] }
 0x271   : > { %12064 = vmatmul.mubr.msk.bf16.gmra.mxu1 %vm3928_vm1, %v4632_v13  ;;  %v5566_v13 = vpack.c.bf16 %v5536_v50, %v15335_v5  ;;  %v5540_v5 = vmul.f32 %v18901_v4, %v15355_v12  ;;  %v18921_v12 = vld [vmem:[#allocation48_spill] sm:$0xff]  ;;  %v18925_v50 = vld [vmem:[#allocation13_spill] sm:$0xff] }
 0x272   : > { %12067 = vmatprep.mubr.msk.bf16.mxu1 %vm3928_vm1, %v4633_v61  ;;  %v18917_v61 = vld [vmem:[#allocation66_spill] sm:$0xff]  ;;  %v5546_v33 = vmul.f32 %v18921_v12, %v15431_v38  ;;  %v5550_v38 = vmul.f32 %v18909_v29, %v15455_v56  ;;  %v5554_v56 = vmul.f32 %v18911_v3, %v15479_v15  ;;  %v5558_v15 = vmul.f32 %v18913_v1, %v15503_v41 }
 0x273   : > { %v5562_v41 = vmul.f32 %v18905_v17, %v15527_v39  ;;  %v18933_v39 = vld [vmem:[#allocation15_spill] sm:$0xff] }
 0x275   : > { %12098 = vmatmul.mubr.msk.bf16.gmra.mxu0 %vm3928_vm1, %v4958_v45  ;;  %v6252_v45 = vsel %vm4178_vm0, %v15365_v0, 0  ;;  %v5568_v0 = vpack.c.bf16 %v5540_v5, %v15393_v36  ;;  %v5570_v36 = vpack.c.bf16 %v5544_v20, %v15427_v14  ;;  %v5572_v14 = vpack.c.bf16 %v5548_v2, %v15451_v8  ;;  %v18932_v5 = vld [vmem:[#allocation16_spill] sm:$0xff] }
 0x276   : > { %12101 = vmatprep.mubr.msk.bf16.mxu0 %vm3928_vm1, %v4959_v16  ;;  %v18916_v16 = vld [vmem:[#allocation32_spill] sm:$0xff]  ;;  %v5574_v8 = vpack.c.bf16 %v5552_v26, %v15475_v31  ;;  %v5576_v31 = vpack.c.bf16 %v5556_v48, %v15499_v18  ;;  %v5578_v18 = vpack.c.bf16 %v5560_v51, %v15523_v54  ;;  %v5564_v63 = vmul.f32 %v18915_v57, %v18932_v5  ;;  %v6154_v54 = vld [vmem:[#allocation3 + $0x30] sm:$0xff]  ;;  %v18936_v5 = vld [vmem:[#allocation27_spill] sm:$0xff] }
 0x277   : > { %v5538_v53 = vmul.f32 %v18916_v16, %v15344_v55  ;;  %v18918_v55 = vld [vmem:[#allocation56_spill] sm:$0xff]  ;;  %v6158_v26 = vld [vmem:[#allocation3 + $0x50] sm:$0xff] }
 0x278   : > { %v6153_v20 = vld [vmem:[#allocation3 + $0x28] sm:$0xff]  ;;  %v6156_v2 = vld [vmem:[#allocation3 + $0x40] sm:$0xff] }
 0x279   : > { %12068 = vmatmul.mubr.msk.bf16.gmra.mxu1 %vm3928_vm1, %v4634_v21  ;;  %v18922_v21 = vld [vmem:[#allocation17_spill] sm:$0xff] }
 0x27a   : > { %12107 = vmatprep.mubr.msk.bf16.mxu1 %vm3928_vm1, %v14965_v25  ;;  %v5567_v25 = vpack.c.bf16 %v5538_v53, %v15387_v43  ;;  %v5569_v43 = vpack.c.bf16 %v5542_v49, %v15421_v24  ;;  %v5571_v24 = vpack.c.bf16 %v5546_v33, %v15445_v28  ;;  %v5573_v28 = vpack.c.bf16 %v5550_v38, %v15469_v59  ;;  %v18926_v53 = vld [vmem:[#allocation68_spill] sm:$0xff]  ;;  %v5238_v49 = vld [vmem:[#allocation3 + $0x110] sm:$0xff] }
 0x27b   : > { %v5575_v59 = vpack.c.bf16 %v5554_v56, %v15493_v22  ;;  %v5577_v22 = vpack.c.bf16 %v5558_v15, %v15517_v19  ;;  %v5579_v19 = vpack.c.bf16 %v5562_v41, %v15539_v32  ;;  %v18934_v38 = vld [vmem:[#allocation21_spill] sm:$0xff] }
 0x27c   : > { %v6157_v15 = vld [vmem:[#allocation3 + $0x48] sm:$0xff] }
 0x27d   : > { %12102 = vmatmul.mubr.msk.bf16.gmra.mxu0 %vm3928_vm1, %v4960_v27  ;;  %v18923_v27 = vld [vmem:[#allocation28_spill] sm:$0xff] }
 0x27e   : > { %12141 = vmatprep.mubr.msk.bf16.mxu0 %vm3928_vm1, %v5565_v46  ;;  %v18924_v46 = vld [vmem:[#allocation53_spill] sm:$0xff] }
 0x27f   : > { %v5835_v51 = vld [vmem:[#allocation3 + $0x67] sm:$0xff] }
 0x281   : > { %12108 = vmatmul.mubr.msk.bf16.vlgmr.msra.gmra.mxu1 %vm3928_vm1, %v18917_v61  ;;  %v18930_v61 = vld [vmem:[#allocation9_spill] sm:$0xff] }
 0x282   : > { %12174 = vmatpush3.bf16.msra.mxu1 %v5958_v6  ;;  %12111 = vmatprep.mubr.msk.bf16.mxu1 %vm3928_vm1, %v18918_v55  ;;  %v18928_v6 = vld [vmem:[#allocation46_spill] sm:$0xff]  ;;  %v18931_v55 = vld [vmem:[#allocation71_spill] sm:$0xff] }
 0x283   : > { %12607 = vmatprep.subr.msk.bf16.mxu1 %vm4178_vm0, %v15565_v62 }
 0x285   : > { %12142 = vmatmul.mubr.msk.bf16.vlgmr.msra.gmra.mxu0 %vm3928_vm1, %v5566_v13  ;;  %v18927_v13 = vld [vmem:[#allocation55_spill] sm:$0xff] }
 0x286   : > { %12145 = vmatprep.mubr.msk.bf16.mxu0 %vm3928_vm1, %v5567_v25  ;;  %12208 = vmatpush3.bf16.msra.mxu0 %v6252_v45  ;;  %v18929_v45 = vld [vmem:[#allocation69_spill] sm:$0xff] }
 0x287   : > { %v5827_v25 = vld [vmem:[#allocation3 + $0x27] sm:$0xff] }
 0x289   : > { %12112 = vmatmul.mubr.msk.bf16.gmra.mxu1 %vm3928_vm1, %v18919_v10  ;;  %v5580_v10 = vpack.c.bf16 %v5564_v63, %v15417_v34  ;;  %v5867_v63 = vmul.f32 %v18936_v5, %v5835_v51 }
 0x28a   : > { %12115 = vmatprep.mubr.msk.bf16.mxu1 %vm3928_vm1, %v18920_v7  ;;  %v5828_v7 = vld [vmem:[#allocation3 + $0x2f] sm:$0xff] }
 0x28d   : > { %12146 = vmatmul.mubr.msk.bf16.gmra.mxu0 %vm3928_vm1, %v5568_v0  ;;  %v5859_v0 = vmul.f32 %v18933_v39, %v5827_v25  ;;  %v5834_v25 = vld [vmem:[#allocation3 + $0x5f] sm:$0xff] }
 0x28e   : > { %12149 = vmatprep.mubr.msk.bf16.mxu0 %vm3928_vm1, %v5569_v43  ;;  %v5237_v43 = vld [vmem:[#allocation3 + $0x108] sm:$0xff] }
 0x28f   : > { %v15647_v32 = vpack.c.bf16 %v5238_v49, %v5237_v43  ;;  %v5891_v33 = vpack.c.bf16 %v5828_v7, %v5859_v0  ;;  %v6450_v39 = vld [vmem:[#allocation3 + $0x41] sm:$0xff] }
 0x291   : > { %12116 = vmatmul.mubr.msk.bf16.gmra.mxu1 %vm3928_vm1, %v18922_v21  ;;  %v5829_v21 = vld [vmem:[#allocation3 + $0x37] sm:$0xff] }
 0x292   : > { %12119 = vmatprep.mubr.msk.bf16.mxu1 %vm3928_vm1, %v18923_v27  ;;  %v5830_v27 = vld [vmem:[#allocation3 + $0x3f] sm:$0xff] }
 0x295   : > { %12150 = vmatmul.mubr.msk.bf16.gmra.mxu0 %vm3928_vm1, %v5570_v36  ;;  %v6185_v36 = vpack.c.bf16 %v6154_v54, %v6153_v20  ;;  %v18937_v54 = vld [vmem:[#allocation25_spill] sm:$0xff]  ;;  %v6159_v20 = vld [vmem:[#allocation3 + $0x58] sm:$0xff] }
 0x296   : > { %12153 = vmatprep.mubr.msk.bf16.mxu0 %vm3928_vm1, %v5571_v24  ;;  %v5831_v24 = vld [vmem:[#allocation3 + $0x47] sm:$0xff] }
 0x299   : > { %12120 = vmatmul.mubr.msk.bf16.gmra.mxu1 %vm3928_vm1, %v18924_v46 }
 0x29a   : > { %12123 = vmatprep.mubr.msk.bf16.mxu1 %vm3928_vm1, %v18925_v50  ;;  %v6155_v50 = vld [vmem:[#allocation3 + $0x38] sm:$0xff] }
 0x29d   : > { %12154 = vmatmul.mubr.msk.bf16.gmra.mxu0 %vm3928_vm1, %v5572_v14  ;;  %v5863_v14 = vmul.f32 %v18934_v38, %v5831_v24  ;;  %v6447_v38 = vld [vmem:[#allocation3 + $0x29] sm:$0xff] }
 0x29e   : > { %12157 = vmatprep.mubr.msk.bf16.mxu0 %vm3928_vm1, %v5573_v28  ;;  %v18935_v28 = vld [vmem:[#allocation19_spill] sm:$0xff] }
 0x29f   : > { %v5861_v46 = vmul.f32 %v18935_v28, %v5829_v21 }
 0x2a1   : > { %12124 = vmatmul.mubr.msk.bf16.gmra.mxu1 %vm3928_vm1, %v18926_v53  ;;  %v5892_v56 = vpack.c.bf16 %v5830_v27, %v5861_v46  ;;  %v5832_v53 = vld [vmem:[#allocation3 + $0x4f] sm:$0xff] }
 0x2a2   : > { %12127 = vmatprep.mubr.msk.bf16.mxu1 %vm3928_vm1, %v18927_v13  ;;  %v5893_v48 = vpack.c.bf16 %v5832_v53, %v5863_v14  ;;  %v5836_v27 = vld [vmem:[#allocation3 + $0x6f] sm:$0xff] }
 0x2a3   : > { %v5895_v46 = vpack.c.bf16 %v5836_v27, %v5867_v63  ;;  %v18939_v27 = vld [vmem:[#allocation73_spill] sm:$0xff] }
 0x2a5   : > { %12158 = vmatmul.mubr.msk.bf16.gmra.mxu0 %vm3928_vm1, %v5574_v8  ;;  %v6186_v8 = vpack.c.bf16 %v6156_v2, %v6155_v50  ;;  %v6161_v2 = vld [vmem:[#allocation3 + $0x68] sm:$0xff] }
 0x2a6   : > { %12161 = vmatprep.mubr.msk.bf16.mxu0 %vm3928_vm1, %v5575_v59  ;;  %v6578_v59 = vsel %vm4178_vm0, %v15565_v62, 0 }
 0x2a9   : > { %12128 = vmatmul.mubr.msk.bf16.gmra.mxu1 %vm3928_vm1, %v18928_v6 }
 0x2aa   : > { %12131 = vmatprep.mubr.msk.bf16.mxu1 %vm3928_vm1, %v18929_v45  ;;  %v6187_v45 = vpack.c.bf16 %v6158_v26, %v6157_v15 }
 0x2ad   : > { %12162 = vmatmul.mubr.msk.bf16.gmra.mxu0 %vm3928_vm1, %v5576_v31 }
 0x2ae   : > { %12165 = vmatprep.mubr.msk.bf16.mxu0 %vm3928_vm1, %v5577_v22 }
 0x2b1   : > { %12132 = vmatmul.mubr.msk.bf16.gmra.mxu1 %vm3928_vm1, %v18930_v61 }
 0x2b2   : > { %12135 = vmatprep.mubr.msk.bf16.mxu1 %vm3928_vm1, %v18931_v55  ;;  %v6160_v55 = vld [vmem:[#allocation3 + $0x60] sm:$0xff] }
 0x2b3   : > { %v6188_v21 = vpack.c.bf16 %v6160_v55, %v6159_v20  ;;  %v6163_v55 = vld [vmem:[#allocation3 + $0x78] sm:$0xff] }
 0x2b5   : > { %12166 = vmatmul.mubr.msk.bf16.gmra.mxu0 %vm3928_vm1, %v5578_v18  ;;  %v5833_v18 = vld [vmem:[#allocation3 + $0x57] sm:$0xff] }
 0x2b6   : > { %12169 = vmatprep.mubr.msk.bf16.mxu0 %vm3928_vm1, %v5579_v19  ;;  %v5865_v43 = vmul.f32 %v18937_v54, %v5833_v18  ;;  %v18938_v18 = vld [vmem:[#allocation30_spill] sm:$0xff] }
 0x2b8   : > { %v5894_v24 = vpack.c.bf16 %v5834_v25, %v5865_v43 }
 0x2b9   : > { %12136 = vmatmul.mubr.msk.bf16.gmra.mxu1 %vm3928_vm1, %v15647_v32 }
 0x2ba   : > { %12175 = vmatprep.mubr.msk.bf16.mxu1 %vm3928_vm1, %v5891_v33 }
 0x2bd   : > { %12170 = vmatmul.mubr.msk.bf16.gmra.mxu0 %vm3928_vm1, %v5580_v10  ;;  %v6162_v10 = vld [vmem:[#allocation3 + $0x70] sm:$0xff] }
 0x2be   : > { %12209 = vmatprep.mubr.msk.bf16.mxu0 %vm3928_vm1, %v6185_v36  ;;  %v11973_v31 = vpop.f32.mrf.mxu1  ;;  %v6189_v50 = vpack.c.bf16 %v6162_v10, %v6161_v2  ;;  %v6165_v10 = vld [vmem:[#allocation3 + $0x88] sm:$0xff] }
 0x2bf   : > { %v12007_v22 = vpop.f32.mrf.mxu0  ;;  %v18940_v2 = vld [vmem:[#allocation77_spill] sm:$0xff] }
 0x2c0   : > { %v15661_v41 = vadd.f32 %v12007_v22, %v11973_v31  ;;  %v4216_v62 = vpop.f32.mrf.mxu1  ;;  %v5838_v31 = vld [vmem:[#allocation3 + $0x7f] sm:$0xff] }
 0x2c1   : > { %12176 = vmatmul.mubr.msk.bf16.vlgmr.msra.gmra.mxu1 %vm3928_vm1, %v5892_v56  ;;  %v4428_v19 = vpop.f32.mrf.mxu0  ;;  %v6164_v22 = vld [vmem:[#allocation3 + $0x80] sm:$0xff] }
 0x2c2   : > { %12242 = vmatpush3.bf16.msra.mxu1 %v6578_v59  ;;  %12179 = vmatprep.mubr.msk.bf16.mxu1 %vm3928_vm1, %v5893_v48  ;;  %v15665_v61 = vadd.f32 %v4428_v19, %v4216_v62  ;;  %v11974_v49 = vpop.f32.mrf.mxu1  ;;  %v5837_v59 = vld [vmem:[#allocation3 + $0x77] sm:$0xff]  ;;  %v6190_v43 = vpack.c.bf16 %v6164_v22, %v6163_v55  ;;  %v6169_v55 = vld [vmem:[#allocation3 + $0xa8] sm:$0xff] }
 0x2c3   : > { %v12008_v0 = vpop.f32.mrf.mxu0  ;;  %v5869_v62 = vmul.f32 %v18938_v18, %v5837_v59  ;;  %v6166_v19 = vld [vmem:[#allocation3 + $0x90] sm:$0xff]  ;;  %v6168_v59 = vld [vmem:[#allocation3 + $0xa0] sm:$0xff] }
 0x2c4   : > { %v15669_v7 = vadd.f32 %v12008_v0, %v11974_v49  ;;  %v4219_v33 = vpop.f32.mrf.mxu1 }
 0x2c5   : > { %12210 = vmatmul.mubr.msk.bf16.vlgmr.msra.gmra.mxu0 %vm3928_vm1, %v6186_v8  ;;  %v4431_v36 = vpop.f32.mrf.mxu0  ;;  %v5896_v0 = vpack.c.bf16 %v5838_v31, %v5869_v62  ;;  %v6170_v31 = vld [vmem:[#allocation3 + $0xb0] sm:$0xff] }
 0x2c6   : > { %12213 = vmatprep.mubr.msk.bf16.mxu0 %vm3928_vm1, %v6187_v45  ;;  %v15671_v14 = vadd.f32 %v4431_v36, %v4219_v33  ;;  %v6191_v33 = vpack.c.bf16 %v6166_v19, %v6165_v10  ;;  %v18942_v10 = vld [vmem:[#allocation23_spill] sm:$0xff] }
 0x2c7   : > { %v11977_v26 = vpop.f32.mrf.mxu1  ;;  %v12011_v56 = vpop.f32.mrf.mxu0 }
 0x2c8   : > { %v15675_v8 = vadd.f32 %v12011_v56, %v11977_v26 }
 0x2c9   : > { %12180 = vmatmul.mubr.msk.bf16.gmra.mxu1 %vm3928_vm1, %v5894_v24  ;;  %v4232_v53 = vpop.f32.mrf.mxu1  ;;  %v4444_v48 = vpop.f32.mrf.mxu0 }
 0x2ca   : > { %12183 = vmatprep.mubr.msk.bf16.mxu1 %vm3928_vm1, %v5895_v46  ;;  %v15679_v15 = vadd.f32 %v4444_v48, %v4232_v53  ;;  %v18941_v46 = vpack.c.bf16 %v18939_v27, %v18940_v2  ;;  %v18945_v27 = vld [vmem:[#allocation74_spill] sm:$0xff]  ;;  %v18946_v2 = vld [vmem:[#allocation79_spill] sm:$0xff] }
 0x2cb   : > { %v11978_v45 = vpop.f32.mrf.mxu1  ;;  %v12012_v51 = vpop.f32.mrf.mxu0 }
 0x2cc   : > { %v15682_v25 = vadd.f32 %v12012_v51, %v11978_v45  ;;  %v6167_v45 = vld [vmem:[#allocation3 + $0x98] sm:$0xff] }
 0x2cd   : > { %12214 = vmatmul.mubr.msk.bf16.gmra.mxu0 %vm3928_vm1, %v6188_v21  ;;  %v4235_v63 = vpop.f32.mrf.mxu1  ;;  %v4447_v49 = vpop.f32.mrf.mxu0  ;;  %v6192_v19 = vpack.c.bf16 %v6168_v59, %v6167_v45 }
 0x2ce   : > { %12217 = vmatprep.mubr.msk.bf16.mxu0 %vm3928_vm1, %v6189_v50  ;;  %v15684_v20 = vadd.f32 %v4447_v49, %v4235_v63  ;;  %v6193_v49 = vpack.c.bf16 %v6170_v31, %v6169_v55 }
 0x2d0   : > { %v11981_v36 = vpop.f32.mrf.mxu1 }
 0x2d1   : > { %v12015_v24 = vpop.f32.mrf.mxu0  ;;  %12184 = vmatmul.mubr.msk.bf16.gmra.mxu1 %vm3928_vm1, %v5896_v0 }
 0x2d2   : > { %v15688_v21 = vadd.f32 %v12015_v24, %v11981_v36  ;;  %12187 = vmatprep.mubr.msk.bf16.mxu1 %vm3928_vm1, %v18941_v46  ;;  %v4248_v50 = vpop.f32.mrf.mxu1  ;;  %v18947_v46 = vpack.c.bf16 %v18945_v27, %v18946_v2  ;;  %v5849_v2 = vld [vmem:[#allocation3 + $0xd7] sm:$0xff] }
 0x2d3   : > { %v4460_v26 = vpop.f32.mrf.mxu0 }
 0x2d4   : > { %v15695_v56 = vadd.f32 %v4460_v26, %v4248_v50  ;;  %v11982_v53 = vpop.f32.mrf.mxu1 }
 0x2d5   : > { %12218 = vmatmul.mubr.msk.bf16.gmra.mxu0 %vm3928_vm1, %v6190_v43  ;;  %v12016_v48 = vpop.f32.mrf.mxu0 }
 0x2d6   : > { %12221 = vmatprep.mubr.msk.bf16.mxu0 %vm3928_vm1, %v6191_v33  ;;  %v15697_v22 = vadd.f32 %v12016_v48, %v11982_v53  ;;  %v4251_v51 = vpop.f32.mrf.mxu1  ;;  %v18943_v33 = vld [vmem:[#allocation41_spill] sm:$0xff] }
 0x2d7   : > { %v4463_v62 = vpop.f32.mrf.mxu0  ;;  %v18944_v36 = vpack.c.bf16 %v18942_v10, %v18943_v33 }
 0x2d8   : > { %v15699_v63 = vadd.f32 %v4463_v62, %v4251_v51 }
 0x2d9   : > { %v11985_v0 = vpop.f32.mrf.mxu1  ;;  %v12019_v43 = vpop.f32.mrf.mxu0  ;;  %12188 = vmatmul.mubr.msk.bf16.gmra.mxu1 %vm3928_vm1, %v18944_v36  ;;  %v18951_v36 = vld [vmem:[#allocation70_spill] sm:$0xff] }
 0x2da   : > { %v15706_v24 = vadd.f32 %v12019_v43, %v11985_v0  ;;  %12191 = vmatprep.mubr.msk.bf16.mxu1 %vm3928_vm1, %v18947_v46  ;;  %v18948_v0 = vld [vmem:[#allocation8_spill] sm:$0xff]  ;;  %v18952_v27 = vpack.c.bf16 %v15240_v40, %v18951_v36 }
 0x2db   : > { %v4264_v50 = vpop.f32.mrf.mxu1  ;;  %v4476_v26 = vpop.f32.mrf.mxu0  ;;  %v18949_v43 = vld [vmem:[#allocation72_spill] sm:$0xff] }
 0x2dc   : > { %v15713_v59 = vadd.f32 %v4476_v26, %v4264_v50  ;;  %v18950_v10 = vpack.c.bf16 %v18948_v0, %v18949_v43  ;;  %v6178_v43 = vld [vmem:[#allocation3 + $0xf0] sm:$0xff] }
 0x2dd   : > { %12222 = vmatmul.mubr.msk.bf16.gmra.mxu0 %vm3928_vm1, %v6192_v19  ;;  %v11986_v53 = vpop.f32.mrf.mxu1  ;;  %v12020_v48 = vpop.f32.mrf.mxu0 }
 0x2de   : > { %12225 = vmatprep.mubr.msk.bf16.mxu0 %vm3928_vm1, %v6193_v49  ;;  %v15715_v31 = vadd.f32 %v12020_v48, %v11986_v53  ;;  %v5851_v49 = vld [vmem:[#allocation3 + $0xe7] sm:$0xff]  ;;  %v5850_v53 = vld [vmem:[#allocation3 + $0xdf] sm:$0xff] }
 0x2df   : > { %v4267_v45 = vpop.f32.mrf.mxu1  ;;  %v4479_v51 = vpop.f32.mrf.mxu0  ;;  %v6176_v48 = vld [vmem:[#allocation3 + $0xe0] sm:$0xff] }
 0x2e0   : > { %v15717_v62 = vadd.f32 %v4479_v51, %v4267_v45  ;;  %v18953_v45 = vld [vmem:[#allocation61_spill] sm:$0xff] }
 0x2e1   : > { %v11989_v19 = vpop.f32.mrf.mxu1  ;;  %12192 = vmatmul.mubr.msk.bf16.gmra.mxu1 %vm3928_vm1, %v18950_v10  ;;  %v6175_v10 = vld [vmem:[#allocation3 + $0xd8] sm:$0xff] }
 0x2e2   : > { %12195 = vmatprep.mubr.msk.bf16.mxu1 %vm3928_vm1, %v18952_v27  ;;  %v6196_v17 = vpack.c.bf16 %v6176_v48, %v6175_v10 }
 0x2e3   : > { %v4280_v46 = vpop.f32.mrf.mxu1 }
 0x2e5   : > { %v12023_v55 = vpop.f32.mrf.mxu0  ;;  %12226 = vmatmul.mubr.msk.bf16.gmra.mxu0 %vm3928_vm1, %v18927_v13  ;;  %v5883_v13 = vmul.f32 %v18953_v45, %v5851_v49  ;;  %v11990_v51 = vpop.f32.mrf.mxu1 }
 0x2e6   : > { %v15725_v33 = vadd.f32 %v12023_v55, %v11989_v19  ;;  %12229 = vmatprep.mubr.msk.bf16.mxu0 %vm3928_vm1, %v18928_v6  ;;  %v18954_v55 = vld [vmem:[#allocation57_spill] sm:$0xff] }
 0x2e7   : > { %v4492_v50 = vpop.f32.mrf.mxu0  ;;  %v5881_v0 = vmul.f32 %v18954_v55, %v5849_v2  ;;  %v15739_v36 = vpop.f32.mrf.mxu1 }
 0x2e8   : > { %v15733_v26 = vadd.f32 %v4492_v50, %v4280_v46  ;;  %18955 = vst [vmem:[#allocation51_spill] sm:$0xff] %v15739_v36  ;;  %v5852_v46 = vld [vmem:[#allocation3 + $0xef] sm:$0xff] }
 0x2e9   : > { %v12024_v19 = vpop.f32.mrf.mxu0  ;;  %v5902_v27 = vpack.c.bf16 %v5850_v53, %v5881_v0  ;;  %v6177_v50 = vld [vmem:[#allocation3 + $0xe8] sm:$0xff]  ;;  %v5903_v47 = vpack.c.bf16 %v5852_v46, %v5883_v13  ;;  %v11993_v5 = vpop.f32.mrf.mxu1  ;;  %v5854_v0 = vld [vmem:[#allocation3 + $0xff] sm:$0xff] }
 0x2ea   : > { %v15737_v40 = vadd.f32 %v12024_v19, %v11990_v51  ;;  %v6197_v18 = vpack.c.bf16 %v6178_v43, %v6177_v50  ;;  %v5853_v51 = vld [vmem:[#allocation3 + $0xf7] sm:$0xff]  ;;  %v6180_v13 = vld [vmem:[#allocation3 + $0x100] sm:$0xff] }
 0x2eb   : > { %v15741_v6 = vpop.f32.mrf.mxu0  ;;  %12196 = vmatmul.mubr.msk.bf16.gmra.mxu1 %vm3928_vm1, %v5902_v27  ;;  %v4296_v19 = vpop.f32.mrf.mxu1  ;;  %v5885_v46 = vmul.f32 %v18885_v23, %v5853_v51  ;;  %v18959_v51 = vld [vmem:[#allocation54_spill] sm:$0xff] }
 0x2ec   : > { %18956 = vst [vmem:[#allocation76_spill] sm:$0xff] %v15741_v6  ;;  %12199 = vmatprep.mubr.msk.bf16.mxu1 %vm3928_vm1, %v5903_v47 }
 0x2ed   : > { %v12027_v49 = vpop.f32.mrf.mxu0  ;;  %12230 = vmatmul.mubr.msk.bf16.gmra.mxu0 %vm3928_vm1, %v6196_v17  ;;  %v11994_v43 = vpop.f32.mrf.mxu1  ;;  %v6179_v17 = vld [vmem:[#allocation3 + $0xf8] sm:$0xff]  ;;  %v5904_v47 = vpack.c.bf16 %v5854_v0, %v5885_v46 }
 0x2ee   : > { %v15745_v2 = vadd.f32 %v12027_v49, %v11993_v5  ;;  %12233 = vmatprep.mubr.msk.bf16.mxu0 %vm3928_vm1, %v6197_v18  ;;  %v6198_v18 = vpack.c.bf16 %v6180_v13, %v6179_v17  ;;  %v5857_v49 = vld [vmem:[#allocation3 + $0x117] sm:$0xff]  ;;  %v6184_v13 = vld [vmem:[#allocation3 + $0x120] sm:$0xff] }
 0x2ef   : > { %v4508_v53 = vpop.f32.mrf.mxu0  ;;  %v15754_v5 = vpop.f32.mrf.mxu1  ;;  %v6183_v0 = vld [vmem:[#allocation3 + $0x118] sm:$0xff]  ;;  %v5889_v17 = vmul.f32 %v18889_v30, %v5857_v49  ;;  %v6454_v30 = vld [vmem:[#allocation3 + $0x61] sm:$0xff] }
 0x2f0   : > { %v15749_v48 = vadd.f32 %v4508_v53, %v4296_v19  ;;  %18957 = vst [vmem:[#allocation45_spill] sm:$0xff] %v15754_v5  ;;  %v6448_v19 = vld [vmem:[#allocation3 + $0x31] sm:$0xff]  ;;  %v6200_v54 = vpack.c.bf16 %v6184_v13, %v6183_v0  ;;  %v6482_v13 = vmul.f32 %v18893_v35, %v6450_v39  ;;  %v6453_v35 = vld [vmem:[#allocation3 + $0x59] sm:$0xff] }
 0x2f1   : > { %v12028_v10 = vpop.f32.mrf.mxu0  ;;  %v11997_v45 = vpop.f32.mrf.mxu1  ;;  %v6456_v39 = vld [vmem:[#allocation3 + $0x71] sm:$0xff] }
 0x2f2   : > { %v15752_v27 = vadd.f32 %v12028_v10, %v11994_v43  ;;  %v18960_v43 = vpack.c.bf16 %v15377_v11, %v18959_v51 }
 0x2f3   : > { %v15756_v50 = vpop.f32.mrf.mxu0  ;;  %12200 = vmatmul.mubr.msk.bf16.gmra.mxu1 %vm3928_vm1, %v5904_v47  ;;  %v4312_v10 = vpop.f32.mrf.mxu1 }
 0x2f4   : > { %18958 = vst [vmem:[#allocation59_spill] sm:$0xff] %v15756_v50  ;;  %12203 = vmatprep.mubr.msk.bf16.mxu1 %vm3928_vm1, %v18960_v43 }
 0x2f5   : > { %v12031_v55 = vpop.f32.mrf.mxu0  ;;  %12234 = vmatmul.mubr.msk.bf16.gmra.mxu0 %vm3928_vm1, %v6198_v18  ;;  %v5858_v18 = vld [vmem:[#allocation3 + $0x11f] sm:$0xff] }
 0x2f6   : > { %v15760_v53 = vadd.f32 %v12031_v55, %v11997_v45  ;;  %12237 = vmatprep.mubr.msk.bf16.mxu0 %vm3928_vm1, %v15647_v32  ;;  %v6480_v45 = vmul.f32 %v18890_v44, %v6448_v19  ;;  %v11998_v55 = vpop.f32.mrf.mxu1  ;;  %v5906_v32 = vpack.c.bf16 %v5858_v18, %v5889_v17  ;;  %v6452_v19 = vld [vmem:[#allocation3 + $0x51] sm:$0xff] }
 0x2f7   : > { %v4524_v46 = vpop.f32.mrf.mxu0 }
 0x2f8   : > { %v15769_v47 = vadd.f32 %v4524_v46, %v4312_v10  ;;  %v15774_v51 = vpop.f32.mrf.mxu1  ;;  %v6511_v28 = vpack.c.bf16 %v6480_v45, %v6447_v38  ;;  %v6484_v38 = vmul.f32 %v18916_v16, %v6452_v19 }
 0x2f9   : > { %v12032_v23 = vpop.f32.mrf.mxu0  ;;  %18961 = vst [vmem:[#allocation75_spill] sm:$0xff] %v15774_v51 }
 0x2fa   : > { %v15772_v11 = vadd.f32 %v12032_v23, %v11998_v55  ;;  %v12001_v50 = vpop.f32.mrf.mxu1  ;;  %v6449_v55 = vld [vmem:[#allocation3 + $0x39] sm:$0xff] }
 0x2fb   : > { %v15776_v43 = vpop.f32.mrf.mxu0  ;;  %12204 = vmatmul.mubr.msk.bf16.gmra.mxu1 %vm3928_vm1, %v5906_v32 }
 0x2fc   : > { %18962 = vst [vmem:[#allocation82_spill] sm:$0xff] %v15776_v43  ;;  %12243 = vmatprep.mubr.msk.bf16.mxu1 %vm3928_vm1, %v6511_v28  ;;  %v4328_v23 = vpop.f32.mrf.mxu1 }
 0x2fd   : > { %v12035_v49 = vpop.f32.mrf.mxu0  ;;  %12238 = vmatmul.mubr.msk.bf16.gmra.mxu0 %vm3928_vm1, %v6200_v54 }
 0x2fe   : > { %v15780_v10 = vadd.f32 %v12035_v49, %v12001_v50  ;;  %v12002_v17 = vpop.f32.mrf.mxu1  ;;  %v6512_v50 = vpack.c.bf16 %v6482_v13, %v6449_v55  ;;  %v6451_v49 = vld [vmem:[#allocation3 + $0x49] sm:$0xff] }
 0x2ff   : > { %v4540_v0 = vpop.f32.mrf.mxu0  ;;  %v6513_v28 = vpack.c.bf16 %v6484_v38, %v6451_v49  ;;  %v6488_v38 = vmul.f32 %v18902_v37, %v6456_v39 }
 0x300   : > { %v15784_v46 = vadd.f32 %v4540_v0, %v4328_v23  ;;  %v15789_v32 = vpop.f32.mrf.mxu1 }
 0x301   : > { %v12036_v18 = vpop.f32.mrf.mxu0  ;;  %18963 = vst [vmem:[#allocation89_spill] sm:$0xff] %v15789_v32 }
 0x302   : > { %v15787_v45 = vadd.f32 %v12036_v18, %v12002_v17  ;;  %v12041_v44 = vpop.f32.mrf.mxu1  ;;  %v6486_v17 = vmul.f32 %v18901_v4, %v6454_v30 }
 0x303   : > { %v15791_v54 = vpop.f32.mrf.mxu0  ;;  %12244 = vmatmul.mubr.msk.bf16.vlgmr.msra.gmra.mxu1 %vm3928_vm1, %v6512_v50  ;;  %v4851_v19 = vadd.f32 %v12041_v44, %v15661_v41 }
 0x304   : > { %18964 = vst [vmem:[#allocation78_spill] sm:$0xff] %v15791_v54  ;;  %12247 = vmatprep.mubr.msk.bf16.mxu1 %vm3928_vm1, %v6513_v28  ;;  %v4722_v23 = vpop.f32.mrf.mxu1  ;;  %v6514_v28 = vpack.c.bf16 %v6486_v17, %v6453_v35  ;;  %v6455_v54 = vld [vmem:[#allocation3 + $0x69] sm:$0xff] }
 0x305   : > { %v12075_v43 = vpop.f32.mrf.mxu0  ;;  %v4849_v13 = vadd.f32 %v4722_v23, %v15665_v61  ;;  %v6515_v61 = vpack.c.bf16 %v6488_v38, %v6455_v54  ;;  %v6460_v23 = vld [vmem:[#allocation3 + $0x91] sm:$0xff] }
 0x306   : > { %v15797_v18 = vadd.f32 %v12075_v43, %v4851_v19  ;;  %v12042_v55 = vpop.f32.mrf.mxu1  ;;  %v6458_v43 = vld [vmem:[#allocation3 + $0x81] sm:$0xff]  ;;  %v6492_v54 = vmul.f32 %v18921_v12, %v6460_v23 }
 0x307   : > { %v5048_v0 = vpop.f32.mrf.mxu0  ;;  %v4852_v50 = vadd.f32 %v12042_v55, %v15669_v7  ;;  %v6490_v35 = vmul.f32 %v18904_v60, %v6458_v43 }
 0x308   : > { %v15801_v16 = vadd.f32 %v5048_v0, %v4849_v13  ;;  %v4725_v44 = vpop.f32.mrf.mxu1 }
 0x309   : > { %v12076_v49 = vpop.f32.mrf.mxu0  ;;  %v15809_v30 = vadd.f32 %v4725_v44, %v15671_v14  ;;  %v6457_v44 = vld [vmem:[#allocation3 + $0x79] sm:$0xff] }
 0x30a   : > { %v15806_v32 = vadd.f32 %v12076_v49, %v4852_v50  ;;  %v12045_v39 = vpop.f32.mrf.mxu1 }
 0x30b   : > { %v15804_v41 = vpop.f32.mrf.mxu0  ;;  %12248 = vmatmul.mubr.msk.bf16.gmra.mxu1 %vm3928_vm1, %v6514_v28  ;;  %v4855_v7 = vadd.f32 %v12045_v39, %v15675_v8  ;;  %v6459_v39 = vld [vmem:[#allocation3 + $0x89] sm:$0xff] }
 0x30c   : > { %12251 = vmatprep.mubr.msk.bf16.mxu1 %vm3928_vm1, %v6515_v61  ;;  %v4738_v0 = vpop.f32.mrf.mxu1  ;;  %v6516_v61 = vpack.c.bf16 %v6490_v35, %v6457_v44 }
 0x30d   : > { %v12079_v19 = vpop.f32.mrf.mxu0  ;;  %v4853_v14 = vadd.f32 %v4738_v0, %v15679_v15  ;;  %v6517_v15 = vpack.c.bf16 %v6492_v54, %v6459_v39  ;;  %v6464_v0 = vld [vmem:[#allocation3 + $0xb1] sm:$0xff] }
 0x30e   : > { %v15815_v17 = vadd.f32 %v12079_v19, %v4855_v7  ;;  %v12046_v38 = vpop.f32.mrf.mxu1  ;;  %v6462_v19 = vld [vmem:[#allocation3 + $0xa1] sm:$0xff]  ;;  %v6496_v54 = vmul.f32 %v18909_v29, %v6464_v0 }
 0x30f   : > { %v5064_v13 = vpop.f32.mrf.mxu0  ;;  %v4856_v50 = vadd.f32 %v12046_v38, %v15682_v25  ;;  %v6494_v35 = vmul.f32 %v18908_v52, %v6462_v19 }
 0x310   : > { %v15819_v49 = vadd.f32 %v5064_v13, %v4853_v14  ;;  %v4741_v8 = vpop.f32.mrf.mxu1 }
 0x311   : > { %v12080_v55 = vpop.f32.mrf.mxu0  ;;  %v15827_v43 = vadd.f32 %v4741_v8, %v15684_v20 }
 0x312   : > { %v15824_v37 = vadd.f32 %v12080_v55, %v4856_v50  ;;  %v12049_v23 = vpop.f32.mrf.mxu1 }
 0x313   : > { %v15822_v28 = vpop.f32.mrf.mxu0  ;;  %12252 = vmatmul.mubr.msk.bf16.gmra.mxu1 %vm3928_vm1, %v6516_v61  ;;  %v4859_v25 = vadd.f32 %v12049_v23, %v15688_v21  ;;  %v6461_v61 = vld [vmem:[#allocation3 + $0x99] sm:$0xff]  ;;  %v6463_v23 = vld [vmem:[#allocation3 + $0xa9] sm:$0xff] }
 0x314   : > { %12255 = vmatprep.mubr.msk.bf16.mxu1 %vm3928_vm1, %v6517_v15  ;;  %v4754_v13 = vpop.f32.mrf.mxu1  ;;  %v6518_v15 = vpack.c.bf16 %v6494_v35, %v6461_v61 }
 0x315   : > { %v12083_v7 = vpop.f32.mrf.mxu0  ;;  %v4857_v20 = vadd.f32 %v4754_v13, %v15695_v56  ;;  %v6519_v56 = vpack.c.bf16 %v6496_v54, %v6463_v23  ;;  %v6468_v13 = vld [vmem:[#allocation3 + $0xd1] sm:$0xff] }
 0x316   : > { %v15833_v38 = vadd.f32 %v12083_v7, %v4859_v25  ;;  %v12050_v55 = vpop.f32.mrf.mxu1  ;;  %v6466_v7 = vld [vmem:[#allocation3 + $0xc1] sm:$0xff]  ;;  %v6500_v54 = vmul.f32 %v18911_v3, %v6468_v13 }
 0x317   : > { %v5080_v14 = vpop.f32.mrf.mxu0  ;;  %v4860_v8 = vadd.f32 %v12050_v55, %v15697_v22  ;;  %v6498_v35 = vmul.f32 %v18910_v58, %v6466_v7 }
 0x318   : > { %v15837_v44 = vadd.f32 %v5080_v14, %v4857_v20  ;;  %v4757_v21 = vpop.f32.mrf.mxu1 }
 0x319   : > { %v12084_v50 = vpop.f32.mrf.mxu0  ;;  %v15845_v19 = vadd.f32 %v4757_v21, %v15699_v63 }
 0x31a   : > { %v15842_v12 = vadd.f32 %v12084_v50, %v4860_v8  ;;  %v12053_v0 = vpop.f32.mrf.mxu1 }
 0x31b   : > { %v15840_v39 = vpop.f32.mrf.mxu0  ;;  %12256 = vmatmul.mubr.msk.bf16.gmra.mxu1 %vm3928_vm1, %v6518_v15  ;;  %v4863_v22 = vadd.f32 %v12053_v0, %v15706_v24  ;;  %v6465_v15 = vld [vmem:[#allocation3 + $0xb9] sm:$0xff]  ;;  %v6467_v0 = vld [vmem:[#allocation3 + $0xc9] sm:$0xff] }
 0x31c   : > { %12259 = vmatprep.mubr.msk.bf16.mxu1 %vm3928_vm1, %v6519_v56  ;;  %v4770_v14 = vpop.f32.mrf.mxu1  ;;  %v6520_v56 = vpack.c.bf16 %v6498_v35, %v6465_v15 }
 0x31d   : > { %v12087_v25 = vpop.f32.mrf.mxu0  ;;  %v4861_v63 = vadd.f32 %v4770_v14, %v15713_v59  ;;  %v6521_v59 = vpack.c.bf16 %v6500_v54, %v6467_v0  ;;  %v6472_v14 = vld [vmem:[#allocation3 + $0xf1] sm:$0xff] }
 0x31e   : > { %v15851_v55 = vadd.f32 %v12087_v25, %v4863_v22  ;;  %v12054_v50 = vpop.f32.mrf.mxu1  ;;  %v6470_v25 = vld [vmem:[#allocation3 + $0xe1] sm:$0xff]  ;;  %v6504_v54 = vmul.f32 %v18913_v1, %v6472_v14 }
 0x31f   : > { %v5096_v20 = vpop.f32.mrf.mxu0  ;;  %v4864_v21 = vadd.f32 %v12054_v50, %v15715_v31  ;;  %v6502_v35 = vmul.f32 %v18912_v42, %v6470_v25 }
 0x320   : > { %v15855_v61 = vadd.f32 %v5096_v20, %v4861_v63  ;;  %v4773_v24 = vpop.f32.mrf.mxu1 }
 0x321   : > { %v12088_v8 = vpop.f32.mrf.mxu0  ;;  %v15863_v7 = vadd.f32 %v4773_v24, %v15717_v62 }
 0x322   : > { %v15860_v29 = vadd.f32 %v12088_v8, %v4864_v21  ;;  %v12057_v13 = vpop.f32.mrf.mxu1 }
 0x323   : > { %v15858_v23 = vpop.f32.mrf.mxu0  ;;  %12260 = vmatmul.mubr.msk.bf16.gmra.mxu1 %vm3928_vm1, %v6520_v56  ;;  %v4867_v31 = vadd.f32 %v12057_v13, %v15725_v33  ;;  %v6469_v56 = vld [vmem:[#allocation3 + $0xd9] sm:$0xff]  ;;  %v6471_v13 = vld [vmem:[#allocation3 + $0xe9] sm:$0xff] }
 0x324   : > { %12263 = vmatprep.mubr.msk.bf16.mxu1 %vm3928_vm1, %v6521_v59  ;;  %v4786_v20 = vpop.f32.mrf.mxu1  ;;  %v6522_v59 = vpack.c.bf16 %v6502_v35, %v6469_v56 }
 0x325   : > { %v12091_v22 = vpop.f32.mrf.mxu0  ;;  %v4865_v62 = vadd.f32 %v4786_v20, %v15733_v26 }
 0x326   : > { %v15869_v50 = vadd.f32 %v12091_v22, %v4867_v31  ;;  %v12058_v8 = vpop.f32.mrf.mxu1  ;;  %v6523_v22 = vpack.c.bf16 %v6504_v54, %v6471_v13  ;;  %v6474_v31 = vld [vmem:[#allocation3 + $0x101] sm:$0xff]  ;;  %v6473_v13 = vld [vmem:[#allocation3 + $0xf9] sm:$0xff] }
 0x327   : > { %v5112_v63 = vpop.f32.mrf.mxu0  ;;  %v4868_v24 = vadd.f32 %v12058_v8, %v15737_v40 }
 0x328   : > { %v15873_v15 = vadd.f32 %v5112_v63, %v4865_v62  ;;  %v15876_v33 = vpop.f32.mrf.mxu1  ;;  %v6506_v62 = vmul.f32 %v18914_v9, %v6474_v31 }
 0x329   : > { %v12092_v21 = vpop.f32.mrf.mxu0  ;;  %18965 = vst [vmem:[#allocation91_spill] sm:$0xff] %v15876_v33 }
 0x32a   : > { %v15880_v25 = vadd.f32 %v12092_v21, %v4868_v24  ;;  %v12061_v26 = vpop.f32.mrf.mxu1 }
 0x32b   : > { %v15878_v0 = vpop.f32.mrf.mxu0  ;;  %12264 = vmatmul.mubr.msk.bf16.gmra.mxu1 %vm3928_vm1, %v6522_v59  ;;  %v4871_v14 = vadd.f32 %v12061_v26, %v15745_v2  ;;  %v6478_v59 = vld [vmem:[#allocation3 + $0x121] sm:$0xff] }
 0x32c   : > { %18966 = vst [vmem:[#allocation62_spill] sm:$0xff] %v15878_v0  ;;  %12267 = vmatprep.mubr.msk.bf16.mxu1 %vm3928_vm1, %v6523_v22  ;;  %v4802_v40 = vpop.f32.mrf.mxu1  ;;  %v6524_v22 = vpack.c.bf16 %v6506_v62, %v6473_v13 }
 0x32d   : > { %v12095_v20 = vpop.f32.mrf.mxu0  ;;  %v4869_v35 = vadd.f32 %v4802_v40, %v15749_v48  ;;  %v6510_v48 = vmul.f32 %v18915_v57, %v6478_v59  ;;  %v18969_v40 = vld [vmem:[#allocation58_spill] sm:$0xff] }
 0x32e   : > { %v15886_v8 = vadd.f32 %v12095_v20, %v4871_v14  ;;  %v12062_v21 = vpop.f32.mrf.mxu1 }
 0x32f   : > { %v5128_v63 = vpop.f32.mrf.mxu0  ;;  %v4872_v56 = vadd.f32 %v12062_v21, %v15752_v27  ;;  %v18970_v27 = vpack.c.bf16 %v18969_v40, %v15417_v34 }
 0x330   : > { %v15889_v54 = vadd.f32 %v5128_v63, %v4869_v35  ;;  %v15892_v1 = vpop.f32.mrf.mxu1  ;;  %v6477_v63 = vld [vmem:[#allocation3 + $0x119] sm:$0xff] }
 0x331   : > { %v12096_v24 = vpop.f32.mrf.mxu0  ;;  %18967 = vst [vmem:[#allocation24_spill] sm:$0xff] %v15892_v1  ;;  %v6526_v13 = vpack.c.bf16 %v6510_v48, %v6477_v63 }
 0x332   : > { %v15896_v26 = vadd.f32 %v12096_v24, %v4872_v56  ;;  %v12065_v31 = vpop.f32.mrf.mxu1 }
 0x333   : > { %v15894_v2 = vpop.f32.mrf.mxu0  ;;  %12268 = vmatmul.mubr.msk.bf16.gmra.mxu1 %vm3928_vm1, %v6524_v22  ;;  %v4875_v14 = vadd.f32 %v12065_v31, %v15760_v53 }
 0x334   : > { %18968 = vst [vmem:[#allocation38_spill] sm:$0xff] %v15894_v2  ;;  %12271 = vmatprep.mubr.msk.bf16.mxu1 %vm3928_vm1, %v18970_v27  ;;  %v4818_v35 = vpop.f32.mrf.mxu1 }
 0x335   : > { %v12099_v20 = vpop.f32.mrf.mxu0  ;;  %v4873_v62 = vadd.f32 %v4818_v35, %v15769_v47 }
 0x336   : > { %v15905_v9 = vadd.f32 %v12099_v20, %v4875_v14  ;;  %v12066_v24 = vpop.f32.mrf.mxu1 }
 0x337   : > { %v5144_v21 = vpop.f32.mrf.mxu0  ;;  %v4876_v59 = vadd.f32 %v12066_v24, %v15772_v11 }
 0x338   : > { %v15908_v22 = vadd.f32 %v5144_v21, %v4873_v62  ;;  %v15911_v53 = vpop.f32.mrf.mxu1 }
 0x339   : > { %v12100_v56 = vpop.f32.mrf.mxu0  ;;  %18971 = vst [vmem:[#allocation31_spill] sm:$0xff] %v15911_v53 }
 0x33a   : > { %v15915_v34 = vadd.f32 %v12100_v56, %v4876_v59  ;;  %v12069_v40 = vpop.f32.mrf.mxu1 }
 0x33b   : > { %v15913_v31 = vpop.f32.mrf.mxu0  ;;  %12272 = vmatmul.mubr.msk.bf16.gmra.mxu1 %vm3928_vm1, %v6526_v13  ;;  %v4879_v20 = vadd.f32 %v12069_v40, %v15780_v10 }
 0x33c   : > { %18972 = vst [vmem:[#allocation80_spill] sm:$0xff] %v15913_v31  ;;  %v4834_v47 = vpop.f32.mrf.mxu1 }
 0x33d   : > { %v12103_v27 = vpop.f32.mrf.mxu0  ;;  %v4877_v48 = vadd.f32 %v4834_v47, %v15784_v46 }
 0x33e   : > { %v15919_v35 = vadd.f32 %v12103_v27, %v4879_v20  ;;  %v12070_v63 = vpop.f32.mrf.mxu1 }
 0x33f   : > { %v5160_v14 = vpop.f32.mrf.mxu0  ;;  %v4880_v62 = vadd.f32 %v12070_v63, %v15787_v45 }
 0x340   : > { %v15922_v21 = vadd.f32 %v5160_v14, %v4877_v48  ;;  %v15925_v24 = vpop.f32.mrf.mxu1 }
 0x341   : > { %v12104_v11 = vpop.f32.mrf.mxu0  ;;  %18973 = vst [vmem:[#allocation94_spill] sm:$0xff] %v15925_v24 }
 0x342   : > { %v15929_v59 = vadd.f32 %v12104_v11, %v4880_v62  ;;  %v12109_v13 = vpop.f32.mrf.mxu1 }
 0x343   : > { %v15927_v56 = vpop.f32.mrf.mxu0  ;;  %v15934_v40 = vadd.f32 %v12109_v13, %v15797_v18 }
 0x344   : > { %18974 = vst [vmem:[#allocation10_spill] sm:$0xff] %v15927_v56  ;;  %v5342_v27 = vpop.f32.mrf.mxu1 }
 0x345   : > { %v15931_v10 = vpop.f32.mrf.mxu0  ;;  %v15939_v20 = vadd.f32 %v5342_v27, %v15801_v16 }
 0x346   : > { %v12110_v47 = vpop.f32.mrf.mxu1 }
 0x347   : > { %v15936_v46 = vpop.f32.mrf.mxu0  ;;  %v15944_v14 = vadd.f32 %v12110_v47, %v15806_v32 }
 0x348   : > { %v15946_v48 = vpop.f32.mrf.mxu1 }
 0x349   : > { %v15941_v45 = vpop.f32.mrf.mxu0 }
 0x34a   : > { %v12113_v11 = vpop.f32.mrf.mxu1 }
 0x34b   : > { %v15948_v63 = vpop.f32.mrf.mxu0  ;;  %v5475_v18 = vadd.f32 %v12113_v11, %v15815_v17 }
 0x34c   : > { %v5358_v13 = vpop.f32.mrf.mxu1 }
 0x34d   : > { %v12147_v62 = vpop.f32.mrf.mxu0  ;;  %v15956_v16 = vadd.f32 %v5358_v13, %v15819_v49 }
 0x34e   : > { %v15953_v42 = vadd.f32 %v12147_v62, %v5475_v18  ;;  %v12114_v27 = vpop.f32.mrf.mxu1 }
 0x34f   : > { %v15951_v57 = vpop.f32.mrf.mxu0  ;;  %v5476_v32 = vadd.f32 %v12114_v27, %v15824_v37 }
 0x350   : > { %v15959_v47 = vpop.f32.mrf.mxu1 }
 0x351   : > { %v12148_v3 = vpop.f32.mrf.mxu0 }
 0x352   : > { %v15963_v52 = vadd.f32 %v12148_v3, %v5476_v32  ;;  %v12117_v60 = vpop.f32.mrf.mxu1 }
 0x353   : > { %v15961_v58 = vpop.f32.mrf.mxu0  ;;  %v5479_v11 = vadd.f32 %v12117_v60, %v15833_v38 }
 0x354   : > { %v5374_v4 = vpop.f32.mrf.mxu1 }
 0x355   : > { %v12151_v17 = vpop.f32.mrf.mxu0  ;;  %v15971_v49 = vadd.f32 %v5374_v4, %v15837_v44 }
 0x356   : > { %v15968_v18 = vadd.f32 %v12151_v17, %v5479_v11  ;;  %v12118_v13 = vpop.f32.mrf.mxu1 }
 0x357   : > { %v15966_v62 = vpop.f32.mrf.mxu0  ;;  %v5480_v27 = vadd.f32 %v12118_v13, %v15842_v12 }
 0x358   : > { %v15974_v56 = vpop.f32.mrf.mxu1 }
 0x359   : > { %v12152_v37 = vpop.f32.mrf.mxu0 }
 0x35a   : > { %v15978_v32 = vadd.f32 %v12152_v37, %v5480_v27  ;;  %v12121_v24 = vpop.f32.mrf.mxu1 }
 0x35b   : > { %v15976_v3 = vpop.f32.mrf.mxu0  ;;  %v5483_v38 = vadd.f32 %v12121_v24, %v15851_v55 }
 0x35c   : > { %v5390_v31 = vpop.f32.mrf.mxu1 }
 0x35d   : > { %v12155_v60 = vpop.f32.mrf.mxu0  ;;  %v15986_v4 = vadd.f32 %v5390_v31, %v15855_v61 }
 0x35e   : > { %v15983_v11 = vadd.f32 %v12155_v60, %v5483_v38  ;;  %v12122_v44 = vpop.f32.mrf.mxu1 }
 0x35f   : > { %v15981_v17 = vpop.f32.mrf.mxu0  ;;  %18976 = vst [vmem:[#allocation96_spill] sm:$0xff] %v15986_v4  ;;  %v5484_v13 = vadd.f32 %v12122_v44, %v15860_v29 }
 0x360   : > { %18975 = vst [vmem:[#allocation81_spill] sm:$0xff] %v15981_v17  ;;  %v15989_v53 = vpop.f32.mrf.mxu1 }
 0x361   : > { %v12156_v12 = vpop.f32.mrf.mxu0  ;;  %18977 = vst [vmem:[#allocation98_spill] sm:$0xff] %v15989_v53 }
 0x362   : > { %v15993_v27 = vadd.f32 %v12156_v12, %v5484_v13  ;;  %v12125_v51 = vpop.f32.mrf.mxu1 }
 0x363   : > { %v15991_v37 = vpop.f32.mrf.mxu0  ;;  %v5487_v24 = vadd.f32 %v12125_v51, %v15869_v50 }
 0x364   : > { %18978 = vst [vmem:[#allocation87_spill] sm:$0xff] %v15991_v37  ;;  %v5406_v2 = vpop.f32.mrf.mxu1 }
 0x365   : > { %v12159_v55 = vpop.f32.mrf.mxu0  ;;  %v16001_v61 = vadd.f32 %v5406_v2, %v15873_v15 }
 0x366   : > { %v15998_v38 = vadd.f32 %v12159_v55, %v5487_v24  ;;  %v12126_v31 = vpop.f32.mrf.mxu1 }
 0x367   : > { %v15996_v60 = vpop.f32.mrf.mxu0  ;;  %18980 = vst [vmem:[#allocation64_spill] sm:$0xff] %v16001_v61  ;;  %v5488_v44 = vadd.f32 %v12126_v31, %v15880_v25 }
 0x368   : > { %18979 = vst [vmem:[#allocation100_spill] sm:$0xff] %v15996_v60  ;;  %v16004_v1 = vpop.f32.mrf.mxu1 }
 0x369   : > { %v12160_v29 = vpop.f32.mrf.mxu0  ;;  %18981 = vst [vmem:[#allocation34_spill] sm:$0xff] %v16004_v1 }
 0x36a   : > { %v16008_v13 = vadd.f32 %v12160_v29, %v5488_v44  ;;  %v12129_v5 = vpop.f32.mrf.mxu1 }
 0x36b   : > { %v16006_v12 = vpop.f32.mrf.mxu0  ;;  %v5491_v50 = vadd.f32 %v12129_v5, %v15886_v8 }
 0x36c   : > { %18982 = vst [vmem:[#allocation84_spill] sm:$0xff] %v16006_v12  ;;  %v5422_v60 = vpop.f32.mrf.mxu1 }
 0x36d   : > { %v12163_v51 = vpop.f32.mrf.mxu0  ;;  %v16016_v15 = vadd.f32 %v5422_v60, %v15889_v54 }
 0x36e   : > { %v16013_v24 = vadd.f32 %v12163_v51, %v5491_v50  ;;  %v12130_v2 = vpop.f32.mrf.mxu1 }
 0x36f   : > { %v16011_v55 = vpop.f32.mrf.mxu0  ;;  %18984 = vst [vmem:[#allocation90_spill] sm:$0xff] %v16016_v15  ;;  %v5492_v31 = vadd.f32 %v12130_v2, %v15896_v26 }
 0x370   : > { %18983 = vst [vmem:[#allocation14_spill] sm:$0xff] %v16011_v55  ;;  %v16019_v1 = vpop.f32.mrf.mxu1 }
 0x371   : > { %v12164_v25 = vpop.f32.mrf.mxu0  ;;  %18985 = vst [vmem:[#allocation102_spill] sm:$0xff] %v16019_v1 }
 0x372   : > { %v16023_v44 = vadd.f32 %v12164_v25, %v5492_v31  ;;  %v12133_v12 = vpop.f32.mrf.mxu1 }
 0x373   : > { %v16021_v29 = vpop.f32.mrf.mxu0  ;;  %v5495_v8 = vadd.f32 %v12133_v12, %v15905_v9 }
 0x374   : > { %18986 = vst [vmem:[#allocation18_spill] sm:$0xff] %v16021_v29  ;;  %v5438_v55 = vpop.f32.mrf.mxu1 }
 0x375   : > { %v12167_v5 = vpop.f32.mrf.mxu0  ;;  %v16031_v54 = vadd.f32 %v5438_v55, %v15908_v22 }
 0x376   : > { %v16028_v50 = vadd.f32 %v12167_v5, %v5495_v8  ;;  %v12134_v60 = vpop.f32.mrf.mxu1 }
 0x377   : > { %v16026_v51 = vpop.f32.mrf.mxu0  ;;  %18988 = vst [vmem:[#allocation104_spill] sm:$0xff] %v16031_v54  ;;  %v5496_v2 = vadd.f32 %v12134_v60, %v15915_v34 }
 0x378   : > { %18987 = vst [vmem:[#allocation93_spill] sm:$0xff] %v16026_v51  ;;  %v16034_v1 = vpop.f32.mrf.mxu1 }
 0x379   : > { %v12168_v26 = vpop.f32.mrf.mxu0  ;;  %18989 = vst [vmem:[#allocation105_spill] sm:$0xff] %v16034_v1 }
 0x37a   : > { %v16038_v31 = vadd.f32 %v12168_v26, %v5496_v2  ;;  %v12137_v29 = vpop.f32.mrf.mxu1 }
 0x37b   : > { %v16036_v25 = vpop.f32.mrf.mxu0  ;;  %v5499_v12 = vadd.f32 %v12137_v29, %v15919_v35 }
 0x37c   : > { %18990 = vst [vmem:[#allocation95_spill] sm:$0xff] %v16036_v25  ;;  %v5454_v51 = vpop.f32.mrf.mxu1 }
 0x37d   : > { %v12171_v9 = vpop.f32.mrf.mxu0  ;;  %v16046_v22 = vadd.f32 %v5454_v51, %v15922_v21 }
 0x37e   : > { %v16043_v8 = vadd.f32 %v12171_v9, %v5499_v12  ;;  %v12138_v55 = vpop.f32.mrf.mxu1 }
 0x37f   : > { %v16041_v5 = vpop.f32.mrf.mxu0  ;;  %18992 = vst [vmem:[#allocation67_spill] sm:$0xff] %v16046_v22  ;;  %v5500_v60 = vadd.f32 %v12138_v55, %v15929_v59 }
 0x380   : > { %18991 = vst [vmem:[#allocation106_spill] sm:$0xff] %v16041_v5  ;;  %v16049_v1 = vpop.f32.mrf.mxu1 }
 0x381   : > { %v12172_v34 = vpop.f32.mrf.mxu0  ;;  %18993 = vst [vmem:[#allocation35_spill] sm:$0xff] %v16049_v1 }
 0x382   : > { %v16053_v2 = vadd.f32 %v12172_v34, %v5500_v60  ;;  %v16055_v25 = vpop.f32.mrf.mxu1 }
 0x383   : > { %v16051_v26 = vpop.f32.mrf.mxu0 }
 0x384   : > { %18994 = vst [vmem:[#allocation97_spill] sm:$0xff] %v16051_v26  ;;  %v16059_v29 = vpop.f32.mrf.mxu1 }
 0x385   : > { %v16057_v35 = vpop.f32.mrf.mxu0 }
 0x386   : > { %v16063_v21 = vpop.f32.mrf.mxu1 }
 0x387   : > { %v16061_v9 = vpop.f32.mrf.mxu0 }
 0x388   : > { %v16067_v12 = vpop.f32.mrf.mxu1 }
 0x389   : > { %v16065_v51 = vpop.f32.mrf.mxu0 }
 0x38a   : > { %v12181_v55 = vpop.f32.mrf.mxu1 }
 0x38b   : > { %v16069_v59 = vpop.f32.mrf.mxu0  ;;  %v16074_v34 = vadd.f32 %v12181_v55, %v15953_v42 }
 0x38c   : > { %v16076_v60 = vpop.f32.mrf.mxu1 }
 0x38d   : > { %v16071_v26 = vpop.f32.mrf.mxu0 }
 0x38e   : > { %v12182_v5 = vpop.f32.mrf.mxu1 }
 0x38f   : > { %v16078_v1 = vpop.f32.mrf.mxu0  ;;  %v16083_v54 = vadd.f32 %v12182_v5, %v15963_v52 }
 0x390   : > { %v16085_v15 = vpop.f32.mrf.mxu1 }
 0x391   : > { %v16080_v22 = vpop.f32.mrf.mxu0 }
 0x392   : > { %v12185_v0 = vpop.f32.mrf.mxu1 }
 0x393   : > { %v16087_v61 = vpop.f32.mrf.mxu0  ;;  %v16092_v42 = vadd.f32 %v12185_v0, %v15968_v18 }
 0x394   : > { %v16094_v55 = vpop.f32.mrf.mxu1 }
 0x395   : > { %v16089_v37 = vpop.f32.mrf.mxu0  ;;  %18996 = vst [vmem:[#allocation99_spill] sm:$0xff] %v16092_v42 }
 0x396   : > { %18995 = vst [vmem:[#allocation65_spill] sm:$0xff] %v16089_v37  ;;  %v12186_v17 = vpop.f32.mrf.mxu1 }
 0x397   : > { %v16096_v33 = vpop.f32.mrf.mxu0  ;;  %v16101_v52 = vadd.f32 %v12186_v17, %v15978_v32 }
 0x398   : > { %18997 = vst [vmem:[#allocation107_spill] sm:$0xff] %v16096_v33  ;;  %v16103_v5 = vpop.f32.mrf.mxu1 }
 0x399   : > { %v16098_v4 = vpop.f32.mrf.mxu0  ;;  %18999 = vst [vmem:[#allocation101_spill] sm:$0xff] %v16101_v52 }
 0x39a   : > { %18998 = vst [vmem:[#allocation47_spill] sm:$0xff] %v16098_v4  ;;  %v12189_v6 = vpop.f32.mrf.mxu1 }
 0x39b   : > { %v16105_v53 = vpop.f32.mrf.mxu0  ;;  %v16110_v0 = vadd.f32 %v12189_v6, %v15983_v11 }
 0x39c   : > { %19000 = vst [vmem:[#allocation108_spill] sm:$0xff] %v16105_v53  ;;  %v16112_v18 = vpop.f32.mrf.mxu1 }
 0x39d   : > { %v16107_v36 = vpop.f32.mrf.mxu0  ;;  %19002 = vst [vmem:[#allocation103_spill] sm:$0xff] %v16110_v0 }
 0x39e   : > { %19001 = vst [vmem:[#allocation109_spill] sm:$0xff] %v16107_v36  ;;  %v12190_v33 = vpop.f32.mrf.mxu1 }
 0x39f   : > { %v16114_v37 = vpop.f32.mrf.mxu0  ;;  %v16119_v32 = vadd.f32 %v12190_v33, %v15993_v27 }
 0x3a0   : > { %19003 = vst [vmem:[#allocation110_spill] sm:$0xff] %v16114_v37  ;;  %v16121_v17 = vpop.f32.mrf.mxu1 }
 0x3a1   : > { %v16116_v42 = vpop.f32.mrf.mxu0  ;;  %19005 = vst [vmem:[#allocation56_spill] sm:$0xff] %v16119_v32 }
 0x3a2   : > { %19004 = vst [vmem:[#allocation66_spill] sm:$0xff] %v16116_v42  ;;  %v12193_v52 = vpop.f32.mrf.mxu1 }
 0x3a3   : > { %v16123_v4 = vpop.f32.mrf.mxu0  ;;  %v16128_v6 = vadd.f32 %v12193_v52, %v15998_v38 }
 0x3a4   : > { %19006 = vst [vmem:[#allocation11_spill] sm:$0xff] %v16123_v4  ;;  %v16130_v11 = vpop.f32.mrf.mxu1 }
 0x3a5   : > { %v16125_v53 = vpop.f32.mrf.mxu0  ;;  %19008 = vst [vmem:[#allocation17_spill] sm:$0xff] %v16128_v6 }
 0x3a6   : > { %19007 = vst [vmem:[#allocation12_spill] sm:$0xff] %v16125_v53  ;;  %v12194_v37 = vpop.f32.mrf.mxu1 }
 0x3a7   : > { %v16132_v36 = vpop.f32.mrf.mxu0  ;;  %v16137_v33 = vadd.f32 %v12194_v37, %v16008_v13 }
 0x3a8   : > { %19009 = vst [vmem:[#allocation28_spill] sm:$0xff] %v16132_v36  ;;  %v16139_v27 = vpop.f32.mrf.mxu1 }
 0x3a9   : > { %v16134_v0 = vpop.f32.mrf.mxu0  ;;  %19011 = vst [vmem:[#allocation13_spill] sm:$0xff] %v16137_v33 }
 0x3aa   : > { %19010 = vst [vmem:[#allocation53_spill] sm:$0xff] %v16134_v0 }
 0x3ab   : > { %v16141_v42 = vpop.f32.mrf.mxu0  ;;  %v12197_v32 = vpop.f32.mrf.mxu1 }
 0x3ac   : > { %19012 = vst [vmem:[#allocation68_spill] sm:$0xff] %v16141_v42  ;;  %v16146_v38 = vadd.f32 %v12197_v32, %v16013_v24 }
 0x3ad   : > { %v16143_v4 = vpop.f32.mrf.mxu0  ;;  %v16148_v52 = vpop.f32.mrf.mxu1 }
 0x3ae   : > { %19013 = vst [vmem:[#allocation55_spill] sm:$0xff] %v16143_v4  ;;  %19014 = vst [vmem:[#allocation46_spill] sm:$0xff] %v16146_v38 }
 0x3af   : > { %v16150_v53 = vpop.f32.mrf.mxu0  ;;  %v12198_v6 = vpop.f32.mrf.mxu1 }
 0x3b0   : > { %19015 = vst [vmem:[#allocation69_spill] sm:$0xff] %v16150_v53  ;;  %v16155_v37 = vadd.f32 %v12198_v6, %v16023_v44 }
 0x3b1   : > { %v16152_v36 = vpop.f32.mrf.mxu0  ;;  %v16157_v13 = vpop.f32.mrf.mxu1 }
 0x3b2   : > { %19016 = vst [vmem:[#allocation9_spill] sm:$0xff] %v16152_v36 }
 0x3b3   : > { %v16159_v0 = vpop.f32.mrf.mxu0  ;;  %v12201_v33 = vpop.f32.mrf.mxu1 }
 0x3b4   : > { %19017 = vst [vmem:[#allocation71_spill] sm:$0xff] %v16159_v0  ;;  %v16164_v24 = vadd.f32 %v12201_v33, %v16028_v50  ;;  %v5797_v33 = vadd.f32 %v15931_v10, %v15934_v40  ;;  %v5798_v10 = vadd.f32 %v15941_v45, %v15944_v14  ;;  %v16209_v45 = vld [vmem:[%s18174_s4] ss:$0 sm:$0xff]  ;;  %v5180_v14 = vadd.f32 %v15822_v28, %v15827_v43 }
 0x3b5   : > { %v16161_v42 = vpop.f32.mrf.mxu0  ;;  %v16166_v32 = vpop.f32.mrf.mxu1 }
 0x3b6   : > { %19018 = vst [vmem:[#allocation16_spill] sm:$0xff] %v16161_v42  ;;  %19019 = vst [vmem:[#allocation73_spill] sm:$0xff] %v16164_v24  ;;  %v5176_v42 = vadd.f32 %v15804_v41, %v15809_v30 }
 0x3b7   : > { %v16168_v4 = vpop.f32.mrf.mxu0  ;;  %v12202_v38 = vpop.f32.mrf.mxu1 }
 0x3b8   : > { %19020 = vst [vmem:[#allocation77_spill] sm:$0xff] %v16168_v4  ;;  %v16173_v44 = vadd.f32 %v12202_v38, %v16038_v31  ;;  %v5470_v4 = vadd.f32 %v15946_v48, %v5176_v42  ;;  %v5795_v38 = vadd.f32 %v15936_v46, %v15939_v20  ;;  %v6124_v46 = vadd.f32 %v16063_v21, %v5798_v10 }
 0x3b9   : > { %v16170_v53 = vpop.f32.mrf.mxu0  ;;  %v16175_v6 = vpop.f32.mrf.mxu1 }
 0x3ba   : > { %19021 = vst [vmem:[#allocation23_spill] sm:$0xff] %v16170_v53  ;;  %19022 = vst [vmem:[#allocation41_spill] sm:$0xff] %v16173_v44  ;;  %v6121_v40 = vadd.f32 %v16059_v29, %v5795_v38  ;;  %v6418_v29 = vadd.f32 %v16065_v51, %v6124_v46 }
 0x3bb   : > { %v16177_v36 = vpop.f32.mrf.mxu0  ;;  %v12205_v0 = vpop.f32.mrf.mxu1 }
 0x3bc   : > { %19023 = vst [vmem:[#allocation74_spill] sm:$0xff] %v16177_v36  ;;  %v6151_v24 = vadd.f32 %v12205_v0, %v16043_v8  ;;  %v6123_v36 = vadd.f32 %v16055_v25, %v5797_v33  ;;  %v5796_v8 = vadd.f32 %v15948_v63, %v5470_v4  ;;  %v6415_v63 = vadd.f32 %v16061_v9, %v6121_v40 }
 0x3bd   : > { %v12239_v50 = vpop.f32.mrf.mxu0  ;;  %v16185_v53 = vpop.f32.mrf.mxu1 }
 0x3be   : > { %v16192_v44 = vadd.f32 %v12239_v50, %v6151_v24  ;;  %v6417_v0 = vadd.f32 %v16057_v35, %v6123_v36  ;;  %v6122_v25 = vadd.f32 %v16067_v12, %v5796_v8  ;;  %v5799_v36 = vadd.f32 %v15951_v57, %v15956_v16 }
 0x3bf   : > { %v16187_v31 = vpop.f32.mrf.mxu0  ;;  %v12206_v41 = vpop.f32.mrf.mxu1  ;;  %v5474_v35 = vadd.f32 %v15959_v47, %v5180_v14  ;;  %v5188_v14 = vadd.f32 %v15858_v23, %v15863_v7  ;;  %v19027_v7 = vld [vmem:[#allocation51_spill] sm:$0xff] }
 0x3c0   : > { %v6152_v48 = vadd.f32 %v12206_v41, %v16053_v2  ;;  %v6416_v50 = vadd.f32 %v16069_v59, %v6122_v25  ;;  %v6125_v28 = vadd.f32 %v16076_v60, %v5799_v36  ;;  %v5184_v60 = vadd.f32 %v15840_v39, %v15845_v19  ;;  %v19024_v36 = vld [vmem:[#allocation99_spill] sm:$0xff] }
 0x3c1   : > { %v12240_v30 = vpop.f32.mrf.mxu0  ;;  %v16199_v42 = vpop.f32.mrf.mxu1  ;;  %v5800_v47 = vadd.f32 %v15961_v58, %v5474_v35  ;;  %v6421_v58 = vadd.f32 %v16071_v26, %v16074_v34 }
 0x3c2   : > { %v16203_v20 = vadd.f32 %v12240_v30, %v6152_v48  ;;  %v6419_v30 = vadd.f32 %v16078_v1, %v6125_v28  ;;  %v5478_v39 = vadd.f32 %v15974_v56, %v5184_v60 }
 0x3c3   : > { %v12245_v24 = vpop.f32.mrf.mxu1  ;;  %v6126_v10 = vadd.f32 %v16085_v15, %v5800_v47  ;;  %v19031_v47 = vld [vmem:[#allocation81_spill] sm:$0xff] }
 0x3c4   : > { %v6743_v4 = vadd.f32 %v12245_v24, %v6417_v0  ;;  %v5803_v0 = vadd.f32 %v15966_v62, %v15971_v49  ;;  %v6422_v24 = vadd.f32 %v16080_v22, %v16083_v54  ;;  %v5804_v62 = vadd.f32 %v15976_v3, %v5478_v39  ;;  %v19026_v54 = vld [vmem:[#allocation107_spill] sm:$0xff] }
 0x3c5   : > { %v6614_v2 = vpop.f32.mrf.mxu1  ;;  %v6420_v25 = vadd.f32 %v16087_v61, %v6126_v10  ;;  %v19035_v39 = vld [vmem:[#allocation47_spill] sm:$0xff] }
 0x3c6   : > { %v16219_v21 = vadd.f32 %v16209_v45, %v6743_v4  ;;  %v6741_v12 = vadd.f32 %v6614_v2, %v6415_v63  ;;  %v6129_v26 = vadd.f32 %v16094_v55, %v5803_v0  ;;  %v19025_v2 = vld [vmem:[#allocation65_spill] sm:$0xff] }
 0x3c7   : > { %v12246_v33 = vpop.f32.mrf.mxu1  ;;  %v6425_v35 = vadd.f32 %v19025_v2, %v19024_v36  ;;  %v19034_v0 = vld [vmem:[#allocation101_spill] sm:$0xff]  ;;  %v19038_v36 = vld [vmem:[#allocation103_spill] sm:$0xff] }
 0x3c8   : > { %v16224_v43 = vadd.f32 %v16209_v45, %v6741_v12  ;;  %v6744_v9 = vadd.f32 %v12246_v33, %v6418_v29  ;;  %v6814_v57 = vmax.f32 %v16219_v21, 0.0  ;;  %v6423_v22 = vadd.f32 %v19026_v54, %v6129_v26  ;;  %v19028_v12 = vld [vmem:[#allocation76_spill] sm:$0xff]  ;;  %v19029_v33 = vld [vmem:[#allocation98_spill] sm:$0xff]  ;;  %v19039_v2 = vld [vmem:[#allocation109_spill] sm:$0xff] }
 0x3c9   : > { %v6617_v16 = vpop.f32.mrf.mxu1  ;;  %v6130_v29 = vadd.f32 %v16103_v5, %v5804_v62  ;;  %v5482_v28 = vadd.f32 %v19029_v33, %v5188_v14  ;;  %v19040_v54 = vld [vmem:[#allocation110_spill] sm:$0xff]  ;;  %v19044_v33 = vld [vmem:[#allocation100_spill] sm:$0xff] }
 0x3ca   : > { %v16229_v51 = vadd.f32 %v16209_v45, %v6744_v9  ;;  %v6742_v38 = vadd.f32 %v6617_v16, %v6416_v50  ;;  %7264 = vrot.lane.b32.xlu1 %v6814_v57, %s12856_s20  ;;  %v6812_v41 = vmax.f32 %v16224_v43, 0.0  ;;  %v4496_v50 = vadd.f32 %v19028_v12, %v19027_v7  ;;  %v19030_v16 = vld [vmem:[#allocation96_spill] sm:$0xff]  ;;  %v19042_v7 = vld [vmem:[#allocation59_spill] sm:$0xff] }
 0x3cb   : > { %v12249_v59 = vpop.f32.mrf.mxu1 }
 0x3cc   : > { %v16238_v40 = vadd.f32 %v16209_v45, %v6742_v38  ;;  %7260 = vrot.lane.b32.xlu0 %v6812_v41, %s12856_s20  ;;  %v6815_v8 = vmax.f32 %v16229_v51, 0.0  ;;  %v6747_v1 = vadd.f32 %v12249_v59, %v6421_v58  ;;  %v5807_v38 = vadd.f32 %v19031_v47, %v19030_v16  ;;  %v19033_v58 = vld [vmem:[#allocation108_spill] sm:$0xff] }
 0x3cd   : > { %v6630_v48 = vpop.f32.mrf.mxu1 }
 0x3ce   : > { %v6745_v19 = vadd.f32 %v6630_v48, %v6419_v30  ;;  %7266 = vrot.lane.b32.xlu1 %v6815_v8, %s12856_s20  ;;  %v6813_v46 = vmax.f32 %v16238_v40, 0.0  ;;  %v16261_v63 = vadd.f32 %v16209_v45, %v6747_v1  ;;  %v19032_v30 = vld [vmem:[#allocation91_spill] sm:$0xff]  ;;  %v6424_v48 = vadd.f32 %v19033_v58, %v6130_v29 }
 0x3cf   : > { %v12250_v15 = vpop.f32.mrf.mxu1  ;;  %v4866_v10 = vadd.f32 %v19032_v30, %v4496_v50  ;;  %v6133_v1 = vadd.f32 %v16112_v18, %v5807_v38  ;;  %v19043_v50 = vld [vmem:[#allocation64_spill] sm:$0xff] }
 0x3d0   : > { %v16252_v34 = vadd.f32 %v16209_v45, %v6745_v19  ;;  %7262 = vrot.lane.b32.xlu0 %v6813_v46, %s12856_s20  ;;  %v6748_v61 = vadd.f32 %v12250_v15, %v6422_v24  ;;  %v6818_v60 = vmax.f32 %v16261_v63, 0.0  ;;  %v6426_v19 = vadd.f32 %v19035_v39, %v19034_v0  ;;  %v19036_v46 = vld [vmem:[#allocation87_spill] sm:$0xff]  ;;  %v19048_v0 = vld [vmem:[#allocation56_spill] sm:$0xff]  ;;  %v19049_v39 = vld [vmem:[#allocation66_spill] sm:$0xff] }
 0x3d1   : > { %v6633_v56 = vpop.f32.mrf.mxu1 }
 0x3d2   : > { %v6746_v49 = vadd.f32 %v6633_v56, %v6420_v25  ;;  %v6816_v4 = vmax.f32 %v16252_v34, 0.0  ;;  %v16278_v59 = vadd.f32 %v16209_v45, %v6748_v61  ;;  %v5808_v25 = vadd.f32 %v19036_v46, %v5482_v28  ;;  %v19037_v61 = vld [vmem:[#allocation62_spill] sm:$0xff]  ;;  %v19050_v46 = vld [vmem:[#allocation84_spill] sm:$0xff] }
 0x3d3   : > { %v12253_v55 = vpop.f32.mrf.mxu1  ;;  %v5811_v28 = vadd.f32 %v19044_v33, %v19043_v50  ;;  %v19057_v33 = vld [vmem:[#allocation90_spill] sm:$0xff] }
 0x3d4   : > { %v16269_v3 = vadd.f32 %v16209_v45, %v6746_v49  ;;  %7268 = vrot.lane.b32.xlu0 %v6816_v4, %s12856_s20  ;;  %v6751_v9 = vadd.f32 %v12253_v55, %v6425_v35  ;;  %v6819_v49 = vmax.f32 %v16278_v59, 0.0  ;;  %v5192_v55 = vadd.f32 %v19037_v61, %v4866_v10  ;;  %v19047_v10 = vld [vmem:[#allocation11_spill] sm:$0xff]  ;;  %v19051_v61 = vld [vmem:[#allocation38_spill] sm:$0xff] }
 0x3d5   : > { %v6646_v23 = vpop.f32.mrf.mxu1  ;;  %v6134_v18 = vadd.f32 %v16121_v17, %v5808_v25  ;;  %v6429_v35 = vadd.f32 %v19039_v2, %v19038_v36  ;;  %v19045_v17 = vld [vmem:[#allocation34_spill] sm:$0xff] }
 0x3d6   : > { %v6749_v57 = vadd.f32 %v6646_v23, %v6423_v22  ;;  %v6817_v41 = vmax.f32 %v16269_v3, 0.0  ;;  %v16294_v26 = vadd.f32 %v16209_v45, %v6751_v9  ;;  %v6427_v22 = vadd.f32 %v19040_v54, %v6133_v1  ;;  %v19041_v23 = vld [vmem:[#allocation45_spill] sm:$0xff] }
 0x3d7   : > { %v12254_v5 = vpop.f32.mrf.mxu1  ;;  %v4512_v12 = vadd.f32 %v19042_v7, %v19041_v23  ;;  %v5486_v9 = vadd.f32 %v19045_v17, %v5192_v55  ;;  %v6428_v58 = vadd.f32 %v19047_v10, %v6134_v18  ;;  %v19052_v18 = vld [vmem:[#allocation28_spill] sm:$0xff]  ;;  %v19053_v54 = vld [vmem:[#allocation17_spill] sm:$0xff]  ;;  %v19055_v7 = vld [vmem:[#allocation75_spill] sm:$0xff] }
 0x3d8   : > { %v16285_v8 = vadd.f32 %v16209_v45, %v6749_v57  ;;  %7270 = vrot.lane.b32.xlu1 %v6817_v41, %s12856_s20  ;;  %7272 = vrot.lane.b32.xlu0 %v6818_v60, %s12856_s20  ;;  %v6752_v56 = vadd.f32 %v12254_v5, %v6426_v19  ;;  %v6822_v57 = vmax.f32 %v16294_v26, 0.0  ;;  %v19046_v60 = vld [vmem:[#allocation24_spill] sm:$0xff]  ;;  %v6430_v19 = vadd.f32 %v19049_v39, %v19048_v0 }
 0x3d9   : > { %v6649_v15 = vpop.f32.mrf.mxu1  ;;  %v4870_v30 = vadd.f32 %v19046_v60, %v4512_v12  ;;  %v5812_v25 = vadd.f32 %v19050_v46, %v5486_v9  ;;  %v19056_v12 = vld [vmem:[#allocation82_spill] sm:$0xff] }
 0x3da   : > { %v6750_v24 = vadd.f32 %v6649_v15, %v6424_v48  ;;  %v6820_v14 = vmax.f32 %v16285_v8, 0.0  ;;  %v16315_v16 = vadd.f32 %v16209_v45, %v6752_v56  ;;  %v6137_v48 = vadd.f32 %v16130_v11, %v5811_v28  ;;  %v19058_v28 = vld [vmem:[#allocation14_spill] sm:$0xff] }
 0x3db   : > { %v12257_v62 = vpop.f32.mrf.mxu1  ;;  %v5196_v55 = vadd.f32 %v19051_v61, %v4870_v30  ;;  %v6138_v2 = vadd.f32 %v16139_v27, %v5812_v25  ;;  %v4528_v50 = vadd.f32 %v19056_v12, %v19055_v7  ;;  %v5815_v17 = vadd.f32 %v19058_v28, %v19057_v33  ;;  %v19059_v9 = vld [vmem:[#allocation102_spill] sm:$0xff]  ;;  %v19060_v30 = vld [vmem:[#allocation31_spill] sm:$0xff] }
 0x3dc   : > { %v16301_v4 = vadd.f32 %v16209_v45, %v6750_v24  ;;  %7274 = vrot.lane.b32.xlu1 %v6819_v49, %s12856_s20  ;;  %7276 = vrot.lane.b32.xlu0 %v6820_v14, %s12856_s20  ;;  %v6755_v47 = vadd.f32 %v12257_v62, %v6429_v35  ;;  %v6823_v11 = vmax.f32 %v16315_v16, 0.0  ;;  %v6431_v36 = vadd.f32 %v19052_v18, %v6137_v48  ;;  %v19066_v61 = vld [vmem:[#allocation78_spill] sm:$0xff]  ;;  %v19070_v33 = vld [vmem:[#allocation55_spill] sm:$0xff] }
 0x3dd   : > { %v6662_v29 = vpop.f32.mrf.mxu1  ;;  %v4874_v10 = vadd.f32 %v19060_v30, %v4528_v50  ;;  %v6141_v0 = vadd.f32 %v16148_v52, %v5815_v17  ;;  %v19069_v50 = vld [vmem:[#allocation46_spill] sm:$0xff] }
 0x3de   : > { %v6753_v38 = vadd.f32 %v6662_v29, %v6427_v22  ;;  %v6821_v41 = vmax.f32 %v16301_v4, 0.0  ;;  %v16330_v56 = vadd.f32 %v16209_v45, %v6755_v47  ;;  %v19054_v22 = vld [vmem:[#allocation12_spill] sm:$0xff]  ;;  %v6437_v28 = vadd.f32 %v19070_v33, %v19069_v50 }
 0x3df   : > { %v12258_v5 = vpop.f32.mrf.mxu1  ;;  %v6433_v29 = vadd.f32 %v19054_v22, %v19053_v54  ;;  %v19067_v54 = vld [vmem:[#allocation80_spill] sm:$0xff] }
 0x3e0   : > { %v16324_v1 = vadd.f32 %v16209_v45, %v6753_v38  ;;  %7278 = vrot.lane.b32.xlu1 %v6821_v41, %s12856_s20  ;;  %7280 = vrot.lane.b32.xlu0 %v6822_v57, %s12856_s20  ;;  %v6756_v62 = vadd.f32 %v12258_v5, %v6430_v19  ;;  %v5490_v57 = vadd.f32 %v19059_v9, %v5196_v55  ;;  %v6826_v60 = vmax.f32 %v16330_v56, 0.0  ;;  %v19062_v19 = vld [vmem:[#allocation13_spill] sm:$0xff]  ;;  %v19071_v9 = vld [vmem:[#allocation94_spill] sm:$0xff]  ;;  %v19081_v50 = vld [vmem:[#allocation16_spill] sm:$0xff] }
 0x3e1   : > { %v6665_v15 = vpop.f32.mrf.mxu1  ;;  %v5200_v22 = vadd.f32 %v19067_v54, %v4874_v10 }
 0x3e2   : > { %v6754_v24 = vadd.f32 %v6665_v15, %v6428_v58  ;;  %v6824_v14 = vmax.f32 %v16324_v1, 0.0  ;;  %v16350_v47 = vadd.f32 %v16209_v45, %v6756_v62  ;;  %v19061_v58 = vld [vmem:[#allocation68_spill] sm:$0xff]  ;;  %v19063_v15 = vld [vmem:[#allocation53_spill] sm:$0xff] }
 0x3e3   : > { %v12261_v49 = vpop.f32.mrf.mxu1  ;;  %v6432_v48 = vadd.f32 %v19061_v58, %v6138_v2  ;;  %v6434_v46 = vadd.f32 %v19063_v15, %v19062_v19  ;;  %v19075_v19 = vld [vmem:[#allocation9_spill] sm:$0xff] }
 0x3e4   : > { %v16338_v35 = vadd.f32 %v16209_v45, %v6754_v24  ;;  %7282 = vrot.lane.b32.xlu1 %v6823_v11, %s12856_s20  ;;  %7284 = vrot.lane.b32.xlu0 %v6824_v14, %s12856_s20  ;;  %v6759_v38 = vadd.f32 %v12261_v49, %v6433_v29  ;;  %v19064_v24 = vld [vmem:[#allocation18_spill] sm:$0xff]  ;;  %v19065_v14 = vld [vmem:[#allocation89_spill] sm:$0xff]  ;;  %v6827_v2 = vmax.f32 %v16350_v47, 0.0  ;;  %v6438_v15 = vadd.f32 %v19075_v19, %v16155_v37 }
 0x3e5   : > { %v6678_v23 = vpop.f32.mrf.mxu1  ;;  %v5816_v62 = vadd.f32 %v19064_v24, %v5490_v57  ;;  %v4544_v55 = vadd.f32 %v19066_v61, %v19065_v14  ;;  %v19068_v29 = vld [vmem:[#allocation69_spill] sm:$0xff]  ;;  %v19077_v61 = vld [vmem:[#allocation95_spill] sm:$0xff] }
 0x3e6   : > { %v6757_v27 = vadd.f32 %v6678_v23, %v6431_v36  ;;  %v6825_v41 = vmax.f32 %v16338_v35, 0.0  ;;  %v16369_v52 = vadd.f32 %v16209_v45, %v6759_v38  ;;  %v6435_v23 = vadd.f32 %v19068_v29, %v6141_v0  ;;  %v19073_v38 = vld [vmem:[#allocation93_spill] sm:$0xff] }
 0x3e7   : > { %v12262_v5 = vpop.f32.mrf.mxu1  ;;  %v6142_v7 = vadd.f32 %v16157_v13, %v5816_v62  ;;  %v4878_v57 = vadd.f32 %v19071_v9, %v4544_v55  ;;  %v19082_v9 = vld [vmem:[#allocation67_spill] sm:$0xff]  ;;  %v19085_v19 = vld [vmem:[#allocation41_spill] sm:$0xff] }
 0x3e8   : > { %v16358_v39 = vadd.f32 %v16209_v45, %v6757_v27  ;;  %7286 = vrot.lane.b32.xlu1 %v6825_v41, %s12856_s20  ;;  %7288 = vrot.lane.b32.xlu0 %v6826_v60, %s12856_s20  ;;  %v6760_v18 = vadd.f32 %v12262_v5, %v6434_v46  ;;  %v19072_v27 = vld [vmem:[#allocation104_spill] sm:$0xff]  ;;  %v19074_v41 = vld [vmem:[#allocation105_spill] sm:$0xff]  ;;  %v6830_v0 = vmax.f32 %v16369_v52, 0.0  ;;  %v19076_v46 = vld [vmem:[#allocation71_spill] sm:$0xff] }
 0x3e9   : > { %v6681_v25 = vpop.f32.mrf.mxu1  ;;  %v5819_v5 = vadd.f32 %v19073_v38, %v19072_v27  ;;  %v5494_v60 = vadd.f32 %v19074_v41, %v5200_v22  ;;  %v19079_v22 = vld [vmem:[#allocation77_spill] sm:$0xff]  ;;  %v19083_v27 = vld [vmem:[#allocation106_spill] sm:$0xff] }
 0x3ea   : > { %v6758_v49 = vadd.f32 %v6681_v25, %v6432_v48  ;;  %v6828_v11 = vmax.f32 %v16358_v39, 0.0  ;;  %v16387_v13 = vadd.f32 %v16209_v45, %v6760_v18  ;;  %v6436_v25 = vadd.f32 %v19076_v46, %v6142_v7  ;;  %v19080_v7 = vld [vmem:[#allocation73_spill] sm:$0xff] }
 0x3eb   : > { %v12265_v36 = vpop.f32.mrf.mxu1  ;;  %v6145_v24 = vadd.f32 %v16166_v32, %v5819_v5  ;;  %v5820_v55 = vadd.f32 %v19077_v61, %v5494_v60  ;;  %v6441_v33 = vadd.f32 %v19081_v50, %v19080_v7  ;;  %v5823_v38 = vadd.f32 %v19083_v27, %v19082_v9  ;;  %v19084_v5 = vld [vmem:[#allocation35_spill] sm:$0xff] }
 0x3ec   : > { %v16376_v12 = vadd.f32 %v16209_v45, %v6758_v49  ;;  %7290 = vrot.lane.b32.xlu1 %v6827_v2, %s12856_s20  ;;  %7292 = vrot.lane.b32.xlu0 %v6828_v11, %s12856_s20  ;;  %v6763_v10 = vadd.f32 %v12265_v36, %v6437_v28  ;;  %v6831_v36 = vmax.f32 %v16387_v13, 0.0  ;;  %v19078_v2 = vld [vmem:[#allocation10_spill] sm:$0xff] }
 0x3ed   : > { %v6694_v17 = vpop.f32.mrf.mxu1  ;;  %v5204_v54 = vadd.f32 %v19078_v2, %v4878_v57  ;;  %v6439_v29 = vadd.f32 %v19079_v22, %v6145_v24  ;;  %v6146_v28 = vadd.f32 %v16175_v6, %v5820_v55 }
 0x3ee   : > { %v6761_v30 = vadd.f32 %v6694_v17, %v6435_v23  ;;  %v6829_v48 = vmax.f32 %v16376_v12, 0.0  ;;  %v16402_v18 = vadd.f32 %v16209_v45, %v6763_v10 }
 0x3ef   : > { %v12266_v58 = vpop.f32.mrf.mxu1  ;;  %v5498_v57 = vadd.f32 %v19084_v5, %v5204_v54 }
 0x3f0   : > { %v16396_v62 = vadd.f32 %v16209_v45, %v6761_v30  ;;  %7294 = vrot.lane.b32.xlu1 %v6829_v48, %s12856_s20  ;;  %7296 = vrot.lane.b32.xlu0 %v6830_v0, %s12856_s20  ;;  %v6764_v11 = vadd.f32 %v12266_v58, %v6438_v15  ;;  %v6834_v6 = vmax.f32 %v16402_v18, 0.0  ;;  %v6149_v48 = vadd.f32 %v16185_v53, %v5823_v38  ;;  %v19086_v15 = vld [vmem:[#allocation23_spill] sm:$0xff] }
 0x3f1   : > { %v6697_v49 = vpop.f32.mrf.mxu1  ;;  %v6442_v46 = vadd.f32 %v19086_v15, %v19085_v19  ;;  %v11010_v19 = vmul.f32 -1.442695, %v16238_v40  ;;  %v11012_v15 = vmul.f32 -1.442695, %v16229_v51  ;;  %v11017_v51 = vmul.f32 -1.442695, %v16285_v8 }
 0x3f2   : > { %v6762_v14 = vadd.f32 %v6697_v49, %v6436_v25  ;;  %v6832_v32 = vmax.f32 %v16396_v62, 0.0  ;;  %v16420_v41 = vadd.f32 %v16209_v45, %v6764_v11  ;;  %v19087_v25 = vld [vmem:[#allocation74_spill] sm:$0xff]  ;;  %v19088_v11 = vld [vmem:[#allocation97_spill] sm:$0xff]  ;;  %v6443_v2 = vadd.f32 %v16187_v31, %v6149_v48 }
 0x3f3   : > { %v12269_v37 = vpop.f32.mrf.mxu1  ;;  %v6440_v24 = vadd.f32 %v19087_v25, %v6146_v28  ;;  %v11011_v48 = vmul.f32 -1.442695, %v16219_v21  ;;  %v11016_v25 = vmul.f32 -1.442695, %v16278_v59  ;;  %v11019_v21 = vmul.f32 -1.442695, %v16294_v26 }
 0x3f4   : > { %v16409_v23 = vadd.f32 %v16209_v45, %v6762_v14  ;;  %7298 = vrot.lane.b32.xlu1 %v6831_v36, %s12856_s20  ;;  %7300 = vrot.lane.b32.xlu0 %v6832_v32, %s12856_s20  ;;  %v6767_v30 = vadd.f32 %v12269_v37, %v6441_v33  ;;  %v5824_v14 = vadd.f32 %v19088_v11, %v5498_v57  ;;  %v6835_v61 = vmax.f32 %v16420_v41, 0.0 }
 0x3f5   : > { %v6710_v17 = vpop.f32.mrf.mxu1  ;;  %v11021_v26 = vmul.f32 -1.442695, %v16324_v1 }
 0x3f6   : > { %v6765_v60 = vadd.f32 %v6710_v17, %v6439_v29  ;;  %v6833_v58 = vmax.f32 %v16409_v23, 0.0  ;;  %v16436_v55 = vadd.f32 %v16209_v45, %v6767_v30  ;;  %v6150_v54 = vadd.f32 %v16199_v42, %v5824_v14  ;;  %v6403_v29 = vpop.f32.mrf.mxu0 }
 0x3f7   : > { %v12270_v10 = vpop.f32.mrf.mxu1 }
 0x3f8   : > { %v16426_v0 = vadd.f32 %v16209_v45, %v6765_v60  ;;  %7302 = vrot.lane.b32.xlu1 %v6833_v58, %s12856_s20  ;;  %7304 = vrot.lane.b32.xlu0 %v6834_v6, %s12856_s20  ;;  %v6768_v53 = vadd.f32 %v12270_v10, %v6442_v46  ;;  %v6444_v9 = vadd.f32 %v6403_v29, %v6150_v54  ;;  %v11009_v6 = vmul.f32 -1.442695, %v16224_v43 }
 0x3f9   : > { %v6713_v49 = vpop.f32.mrf.mxu1  ;;  %v11013_v46 = vmul.f32 -1.442695, %v16252_v34  ;;  %v11014_v43 = vmul.f32 -1.442695, %v16269_v3  ;;  %v11018_v34 = vmul.f32 -1.442695, %v16301_v4 }
 0x3fa   : > { %v6766_v37 = vadd.f32 %v6713_v49, %v6440_v24  ;;  %v6836_v32 = vmax.f32 %v16426_v0, 0.0  ;;  %v16451_v17 = vadd.f32 %v16209_v45, %v6768_v53  ;;  %12661 = vpow2.f32 %v11009_v6 }
 0x3fb   : > { %v12273_v36 = vpop.f32.mrf.mxu1  ;;  %12663 = vpow2.f32 %v11011_v48  ;;  %v11020_v24 = vmul.f32 -1.442695, %v16315_v16  ;;  %v11023_v16 = vmul.f32 -1.442695, %v16330_v56  ;;  %v11022_v4 = vmul.f32 -1.442695, %v16338_v35 }
 0x3fc   : > { %v6771_v22 = vadd.f32 %v12273_v36, %v16192_v44  ;;  %v16443_v7 = vadd.f32 %v16209_v45, %v6766_v37  ;;  %7306 = vrot.lane.b32.xlu1 %v6835_v61, %s12856_s20  ;;  %7308 = vrot.lane.b32.xlu0 %v6836_v32, %s12856_s20  ;;  %v6838_v44 = vmax.f32 %v16436_v55, 0.0  ;;  %v6839_v30 = vmax.f32 %v16451_v17, 0.0  ;;  %v7666_v48 = vld [vmem:[%s18175_s5] sm:$0xf] }
 0x3fd   : > { %v6726_v50 = vpop.f32.mrf.mxu1  ;;  %12665 = vpow2.f32 %v11010_v19  ;;  %v11024_v54 = vmul.f32 -1.442695, %v16350_v47  ;;  %v11025_v29 = vmul.f32 -1.442695, %v16358_v39  ;;  %v11041_v47 = vld [vmem:[%s18175_s5 + $0x4] sm:$0xf]  ;;  %12609 = vmatprep.subr.msk.bf16.mxu1 %vm4178_vm0, %v7666_v48 }
 0x3fe   : > { %v16448_v33 = vadd.f32 %v16209_v45, %v6771_v22  ;;  %v6769_v28 = vadd.f32 %v6726_v50, %v6443_v2  ;;  %v6837_v42 = vmax.f32 %v16443_v7, 0.0  ;;  %12667 = vpow2.f32 %v11012_v15  ;;  %12608 = vmatprep.subr.msk.bf16.mxu0 %vm4178_vm0, %v11041_v47 }
 0x3ff   : > { %v12274_v31 = vpop.f32.mrf.mxu1  ;;  %v11031_v15 = vmul.f32 -1.442695, %v16402_v18  ;;  %v7668_v18 = vld [vmem:[#allocation4 + $0x10] sm:$0xff] }
 0x400   : > { %v16456_v27 = vadd.f32 %v16209_v45, %v6769_v28  ;;  %v6772_v38 = vadd.f32 %v12274_v31, %v16203_v20  ;;  %7310 = vrot.lane.b32.xlu1 %v6837_v42, %s12856_s20  ;;  %7312 = vrot.lane.b32.xlu0 %v6838_v44, %s12856_s20  ;;  %v11027_v28 = vmul.f32 -1.442695, %v16369_v52  ;;  %v11026_v42 = vmul.f32 -1.442695, %v16376_v12 }
 0x401   : > { %v6729_v5 = vpop.f32.mrf.mxu1  ;;  %v11028_v12 = vmul.f32 -1.442695, %v16387_v13 }
 0x402   : > { %v6770_v57 = vadd.f32 %v6729_v5, %v6444_v9  ;;  %v16462_v60 = vadd.f32 %v16209_v45, %v6772_v38  ;;  %v6840_v10 = vmax.f32 %v16456_v27, 0.0  ;;  %v7766_v9 = vsel %vm4178_vm0, %v11041_v47, 0 }
 0x403   : > { %12276 = vmatpush3.bf16.msra.mxu0 %v7766_v9  ;;  %v11034_v9 = vmul.f32 -1.442695, %v16443_v7 }
 0x404   : > { %v16467_v58 = vadd.f32 %v16209_v45, %v6770_v57  ;;  %7314 = vrot.lane.b32.xlu1 %v6839_v30, %s12856_s20  ;;  %7316 = vrot.lane.b32.xlu0 %v6840_v10, %s12856_s20  ;;  %v11015_v45 = vmul.f32 -1.442695, %v16261_v63  ;;  %v11029_v30 = vmul.f32 -1.442695, %v16396_v62  ;;  %v7978_v62 = vsel %vm4178_vm0, %v7666_v48, 0 }
 0x405   : > { %12310 = vmatpush3.bf16.msra.mxu1 %v7978_v62  ;;  %v11037_v62 = vmul.f32 -1.442695, %v16456_v27 }
 0x406   : > { %v6841_v20 = vmax.f32 %v16467_v58, 0.0  ;;  %12669 = vpow2.f32 %v11015_v45 }
 0x407   : > { %12671 = vpow2.f32 %v11013_v46  ;;  %v12662_v40 = vpop.eup %12661 }
 0x408   : > { %7318 = vrot.lane.b32.xlu1 %v6841_v20, %s12856_s20  ;;  %12673 = vpow2.f32 %v11016_v25  ;;  %v12664_v49 = vpop.eup %12663  ;;  %v6940_v11 = vadd.f32 1.0, %v12662_v40 }
 0x409   : > { %12675 = vpow2.f32 %v11014_v43  ;;  %v6942_v14 = vadd.f32 1.0, %v12664_v49  ;;  %v7586_v49 = vld [vmem:[#allocation4 + $0x7] sm:$0xff] }
 0x40a   : > { %12677 = vpow2.f32 %v11019_v21  ;;  %v12666_v63 = vpop.eup %12665 }
 0x40b   : > { %12679 = vpow2.f32 %v11017_v51  ;;  %v12668_v59 = vpop.eup %12667  ;;  %v6941_v3 = vadd.f32 1.0, %v12666_v63 }
 0x40c   : > { %12681 = vpow2.f32 %v11020_v24  ;;  %v6943_v53 = vadd.f32 1.0, %v12668_v59  ;;  %v7667_v24 = vld [vmem:[#allocation4 + $0x8] sm:$0xff] }
 0x40d   : > { %12683 = vrcp.f32 %v6940_v11  ;;  %v11030_v11 = vmul.f32 -1.442695, %v16409_v23  ;;  %v7587_v59 = vld [vmem:[#allocation4 + $0xf] sm:$0xff] }
 0x40e   : > { %12685 = vpow2.f32 %v11018_v34  ;;  %v7699_v34 = vpack.c.bf16 %v7668_v18, %v7667_v24 }
 0x40f   : > { %12687 = vrcp.f32 %v6942_v14  ;;  %v19089_v14 = vld [vmem:[#allocation15_spill] sm:$0xff] }
 0x410   : > { %12689 = vrcp.f32 %v6941_v3  ;;  %v7618_v3 = vmul.f32 %v19089_v14, %v7586_v49  ;;  %12277 = vmatprep.mubr.msk.bf16.mxu0 %vm3928_vm1, %v7699_v34 }
 0x411   : > { %12691 = vpow2.f32 %v11021_v26 }
 0x412   : > { %12693 = vrcp.f32 %v6943_v53  ;;  %v7650_v23 = vpack.c.bf16 %v7587_v59, %v7618_v3 }
 0x413   : > { %v12670_v61 = vpop.eup %12669  ;;  %12695 = vpow2.f32 %v11023_v16  ;;  %v11032_v16 = vmul.f32 -1.442695, %v16420_v41 }
 0x414   : > { %v12672_v8 = vpop.eup %12671  ;;  %v6946_v37 = vadd.f32 1.0, %v12670_v61  ;;  %12311 = vmatprep.mubr.msk.bf16.mxu1 %vm3928_vm1, %v7650_v23 }
 0x415   : > { %v12674_v36 = vpop.eup %12673  ;;  %v6944_v32 = vadd.f32 1.0, %v12672_v8 }
 0x416   : > { %v12676_v2 = vpop.eup %12675  ;;  %12697 = vrcp.f32 %v6946_v37  ;;  %v6947_v1 = vadd.f32 1.0, %v12674_v36 }
 0x417   : > { %v12678_v22 = vpop.eup %12677  ;;  %12699 = vpow2.f32 %v11022_v4  ;;  %v6945_v56 = vadd.f32 1.0, %v12676_v2 }
 0x418   : > { %12701 = vrcp.f32 %v6944_v32  ;;  %v12680_v50 = vpop.eup %12679  ;;  %v6950_v35 = vadd.f32 1.0, %v12678_v22 }
 0x419   : > { %12703 = vpow2.f32 %v11024_v54  ;;  %v12682_v31 = vpop.eup %12681  ;;  %v6948_v39 = vadd.f32 1.0, %v12680_v50 }
 0x41a   : > { %12705 = vrcp.f32 %v6947_v1  ;;  %v16495_v44 = vpop.eup %12683  ;;  %v6951_v52 = vadd.f32 1.0, %v12682_v31  ;;  %v11033_v1 = vmul.f32 -1.442695, %v16426_v0  ;;  %v11035_v31 = vmul.f32 -1.442695, %v16436_v55 }
 0x41b   : > { %12707 = vpow2.f32 %v11025_v29  ;;  %v12686_v38 = vpop.eup %12685  ;;  %v7196_v6 = vadd.f32 1.0, %v16495_v44 }
 0x41c   : > { %12709 = vrcp.f32 %v6945_v56  ;;  %v16499_v5 = vpop.eup %12687  ;;  %v6949_v20 = vadd.f32 1.0, %v12686_v38 }
 0x41d   : > { %12711 = vpow2.f32 %v11027_v28  ;;  %v16502_v57 = vpop.eup %12689  ;;  %v7198_v40 = vadd.f32 1.0, %v16499_v5 }
 0x41e   : > { %12713 = vrcp.f32 %v6950_v35  ;;  %v12692_v10 = vpop.eup %12691  ;;  %v7197_v51 = vadd.f32 1.0, %v16502_v57 }
 0x41f   : > { %12715 = vpow2.f32 %v11026_v42  ;;  %v16509_v19 = vpop.eup %12693  ;;  %v6952_v21 = vadd.f32 1.0, %v12692_v10 }
 0x420   : > { %12717 = vrcp.f32 %v6948_v39  ;;  %v12696_v46 = vpop.eup %12695  ;;  %v7199_v22 = vadd.f32 1.0, %v16509_v19 }
 0x421   : > { %12719 = vrcp.f32 %v6951_v52  ;;  %v6954_v26 = vadd.f32 1.0, %v12696_v46 }
 0x422   : > { %12721 = vpow2.f32 %v11028_v12 }
 0x423   : > { %v16514_v43 = vpop.eup %12697  ;;  %12723 = vpow2.f32 %v11029_v30 }
 0x424   : > { %v12700_v63 = vpop.eup %12699  ;;  %12725 = vrcp.f32 %v6949_v20  ;;  %v7202_v52 = vadd.f32 1.0, %v16514_v43 }
 0x425   : > { %v16521_v61 = vpop.eup %12701  ;;  %12727 = vpow2.f32 %v11031_v15  ;;  %v6953_v32 = vadd.f32 1.0, %v12700_v63 }
 0x426   : > { %v12704_v8 = vpop.eup %12703  ;;  %12729 = vrcp.f32 %v6952_v21  ;;  %v7200_v41 = vadd.f32 1.0, %v16521_v61 }
 0x427   : > { %v16525_v4 = vpop.eup %12705  ;;  %12731 = vpow2.f32 %v11030_v11  ;;  %v6955_v56 = vadd.f32 1.0, %v12704_v8  ;;  %v11038_v11 = vmul.f32 -1.442695, %v16467_v58 }
 0x428   : > { %v12708_v54 = vpop.eup %12707  ;;  %12733 = vrcp.f32 %v6954_v26  ;;  %v7203_v46 = vadd.f32 1.0, %v16525_v4 }
 0x429   : > { %v16532_v29 = vpop.eup %12709  ;;  %12735 = vpow2.f32 %v11032_v16  ;;  %v6956_v47 = vadd.f32 1.0, %v12708_v54 }
 0x42a   : > { %v12712_v28 = vpop.eup %12711  ;;  %12737 = vrcp.f32 %v6953_v32  ;;  %v7201_v38 = vadd.f32 1.0, %v16532_v29 }
 0x42b   : > { %v16536_v42 = vpop.eup %12713  ;;  %12739 = vpow2.f32 %v11033_v1  ;;  %v6958_v55 = vadd.f32 1.0, %v12712_v28 }
 0x42c   : > { %v12716_v39 = vpop.eup %12715  ;;  %12741 = vrcp.f32 %v6955_v56  ;;  %v7206_v59 = vadd.f32 1.0, %v16536_v42 }
 0x42d   : > { %v16543_v12 = vpop.eup %12717  ;;  %12743 = vpow2.f32 %v11035_v31 }
 0x42e   : > { %v16545_v20 = vpop.eup %12719  ;;  %12745 = vrcp.f32 %v6956_v47 }
 0x42f   : > { %v12722_v15 = vpop.eup %12721  ;;  %12747 = vpow2.f32 %v11034_v9 }
 0x430   : > { %12749 = vrcp.f32 %v6958_v55  ;;  %v6959_v24 = vadd.f32 1.0, %v12722_v15 }
 0x43c   : > { %v7265_v13 = vpop.permute.xlu1 %7264 }
 0x43d   : > { %v7358_v37 = vmul.f32 %v7265_v13, %v7198_v40  ;;  %v6957_v13 = vadd.f32 1.0, %v12716_v39 }
 0x43e   : > { %v7261_v45 = vpop.permute.xlu0 %7260 }
 0x43f   : > { %v7356_v25 = vmul.f32 %v7261_v45, %v7196_v6  ;;  %v11036_v6 = vmul.f32 -1.442695, %v16451_v17  ;;  %v12724_v45 = vpop.eup %12723 }
 0x440   : > { %v7267_v2 = vpop.permute.xlu1 %7266  ;;  %v16553_v21 = vpop.eup %12725  ;;  %v6960_v27 = vadd.f32 1.0, %v12724_v45 }
 0x441   : > { %7458 = vrot.lane.b32.xlu0 %v7356_v25, %s12857_s28  ;;  %v7359_v0 = vmul.f32 %v7267_v2, %v7199_v22  ;;  %v7204_v25 = vadd.f32 1.0, %v16543_v12  ;;  %12751 = vpow2.f32 %v11036_v6  ;;  %v7205_v34 = vadd.f32 1.0, %v16553_v21 }
 0x442   : > { %v7263_v53 = vpop.permute.xlu0 %7262  ;;  %12753 = vrcp.f32 %v6957_v13  ;;  %v7207_v2 = vadd.f32 1.0, %v16545_v20 }
 0x443   : > { %v7357_v36 = vmul.f32 %v7263_v53, %v7197_v51  ;;  %v12728_v51 = vpop.eup %12727  ;;  %12755 = vpow2.f32 %v11037_v62 }
 0x444   : > { %v16555_v63 = vpop.eup %12729  ;;  %12757 = vrcp.f32 %v6959_v24  ;;  %v6962_v23 = vadd.f32 1.0, %v12728_v51 }
 0x445   : > { %7462 = vrot.lane.b32.xlu0 %v7358_v37, %s12857_s28  ;;  %7460 = vrot.lane.b32.xlu1 %v7357_v36, %s12857_s28  ;;  %v12732_v3 = vpop.eup %12731  ;;  %12759 = vrcp.f32 %v6960_v27  ;;  %v7208_v54 = vadd.f32 1.0, %v16555_v63 }
 0x446   : > { %v7269_v50 = vpop.permute.xlu0 %7268  ;;  %v16562_v8 = vpop.eup %12733  ;;  %v6961_v32 = vadd.f32 1.0, %v12732_v3  ;;  %12761 = vpow2.f32 %v11038_v11 }
 0x447   : > { %v7360_v35 = vmul.f32 %v7269_v50, %v7200_v41  ;;  %v12736_v36 = vpop.eup %12735  ;;  %12763 = vrcp.f32 %v6962_v23  ;;  %v7210_v9 = vadd.f32 1.0, %v16562_v8 }
 0x448   : > { %v16564_v58 = vpop.eup %12737  ;;  %12765 = vrcp.f32 %v6961_v32 }
 0x449   : > { %7464 = vrot.lane.b32.xlu1 %v7359_v0, %s12857_s28  ;;  %7466 = vrot.lane.b32.xlu0 %v7360_v35, %s12857_s28  ;;  %19090 = vst [vmem:[#allocation79_spill] sm:$0xff] %v16564_v58  ;;  %v12740_v1 = vpop.eup %12739  ;;  %v6963_v0 = vadd.f32 1.0, %v12736_v36  ;;  %v7209_v39 = vadd.f32 1.0, %v16564_v58 }
 0x44a   : > { %v7271_v30 = vpop.permute.xlu1 %7270  ;;  %v7273_v10 = vpop.permute.xlu0 %7272  ;;  %v6964_v47 = vadd.f32 1.0, %v12740_v1 }
 0x44b   : > { %v7361_v7 = vmul.f32 %v7271_v30, %v7201_v38  ;;  %v7362_v48 = vmul.f32 %v7273_v10, %v7202_v52  ;;  %v16570_v56 = vpop.eup %12741  ;;  %12767 = vrcp.f32 %v6963_v0 }
 0x44c   : > { %19091 = vst [vmem:[#allocation8_spill] sm:$0xff] %v16570_v56  ;;  %v12744_v31 = vpop.eup %12743  ;;  %12769 = vrcp.f32 %v6964_v47  ;;  %v7211_v45 = vadd.f32 1.0, %v16570_v56 }
 0x44d   : > { %7468 = vrot.lane.b32.xlu1 %v7361_v7, %s12857_s28  ;;  %7470 = vrot.lane.b32.xlu0 %v7362_v48, %s12857_s28  ;;  %v16572_v35 = vpop.eup %12745  ;;  %v6966_v48 = vadd.f32 1.0, %v12744_v31 }
 0x44e   : > { %v7275_v17 = vpop.permute.xlu1 %7274  ;;  %v7277_v40 = vpop.permute.xlu0 %7276  ;;  %v7212_v62 = vadd.f32 1.0, %v16572_v35 }
 0x44f   : > { %v7363_v18 = vmul.f32 %v7275_v17, %v7203_v46  ;;  %v7364_v49 = vmul.f32 %v7277_v40, %v7204_v25  ;;  %v12748_v38 = vpop.eup %12747  ;;  %12771 = vrcp.f32 %v6966_v48 }
 0x450   : > { %v16578_v30 = vpop.eup %12749  ;;  %v6965_v13 = vadd.f32 1.0, %v12748_v38 }
 0x451   : > { %7472 = vrot.lane.b32.xlu1 %v7363_v18, %s12857_s28  ;;  %7474 = vrot.lane.b32.xlu0 %v7364_v49, %s12857_s28  ;;  %v12752_v7 = vpop.eup %12751 }
 0x452   : > { %v7279_v26 = vpop.permute.xlu1 %7278  ;;  %v7281_v53 = vpop.permute.xlu0 %7280  ;;  %v6967_v18 = vadd.f32 1.0, %v12752_v7  ;;  %12773 = vrcp.f32 %v6965_v13 }
 0x453   : > { %v7365_v16 = vmul.f32 %v7279_v26, %v7205_v34  ;;  %v7366_v37 = vmul.f32 %v7281_v53, %v7206_v59  ;;  %v16580_v15 = vpop.eup %12753  ;;  %v7214_v34 = vadd.f32 1.0, %v16578_v30 }
 0x454   : > { %19092 = vst [vmem:[#allocation72_spill] sm:$0xff] %v16580_v15  ;;  %v12756_v46 = vpop.eup %12755  ;;  %v7213_v11 = vadd.f32 1.0, %v16580_v15  ;;  %12775 = vrcp.f32 %v6967_v18 }
 0x455   : > { %7476 = vrot.lane.b32.xlu1 %v7365_v16, %s12857_s28  ;;  %7478 = vrot.lane.b32.xlu0 %v7366_v37, %s12857_s28  ;;  %v16586_v24 = vpop.eup %12757  ;;  %v6968_v27 = vadd.f32 1.0, %v12756_v46 }
 0x456   : > { %v7283_v22 = vpop.permute.xlu1 %7282  ;;  %v7285_v41 = vpop.permute.xlu0 %7284  ;;  %19093 = vst [vmem:[#allocation70_spill] sm:$0xff] %v16586_v24  ;;  %v7215_v23 = vadd.f32 1.0, %v16586_v24 }
 0x457   : > { %v7367_v50 = vmul.f32 %v7283_v22, %v7207_v2  ;;  %v7368_v28 = vmul.f32 %v7285_v41, %v7208_v54  ;;  %v16588_v49 = vpop.eup %12759  ;;  %12777 = vrcp.f32 %v6968_v27 }
 0x458   : > { %v12762_v59 = vpop.eup %12761  ;;  %v7216_v32 = vadd.f32 1.0, %v16588_v49 }
 0x459   : > { %7480 = vrot.lane.b32.xlu1 %v7367_v50, %s12857_s28  ;;  %7482 = vrot.lane.b32.xlu0 %v7368_v28, %s12857_s28  ;;  %v16594_v37 = vpop.eup %12763  ;;  %v6969_v36 = vadd.f32 1.0, %v12762_v59 }
 0x45a   : > { %v7287_v52 = vpop.permute.xlu1 %7286  ;;  %v7289_v55 = vpop.permute.xlu0 %7288  ;;  %v7218_v31 = vadd.f32 1.0, %v16594_v37 }
 0x45b   : > { %v7369_v10 = vmul.f32 %v7287_v52, %v7209_v39  ;;  %v7370_v6 = vmul.f32 %v7289_v55, %v7210_v9  ;;  %v16600_v2 = vpop.eup %12765  ;;  %12779 = vrcp.f32 %v6969_v36  ;;  %v11074_v36 = vld [vmem:[%s18175_s5 + $0x8] sm:$0xf] }
 0x45c   : > { %19094 = vst [vmem:[#allocation54_spill] sm:$0xff] %v16600_v2  ;;  %v16602_v50 = vpop.eup %12767  ;;  %v7217_v28 = vadd.f32 1.0, %v16600_v2  ;;  %12610 = vmatprep.subr.msk.bf16.mxu0 %vm4178_vm0, %v11074_v36  ;;  %v19128_v2 = vld [vmem:[#allocation48_spill] sm:$0xff] }
 0x45d   : > { %7484 = vrot.lane.b32.xlu1 %v7369_v10, %s12857_s28  ;;  %7486 = vrot.lane.b32.xlu0 %v7370_v6, %s12857_s28  ;;  %19095 = vst [vmem:[#allocation58_spill] sm:$0xff] %v16602_v50  ;;  %v16608_v0 = vpop.eup %12769  ;;  %v7219_v55 = vadd.f32 1.0, %v16602_v50 }
 0x45e   : > { %v7291_v25 = vpop.permute.xlu1 %7290  ;;  %v7293_v17 = vpop.permute.xlu0 %7292  ;;  %v7220_v10 = vadd.f32 1.0, %v16608_v0 }
 0x45f   : > { %v7371_v40 = vmul.f32 %v7291_v25, %v7211_v45  ;;  %v7372_v51 = vmul.f32 %v7293_v17, %v7212_v62  ;;  %v16610_v52 = vpop.eup %12771 }
 0x460   : > { %v16616_v6 = vpop.eup %12773  ;;  %v7222_v25 = vadd.f32 1.0, %v16610_v52 }
 0x461   : > { %7488 = vrot.lane.b32.xlu1 %v7371_v40, %s12857_s28  ;;  %7490 = vrot.lane.b32.xlu0 %v7372_v51, %s12857_s28  ;;  %19096 = vst [vmem:[#allocation99_spill] sm:$0xff] %v16616_v6  ;;  %v16618_v62 = vpop.eup %12775  ;;  %v7221_v46 = vadd.f32 1.0, %v16616_v6 }
 0x462   : > { %v7295_v3 = vpop.permute.xlu1 %7294  ;;  %v7297_v26 = vpop.permute.xlu0 %7296  ;;  %19097 = vst [vmem:[#allocation65_spill] sm:$0xff] %v16618_v62 }
 0x463   : > { %v7373_v53 = vmul.f32 %v7295_v3, %v7213_v11  ;;  %v7374_v16 = vmul.f32 %v7297_v26, %v7214_v34  ;;  %v7223_v11 = vadd.f32 1.0, %v16618_v62 }
 0x464   : > { %v12778_v17 = vpop.eup %12777 }
 0x465   : > { %7492 = vrot.lane.b32.xlu1 %v7373_v53, %s12857_s28  ;;  %7494 = vrot.lane.b32.xlu0 %v7374_v16, %s12857_s28  ;;  %v7224_v34 = vadd.f32 1.0, %v12778_v17 }
 0x466   : > { %v7299_v54 = vpop.permute.xlu1 %7298  ;;  %v7301_v1 = vpop.permute.xlu0 %7300 }
 0x467   : > { %v7375_v22 = vmul.f32 %v7299_v54, %v7215_v23  ;;  %v7376_v41 = vmul.f32 %v7301_v1, %v7216_v32  ;;  %v6842_v1 = vmax.f32 %v16448_v33, 0.0 }
 0x468   : > { %v16627_v59 = vpop.eup %12779 }
 0x469   : > { %7496 = vrot.lane.b32.xlu1 %v7375_v22, %s12857_s28  ;;  %7498 = vrot.lane.b32.xlu0 %v7376_v41, %s12857_s28  ;;  %19098 = vst [vmem:[#allocation107_spill] sm:$0xff] %v16627_v59  ;;  %v7225_v23 = vadd.f32 1.0, %v16627_v59  ;;  %v11091_v22 = vld [vmem:[%s18175_s5 + $0xc] sm:$0xf]  ;;  %v6843_v41 = vmax.f32 %v16462_v60, 0.0 }
 0x46a   : > { %v7303_v47 = vpop.permute.xlu1 %7302  ;;  %v7305_v39 = vpop.permute.xlu0 %7304  ;;  %12611 = vmatprep.subr.msk.bf16.mxu1 %vm4178_vm0, %v11091_v22 }
 0x46b   : > { %v7377_v9 = vmul.f32 %v7303_v47, %v7217_v28  ;;  %v7378_v38 = vmul.f32 %v7305_v39, %v7218_v31  ;;  %v11039_v28 = vmul.f32 -1.442695, %v16448_v33 }
 0x46d   : > { %7500 = vrot.lane.b32.xlu1 %v7377_v9, %s12857_s28  ;;  %7502 = vrot.lane.b32.xlu0 %v7378_v38, %s12857_s28  ;;  %12781 = vpow2.f32 %v11039_v28 }
 0x46e   : > { %v7307_v7 = vpop.permute.xlu1 %7306  ;;  %v7309_v48 = vpop.permute.xlu0 %7308 }
 0x46f   : > { %v7379_v13 = vmul.f32 %v7307_v7, %v7219_v55  ;;  %v7380_v45 = vmul.f32 %v7309_v48, %v7220_v10  ;;  %v8598_v55 = vsel %vm4178_vm0, %v11091_v22, 0  ;;  %v16704_v7 = vld [vmem:[%s18175_s5 + $0x10] sm:$0xf]  ;;  %v19101_v48 = vld [vmem:[#allocation26_spill] sm:$0xff] }
 0x471   : > { %7504 = vrot.lane.b32.xlu1 %v7379_v13, %s12857_s28  ;;  %7506 = vrot.lane.b32.xlu0 %v7380_v45, %s12857_s28  ;;  %v19103_v45 = vld [vmem:[#allocation21_spill] sm:$0xff] }
 0x472   : > { %v7311_v40 = vpop.permute.xlu1 %7310  ;;  %v7313_v51 = vpop.permute.xlu0 %7312 }
 0x473   : > { %v7381_v18 = vmul.f32 %v7311_v40, %v7221_v46  ;;  %v7382_v27 = vmul.f32 %v7313_v51, %v7222_v25 }
 0x475   : > { %7508 = vrot.lane.b32.xlu1 %v7381_v18, %s12857_s28  ;;  %7510 = vrot.lane.b32.xlu0 %v7382_v27, %s12857_s28 }
 0x476   : > { %v7315_v3 = vpop.permute.xlu1 %7314  ;;  %v7317_v26 = vpop.permute.xlu0 %7316 }
 0x477   : > { %v7383_v53 = vmul.f32 %v7315_v3, %v7223_v11  ;;  %v7384_v16 = vmul.f32 %v7317_v26, %v7224_v34  ;;  %v19117_v11 = vld [vmem:[#allocation39_spill] sm:$0xff] }
 0x479   : > { %7512 = vrot.lane.b32.xlu1 %v7383_v53, %s12857_s28  ;;  %7514 = vrot.lane.b32.xlu0 %v7384_v16, %s12857_s28  ;;  %v19105_v16 = vld [vmem:[#allocation29_spill] sm:$0xff] }
 0x47a   : > { %v7319_v32 = vpop.permute.xlu1 %7318 }
 0x47b   : > { %v7385_v54 = vmul.f32 %v7319_v32, %v7225_v23  ;;  %v19107_v23 = vld [vmem:[#allocation25_spill] sm:$0xff] }
 0x47d   : > { %7516 = vrot.lane.b32.xlu1 %v7385_v54, %s12857_s28  ;;  %7320 = vrot.lane.b32.xlu0 %v6842_v1, %s12856_s20 }
 0x481   : > { %7322 = vrot.lane.b32.xlu0 %v6843_v41, %s12856_s20  ;;  %s352_s20 = scalar_lea.vmem [#allocation5], %s351_s18 }
 0x485   : > { %7068 = vrot.lane.b32.xlu0 %v16495_v44, %s12857_s28  ;;  %v12782_v44 = vpop.eup %12781 }
 0x489   : > { %7072 = vrot.lane.b32.xlu0 %v16499_v5, %s12857_s28  ;;  %v6970_v5 = vadd.f32 1.0, %v12782_v44 }
 0x48b   : > { %12783 = vrcp.f32 %v6970_v5 }
 0x48d   : > { %7076 = vrot.lane.b32.xlu0 %v16521_v61, %s12857_s28 }
 0x491   : > { %7080 = vrot.lane.b32.xlu0 %v16514_v43, %s12857_s28 }
 0x495   : > { %7084 = vrot.lane.b32.xlu0 %v16543_v12, %s12857_s28 }
 0x498   : > { %v16686_v47 = vpop.eup %12783 }
 0x499   : > { %7088 = vrot.lane.b32.xlu0 %v16536_v42, %s12857_s28 }
 0x49d   : > { %7092 = vrot.lane.b32.xlu0 %v16555_v63, %s12857_s28 }
 0x4a1   : > { %7096 = vrot.lane.b32.xlu0 %v16562_v8, %s12857_s28  ;;  %v19099_v8 = vld [vmem:[#allocation19_spill] sm:$0xff] }
 0x4a5   : > { %7100 = vrot.lane.b32.xlu0 %v16572_v35, %s12857_s28 }
 0x4a9   : > { %7104 = vrot.lane.b32.xlu0 %v16578_v30, %s12857_s28 }
 0x4ad   : > { %7108 = vrot.lane.b32.xlu0 %v16588_v49, %s12857_s28 }
 0x4b1   : > { %7112 = vrot.lane.b32.xlu0 %v16594_v37, %s12857_s28 }
 0x4b3   : > { %v7459_v33 = vpop.permute.xlu0 %7458 }
 0x4b4   : > { %7554 = vst.msk [vmem:[#allocation4 + $0x18] sm:$0xff] %vm3928_vm1, %v7459_v33 }
 0x4b5   : > { %7116 = vrot.lane.b32.xlu0 %v16608_v0, %s12857_s28 }
 0x4b7   : > { %v7461_v43 = vpop.permute.xlu1 %7460  ;;  %v7463_v61 = vpop.permute.xlu0 %7462 }
 0x4b8   : > { %7555 = vst.msk [vmem:[#allocation4 + $0x20] sm:$0xff] %vm3928_vm1, %v7461_v43  ;;  %7556 = vst.msk [vmem:[#allocation4 + $0x28] sm:$0xff] %vm3928_vm1, %v7463_v61 }
 0x4b9   : > { %7120 = vrot.lane.b32.xlu0 %v16610_v52, %s12857_s28  ;;  %v8272_v52 = vsel %vm4178_vm0, %v11074_v36, 0 }
 0x4bb   : > { %v7465_v42 = vpop.permute.xlu1 %7464  ;;  %v7467_v12 = vpop.permute.xlu0 %7466  ;;  %v16677_v63 = vld [vmem:[#allocation4 + $0x17] sm:$0xff] }
 0x4bc   : > { %7557 = vst.msk [vmem:[#allocation4 + $0x30] sm:$0xff] %vm3928_vm1, %v7465_v42  ;;  %7558 = vst.msk [vmem:[#allocation4 + $0x38] sm:$0xff] %vm3928_vm1, %v7467_v12  ;;  %v7620_v35 = vmul.f32 %v19099_v8, %v16677_v63  ;;  %v7669_v37 = vld [vmem:[#allocation4 + $0x18] sm:$0xff] }
 0x4bd   : > { %7124 = vrot.lane.b32.xlu0 %v12778_v17, %s12857_s28  ;;  %v19109_v12 = vld [vmem:[#allocation32_spill] sm:$0xff] }
 0x4bf   : > { %v7469_v30 = vpop.permute.xlu1 %7468  ;;  %v7471_v49 = vpop.permute.xlu0 %7470  ;;  %v7670_v31 = vld [vmem:[#allocation4 + $0x20] sm:$0xff]  ;;  %v7671_v51 = vld [vmem:[#allocation4 + $0x28] sm:$0xff] }
 0x4c0   : > { %v16684_v0 = vld [vmem:[#allocation4 + $0x1f] sm:$0xff]  ;;  %7559 = vst.msk [vmem:[#allocation4 + $0x40] sm:$0xff] %vm3928_vm1, %v7469_v30  ;;  %7560 = vst.msk [vmem:[#allocation4 + $0x48] sm:$0xff] %vm3928_vm1, %v7471_v49  ;;  %v16690_v39 = vpack.c.bf16 %v7670_v31, %v7669_v37  ;;  %v16693_v38 = vld [vmem:[#allocation4 + $0x27] sm:$0xff]  ;;  %v11040_v30 = vmul.f32 -1.442695, %v16462_v60 }
 0x4c1   : > { %v7651_v9 = vpack.c.bf16 %v16684_v0, %v7620_v35  ;;  %v16697_v10 = vld [vmem:[#allocation4 + $0x21] sm:$0xff]  ;;  %7128 = vrot.lane.b32.xlu0 %v16686_v47, %s12857_s28  ;;  %v7622_v46 = vmul.f32 %v19103_v45, %v16693_v38  ;;  %v16715_v25 = vld [vmem:[#allocation4 + $0x19] sm:$0xff]  ;;  %v19111_v49 = vld [vmem:[#allocation27_spill] sm:$0xff] }
 0x4c2   : > { %19100 = vst [vmem:[#allocation51_spill] sm:$0xff] %v16690_v39  ;;  %v16708_v13 = vmul.f32 %v19101_v48, %v16697_v10  ;;  %12278 = vmatmul.mubr.msk.bf16.vlgmr.msra.gmra.mxu0 %vm3928_vm1, %v16690_v39  ;;  %12785 = vpow2.f32 %v11040_v30 }
 0x4c3   : > { %12312 = vmatmul.mubr.msk.bf16.vlgmr.msra.gmra.mxu1 %vm3928_vm1, %v7651_v9  ;;  %v7473_v17 = vpop.permute.xlu1 %7472  ;;  %v7475_v40 = vpop.permute.xlu0 %7474  ;;  %v7672_v18 = vld [vmem:[#allocation4 + $0x30] sm:$0xff]  ;;  %12344 = vmatpush3.bf16.msra.mxu0 %v8272_v52  ;;  %v7673_v41 = vld [vmem:[#allocation4 + $0x38] sm:$0xff] }
 0x4c4   : > { %19102 = vst [vmem:[#allocation76_spill] sm:$0xff] %v16708_v13  ;;  %v16717_v27 = vld [vmem:[#allocation4 + $0x2f] sm:$0xff]  ;;  %12378 = vmatpush3.bf16.msra.mxu1 %v8598_v55  ;;  %7561 = vst.msk [vmem:[#allocation4 + $0x50] sm:$0xff] %vm3928_vm1, %v7473_v17  ;;  %v16723_v34 = vpack.c.bf16 %v7672_v18, %v7671_v51  ;;  %v16726_v26 = vld [vmem:[#allocation4 + $0x37] sm:$0xff]  ;;  %12612 = vmatprep.subr.msk.bf16.mxu0 %vm4178_vm0, %v16704_v7 }
 0x4c5   : > { %7562 = vst.msk [vmem:[#allocation4 + $0x58] sm:$0xff] %vm3928_vm1, %v7475_v40  ;;  %v7652_v3 = vpack.c.bf16 %v16717_v27, %v7622_v46  ;;  %v16728_v53 = vld [vmem:[#allocation4 + $0x31] sm:$0xff]  ;;  %v7624_v32 = vmul.f32 %v19107_v23, %v16726_v26  ;;  %v16741_v54 = vld [vmem:[#allocation4 + $0x29] sm:$0xff] }
 0x4c6   : > { %19104 = vst [vmem:[#allocation98_spill] sm:$0xff] %v16723_v34  ;;  %v16734_v36 = vmul.f32 %v19105_v16, %v16728_v53  ;;  %12281 = vmatprep.mubr.msk.bf16.mxu0 %vm3928_vm1, %v16723_v34  ;;  %v19121_v13 = vld [vmem:[#allocation42_spill] sm:$0xff] }
 0x4c7   : > { %12315 = vmatprep.mubr.msk.bf16.mxu1 %vm3928_vm1, %v7652_v3  ;;  %v7477_v1 = vpop.permute.xlu1 %7476  ;;  %v7479_v22 = vpop.permute.xlu0 %7478  ;;  %v7674_v28 = vld [vmem:[#allocation4 + $0x40] sm:$0xff]  ;;  %v7675_v55 = vld [vmem:[#allocation4 + $0x48] sm:$0xff] }
 0x4c8   : > { %19106 = vst [vmem:[#allocation96_spill] sm:$0xff] %v16734_v36  ;;  %v16743_v44 = vld [vmem:[#allocation4 + $0x3f] sm:$0xff]  ;;  %7563 = vst.msk [vmem:[#allocation4 + $0x60] sm:$0xff] %vm3928_vm1, %v7477_v1  ;;  %v16749_v33 = vpack.c.bf16 %v7674_v28, %v7673_v41  ;;  %v16752_v61 = vld [vmem:[#allocation4 + $0x47] sm:$0xff] }
 0x4c9   : > { %7564 = vst.msk [vmem:[#allocation4 + $0x68] sm:$0xff] %vm3928_vm1, %v7479_v22  ;;  %v7653_v43 = vpack.c.bf16 %v16743_v44, %v7624_v32  ;;  %v16754_v42 = vld [vmem:[#allocation4 + $0x41] sm:$0xff]  ;;  %v7626_v37 = vmul.f32 %v19111_v49, %v16752_v61  ;;  %v16766_v31 = vld [vmem:[#allocation4 + $0x39] sm:$0xff] }
 0x4ca   : > { %19108 = vst [vmem:[#allocation81_spill] sm:$0xff] %v16749_v33  ;;  %v16758_v35 = vmul.f32 %v19109_v12, %v16754_v42  ;;  %12282 = vmatmul.mubr.msk.bf16.gmra.mxu0 %vm3928_vm1, %v16749_v33  ;;  %v19113_v32 = vld [vmem:[#allocation36_spill] sm:$0xff]  ;;  %v19115_v22 = vld [vmem:[#allocation30_spill] sm:$0xff] }
 0x4cb   : > { %12316 = vmatmul.mubr.msk.bf16.gmra.mxu1 %vm3928_vm1, %v7653_v43  ;;  %v7481_v9 = vpop.permute.xlu1 %7480  ;;  %v7483_v52 = vpop.permute.xlu0 %7482  ;;  %v7676_v46 = vld [vmem:[#allocation4 + $0x50] sm:$0xff] }
 0x4cc   : > { %19110 = vst [vmem:[#allocation91_spill] sm:$0xff] %v16758_v35  ;;  %v16768_v17 = vld [vmem:[#allocation4 + $0x4f] sm:$0xff]  ;;  %7565 = vst.msk [vmem:[#allocation4 + $0x70] sm:$0xff] %vm3928_vm1, %v7481_v9  ;;  %v16774_v60 = vpack.c.bf16 %v7676_v46, %v7675_v55  ;;  %v16777_v18 = vld [vmem:[#allocation4 + $0x57] sm:$0xff] }
 0x4cd   : > { %7566 = vst.msk [vmem:[#allocation4 + $0x78] sm:$0xff] %vm3928_vm1, %v7483_v52  ;;  %v7654_v51 = vpack.c.bf16 %v16768_v17, %v7626_v37  ;;  %v16779_v3 = vld [vmem:[#allocation4 + $0x51] sm:$0xff]  ;;  %v7628_v41 = vmul.f32 %v19115_v22, %v16777_v18  ;;  %v16790_v28 = vld [vmem:[#allocation4 + $0x49] sm:$0xff] }
 0x4ce   : > { %19112 = vst [vmem:[#allocation108_spill] sm:$0xff] %v16774_v60  ;;  %v16783_v1 = vmul.f32 %v19113_v32, %v16779_v3  ;;  %12285 = vmatprep.mubr.msk.bf16.mxu0 %vm3928_vm1, %v16774_v60  ;;  %v7677_v9 = vld [vmem:[#allocation4 + $0x58] sm:$0xff] }
 0x4cf   : > { %12319 = vmatprep.mubr.msk.bf16.mxu1 %vm3928_vm1, %v7654_v51  ;;  %v7485_v43 = vpop.permute.xlu1 %7484  ;;  %v7487_v37 = vpop.permute.xlu0 %7486  ;;  %v7678_v52 = vld [vmem:[#allocation4 + $0x60] sm:$0xff] }
 0x4d0   : > { %19114 = vst [vmem:[#allocation101_spill] sm:$0xff] %v16783_v1  ;;  %v16792_v55 = vld [vmem:[#allocation4 + $0x5f] sm:$0xff]  ;;  %7567 = vst.msk [vmem:[#allocation4 + $0x80] sm:$0xff] %vm3928_vm1, %v7485_v43  ;;  %v16798_v30 = vpack.c.bf16 %v7678_v52, %v7677_v9  ;;  %v16801_v40 = vld [vmem:[#allocation4 + $0x67] sm:$0xff] }
 0x4d1   : > { %7568 = vst.msk [vmem:[#allocation4 + $0x88] sm:$0xff] %vm3928_vm1, %v7487_v37  ;;  %v7655_v51 = vpack.c.bf16 %v16792_v55, %v7628_v41  ;;  %v16803_v5 = vld [vmem:[#allocation4 + $0x61] sm:$0xff]  ;;  %v16814_v9 = vld [vmem:[#allocation4 + $0x59] sm:$0xff] }
 0x4d2   : > { %19116 = vst [vmem:[#allocation47_spill] sm:$0xff] %v16798_v30  ;;  %v16807_v60 = vmul.f32 %v19117_v11, %v16803_v5  ;;  %12286 = vmatmul.mubr.msk.bf16.gmra.mxu0 %vm3928_vm1, %v16798_v30  ;;  %v19119_v43 = vld [vmem:[#allocation33_spill] sm:$0xff]  ;;  %v7679_v46 = vld [vmem:[#allocation4 + $0x68] sm:$0xff] }
 0x4d3   : > { %12320 = vmatmul.mubr.msk.bf16.gmra.mxu1 %vm3928_vm1, %v7655_v51  ;;  %v7630_v37 = vmul.f32 %v19119_v43, %v16801_v40  ;;  %v7489_v52 = vpop.permute.xlu1 %7488  ;;  %v7491_v41 = vpop.permute.xlu0 %7490  ;;  %v7680_v1 = vld [vmem:[#allocation4 + $0x70] sm:$0xff] }
 0x4d4   : > { %19118 = vst [vmem:[#allocation87_spill] sm:$0xff] %v16807_v60  ;;  %v16816_v35 = vld [vmem:[#allocation4 + $0x6f] sm:$0xff]  ;;  %7569 = vst.msk [vmem:[#allocation4 + $0x90] sm:$0xff] %vm3928_vm1, %v7489_v52  ;;  %v16822_v30 = vpack.c.bf16 %v7680_v1, %v7679_v46  ;;  %v16825_v33 = vld [vmem:[#allocation4 + $0x77] sm:$0xff] }
 0x4d5   : > { %7570 = vst.msk [vmem:[#allocation4 + $0x98] sm:$0xff] %vm3928_vm1, %v7491_v41  ;;  %v7656_v51 = vpack.c.bf16 %v16816_v35, %v7630_v37  ;;  %v16827_v34 = vld [vmem:[#allocation4 + $0x71] sm:$0xff]  ;;  %v19123_v52 = vld [vmem:[#allocation37_spill] sm:$0xff]  ;;  %v16838_v1 = vld [vmem:[#allocation4 + $0x69] sm:$0xff] }
 0x4d6   : > { %19120 = vst [vmem:[#allocation62_spill] sm:$0xff] %v16822_v30  ;;  %v16831_v39 = vmul.f32 %v19121_v13, %v16827_v34  ;;  %12289 = vmatprep.mubr.msk.bf16.mxu0 %vm3928_vm1, %v16822_v30  ;;  %v7632_v41 = vmul.f32 %v19123_v52, %v16825_v33  ;;  %v7681_v36 = vld [vmem:[#allocation4 + $0x78] sm:$0xff] }
 0x4d7   : > { %12323 = vmatprep.mubr.msk.bf16.mxu1 %vm3928_vm1, %v7656_v51  ;;  %v7493_v46 = vpop.permute.xlu1 %7492  ;;  %v7495_v37 = vpop.permute.xlu0 %7494  ;;  %v7682_v60 = vld [vmem:[#allocation4 + $0x80] sm:$0xff] }
 0x4d8   : > { %19122 = vst [vmem:[#allocation103_spill] sm:$0xff] %v16831_v39  ;;  %v16840_v59 = vld [vmem:[#allocation4 + $0x7f] sm:$0xff]  ;;  %7571 = vst.msk [vmem:[#allocation4 + $0xa0] sm:$0xff] %vm3928_vm1, %v7493_v46  ;;  %v16846_v30 = vpack.c.bf16 %v7682_v60, %v7681_v36  ;;  %v16849_v6 = vld [vmem:[#allocation4 + $0x87] sm:$0xff]  ;;  %v12786_v60 = vpop.eup %12785 }
 0x4d9   : > { %19124 = vst [vmem:[#allocation109_spill] sm:$0xff] %v16840_v59  ;;  %7572 = vst.msk [vmem:[#allocation4 + $0xa8] sm:$0xff] %vm3928_vm1, %v7495_v37  ;;  %v7657_v51 = vpack.c.bf16 %v16840_v59, %v7632_v41  ;;  %v16851_v50 = vld [vmem:[#allocation4 + $0x81] sm:$0xff]  ;;  %v19130_v46 = vld [vmem:[#allocation40_spill] sm:$0xff]  ;;  %v6971_v59 = vadd.f32 1.0, %v12786_v60 }
 0x4da   : > { %19125 = vst [vmem:[#allocation110_spill] sm:$0xff] %v16846_v30  ;;  %19126 = vst [vmem:[#allocation45_spill] sm:$0xff] %v16849_v6  ;;  %v16855_v24 = vmul.f32 %v19128_v2, %v16851_v50  ;;  %12290 = vmatmul.mubr.msk.bf16.gmra.mxu0 %vm3928_vm1, %v16846_v30  ;;  %v7634_v37 = vmul.f32 %v19130_v46, %v16849_v6  ;;  %v16862_v36 = vld [vmem:[#allocation4 + $0x79] sm:$0xff]  ;;  %v7683_v39 = vld [vmem:[#allocation4 + $0x88] sm:$0xff] }
 0x4db   : > { %19127 = vst [vmem:[#allocation59_spill] sm:$0xff] %v16851_v50  ;;  %12324 = vmatmul.mubr.msk.bf16.gmra.mxu1 %vm3928_vm1, %v7657_v51  ;;  %19131 = vst [vmem:[#allocation100_spill] sm:$0xff] %v16862_v36  ;;  %v7497_v41 = vpop.permute.xlu1 %7496  ;;  %v7499_v62 = vpop.permute.xlu0 %7498  ;;  %v7684_v15 = vld [vmem:[#allocation4 + $0x90] sm:$0xff]  ;;  %12787 = vrcp.f32 %v6971_v59 }
 0x4dc   : > { %19129 = vst [vmem:[#allocation64_spill] sm:$0xff] %v16855_v24  ;;  %v16864_v56 = vld [vmem:[#allocation4 + $0x8f] sm:$0xff]  ;;  %7573 = vst.msk [vmem:[#allocation4 + $0xb0] sm:$0xff] %vm3928_vm1, %v7497_v41  ;;  %v16870_v51 = vpack.c.bf16 %v7684_v15, %v7683_v39  ;;  %v16873_v46 = vld [vmem:[#allocation4 + $0x97] sm:$0xff] }
 0x4dd   : > { %19132 = vst [vmem:[#allocation34_spill] sm:$0xff] %v16864_v56  ;;  %7574 = vst.msk [vmem:[#allocation4 + $0xb8] sm:$0xff] %vm3928_vm1, %v7499_v62  ;;  %v7658_v30 = vpack.c.bf16 %v16864_v56, %v7634_v37  ;;  %v16875_v6 = vld [vmem:[#allocation4 + $0x91] sm:$0xff]  ;;  %v16886_v39 = vld [vmem:[#allocation4 + $0x89] sm:$0xff] }
 0x4de   : > { %19133 = vst [vmem:[#allocation24_spill] sm:$0xff] %v16870_v51  ;;  %19134 = vst [vmem:[#allocation11_spill] sm:$0xff] %v16873_v46  ;;  %v19136_v50 = vld [vmem:[#allocation52_spill] sm:$0xff]  ;;  %12293 = vmatprep.mubr.msk.bf16.mxu0 %vm3928_vm1, %v16870_v51  ;;  %v19138_v62 = vld [vmem:[#allocation43_spill] sm:$0xff] }
 0x4df   : > { %19135 = vst [vmem:[#allocation56_spill] sm:$0xff] %v16875_v6  ;;  %v16879_v58 = vmul.f32 %v19136_v50, %v16875_v6  ;;  %12327 = vmatprep.mubr.msk.bf16.mxu1 %vm3928_vm1, %v7658_v30  ;;  %v7636_v15 = vmul.f32 %v19138_v62, %v16873_v46  ;;  %19139 = vst [vmem:[#allocation84_spill] sm:$0xff] %v16886_v39  ;;  %v7501_v37 = vpop.permute.xlu1 %7500  ;;  %v7503_v41 = vpop.permute.xlu0 %7502  ;;  %v7685_v52 = vld [vmem:[#allocation4 + $0x98] sm:$0xff]  ;;  %v7686_v24 = vld [vmem:[#allocation4 + $0xa0] sm:$0xff] }
 0x4e0   : > { %v16888_v56 = vld [vmem:[#allocation4 + $0x9f] sm:$0xff]  ;;  %7575 = vst.msk [vmem:[#allocation4 + $0xc0] sm:$0xff] %vm3928_vm1, %v7501_v37  ;;  %7576 = vst.msk [vmem:[#allocation4 + $0xc8] sm:$0xff] %vm3928_vm1, %v7503_v41  ;;  %v16894_v60 = vpack.c.bf16 %v7686_v24, %v7685_v52  ;;  %v16897_v51 = vld [vmem:[#allocation4 + $0xa7] sm:$0xff] }
 0x4e1   : > { %19137 = vst [vmem:[#allocation66_spill] sm:$0xff] %v16879_v58  ;;  %19140 = vst [vmem:[#allocation38_spill] sm:$0xff] %v16888_v56  ;;  %v7659_v30 = vpack.c.bf16 %v16888_v56, %v7636_v15  ;;  %v16899_v62 = vld [vmem:[#allocation4 + $0xa1] sm:$0xff]  ;;  %v19144_v46 = vld [vmem:[#allocation60_spill] sm:$0xff] }
 0x4e2   : > { %19141 = vst [vmem:[#allocation28_spill] sm:$0xff] %v16894_v60  ;;  %19142 = vst [vmem:[#allocation17_spill] sm:$0xff] %v16897_v51  ;;  %v16903_v6 = vmul.f32 %v19144_v46, %v16899_v62  ;;  %12294 = vmatmul.mubr.msk.bf16.gmra.mxu0 %vm3928_vm1, %v16894_v60  ;;  %v19146_v37 = vld [vmem:[#allocation50_spill] sm:$0xff]  ;;  %v16910_v52 = vld [vmem:[#allocation4 + $0x99] sm:$0xff] }
 0x4e3   : > { %19143 = vst [vmem:[#allocation12_spill] sm:$0xff] %v16899_v62  ;;  %12328 = vmatmul.mubr.msk.bf16.gmra.mxu1 %vm3928_vm1, %v7659_v30  ;;  %v7638_v24 = vmul.f32 %v19146_v37, %v16897_v51  ;;  %19147 = vst [vmem:[#allocation82_spill] sm:$0xff] %v16910_v52  ;;  %v7505_v15 = vpop.permute.xlu1 %7504  ;;  %v7507_v41 = vpop.permute.xlu0 %7506  ;;  %v7687_v36 = vld [vmem:[#allocation4 + $0xa8] sm:$0xff]  ;;  %v7688_v58 = vld [vmem:[#allocation4 + $0xb0] sm:$0xff] }
 0x4e4   : > { %19145 = vst [vmem:[#allocation75_spill] sm:$0xff] %v16903_v6  ;;  %v16912_v56 = vld [vmem:[#allocation4 + $0xaf] sm:$0xff]  ;;  %7577 = vst.msk [vmem:[#allocation4 + $0xd0] sm:$0xff] %vm3928_vm1, %v7505_v15  ;;  %v16918_v59 = vpack.c.bf16 %v7688_v58, %v7687_v36  ;;  %v16921_v60 = vld [vmem:[#allocation4 + $0xb7] sm:$0xff] }
 0x4e5   : > { %19148 = vst [vmem:[#allocation90_spill] sm:$0xff] %v16912_v56  ;;  %7578 = vst.msk [vmem:[#allocation4 + $0xd8] sm:$0xff] %vm3928_vm1, %v7507_v41  ;;  %v7660_v30 = vpack.c.bf16 %v16912_v56, %v7638_v24  ;;  %v16923_v37 = vld [vmem:[#allocation4 + $0xb1] sm:$0xff]  ;;  %v19154_v15 = vld [vmem:[#allocation57_spill] sm:$0xff] }
 0x4e6   : > { %19149 = vst [vmem:[#allocation14_spill] sm:$0xff] %v16918_v59  ;;  %19150 = vst [vmem:[#allocation102_spill] sm:$0xff] %v16921_v60  ;;  %v19152_v51 = vld [vmem:[#allocation63_spill] sm:$0xff]  ;;  %12297 = vmatprep.mubr.msk.bf16.mxu0 %vm3928_vm1, %v16918_v59  ;;  %v7640_v41 = vmul.f32 %v19154_v15, %v16921_v60  ;;  %v7689_v62 = vld [vmem:[#allocation4 + $0xb8] sm:$0xff] }
 0x4e7   : > { %19151 = vst [vmem:[#allocation31_spill] sm:$0xff] %v16923_v37  ;;  %v16927_v39 = vmul.f32 %v19152_v51, %v16923_v37  ;;  %12331 = vmatprep.mubr.msk.bf16.mxu1 %vm3928_vm1, %v7660_v30  ;;  %v16934_v58 = vld [vmem:[#allocation4 + $0xa9] sm:$0xff]  ;;  %v7509_v36 = vpop.permute.xlu1 %7508  ;;  %v7511_v24 = vpop.permute.xlu0 %7510  ;;  %v7690_v6 = vld [vmem:[#allocation4 + $0xc0] sm:$0xff]  ;;  %v19160_v37 = vld [vmem:[#allocation44_spill] sm:$0xff] }
 0x4e8   : > { %19155 = vst [vmem:[#allocation13_spill] sm:$0xff] %v16934_v58  ;;  %v16936_v56 = vld [vmem:[#allocation4 + $0xbf] sm:$0xff]  ;;  %7579 = vst.msk [vmem:[#allocation4 + $0xe0] sm:$0xff] %vm3928_vm1, %v7509_v36  ;;  %v16942_v59 = vpack.c.bf16 %v7690_v6, %v7689_v62  ;;  %v16945_v15 = vld [vmem:[#allocation4 + $0xc7] sm:$0xff] }
 0x4e9   : > { %19153 = vst [vmem:[#allocation68_spill] sm:$0xff] %v16927_v39  ;;  %19156 = vst [vmem:[#allocation53_spill] sm:$0xff] %v16936_v56  ;;  %v7661_v30 = vpack.c.bf16 %v16936_v56, %v7640_v41  ;;  %v16947_v60 = vld [vmem:[#allocation4 + $0xc1] sm:$0xff]  ;;  %v16958_v6 = vld [vmem:[#allocation4 + $0xb9] sm:$0xff] }
 0x4ea   : > { %7580 = vst.msk [vmem:[#allocation4 + $0xe8] sm:$0xff] %vm3928_vm1, %v7511_v24  ;;  %19157 = vst [vmem:[#allocation18_spill] sm:$0xff] %v16942_v59  ;;  %v16951_v51 = vmul.f32 %v19160_v37, %v16947_v60  ;;  %12298 = vmatmul.mubr.msk.bf16.gmra.mxu0 %vm3928_vm1, %v16942_v59  ;;  %v19162_v36 = vld [vmem:[#allocation61_spill] sm:$0xff]  ;;  %v7691_v52 = vld [vmem:[#allocation4 + $0xc8] sm:$0xff] }
 0x4eb   : > { %19158 = vst [vmem:[#allocation89_spill] sm:$0xff] %v16945_v15  ;;  %19159 = vst [vmem:[#allocation78_spill] sm:$0xff] %v16947_v60  ;;  %12332 = vmatmul.mubr.msk.bf16.gmra.mxu1 %vm3928_vm1, %v7661_v30  ;;  %v7642_v24 = vmul.f32 %v19162_v36, %v16945_v15  ;;  %v7513_v62 = vpop.permute.xlu1 %7512  ;;  %v7515_v41 = vpop.permute.xlu0 %7514  ;;  %v7692_v39 = vld [vmem:[#allocation4 + $0xd0] sm:$0xff]  ;;  %v19168_v58 = vld [vmem:[#allocation49_spill] sm:$0xff] }
 0x4ec   : > { %19161 = vst [vmem:[#allocation80_spill] sm:$0xff] %v16951_v51  ;;  %19163 = vst [vmem:[#allocation69_spill] sm:$0xff] %v16958_v6  ;;  %v16960_v56 = vld [vmem:[#allocation4 + $0xcf] sm:$0xff]  ;;  %v16966_v59 = vpack.c.bf16 %v7692_v39, %v7691_v52  ;;  %v16969_v36 = vld [vmem:[#allocation4 + $0xd7] sm:$0xff] }
 0x4ed   : > { %19164 = vst [vmem:[#allocation46_spill] sm:$0xff] %v16960_v56  ;;  %7581 = vst.msk [vmem:[#allocation4 + $0xf0] sm:$0xff] %vm3928_vm1, %v7513_v62  ;;  %v7662_v30 = vpack.c.bf16 %v16960_v56, %v7642_v24  ;;  %v16971_v15 = vld [vmem:[#allocation4 + $0xd1] sm:$0xff]  ;;  %v7226_v62 = vadd.f32 1.0, %v16686_v47  ;;  %v16985_v24 = vpop.eup %12787  ;;  %v19177_v46 = vld [vmem:[#allocation86_spill] sm:$0xff] }
 0x4ee   : > { %7582 = vst.msk [vmem:[#allocation4 + $0xf8] sm:$0xff] %vm3928_vm1, %v7515_v41  ;;  %19165 = vst [vmem:[#allocation55_spill] sm:$0xff] %v16966_v59  ;;  %v16975_v37 = vmul.f32 %v19168_v58, %v16971_v15  ;;  %12301 = vmatprep.mubr.msk.bf16.mxu0 %vm3928_vm1, %v16966_v59  ;;  %v19170_v39 = vld [vmem:[#allocation83_spill] sm:$0xff]  ;;  %v7693_v56 = vld [vmem:[#allocation4 + $0xd8] sm:$0xff] }
 0x4ef   : > { %19166 = vst [vmem:[#allocation94_spill] sm:$0xff] %v16969_v36  ;;  %19167 = vst [vmem:[#allocation104_spill] sm:$0xff] %v16971_v15  ;;  %12335 = vmatprep.mubr.msk.bf16.mxu1 %vm3928_vm1, %v7662_v30  ;;  %v7644_v52 = vmul.f32 %v19170_v39, %v16969_v36  ;;  %v16983_v41 = vld [vmem:[#allocation4 + $0xc9] sm:$0xff]  ;;  %v7517_v60 = vpop.permute.xlu1 %7516  ;;  %v7321_v51 = vpop.permute.xlu0 %7320  ;;  %v7694_v6 = vld [vmem:[#allocation4 + $0xe0] sm:$0xff] }
 0x4f0   : > { %19169 = vst [vmem:[#allocation93_spill] sm:$0xff] %v16975_v37  ;;  %19171 = vst [vmem:[#allocation105_spill] sm:$0xff] %v16983_v41  ;;  %v16987_v15 = vld [vmem:[#allocation4 + $0xdf] sm:$0xff]  ;;  %v7386_v30 = vmul.f32 %v7321_v51, %v7226_v62  ;;  %v16992_v47 = vpack.c.bf16 %v7694_v6, %v7693_v56  ;;  %v7227_v51 = vadd.f32 1.0, %v16985_v24  ;;  %v8142_v6 = vld [vmem:[#allocation4 + $0x11] sm:$0xff] }
 0x4f1   : > { %19172 = vst [vmem:[#allocation9_spill] sm:$0xff] %v16985_v24  ;;  %19173 = vst [vmem:[#allocation71_spill] sm:$0xff] %v16987_v15  ;;  %v7663_v39 = vpack.c.bf16 %v16987_v15, %v7644_v52  ;;  %v16995_v36 = vld [vmem:[#allocation4 + $0xe7] sm:$0xff]  ;;  %v19179_v56 = vld [vmem:[#allocation85_spill] sm:$0xff] }
 0x4f2   : > { %7583 = vst.msk [vmem:[#allocation4 + $0x100] sm:$0xff] %vm3928_vm1, %v7517_v60  ;;  %19174 = vst [vmem:[#allocation95_spill] sm:$0xff] %v16992_v47  ;;  %v16997_v58 = vld [vmem:[#allocation4 + $0xe1] sm:$0xff]  ;;  %12302 = vmatmul.mubr.msk.bf16.gmra.mxu0 %vm3928_vm1, %v16992_v47  ;;  %v7646_v60 = vmul.f32 %v19179_v56, %v16995_v36  ;;  %v17009_v62 = vld [vmem:[#allocation4 + $0xd9] sm:$0xff]  ;;  %7518 = vrot.lane.b32.xlu1 %v7386_v30, %s12857_s28  ;;  %v8174_v30 = vmul.f32 %v19101_v48, %v8142_v6 }
 0x4f3   : > { %19175 = vst [vmem:[#allocation10_spill] sm:$0xff] %v16995_v36  ;;  %19176 = vst [vmem:[#allocation77_spill] sm:$0xff] %v16997_v58  ;;  %v17001_v50 = vmul.f32 %v19177_v46, %v16997_v58  ;;  %12336 = vmatmul.mubr.msk.bf16.gmra.mxu1 %vm3928_vm1, %v7663_v39  ;;  %v7323_v52 = vpop.permute.xlu0 %7322  ;;  %v7695_v59 = vld [vmem:[#allocation4 + $0xe8] sm:$0xff]  ;;  %v19184_v47 = vld [vmem:[#allocation88_spill] sm:$0xff] }
 0x4f4   : > { %19180 = vst [vmem:[#allocation16_spill] sm:$0xff] %v17009_v62  ;;  %v7696_v37 = vld [vmem:[#allocation4 + $0xf0] sm:$0xff]  ;;  %v7387_v39 = vmul.f32 %v7323_v52, %v7227_v51 }
 0x4f5   : > { %19178 = vst [vmem:[#allocation73_spill] sm:$0xff] %v17001_v50  ;;  %v17012_v58 = vld [vmem:[#allocation4 + $0xef] sm:$0xff]  ;;  %v17016_v15 = vpack.c.bf16 %v7696_v37, %v7695_v59  ;;  %v17019_v41 = vld [vmem:[#allocation4 + $0xf7] sm:$0xff] }
 0x4f6   : > { %19181 = vst [vmem:[#allocation67_spill] sm:$0xff] %v17012_v58  ;;  %v7664_v24 = vpack.c.bf16 %v17012_v58, %v7646_v60  ;;  %19183 = vst [vmem:[#allocation35_spill] sm:$0xff] %v17019_v41  ;;  %v17021_v56 = vld [vmem:[#allocation4 + $0xf1] sm:$0xff]  ;;  %v8141_v60 = vld [vmem:[#allocation4 + $0x9] sm:$0xff]  ;;  %7520 = vrot.lane.b32.xlu1 %v7387_v39, %s12857_s28  ;;  %v8499_v39 = vmul.f32 %v19089_v14, %v16677_v63  ;;  %v8176_v63 = vmul.f32 %v19105_v16, %v16697_v10 }
 0x4f7   : > { %19182 = vst [vmem:[#allocation106_spill] sm:$0xff] %v17016_v15  ;;  %v17033_v51 = vmul.f32 %v19184_v47, %v17021_v56  ;;  %12305 = vmatprep.mubr.msk.bf16.mxu0 %vm3928_vm1, %v17016_v15  ;;  %v19185_v37 = vld [vmem:[#allocation92_spill] sm:$0xff]  ;;  %v17040_v52 = vld [vmem:[#allocation4 + $0xe9] sm:$0xff]  ;;  %v7069_v6 = vpop.permute.xlu0 %7068  ;;  %v8503_v10 = vmul.f32 %v19103_v45, %v16726_v26  ;;  %v8180_v26 = vmul.f32 %v19113_v32, %v16754_v42 }
 0x4f8   : > { %12339 = vmatprep.mubr.msk.bf16.mxu1 %vm3928_vm1, %v7664_v24  ;;  %v7648_v59 = vmul.f32 %v19185_v37, %v17019_v41  ;;  %v11125_v50 = vld [vmem:[%s18175_s5 + $0x14] sm:$0xf]  ;;  %v7697_v48 = vld [vmem:[#allocation4 + $0xf8] sm:$0xff]  ;;  %7164 = vst.msk [vmem:[%s17028_s29] sm:$0xff] %vm3928_vm1, %v7069_v6  ;;  %v8205_v41 = vpack.c.bf16 %v8174_v30, %v8141_v60  ;;  %v8531_v36 = vpack.c.bf16 %v16684_v0, %v8499_v39 }
 0x4f9   : > { %v7698_v58 = vld [vmem:[#allocation4 + $0x100] sm:$0xff]  ;;  %12613 = vmatprep.subr.msk.bf16.mxu1 %vm4178_vm0, %v11125_v50  ;;  %v8501_v30 = vmul.f32 %v19099_v8, %v16693_v38  ;;  %v8206_v0 = vpack.c.bf16 %v8176_v63, %v16715_v25  ;;  %v9218_v38 = vsel %vm4178_vm0, %v11125_v50, 0  ;;  %v8182_v50 = vmul.f32 %v19117_v11, %v16779_v3 }
 0x4fa   : > { %v17046_v62 = vld [vmem:[#allocation4 + $0xff] sm:$0xff]  ;;  %v17053_v15 = vpack.c.bf16 %v7698_v58, %v7697_v48  ;;  %7070 = vrot.lane.b32.xlu1 %v16502_v57, %s12857_s28  ;;  %v8178_v58 = vmul.f32 %v19109_v12, %v16728_v53  ;;  %v8892_v53 = vsel %vm4178_vm0, %v16704_v7, 0  ;;  %v8208_v42 = vpack.c.bf16 %v8180_v26, %v16766_v31 }
 0x4fb   : > { %v7665_v37 = vpack.c.bf16 %v17046_v62, %v7648_v59  ;;  %v7073_v48 = vpop.permute.xlu0 %7072  ;;  %v8507_v3 = vmul.f32 %v19111_v49, %v16777_v18  ;;  %v8209_v59 = vpack.c.bf16 %v8182_v50, %v16790_v28  ;;  %v8186_v18 = vmul.f32 %v19128_v2, %v16827_v34  ;;  %v19197_v50 = vld [vmem:[#allocation11_spill] sm:$0xff]  ;;  %v9741_v2 = vld [vmem:[#allocation4 + $0x38] sm:$0xff] }
 0x4fc   : > { %12306 = vmatmul.mubr.msk.bf16.gmra.mxu0 %vm3928_vm1, %v17053_v15  ;;  %7166 = vst.msk [vmem:[%s17028_s29 + $0x10] sm:$0xff] %vm3928_vm1, %v7073_v48 }
 0x4fd   : > { %12340 = vmatmul.mubr.msk.bf16.gmra.mxu1 %vm3928_vm1, %v7665_v37  ;;  %12345 = vmatprep.mubr.msk.bf16.mxu0 %vm3928_vm1, %v8205_v41  ;;  %v8207_v41 = vpack.c.bf16 %v8178_v58, %v16741_v54  ;;  %v8211_v34 = vpack.c.bf16 %v8186_v18, %v16838_v1  ;;  %v19190_v58 = vld [vmem:[#allocation56_spill] sm:$0xff]  ;;  %v19203_v18 = vld [vmem:[#allocation63_spill] sm:$0xff] }
 0x4fe   : > { %12379 = vmatprep.mubr.msk.bf16.mxu1 %vm3928_vm1, %v8531_v36  ;;  %7074 = vrot.lane.b32.xlu1 %v16509_v19, %s12857_s28  ;;  %v8532_v36 = vpack.c.bf16 %v16717_v27, %v8501_v30  ;;  %v8533_v19 = vpack.c.bf16 %v16743_v44, %v8503_v10  ;;  %v17092_v27 = vld [vmem:[%s18175_s5 + $0x18] sm:$0xf] }
 0x4ff   : > { %v7077_v57 = vpop.permute.xlu0 %7076  ;;  %v19191_v30 = vld [vmem:[#allocation60_spill] sm:$0xff] }
 0x500   : > { %7168 = vst.msk [vmem:[%s17028_s29 + $0x20] sm:$0xff] %vm3928_vm1, %v7077_v57  ;;  %v8190_v57 = vmul.f32 %v19191_v30, %v19190_v58 }
 0x502   : > { %7078 = vrot.lane.b32.xlu1 %v16532_v29, %s12857_s28  ;;  %v8505_v29 = vmul.f32 %v19107_v23, %v16752_v61  ;;  %v8535_v61 = vpack.c.bf16 %v16792_v55, %v8507_v3  ;;  %v8509_v55 = vmul.f32 %v19115_v22, %v16801_v40  ;;  %v19186_v40 = vld [vmem:[#allocation109_spill] sm:$0xff]  ;;  %v19200_v3 = vld [vmem:[#allocation38_spill] sm:$0xff] }
 0x503   : > { %v7081_v7 = vpop.permute.xlu0 %7080 }
 0x504   : > { %12346 = vmatmul.mubr.msk.bf16.vlgmr.msra.gmra.mxu0 %vm3928_vm1, %v8206_v0  ;;  %7170 = vst.msk [vmem:[%s17028_s29 + $0x30] sm:$0xff] %vm3928_vm1, %v7081_v7  ;;  %v8534_v37 = vpack.c.bf16 %v16768_v17, %v8505_v29  ;;  %v8184_v17 = vmul.f32 %v19121_v13, %v16803_v5  ;;  %v8536_v6 = vpack.c.bf16 %v16816_v35, %v8509_v55  ;;  %v19188_v35 = vld [vmem:[#allocation59_spill] sm:$0xff]  ;;  %v19192_v0 = vld [vmem:[#allocation45_spill] sm:$0xff]  ;;  %v19196_v7 = vld [vmem:[#allocation34_spill] sm:$0xff] }
 0x505   : > { %12380 = vmatmul.mubr.msk.bf16.vlgmr.msra.gmra.mxu1 %vm3928_vm1, %v8532_v36  ;;  %12349 = vmatprep.mubr.msk.bf16.mxu0 %vm3928_vm1, %v8207_v41  ;;  %v8511_v5 = vmul.f32 %v19119_v43, %v16825_v33  ;;  %v19189_v33 = vld [vmem:[#allocation52_spill] sm:$0xff]  ;;  %v19193_v36 = vld [vmem:[#allocation37_spill] sm:$0xff] }
 0x506   : > { %12383 = vmatprep.mubr.msk.bf16.mxu1 %vm3928_vm1, %v8533_v19  ;;  %12412 = vmatpush3.bf16.msra.mxu0 %v8892_v53  ;;  %v8210_v60 = vpack.c.bf16 %v8184_v17, %v16814_v9  ;;  %v8188_v63 = vmul.f32 %v19189_v33, %v19188_v35  ;;  %v8513_v10 = vmul.f32 %v19193_v36, %v19192_v0  ;;  %v19194_v41 = vld [vmem:[#allocation8_spill] sm:$0xff]  ;;  %v19212_v0 = vld [vmem:[#allocation50_spill] sm:$0xff] }
 0x507   : > { %12446 = vmatpush3.bf16.msra.mxu1 %v9218_v38  ;;  %12614 = vmatprep.subr.msk.bf16.mxu0 %vm4178_vm0, %v17092_v27  ;;  %v7085_v44 = vpop.permute.xlu0 %7084  ;;  %v8537_v39 = vpack.c.bf16 %v19186_v40, %v8511_v5  ;;  %v19195_v19 = vld [vmem:[#allocation100_spill] sm:$0xff]  ;;  %v19206_v5 = vld [vmem:[#allocation17_spill] sm:$0xff] }
 0x508   : > { %7082 = vrot.lane.b32.xlu1 %v16525_v4, %s12857_s28  ;;  %7172 = vst.msk [vmem:[%s17028_s29 + $0x40] sm:$0xff] %vm3928_vm1, %v7085_v44  ;;  %v8212_v38 = vpack.c.bf16 %v8188_v63, %v19195_v19  ;;  %v8538_v26 = vpack.c.bf16 %v19196_v7, %v8513_v10  ;;  %v19198_v29 = vld [vmem:[#allocation40_spill] sm:$0xff]  ;;  %v19210_v63 = vld [vmem:[#allocation90_spill] sm:$0xff] }
 0x509   : > { %v8515_v44 = vmul.f32 %v19198_v29, %v19197_v50  ;;  %v19202_v17 = vld [vmem:[#allocation12_spill] sm:$0xff] }
 0x50a   : > { %v8192_v55 = vmul.f32 %v19203_v18, %v19202_v17  ;;  %v19220_v17 = vld [vmem:[#allocation57_spill] sm:$0xff] }
 0x50b   : > { %v7089_v4 = vpop.permute.xlu0 %7088  ;;  %v9419_v13 = vld [vmem:[#allocation4 + $0x57] sm:$0xff] }
 0x50c   : > { %12350 = vmatmul.mubr.msk.bf16.gmra.mxu0 %vm3928_vm1, %v8208_v42  ;;  %7086 = vrot.lane.b32.xlu1 %v16553_v21, %s12857_s28  ;;  %7174 = vst.msk [vmem:[%s17028_s29 + $0x50] sm:$0xff] %vm3928_vm1, %v7089_v4  ;;  %v19199_v42 = vld [vmem:[#allocation84_spill] sm:$0xff] }
 0x50d   : > { %12384 = vmatmul.mubr.msk.bf16.gmra.mxu1 %vm3928_vm1, %v8534_v37  ;;  %12353 = vmatprep.mubr.msk.bf16.mxu0 %vm3928_vm1, %v8209_v59  ;;  %v8213_v37 = vpack.c.bf16 %v8190_v57, %v19199_v42  ;;  %v8539_v59 = vpack.c.bf16 %v19200_v3, %v8515_v44  ;;  %v19211_v57 = vld [vmem:[#allocation102_spill] sm:$0xff] }
 0x50e   : > { %12387 = vmatprep.mubr.msk.bf16.mxu1 %vm3928_vm1, %v8535_v61  ;;  %v19201_v61 = vld [vmem:[#allocation72_spill] sm:$0xff]  ;;  %v8519_v10 = vmul.f32 %v19212_v0, %v19211_v57  ;;  %v19216_v44 = vld [vmem:[#allocation78_spill] sm:$0xff]  ;;  %v19226_v57 = vld [vmem:[#allocation105_spill] sm:$0xff] }
 0x50f   : > { %v7093_v21 = vpop.permute.xlu0 %7092 }
 0x510   : > { %7090 = vrot.lane.b32.xlu1 %v16545_v20, %s12857_s28  ;;  %7176 = vst.msk [vmem:[%s17028_s29 + $0x60] sm:$0xff] %vm3928_vm1, %v7093_v21  ;;  %v19187_v20 = vld [vmem:[#allocation79_spill] sm:$0xff] }
 0x511   : > { %v19204_v21 = vld [vmem:[#allocation31_spill] sm:$0xff] }
 0x513   : > { %v7097_v48 = vpop.permute.xlu0 %7096 }
 0x514   : > { %12354 = vmatmul.mubr.msk.bf16.gmra.mxu0 %vm3928_vm1, %v8210_v60  ;;  %7094 = vrot.lane.b32.xlu1 %v19187_v20, %s12857_s28  ;;  %7178 = vst.msk [vmem:[%s17028_s29 + $0x70] sm:$0xff] %vm3928_vm1, %v7097_v48  ;;  %v19205_v60 = vld [vmem:[#allocation44_spill] sm:$0xff]  ;;  %v19209_v48 = vld [vmem:[#allocation82_spill] sm:$0xff] }
 0x515   : > { %12388 = vmatmul.mubr.msk.bf16.gmra.mxu1 %vm3928_vm1, %v8536_v6  ;;  %12357 = vmatprep.mubr.msk.bf16.mxu0 %vm3928_vm1, %v8211_v34  ;;  %v8194_v6 = vmul.f32 %v19205_v60, %v19204_v21  ;;  %v19207_v34 = vld [vmem:[#allocation43_spill] sm:$0xff]  ;;  %v8214_v35 = vpack.c.bf16 %v8192_v55, %v19209_v48  ;;  %v19221_v21 = vld [vmem:[#allocation58_spill] sm:$0xff] }
 0x516   : > { %12391 = vmatprep.mubr.msk.bf16.mxu1 %vm3928_vm1, %v8537_v39  ;;  %v8517_v40 = vmul.f32 %v19207_v34, %v19206_v5  ;;  %v19208_v39 = vld [vmem:[#allocation70_spill] sm:$0xff]  ;;  %v19222_v5 = vld [vmem:[#allocation69_spill] sm:$0xff] }
 0x517   : > { %v7101_v53 = vpop.permute.xlu0 %7100 }
 0x518   : > { %7098 = vrot.lane.b32.xlu1 %v19194_v41, %s12857_s28  ;;  %7180 = vst.msk [vmem:[%s17028_s29 + $0x80] sm:$0xff] %vm3928_vm1, %v7101_v53  ;;  %v8540_v58 = vpack.c.bf16 %v19210_v63, %v8517_v40  ;;  %v19213_v41 = vld [vmem:[#allocation13_spill] sm:$0xff] }
 0x519   : > { %v8215_v53 = vpack.c.bf16 %v8194_v6, %v19213_v41  ;;  %v19225_v63 = vld [vmem:[#allocation61_spill] sm:$0xff] }
 0x51b   : > { %v7105_v4 = vpop.permute.xlu0 %7104 }
 0x51c   : > { %12358 = vmatmul.mubr.msk.bf16.gmra.mxu0 %vm3928_vm1, %v8212_v38  ;;  %7102 = vrot.lane.b32.xlu1 %v19201_v61, %s12857_s28  ;;  %7182 = vst.msk [vmem:[%s17028_s29 + $0x90] sm:$0xff] %vm3928_vm1, %v7105_v4  ;;  %v19214_v38 = vld [vmem:[#allocation53_spill] sm:$0xff] }
 0x51d   : > { %12392 = vmatmul.mubr.msk.bf16.gmra.mxu1 %vm3928_vm1, %v8538_v26  ;;  %12361 = vmatprep.mubr.msk.bf16.mxu0 %vm3928_vm1, %v8213_v37  ;;  %v8541_v7 = vpack.c.bf16 %v19214_v38, %v8519_v10  ;;  %v19215_v26 = vld [vmem:[#allocation54_spill] sm:$0xff]  ;;  %v19217_v37 = vld [vmem:[#allocation49_spill] sm:$0xff] }
 0x51e   : > { %12395 = vmatprep.mubr.msk.bf16.mxu1 %vm3928_vm1, %v8539_v59  ;;  %v8196_v3 = vmul.f32 %v19217_v37, %v19216_v44  ;;  %v19218_v59 = vld [vmem:[#allocation104_spill] sm:$0xff]  ;;  %v19219_v4 = vld [vmem:[#allocation89_spill] sm:$0xff] }
 0x51f   : > { %v7109_v20 = vpop.permute.xlu0 %7108  ;;  %v8198_v61 = vmul.f32 %v19177_v46, %v19218_v59  ;;  %v8521_v55 = vmul.f32 %v19220_v17, %v19219_v4  ;;  %v19232_v4 = vld [vmem:[#allocation83_spill] sm:$0xff] }
 0x520   : > { %7106 = vrot.lane.b32.xlu1 %v19208_v39, %s12857_s28  ;;  %7184 = vst.msk [vmem:[%s17028_s29 + $0xa0] sm:$0xff] %vm3928_vm1, %v7109_v20  ;;  %v8216_v40 = vpack.c.bf16 %v8196_v3, %v19222_v5  ;;  %v19223_v39 = vld [vmem:[#allocation46_spill] sm:$0xff]  ;;  %v19230_v3 = vld [vmem:[#allocation20_spill] sm:$0xff] }
 0x521   : > { %v8542_v20 = vpack.c.bf16 %v19223_v39, %v8521_v55  ;;  %v8217_v10 = vpack.c.bf16 %v8198_v61, %v19226_v57  ;;  %v8202_v59 = vmul.f32 %v19230_v3, %v17021_v56  ;;  %v19231_v61 = vld [vmem:[#allocation10_spill] sm:$0xff]  ;;  %v9414_v37 = vld [vmem:[#allocation4 + $0x2f] sm:$0xff] }
 0x522   : > { %v8525_v55 = vmul.f32 %v19232_v4, %v19231_v61 }
 0x523   : > { %v7113_v50 = vpop.permute.xlu0 %7112 }
 0x524   : > { %12362 = vmatmul.mubr.msk.bf16.gmra.mxu0 %vm3928_vm1, %v8214_v35  ;;  %7110 = vrot.lane.b32.xlu1 %v19215_v26, %s12857_s28  ;;  %7186 = vst.msk [vmem:[%s17028_s29 + $0xb0] sm:$0xff] %vm3928_vm1, %v7113_v50  ;;  %v19224_v35 = vld [vmem:[#allocation94_spill] sm:$0xff]  ;;  %v19229_v50 = vld [vmem:[#allocation77_spill] sm:$0xff] }
 0x525   : > { %12396 = vmatmul.mubr.msk.bf16.gmra.mxu1 %vm3928_vm1, %v8540_v58  ;;  %12365 = vmatprep.mubr.msk.bf16.mxu0 %vm3928_vm1, %v8215_v53  ;;  %v8523_v58 = vmul.f32 %v19225_v63, %v19224_v35  ;;  %v19227_v53 = vld [vmem:[#allocation71_spill] sm:$0xff]  ;;  %v8200_v44 = vmul.f32 %v19184_v47, %v19229_v50  ;;  %v19239_v50 = vld [vmem:[#allocation9_spill] sm:$0xff] }
 0x526   : > { %12399 = vmatprep.mubr.msk.bf16.mxu1 %vm3928_vm1, %v8541_v7  ;;  %v19228_v7 = vld [vmem:[#allocation99_spill] sm:$0xff] }
 0x527   : > { %v7117_v6 = vpop.permute.xlu0 %7116  ;;  %v8543_v38 = vpack.c.bf16 %v19227_v53, %v8523_v58  ;;  %v19236_v58 = vld [vmem:[#allocation35_spill] sm:$0xff] }
 0x528   : > { %7114 = vrot.lane.b32.xlu1 %v19221_v21, %s12857_s28  ;;  %7188 = vst.msk [vmem:[%s17028_s29 + $0xc0] sm:$0xff] %vm3928_vm1, %v7117_v6  ;;  %v19233_v21 = vld [vmem:[#allocation65_spill] sm:$0xff] }
 0x52b   : > { %v7121_v26 = vpop.permute.xlu0 %7120 }
 0x52c   : > { %12366 = vmatmul.mubr.msk.bf16.gmra.mxu0 %vm3928_vm1, %v8216_v40  ;;  %7118 = vrot.lane.b32.xlu1 %v19228_v7, %s12857_s28  ;;  %7190 = vst.msk [vmem:[%s17028_s29 + $0xd0] sm:$0xff] %vm3928_vm1, %v7121_v26  ;;  %v19234_v40 = vld [vmem:[#allocation16_spill] sm:$0xff]  ;;  %v19238_v7 = vld [vmem:[#allocation107_spill] sm:$0xff] }
 0x52d   : > { %12400 = vmatmul.mubr.msk.bf16.gmra.mxu1 %vm3928_vm1, %v8542_v20  ;;  %12369 = vmatprep.mubr.msk.bf16.mxu0 %vm3928_vm1, %v8217_v10  ;;  %v8218_v39 = vpack.c.bf16 %v8200_v44, %v19234_v40  ;;  %v19235_v20 = vld [vmem:[#allocation67_spill] sm:$0xff]  ;;  %v19237_v10 = vld [vmem:[#allocation85_spill] sm:$0xff] }
 0x52e   : > { %12403 = vmatprep.mubr.msk.bf16.mxu1 %vm3928_vm1, %v8543_v38  ;;  %v8544_v35 = vpack.c.bf16 %v19235_v20, %v8525_v55  ;;  %v8527_v53 = vmul.f32 %v19237_v10, %v19236_v58  ;;  %v8219_v38 = vpack.c.bf16 %v8202_v59, %v17040_v52  ;;  %v11159_v44 = vld [vmem:[%s18175_s5 + $0x1c] sm:$0xf]  ;;  %v19241_v58 = vld [vmem:[#allocation92_spill] sm:$0xff] }
 0x52f   : > { %v7125_v6 = vpop.permute.xlu0 %7124  ;;  %12615 = vmatprep.subr.msk.bf16.mxu1 %vm4178_vm0, %v11159_v44  ;;  %v17260_v20 = vld [vmem:[#allocation4 + $0xf9] sm:$0xff] }
 0x530   : > { %7122 = vrot.lane.b32.xlu1 %v19233_v21, %s12857_s28  ;;  %7192 = vst.msk [vmem:[%s17028_s29 + $0xe0] sm:$0xff] %vm3928_vm1, %v7125_v6  ;;  %v8545_v56 = vpack.c.bf16 %v17046_v62, %v8527_v53  ;;  %v19240_v6 = vld [vmem:[#allocation22_spill] sm:$0xff] }
 0x533   : > { %v7129_v26 = vpop.permute.xlu0 %7128 }
 0x534   : > { %12370 = vmatmul.mubr.msk.bf16.gmra.mxu0 %vm3928_vm1, %v8218_v39  ;;  %7126 = vrot.lane.b32.xlu1 %v19238_v7, %s12857_s28  ;;  %7194 = vst.msk [vmem:[%s17028_s29 + $0xf0] sm:$0xff] %vm3928_vm1, %v7129_v26 }
 0x535   : > { %12404 = vmatmul.mubr.msk.bf16.gmra.mxu1 %vm3928_vm1, %v8544_v35  ;;  %12373 = vmatprep.mubr.msk.bf16.mxu0 %vm3928_vm1, %v8219_v38 }
 0x536   : > { %12407 = vmatprep.mubr.msk.bf16.mxu1 %vm3928_vm1, %v8545_v56 }
 0x538   : > { %7130 = vrot.lane.b32.xlu1 %v19239_v50, %s12857_s28  ;;  %s10580_s28 = sshll.u32 %s352_s20, 4  ;;  %s10581_s28 = int_to_ptr.vmem [resolvable:$true] %s10580_s28 }
 0x539   : > { %s12793_s11 = scalar_lea.vmem %s10581_s28, 16  ;;  %p12800_p0 = scmp.lt.s32.totalorder %s10581_s28, %s12798_s30 }
 0x53a   : > { %p12794_p11 = scmp.ne.s32.totalorder %s10581_s28, %s12793_s11  ;;  %p12801_p1 = scmp.lt.s32.totalorder %s12799_s17, %s12793_s11 }
 0x53c   : > { %p12795_p12 = pnand %p12794_p11, %p12953_p5  ;;  %p12802_p2 = por %p12801_p1, %p12800_p0 }
 0x53e   : > { %p12796_p13 = pneg %p12795_p12 }
 0x540   : > { %p12803_p3 = pnand %p12802_p2, %p12796_p13 }
 0x564   : > { %v7519_v62 = vpop.permute.xlu1 %7518 }
 0x565   : > { %7584 = vst.msk [vmem:[#allocation4 + $0x108] sm:$0xff] %vm3928_vm1, %v7519_v62 }
 0x568   : > { %v7521_v59 = vpop.permute.xlu1 %7520 }
 0x569   : > { %7585 = vst.msk [vmem:[#allocation4 + $0x110] sm:$0xff] %vm3928_vm1, %v7521_v59  ;;  %v19242_v59 = vld [vmem:[#allocation51_spill] sm:$0xff] }
 0x56c   : > { %v7071_v61 = vpop.permute.xlu1 %7070  ;;  %v17254_v55 = vld [vmem:[#allocation4 + $0x101] sm:$0xff] }
 0x56d   : > { %v8497_v21 = vld [vmem:[#allocation4 + $0x107] sm:$0xff]  ;;  %7165 = vst.msk [vmem:[%s17028_s29 + $0x8] sm:$0xff] %vm3928_vm1, %v7071_v61  ;;  %v8204_v39 = vmul.f32 %v19240_v6, %v17254_v55 }
 0x56e   : > { %v8529_v53 = vmul.f32 %v19241_v58, %v8497_v21  ;;  %v17265_v38 = vmul.f32 %v19237_v10, %v8497_v21  ;;  %v19245_v21 = vld [vmem:[#allocation76_spill] sm:$0xff] }
 0x56f   : > { %v8220_v35 = vpack.c.bf16 %v8204_v39, %v17260_v20  ;;  %v19246_v39 = vpack.c.bf16 %v19245_v21, %v16715_v25  ;;  %v19247_v25 = vld [vmem:[#allocation98_spill] sm:$0xff]  ;;  %v9838_v21 = vsel %vm4178_vm0, %v11159_v44, 0  ;;  %v19253_v44 = vmov 0.0  }
 0x570   : > { %v7075_v56 = vpop.permute.xlu1 %7074  ;;  %v17267_v7 = vld [vmem:[#allocation4 + $0x10f] sm:$0xff] }
 0x571   : > { %7167 = vst.msk [vmem:[%s17028_s29 + $0x18] sm:$0xff] %vm3928_vm1, %v7075_v56  ;;  %12374 = vmatmul.mubr.msk.bf16.gmra.mxu0 %vm3928_vm1, %v8220_v35  ;;  %v8546_v26 = vpack.c.bf16 %v17267_v7, %v8529_v53  ;;  %v17273_v50 = vld [vmem:[#allocation4 + $0x111] sm:$0xff]  ;;  %v17284_v61 = vld [vmem:[#allocation4 + $0x109] sm:$0xff]  ;;  %v9544_v56 = vsel %vm4178_vm0, %v17092_v27, 0 }
 0x572   : > { %12413 = vmatprep.mubr.msk.bf16.mxu0 %vm3928_vm1, %v19242_v59  ;;  %v17281_v10 = vmul.f32 %v19230_v3, %v17273_v50  ;;  %19244 = vst [vmem:[#allocation23_spill] sm:$0xff] %v17284_v61  ;;  %v19251_v53 = vld [vmem:[#allocation91_spill] sm:$0xff] }
 0x573   : > { %12408 = vmatmul.mubr.msk.bf16.gmra.mxu1 %vm3928_vm1, %v8546_v26  ;;  %v17299_v26 = vld [vmem:[%s18175_s5 + $0x20] sm:$0xf] }
 0x574   : > { %19243 = vst [vmem:[#allocation41_spill] sm:$0xff] %v17281_v10  ;;  %12447 = vmatprep.mubr.msk.bf16.mxu1 %vm3928_vm1, %v19246_v39  ;;  %v7079_v35 = vpop.permute.xlu1 %7078  ;;  %v19248_v39 = vld [vmem:[#allocation81_spill] sm:$0xff] }
 0x575   : > { %7169 = vst.msk [vmem:[%s17028_s29 + $0x28] sm:$0xff] %vm3928_vm1, %v7079_v35  ;;  %v19249_v35 = vld [vmem:[#allocation96_spill] sm:$0xff] }
 0x576   : > { %v19250_v27 = vpack.c.bf16 %v19249_v35, %v16741_v54  ;;  %v19254_v54 = vld [vmem:[#allocation108_spill] sm:$0xff] }
 0x579   : > { %12414 = vmatmul.mubr.msk.bf16.vlgmr.msra.gmra.mxu0 %vm3928_vm1, %v19247_v25 }
 0x57a   : > { %v7083_v59 = vpop.permute.xlu1 %7082  ;;  %12480 = vmatpush3.bf16.msra.mxu0 %v9544_v56  ;;  %12417 = vmatprep.mubr.msk.bf16.mxu0 %vm3928_vm1, %v19248_v39 }
 0x57b   : > { %7171 = vst.msk [vmem:[%s17028_s29 + $0x38] sm:$0xff] %vm3928_vm1, %v7083_v59  ;;  %12448 = vmatmul.mubr.msk.bf16.vlgmr.msra.gmra.mxu1 %vm3928_vm1, %v19250_v27  ;;  %12616 = vmatprep.subr.msk.bf16.mxu0 %vm4178_vm0, %v17299_v26  ;;  %v19252_v59 = vpack.c.bf16 %v19251_v53, %v16766_v31  ;;  %v19255_v31 = vld [vmem:[#allocation47_spill] sm:$0xff]  ;;  %v19256_v53 = vld [vmem:[#allocation101_spill] sm:$0xff] }
 0x57c   : > { %12514 = vmatpush3.bf16.msra.mxu1 %v9838_v21  ;;  %v19257_v21 = vpack.c.bf16 %v19256_v53, %v16790_v28 }
 0x57d   : > { %12451 = vmatprep.mubr.msk.bf16.mxu1 %vm3928_vm1, %v19252_v59  ;;  %12581 = vmatprep.subr.bf16.mxu1 %v19253_v44 }
 0x57e   : > { %v7087_v25 = vpop.permute.xlu1 %7086 }
 0x57f   : > { %7173 = vst.msk [vmem:[%s17028_s29 + $0x48] sm:$0xff] %vm3928_vm1, %v7087_v25 }
 0x581   : > { %12418 = vmatmul.mubr.msk.bf16.gmra.mxu0 %vm3928_vm1, %v19254_v54 }
 0x582   : > { %v7091_v56 = vpop.permute.xlu1 %7090  ;;  %v12279_v39 = vpop.f32.mrf.mxu0  ;;  %12421 = vmatprep.mubr.msk.bf16.mxu0 %vm3928_vm1, %v19255_v31 }
 0x583   : > { %7175 = vst.msk [vmem:[%s17028_s29 + $0x58] sm:$0xff] %vm3928_vm1, %v7091_v56  ;;  %v12313_v35 = vpop.f32.mrf.mxu1  ;;  %12452 = vmatmul.mubr.msk.bf16.gmra.mxu1 %vm3928_vm1, %v19257_v21  ;;  %v19258_v56 = vld [vmem:[#allocation87_spill] sm:$0xff] }
 0x584   : > { %v17325_v27 = vadd.f32 %v12313_v35, %v12279_v39  ;;  %v7802_v59 = vpop.f32.mrf.mxu0  ;;  %v19259_v54 = vpack.c.bf16 %v19258_v56, %v16814_v9 }
 0x585   : > { %v8014_v25 = vpop.f32.mrf.mxu1 }
 0x586   : > { %v17333_v62 = vadd.f32 %v8014_v25, %v7802_v59  ;;  %12455 = vmatprep.mubr.msk.bf16.mxu1 %vm3928_vm1, %v19259_v54  ;;  %v7095_v24 = vpop.permute.xlu1 %7094  ;;  %v12280_v39 = vpop.f32.mrf.mxu0  ;;  %v19262_v59 = vld [vmem:[#allocation62_spill] sm:$0xff]  ;;  %v19264_v54 = vld [vmem:[#allocation103_spill] sm:$0xff] }
 0x587   : > { %7177 = vst.msk [vmem:[%s17028_s29 + $0x68] sm:$0xff] %vm3928_vm1, %v7095_v24  ;;  %v12314_v35 = vpop.f32.mrf.mxu1  ;;  %v19263_v24 = vld [vmem:[#allocation110_spill] sm:$0xff] }
 0x588   : > { %v17341_v31 = vadd.f32 %v12314_v35, %v12280_v39  ;;  %v17343_v28 = vpop.f32.mrf.mxu0  ;;  %v19265_v39 = vpack.c.bf16 %v19264_v54, %v16838_v1 }
 0x589   : > { %19260 = vst [vmem:[#allocation74_spill] sm:$0xff] %v17343_v28  ;;  %v17345_v53 = vpop.f32.mrf.mxu1  ;;  %12422 = vmatmul.mubr.msk.bf16.gmra.mxu0 %vm3928_vm1, %v19262_v59 }
 0x58a   : > { %19261 = vst [vmem:[#allocation97_spill] sm:$0xff] %v17345_v53  ;;  %v7099_v21 = vpop.permute.xlu1 %7098  ;;  %v12283_v9 = vpop.f32.mrf.mxu0  ;;  %12425 = vmatprep.mubr.msk.bf16.mxu0 %vm3928_vm1, %v19263_v24 }
 0x58b   : > { %7179 = vst.msk [vmem:[%s17028_s29 + $0x78] sm:$0xff] %vm3928_vm1, %v7099_v21  ;;  %v12317_v25 = vpop.f32.mrf.mxu1  ;;  %12456 = vmatmul.mubr.msk.bf16.gmra.mxu1 %vm3928_vm1, %v19265_v39  ;;  %v19266_v21 = vld [vmem:[#allocation64_spill] sm:$0xff] }
 0x58c   : > { %v17351_v56 = vadd.f32 %v12317_v25, %v12283_v9  ;;  %v7818_v35 = vpop.f32.mrf.mxu0  ;;  %v19267_v59 = vpack.c.bf16 %v19266_v21, %v19195_v19 }
 0x58d   : > { %v8030_v44 = vpop.f32.mrf.mxu1 }
 0x58e   : > { %v17359_v53 = vadd.f32 %v8030_v44, %v7818_v35  ;;  %12459 = vmatprep.mubr.msk.bf16.mxu1 %vm3928_vm1, %v19267_v59  ;;  %v7103_v28 = vpop.permute.xlu1 %7102  ;;  %v12284_v9 = vpop.f32.mrf.mxu0  ;;  %v19270_v44 = vld [vmem:[#allocation24_spill] sm:$0xff]  ;;  %v19272_v59 = vld [vmem:[#allocation66_spill] sm:$0xff] }
 0x58f   : > { %7181 = vst.msk [vmem:[%s17028_s29 + $0x88] sm:$0xff] %vm3928_vm1, %v7103_v28  ;;  %v12318_v25 = vpop.f32.mrf.mxu1  ;;  %v19271_v28 = vld [vmem:[#allocation28_spill] sm:$0xff] }
 0x590   : > { %v17367_v24 = vadd.f32 %v12318_v25, %v12284_v9  ;;  %v17369_v1 = vpop.f32.mrf.mxu0  ;;  %v19273_v9 = vpack.c.bf16 %v19272_v59, %v19199_v42 }
 0x591   : > { %19268 = vst [vmem:[#allocation15_spill] sm:$0xff] %v17369_v1  ;;  %v17371_v54 = vpop.f32.mrf.mxu1  ;;  %12426 = vmatmul.mubr.msk.bf16.gmra.mxu0 %vm3928_vm1, %v19270_v44 }
 0x592   : > { %19269 = vst [vmem:[#allocation19_spill] sm:$0xff] %v17371_v54  ;;  %v7107_v39 = vpop.permute.xlu1 %7106  ;;  %v12287_v19 = vpop.f32.mrf.mxu0  ;;  %12429 = vmatprep.mubr.msk.bf16.mxu0 %vm3928_vm1, %v19271_v28 }
 0x593   : > { %7183 = vst.msk [vmem:[%s17028_s29 + $0x98] sm:$0xff] %vm3928_vm1, %v7107_v39  ;;  %v12321_v35 = vpop.f32.mrf.mxu1  ;;  %12460 = vmatmul.mubr.msk.bf16.gmra.mxu1 %vm3928_vm1, %v19273_v9  ;;  %v19274_v39 = vld [vmem:[#allocation75_spill] sm:$0xff] }
 0x594   : > { %v17377_v21 = vadd.f32 %v12321_v35, %v12287_v19  ;;  %v7834_v25 = vpop.f32.mrf.mxu0  ;;  %v19275_v44 = vpack.c.bf16 %v19274_v39, %v19209_v48 }
 0x595   : > { %v8046_v54 = vpop.f32.mrf.mxu1 }
 0x596   : > { %v17385_v1 = vadd.f32 %v8046_v54, %v7834_v25  ;;  %12463 = vmatprep.mubr.msk.bf16.mxu1 %vm3928_vm1, %v19275_v44  ;;  %v7111_v10 = vpop.permute.xlu1 %7110  ;;  %v12288_v19 = vpop.f32.mrf.mxu0  ;;  %v19278_v54 = vld [vmem:[#allocation14_spill] sm:$0xff]  ;;  %v19280_v44 = vld [vmem:[#allocation68_spill] sm:$0xff] }
 0x597   : > { %7185 = vst.msk [vmem:[%s17028_s29 + $0xa8] sm:$0xff] %vm3928_vm1, %v7111_v10  ;;  %v12322_v35 = vpop.f32.mrf.mxu1  ;;  %v19279_v10 = vld [vmem:[#allocation18_spill] sm:$0xff] }
 0x598   : > { %v17393_v28 = vadd.f32 %v12322_v35, %v12288_v19  ;;  %v17395_v42 = vpop.f32.mrf.mxu0  ;;  %v19281_v19 = vpack.c.bf16 %v19280_v44, %v19213_v41 }
 0x599   : > { %19276 = vst [vmem:[#allocation21_spill] sm:$0xff] %v17395_v42  ;;  %v17397_v59 = vpop.f32.mrf.mxu1  ;;  %12430 = vmatmul.mubr.msk.bf16.gmra.mxu0 %vm3928_vm1, %v19278_v54 }
 0x59a   : > { %19277 = vst [vmem:[#allocation29_spill] sm:$0xff] %v17397_v59  ;;  %v7115_v9 = vpop.permute.xlu1 %7114  ;;  %v12291_v48 = vpop.f32.mrf.mxu0  ;;  %12433 = vmatprep.mubr.msk.bf16.mxu0 %vm3928_vm1, %v19279_v10 }
 0x59b   : > { %7187 = vst.msk [vmem:[%s17028_s29 + $0xb8] sm:$0xff] %vm3928_vm1, %v7115_v9  ;;  %v12325_v25 = vpop.f32.mrf.mxu1  ;;  %12464 = vmatmul.mubr.msk.bf16.gmra.mxu1 %vm3928_vm1, %v19281_v19  ;;  %v19282_v9 = vld [vmem:[#allocation80_spill] sm:$0xff] }
 0x59c   : > { %v17403_v39 = vadd.f32 %v12325_v25, %v12291_v48  ;;  %v7850_v35 = vpop.f32.mrf.mxu0  ;;  %v19283_v54 = vpack.c.bf16 %v19282_v9, %v19222_v5 }
 0x59d   : > { %v8062_v59 = vpop.f32.mrf.mxu1 }
 0x59e   : > { %v17411_v42 = vadd.f32 %v8062_v59, %v7850_v35  ;;  %12467 = vmatprep.mubr.msk.bf16.mxu1 %vm3928_vm1, %v19283_v54  ;;  %v7119_v47 = vpop.permute.xlu1 %7118  ;;  %v12292_v48 = vpop.f32.mrf.mxu0  ;;  %v19286_v59 = vld [vmem:[#allocation55_spill] sm:$0xff]  ;;  %v19288_v54 = vld [vmem:[#allocation93_spill] sm:$0xff] }
 0x59f   : > { %7189 = vst.msk [vmem:[%s17028_s29 + $0xc8] sm:$0xff] %vm3928_vm1, %v7119_v47  ;;  %v12326_v25 = vpop.f32.mrf.mxu1  ;;  %v19287_v47 = vld [vmem:[#allocation95_spill] sm:$0xff] }
 0x5a0   : > { %v17419_v10 = vadd.f32 %v12326_v25, %v12292_v48  ;;  %v17421_v41 = vpop.f32.mrf.mxu0  ;;  %v19289_v48 = vpack.c.bf16 %v19288_v54, %v19226_v57  ;;  %v9148_v57 = vmul.f32 %v19230_v3, %v17254_v55  ;;  %v19293_v3 = vpack.c.bf16 %v17033_v51, %v17040_v52 }
 0x5a1   : > { %19284 = vst [vmem:[#allocation25_spill] sm:$0xff] %v17421_v41  ;;  %v17423_v44 = vpop.f32.mrf.mxu1  ;;  %12434 = vmatmul.mubr.msk.bf16.gmra.mxu0 %vm3928_vm1, %v19286_v59 }
 0x5a2   : > { %19285 = vst [vmem:[#allocation32_spill] sm:$0xff] %v17423_v44  ;;  %v7123_v19 = vpop.permute.xlu1 %7122  ;;  %v12295_v5 = vpop.f32.mrf.mxu0  ;;  %12437 = vmatprep.mubr.msk.bf16.mxu0 %vm3928_vm1, %v19287_v47 }
 0x5a3   : > { %7191 = vst.msk [vmem:[%s17028_s29 + $0xd8] sm:$0xff] %vm3928_vm1, %v7123_v19  ;;  %v12329_v35 = vpop.f32.mrf.mxu1  ;;  %12468 = vmatmul.mubr.msk.bf16.gmra.mxu1 %vm3928_vm1, %v19289_v48  ;;  %v19290_v19 = vld [vmem:[#allocation73_spill] sm:$0xff] }
 0x5a4   : > { %v17429_v9 = vadd.f32 %v12329_v35, %v12295_v5  ;;  %v7866_v25 = vpop.f32.mrf.mxu0  ;;  %v19291_v59 = vpack.c.bf16 %v19290_v19, %v19234_v40  ;;  %v19292_v40 = vld [vmem:[#allocation106_spill] sm:$0xff] }
 0x5a5   : > { %v8078_v44 = vpop.f32.mrf.mxu1 }
 0x5a6   : > { %v17437_v41 = vadd.f32 %v8078_v44, %v7866_v25  ;;  %12471 = vmatprep.mubr.msk.bf16.mxu1 %vm3928_vm1, %v19291_v59  ;;  %v7127_v5 = vpop.permute.xlu1 %7126  ;;  %v12296_v35 = vpop.f32.mrf.mxu0 }
 0x5a7   : > { %7193 = vst.msk [vmem:[%s17028_s29 + $0xe8] sm:$0xff] %vm3928_vm1, %v7127_v5  ;;  %v12330_v46 = vpop.f32.mrf.mxu1 }
 0x5a8   : > { %v17445_v47 = vadd.f32 %v12330_v46, %v12296_v35  ;;  %v17449_v54 = vpop.f32.mrf.mxu0  ;;  %v9165_v46 = vpack.c.bf16 %v9148_v57, %v17260_v20  ;;  %v9413_v35 = vld [vmem:[#allocation4 + $0x27] sm:$0xff] }
 0x5a9   : > { %v17451_v48 = vpop.f32.mrf.mxu1  ;;  %12438 = vmatmul.mubr.msk.bf16.gmra.mxu0 %vm3928_vm1, %v19292_v40  ;;  %v8824_v40 = vld [vmem:[#allocation4 + $0x110] sm:$0xff]  ;;  %v8823_v57 = vld [vmem:[#allocation4 + $0x108] sm:$0xff]  ;;  %v9445_v51 = vmul.f32 %v19089_v14, %v9413_v35 }
 0x5aa   : > { %v7131_v44 = vpop.permute.xlu1 %7130  ;;  %v12299_v25 = vpop.f32.mrf.mxu0  ;;  %12441 = vmatprep.mubr.msk.bf16.mxu0 %vm3928_vm1, %v17053_v15  ;;  %v9150_v15 = vmul.f32 %v19240_v6, %v17273_v50  ;;  %v9415_v35 = vld [vmem:[#allocation4 + $0x37] sm:$0xff]  ;;  %v9417_v6 = vld [vmem:[#allocation4 + $0x47] sm:$0xff] }
 0x5ab   : > { %7195 = vst.msk [vmem:[%s17028_s29 + $0xf8] sm:$0xff] %vm3928_vm1, %v7131_v44  ;;  %v12333_v19 = vpop.f32.mrf.mxu1  ;;  %12472 = vmatmul.mubr.msk.bf16.gmra.mxu1 %vm3928_vm1, %v19293_v3  ;;  %s10563_s29 = scalar_lea.sflag [#allocation6], %s351_s18 }
 0x5ac   : > { %v17457_v59 = vadd.f32 %v12333_v19, %v12299_v25  ;;  %v7882_v55 = vpop.f32.mrf.mxu0  ;;  %12475 = vmatprep.mubr.msk.bf16.mxu1 %vm3928_vm1, %v9165_v46  ;;  %v9477_v46 = vpack.c.bf16 %v9414_v37, %v9445_v51  ;;  %v9166_v50 = vpack.c.bf16 %v9150_v15, %v17284_v61  ;;  %v9416_v51 = vld [vmem:[#allocation4 + $0x3f] sm:$0xff]  ;;  %v9447_v15 = vmul.f32 %v19099_v8, %v9415_v35 }
 0x5ad   : > { %v8094_v5 = vpop.f32.mrf.mxu1 }
 0x5ae   : > { %v17466_v44 = vadd.f32 %v8094_v5, %v7882_v55  ;;  %v12300_v25 = vpop.f32.mrf.mxu0  ;;  %v17478_v55 = vpack.c.bf16 %v8824_v40, %v8823_v57  ;;  %v9740_v5 = vld [vmem:[#allocation4 + $0x30] sm:$0xff]  ;;  %v9478_v61 = vpack.c.bf16 %v9416_v51, %v9447_v15  ;;  %v9421_v15 = vld [vmem:[#allocation4 + $0x67] sm:$0xff] }
 0x5af   : > { %v12334_v19 = vpop.f32.mrf.mxu1 }
 0x5b0   : > { %v17471_v20 = vadd.f32 %v12334_v19, %v12300_v25  ;;  %v17474_v52 = vpop.f32.mrf.mxu0  ;;  %v9739_v25 = vld [vmem:[#allocation4 + $0x28] sm:$0xff] }
 0x5b1   : > { %v17476_v3 = vpop.f32.mrf.mxu1  ;;  %12442 = vmatmul.mubr.msk.bf16.gmra.mxu0 %vm3928_vm1, %v17478_v55  ;;  %v9771_v14 = vpack.c.bf16 %v9740_v5, %v9739_v25  ;;  %v9449_v5 = vmul.f32 %v19103_v45, %v9417_v6 }
 0x5b2   : > { %v12303_v60 = vpop.f32.mrf.mxu0  ;;  %12481 = vmatprep.mubr.msk.bf16.mxu0 %vm3928_vm1, %v9477_v46  ;;  %v9742_v46 = vld [vmem:[#allocation4 + $0x40] sm:$0xff] }
 0x5b3   : > { %v12337_v18 = vpop.f32.mrf.mxu1  ;;  %12476 = vmatmul.mubr.msk.bf16.gmra.mxu1 %vm3928_vm1, %v9166_v50 }
 0x5b4   : > { %v17483_v19 = vadd.f32 %v12337_v18, %v12303_v60  ;;  %v7898_v40 = vpop.f32.mrf.mxu0  ;;  %12515 = vmatprep.mubr.msk.bf16.mxu1 %vm3928_vm1, %v9771_v14  ;;  %v9418_v18 = vld [vmem:[#allocation4 + $0x4f] sm:$0xff] }
 0x5b5   : > { %v8110_v57 = vpop.f32.mrf.mxu1  ;;  %v9744_v14 = vld [vmem:[#allocation4 + $0x50] sm:$0xff] }
 0x5b6   : > { %v17487_v37 = vadd.f32 %v8110_v57, %v7898_v40  ;;  %v12304_v30 = vpop.f32.mrf.mxu0  ;;  %v10164_v40 = vsel %vm4178_vm0, %v17299_v26, 0  ;;  %v9479_v57 = vpack.c.bf16 %v9418_v18, %v9449_v5 }
 0x5b7   : > { %v12338_v33 = vpop.f32.mrf.mxu1 }
 0x5b8   : > { %v17491_v60 = vadd.f32 %v12338_v33, %v12304_v30  ;;  %v17494_v25 = vpop.f32.mrf.mxu0  ;;  %v9772_v33 = vpack.c.bf16 %v9742_v46, %v9741_v2  ;;  %v9743_v30 = vld [vmem:[#allocation4 + $0x48] sm:$0xff]  ;;  %v9451_v46 = vmul.f32 %v19107_v23, %v9419_v13 }
 0x5b9   : > { %v17496_v50 = vpop.f32.mrf.mxu1  ;;  %12482 = vmatmul.mubr.msk.bf16.vlgmr.msra.gmra.mxu0 %vm3928_vm1, %v9478_v61  ;;  %v9773_v6 = vpack.c.bf16 %v9744_v14, %v9743_v30  ;;  %v9420_v61 = vld [vmem:[#allocation4 + $0x5f] sm:$0xff]  ;;  %v9453_v14 = vmul.f32 %v19111_v49, %v9421_v15  ;;  %v9747_v13 = vld [vmem:[#allocation4 + $0x68] sm:$0xff]  ;;  %v9423_v15 = vld [vmem:[#allocation4 + $0x77] sm:$0xff] }
 0x5ba   : > { %12548 = vmatpush3.bf16.msra.mxu0 %v10164_v40  ;;  %12485 = vmatprep.mubr.msk.bf16.mxu0 %vm3928_vm1, %v9479_v57  ;;  %v9422_v40 = vld [vmem:[#allocation4 + $0x6f] sm:$0xff]  ;;  %v9746_v57 = vld [vmem:[#allocation4 + $0x60] sm:$0xff]  ;;  %v9480_v30 = vpack.c.bf16 %v9420_v61, %v9451_v46 }
 0x5bb   : > { %12516 = vmatmul.mubr.msk.bf16.vlgmr.msra.gmra.mxu1 %vm3928_vm1, %v9772_v33  ;;  %v9425_v61 = vld [vmem:[#allocation4 + $0x87] sm:$0xff] }
 0x5bc   : > { %v12307_v8 = vpop.f32.mrf.mxu0  ;;  %12519 = vmatprep.mubr.msk.bf16.mxu1 %vm3928_vm1, %v9773_v6 }
 0x5bd   : > { %v12341_v35 = vpop.f32.mrf.mxu1 }
 0x5be   : > { %v17501_v45 = vadd.f32 %v12341_v35, %v12307_v8  ;;  %v7914_v51 = vpop.f32.mrf.mxu0 }
 0x5bf   : > { %v8126_v26 = vpop.f32.mrf.mxu1 }
 0x5c0   : > { %19294 = vst [vmem:[#allocation27_spill] sm:$0xff] %v17501_v45  ;;  %v17505_v18 = vadd.f32 %v8126_v26, %v7914_v51  ;;  %v12308_v5 = vpop.f32.mrf.mxu0  ;;  %v9748_v51 = vld [vmem:[#allocation4 + $0x70] sm:$0xff]  ;;  %v9481_v26 = vpack.c.bf16 %v9422_v40, %v9453_v14  ;;  %v9424_v14 = vld [vmem:[#allocation4 + $0x7f] sm:$0xff] }
 0x5c1   : > { %v12342_v2 = vpop.f32.mrf.mxu1  ;;  %12486 = vmatmul.mubr.msk.bf16.gmra.mxu0 %vm3928_vm1, %v9480_v30  ;;  %v9775_v49 = vpack.c.bf16 %v9748_v51, %v9747_v13  ;;  %v9426_v30 = vld [vmem:[#allocation4 + $0x8f] sm:$0xff] }
 0x5c2   : > { %19295 = vst [vmem:[#allocation36_spill] sm:$0xff] %v17505_v18  ;;  %v17509_v8 = vadd.f32 %v12342_v2, %v12308_v5  ;;  %v17512_v35 = vpop.f32.mrf.mxu0  ;;  %v9745_v18 = vld [vmem:[#allocation4 + $0x58] sm:$0xff]  ;;  %12489 = vmatprep.mubr.msk.bf16.mxu0 %vm3928_vm1, %v9481_v26 }
 0x5c3   : > { %v17514_v33 = vpop.f32.mrf.mxu1  ;;  %v9774_v11 = vpack.c.bf16 %v9746_v57, %v9745_v18 }
 0x5c4   : > { %v12347_v6 = vpop.f32.mrf.mxu0 }
 0x5c5   : > { %v12381_v45 = vpop.f32.mrf.mxu1  ;;  %v8437_v23 = vadd.f32 %v12347_v6, %v17325_v27  ;;  %12520 = vmatmul.mubr.msk.bf16.gmra.mxu1 %vm3928_vm1, %v9774_v11  ;;  %v9455_v27 = vmul.f32 %v19115_v22, %v9423_v15  ;;  %v9457_v11 = vmul.f32 %v19119_v43, %v9425_v61  ;;  %v9750_v6 = vld [vmem:[#allocation4 + $0x80] sm:$0xff]  ;;  %v9427_v61 = vld [vmem:[#allocation4 + $0x97] sm:$0xff] }
 0x5c6   : > { %v8308_v5 = vpop.f32.mrf.mxu0  ;;  %12523 = vmatprep.mubr.msk.bf16.mxu1 %vm3928_vm1, %v9775_v49 }
 0x5c7   : > { %v8634_v2 = vpop.f32.mrf.mxu1  ;;  %v17520_v46 = vadd.f32 %v12381_v45, %v8437_v23  ;;  %v8435_v40 = vadd.f32 %v8308_v5, %v17333_v62  ;;  %v9482_v62 = vpack.c.bf16 %v9424_v14, %v9455_v27  ;;  %v9752_v23 = vld [vmem:[#allocation4 + $0x90] sm:$0xff]  ;;  %v9483_v5 = vpack.c.bf16 %v9426_v30, %v9457_v11 }
 0x5c8   : > { %v12348_v18 = vpop.f32.mrf.mxu0 }
 0x5c9   : > { %19296 = vst [vmem:[#allocation30_spill] sm:$0xff] %v17520_v46  ;;  %v12382_v57 = vpop.f32.mrf.mxu1  ;;  %v17525_v26 = vadd.f32 %v8634_v2, %v8435_v40  ;;  %v8438_v51 = vadd.f32 %v12348_v18, %v17341_v31  ;;  %v9749_v46 = vld [vmem:[#allocation4 + $0x78] sm:$0xff]  ;;  %12490 = vmatmul.mubr.msk.bf16.gmra.mxu0 %vm3928_vm1, %v9482_v62  ;;  %v9751_v40 = vld [vmem:[#allocation4 + $0x88] sm:$0xff] }
 0x5ca   : > { %v17529_v13 = vpop.f32.mrf.mxu0  ;;  %v9776_v2 = vpack.c.bf16 %v9750_v6, %v9749_v46  ;;  %12493 = vmatprep.mubr.msk.bf16.mxu0 %vm3928_vm1, %v9483_v5  ;;  %v9777_v43 = vpack.c.bf16 %v9752_v23, %v9751_v40  ;;  %v9430_v6 = vld [vmem:[#allocation4 + $0xaf] sm:$0xff] }
 0x5cb   : > { %v17531_v45 = vpop.f32.mrf.mxu1  ;;  %v17533_v49 = vadd.f32 %v12382_v57, %v8438_v51  ;;  %v9429_v57 = vld [vmem:[#allocation4 + $0xa7] sm:$0xff]  ;;  %v9428_v51 = vld [vmem:[#allocation4 + $0x9f] sm:$0xff]  ;;  %v9756_v40 = vld [vmem:[#allocation4 + $0xb0] sm:$0xff] }
 0x5cc   : > { %v12351_v22 = vpop.f32.mrf.mxu0  ;;  %v9461_v5 = vmul.f32 %v19198_v29, %v9429_v57  ;;  %v9431_v57 = vld [vmem:[#allocation4 + $0xb7] sm:$0xff] }
 0x5cd   : > { %v12385_v15 = vpop.f32.mrf.mxu1  ;;  %v8441_v31 = vadd.f32 %v12351_v22, %v17351_v56  ;;  %12524 = vmatmul.mubr.msk.bf16.gmra.mxu1 %vm3928_vm1, %v9776_v2  ;;  %v9459_v56 = vmul.f32 %v19193_v36, %v9427_v61  ;;  %v9754_v22 = vld [vmem:[#allocation4 + $0xa0] sm:$0xff] }
 0x5ce   : > { %v8324_v14 = vpop.f32.mrf.mxu0  ;;  %12527 = vmatprep.mubr.msk.bf16.mxu1 %vm3928_vm1, %v9777_v43  ;;  %v9485_v43 = vpack.c.bf16 %v9430_v6, %v9461_v5 }
 0x5cf   : > { %v8650_v18 = vpop.f32.mrf.mxu1  ;;  %v17539_v27 = vadd.f32 %v12385_v15, %v8441_v31  ;;  %v8439_v30 = vadd.f32 %v8324_v14, %v17359_v53  ;;  %v9484_v53 = vpack.c.bf16 %v9428_v51, %v9459_v56  ;;  %v9753_v14 = vld [vmem:[#allocation4 + $0x98] sm:$0xff] }
 0x5d0   : > { %v12352_v46 = vpop.f32.mrf.mxu0 }
 0x5d1   : > { %v12386_v11 = vpop.f32.mrf.mxu1  ;;  %v17544_v62 = vadd.f32 %v8650_v18, %v8439_v30  ;;  %v8442_v23 = vadd.f32 %v12352_v46, %v17367_v24  ;;  %12494 = vmatmul.mubr.msk.bf16.gmra.mxu0 %vm3928_vm1, %v9484_v53  ;;  %v9778_v18 = vpack.c.bf16 %v9754_v22, %v9753_v14  ;;  %v9755_v30 = vld [vmem:[#allocation4 + $0xa8] sm:$0xff] }
 0x5d2   : > { %v17548_v2 = vpop.f32.mrf.mxu0  ;;  %12497 = vmatprep.mubr.msk.bf16.mxu0 %vm3928_vm1, %v9485_v43  ;;  %v9779_v29 = vpack.c.bf16 %v9756_v40, %v9755_v30  ;;  %v9434_v53 = vld [vmem:[#allocation4 + $0xcf] sm:$0xff] }
 0x5d3   : > { %v17550_v15 = vpop.f32.mrf.mxu1  ;;  %v17552_v31 = vadd.f32 %v12386_v11, %v8442_v23  ;;  %v9433_v11 = vld [vmem:[#allocation4 + $0xc7] sm:$0xff]  ;;  %v9432_v23 = vld [vmem:[#allocation4 + $0xbf] sm:$0xff]  ;;  %v9760_v30 = vld [vmem:[#allocation4 + $0xd0] sm:$0xff] }
 0x5d4   : > { %v12355_v36 = vpop.f32.mrf.mxu0  ;;  %v9465_v14 = vmul.f32 %v19212_v0, %v9433_v11  ;;  %v9435_v11 = vld [vmem:[#allocation4 + $0xd7] sm:$0xff] }
 0x5d5   : > { %v12389_v61 = vpop.f32.mrf.mxu1  ;;  %v8445_v24 = vadd.f32 %v12355_v36, %v17377_v21  ;;  %12528 = vmatmul.mubr.msk.bf16.gmra.mxu1 %vm3928_vm1, %v9778_v18  ;;  %v9463_v21 = vmul.f32 %v19207_v34, %v9431_v57  ;;  %v9758_v36 = vld [vmem:[#allocation4 + $0xc0] sm:$0xff] }
 0x5d6   : > { %v8340_v51 = vpop.f32.mrf.mxu0  ;;  %12531 = vmatprep.mubr.msk.bf16.mxu1 %vm3928_vm1, %v9779_v29  ;;  %v9487_v29 = vpack.c.bf16 %v9434_v53, %v9465_v14 }
 0x5d7   : > { %v8666_v46 = vpop.f32.mrf.mxu1  ;;  %v17558_v56 = vadd.f32 %v12389_v61, %v8445_v24  ;;  %v8443_v6 = vadd.f32 %v8340_v51, %v17385_v1  ;;  %v9486_v1 = vpack.c.bf16 %v9432_v23, %v9463_v21  ;;  %v9757_v51 = vld [vmem:[#allocation4 + $0xb8] sm:$0xff] }
 0x5d8   : > { %v12356_v5 = vpop.f32.mrf.mxu0 }
 0x5d9   : > { %v12390_v22 = vpop.f32.mrf.mxu1  ;;  %v17563_v43 = vadd.f32 %v8666_v46, %v8443_v6  ;;  %v8446_v40 = vadd.f32 %v12356_v5, %v17393_v28  ;;  %12498 = vmatmul.mubr.msk.bf16.gmra.mxu0 %vm3928_vm1, %v9486_v1  ;;  %v9780_v46 = vpack.c.bf16 %v9758_v36, %v9757_v51  ;;  %v9759_v6 = vld [vmem:[#allocation4 + $0xc8] sm:$0xff] }
 0x5da   : > { %v17567_v18 = vpop.f32.mrf.mxu0  ;;  %12501 = vmatprep.mubr.msk.bf16.mxu0 %vm3928_vm1, %v9487_v29  ;;  %v9781_v0 = vpack.c.bf16 %v9760_v30, %v9759_v6  ;;  %v9438_v1 = vld [vmem:[#allocation4 + $0xef] sm:$0xff] }
 0x5db   : > { %v17569_v61 = vpop.f32.mrf.mxu1  ;;  %v17571_v24 = vadd.f32 %v12390_v22, %v8446_v40  ;;  %v9437_v22 = vld [vmem:[#allocation4 + $0xe7] sm:$0xff]  ;;  %v9436_v40 = vld [vmem:[#allocation4 + $0xdf] sm:$0xff]  ;;  %v9764_v6 = vld [vmem:[#allocation4 + $0xf0] sm:$0xff] }
 0x5dc   : > { %v12359_v34 = vpop.f32.mrf.mxu0  ;;  %v9469_v51 = vmul.f32 %v19225_v63, %v9437_v22  ;;  %v9439_v22 = vld [vmem:[#allocation4 + $0xf7] sm:$0xff] }
 0x5dd   : > { %v12393_v57 = vpop.f32.mrf.mxu1  ;;  %v8449_v28 = vadd.f32 %v12359_v34, %v17403_v39  ;;  %12532 = vmatmul.mubr.msk.bf16.gmra.mxu1 %vm3928_vm1, %v9780_v46  ;;  %v9467_v39 = vmul.f32 %v19220_v17, %v9435_v11  ;;  %v9762_v34 = vld [vmem:[#allocation4 + $0xe0] sm:$0xff] }
 0x5de   : > { %v8356_v23 = vpop.f32.mrf.mxu0  ;;  %12535 = vmatprep.mubr.msk.bf16.mxu1 %vm3928_vm1, %v9781_v0  ;;  %v9489_v0 = vpack.c.bf16 %v9438_v1, %v9469_v51  ;;  %v9440_v1 = vld [vmem:[#allocation4 + $0xff] sm:$0xff] }
 0x5df   : > { %v8682_v5 = vpop.f32.mrf.mxu1  ;;  %v17577_v21 = vadd.f32 %v12393_v57, %v8449_v28  ;;  %v8447_v53 = vadd.f32 %v8356_v23, %v17411_v42  ;;  %v9488_v42 = vpack.c.bf16 %v9436_v40, %v9467_v39  ;;  %v9761_v23 = vld [vmem:[#allocation4 + $0xd8] sm:$0xff] }
 0x5e0   : > { %v12360_v14 = vpop.f32.mrf.mxu0 }
 0x5e1   : > { %v12394_v36 = vpop.f32.mrf.mxu1  ;;  %v17582_v29 = vadd.f32 %v8682_v5, %v8447_v53  ;;  %v8450_v30 = vadd.f32 %v12360_v14, %v17419_v10  ;;  %12502 = vmatmul.mubr.msk.bf16.gmra.mxu0 %vm3928_vm1, %v9488_v42  ;;  %v9782_v5 = vpack.c.bf16 %v9762_v34, %v9761_v23  ;;  %v9763_v53 = vld [vmem:[#allocation4 + $0xe8] sm:$0xff]  ;;  %v9471_v34 = vmul.f32 %v19232_v4, %v9439_v22 }
 0x5e2   : > { %v17586_v46 = vpop.f32.mrf.mxu0  ;;  %12505 = vmatprep.mubr.msk.bf16.mxu0 %vm3928_vm1, %v9489_v0  ;;  %v9783_v63 = vpack.c.bf16 %v9764_v6, %v9763_v53  ;;  %v9766_v0 = vld [vmem:[#allocation4 + $0x100] sm:$0xff]  ;;  %v9765_v53 = vld [vmem:[#allocation4 + $0xf8] sm:$0xff] }
 0x5e3   : > { %v17588_v57 = vpop.f32.mrf.mxu1  ;;  %v17590_v28 = vadd.f32 %v12394_v36, %v8450_v30  ;;  %v9784_v22 = vpack.c.bf16 %v9766_v0, %v9765_v53  ;;  %v10033_v53 = vld [vmem:[#allocation4 + $0x29] sm:$0xff] }
 0x5e4   : > { %v12363_v17 = vpop.f32.mrf.mxu0 }
 0x5e5   : > { %v12397_v11 = vpop.f32.mrf.mxu1  ;;  %v8453_v10 = vadd.f32 %v12363_v17, %v17429_v9  ;;  %12536 = vmatmul.mubr.msk.bf16.gmra.mxu1 %vm3928_vm1, %v9782_v5  ;;  %v8082_v9 = vadd.f32 %v17451_v48, %v17449_v54 }
 0x5e6   : > { %v8372_v40 = vpop.f32.mrf.mxu0  ;;  %12539 = vmatprep.mubr.msk.bf16.mxu1 %vm3928_vm1, %v9783_v63 }
 0x5e7   : > { %v8698_v14 = vpop.f32.mrf.mxu1  ;;  %v17596_v36 = vadd.f32 %v12397_v11, %v8453_v10  ;;  %v8451_v39 = vadd.f32 %v8372_v40, %v17437_v41  ;;  %v9490_v11 = vpack.c.bf16 %v9440_v1, %v9471_v34  ;;  %v9443_v10 = vld [vmem:[#allocation4 + $0x117] sm:$0xff]  ;;  %v9444_v34 = vld [vmem:[#allocation4 + $0x11f] sm:$0xff] }
 0x5e8   : > { %v12364_v30 = vpop.f32.mrf.mxu0  ;;  %v10034_v40 = vld [vmem:[#allocation4 + $0x31] sm:$0xff]  ;;  %v9475_v1 = vmul.f32 %v19241_v58, %v9443_v10 }
 0x5e9   : > { %v12398_v51 = vpop.f32.mrf.mxu1  ;;  %v17603_v42 = vadd.f32 %v8698_v14, %v8451_v39  ;;  %v8454_v6 = vadd.f32 %v12364_v30, %v17445_v47  ;;  %12506 = vmatmul.mubr.msk.bf16.gmra.mxu0 %vm3928_vm1, %v9490_v11  ;;  %v19297_v47 = vpack.c.bf16 %v17267_v7, %v17265_v38  ;;  %v9770_v38 = vld [vmem:[#allocation4 + $0x120] sm:$0xff] }
 0x5ea   : > { %v8375_v23 = vpop.f32.mrf.mxu0 }
 0x5eb   : > { %v8701_v17 = vpop.f32.mrf.mxu1  ;;  %v17606_v5 = vadd.f32 %v12398_v51, %v8454_v6  ;;  %v8452_v41 = vadd.f32 %v8375_v23, %v8082_v9  ;;  %12509 = vmatprep.mubr.msk.bf16.mxu0 %vm3928_vm1, %v19297_v47  ;;  %v9769_v6 = vld [vmem:[#allocation4 + $0x118] sm:$0xff]  ;;  %v8098_v23 = vadd.f32 %v17476_v3, %v17474_v52 }
 0x5ec   : > { %v12367_v63 = vpop.f32.mrf.mxu0  ;;  %v9786_v10 = vpack.c.bf16 %v9770_v38, %v9769_v6  ;;  %v10038_v47 = vld [vmem:[#allocation4 + $0x51] sm:$0xff]  ;;  %v8114_v6 = vadd.f32 %v17496_v50, %v17494_v25 }
 0x5ed   : > { %v12401_v4 = vpop.f32.mrf.mxu1  ;;  %v17609_v54 = vadd.f32 %v8701_v17, %v8452_v41  ;;  %v8457_v48 = vadd.f32 %v12367_v63, %v17457_v59  ;;  %12540 = vmatmul.mubr.msk.bf16.gmra.mxu1 %vm3928_vm1, %v9784_v22  ;;  %v19298_v59 = vld [vmem:[#allocation26_spill] sm:$0xff] }
 0x5ee   : > { %v8388_v14 = vpop.f32.mrf.mxu0  ;;  %12543 = vmatprep.mubr.msk.bf16.mxu1 %vm3928_vm1, %v17478_v55  ;;  %v10066_v9 = vmul.f32 %v19298_v59, %v10034_v40  ;;  %v10036_v22 = vld [vmem:[#allocation4 + $0x41] sm:$0xff] }
 0x5ef   : > { %v8714_v39 = vpop.f32.mrf.mxu1  ;;  %v17618_v30 = vadd.f32 %v12401_v4, %v8457_v48  ;;  %v8455_v51 = vadd.f32 %v8388_v14, %v17466_v44  ;;  %v9492_v44 = vpack.c.bf16 %v9444_v34, %v9475_v1  ;;  %v10070_v34 = vmul.f32 %v19109_v12, %v10038_v47  ;;  %v10042_v12 = vld [vmem:[#allocation4 + $0x71] sm:$0xff]  ;;  %v19300_v47 = vld [vmem:[#allocation42_spill] sm:$0xff] }
 0x5f0   : > { %v12368_v7 = vpop.f32.mrf.mxu0  ;;  %v10097_v4 = vpack.c.bf16 %v10066_v9, %v10033_v53 }
 0x5f1   : > { %v12402_v0 = vpop.f32.mrf.mxu1  ;;  %v17626_v17 = vadd.f32 %v8714_v39, %v8455_v51  ;;  %v8458_v58 = vadd.f32 %v12368_v7, %v17471_v20  ;;  %12510 = vmatmul.mubr.msk.bf16.gmra.mxu0 %vm3928_vm1, %v9492_v44  ;;  %v10068_v39 = vmul.f32 %v19105_v16, %v10036_v22  ;;  %v10035_v7 = vld [vmem:[#allocation4 + $0x39] sm:$0xff] }
 0x5f2   : > { %v8391_v11 = vpop.f32.mrf.mxu0  ;;  %12549 = vmatprep.mubr.msk.bf16.mxu0 %vm3928_vm1, %v10097_v4  ;;  %v10041_v4 = vld [vmem:[#allocation4 + $0x69] sm:$0xff] }
 0x5f3   : > { %v8717_v41 = vpop.f32.mrf.mxu1  ;;  %v17629_v55 = vadd.f32 %v12402_v0, %v8458_v58  ;;  %v8456_v63 = vadd.f32 %v8391_v11, %v8098_v23  ;;  %v10098_v23 = vpack.c.bf16 %v10068_v39, %v10035_v7  ;;  %v10037_v58 = vld [vmem:[#allocation4 + $0x49] sm:$0xff]  ;;  %v10043_v39 = vld [vmem:[#allocation4 + $0x79] sm:$0xff] }
 0x5f4   : > { %v12371_v40 = vpop.f32.mrf.mxu0  ;;  %v19303_v7 = vld [vmem:[#allocation60_spill] sm:$0xff] }
 0x5f5   : > { %v12405_v48 = vpop.f32.mrf.mxu1  ;;  %v17632_v52 = vadd.f32 %v8717_v41, %v8456_v63  ;;  %v8461_v3 = vadd.f32 %v12371_v40, %v17483_v19  ;;  %12544 = vmatmul.mubr.msk.bf16.gmra.mxu1 %vm3928_vm1, %v9786_v10  ;;  %v10099_v41 = vpack.c.bf16 %v10070_v34, %v10037_v58  ;;  %v10039_v10 = vld [vmem:[#allocation4 + $0x59] sm:$0xff]  ;;  %v10044_v40 = vld [vmem:[#allocation4 + $0x81] sm:$0xff]  ;;  %v10045_v34 = vld [vmem:[#allocation4 + $0x89] sm:$0xff] }
 0x5f6   : > { %v8404_v20 = vpop.f32.mrf.mxu0 }
 0x5f7   : > { %v8730_v14 = vpop.f32.mrf.mxu1  ;;  %v17638_v1 = vadd.f32 %v12405_v48, %v8461_v3  ;;  %v8459_v51 = vadd.f32 %v8404_v20, %v17487_v37  ;;  %v10040_v37 = vld [vmem:[#allocation4 + $0x61] sm:$0xff]  ;;  %v10046_v48 = vld [vmem:[#allocation4 + $0x91] sm:$0xff]  ;;  %v10076_v3 = vmul.f32 %v19300_v47, %v10044_v40 }
 0x5f8   : > { %v12372_v59 = vpop.f32.mrf.mxu0  ;;  %v10072_v25 = vmul.f32 %v19113_v32, %v10040_v37  ;;  %v19301_v20 = vld [vmem:[#allocation48_spill] sm:$0xff]  ;;  %v10052_v37 = vld [vmem:[#allocation4 + $0xc1] sm:$0xff] }
 0x5f9   : > { %v12406_v9 = vpop.f32.mrf.mxu1  ;;  %v17644_v19 = vadd.f32 %v8730_v14, %v8459_v51  ;;  %v8462_v38 = vadd.f32 %v12372_v59, %v17491_v60  ;;  %12550 = vmatmul.mubr.msk.bf16.vlgmr.msra.gmra.mxu0 %vm3928_vm1, %v10098_v23  ;;  %v19299_v60 = vld [vmem:[#allocation39_spill] sm:$0xff]  ;;  %v10078_v14 = vmul.f32 %v19301_v20, %v10046_v48  ;;  %v10102_v51 = vpack.c.bf16 %v10076_v3, %v10043_v39  ;;  %v10048_v59 = vld [vmem:[#allocation4 + $0xa1] sm:$0xff]  ;;  %v10047_v23 = vld [vmem:[#allocation4 + $0x99] sm:$0xff] }
 0x5fa   : > { %v8407_v0 = vpop.f32.mrf.mxu0  ;;  %12553 = vmatprep.mubr.msk.bf16.mxu0 %vm3928_vm1, %v10099_v41  ;;  %v10074_v50 = vmul.f32 %v19299_v60, %v10042_v12  ;;  %v10100_v63 = vpack.c.bf16 %v10072_v25, %v10039_v10  ;;  %v19304_v12 = vld [vmem:[#allocation63_spill] sm:$0xff]  ;;  %v19305_v60 = vld [vmem:[#allocation44_spill] sm:$0xff]  ;;  %v10056_v40 = vld [vmem:[#allocation4 + $0xe1] sm:$0xff] }
 0x5fb   : > { %v17647_v16 = vadd.f32 %v12406_v9, %v8462_v38  ;;  %v8460_v11 = vadd.f32 %v8407_v0, %v8114_v6  ;;  %v8733_v44 = vpop.f32.mrf.mxu1  ;;  %v10103_v32 = vpack.c.bf16 %v10078_v14, %v10045_v34  ;;  %v10050_v9 = vld [vmem:[#allocation4 + $0xb1] sm:$0xff]  ;;  %v10084_v25 = vmul.f32 %v19304_v12, %v10052_v37  ;;  %v10051_v10 = vld [vmem:[#allocation4 + $0xb9] sm:$0xff]  ;;  %v19307_v20 = vld [vmem:[#allocation86_spill] sm:$0xff] }
 0x5fc   : > { %v10101_v22 = vpack.c.bf16 %v10074_v50, %v10041_v4  ;;  %v19302_v6 = vld [vmem:[#allocation52_spill] sm:$0xff]  ;;  %v10082_v0 = vmul.f32 %v19303_v7, %v10050_v9  ;;  %v10053_v4 = vld [vmem:[#allocation4 + $0xc9] sm:$0xff]  ;;  %v19306_v47 = vld [vmem:[#allocation49_spill] sm:$0xff] }
 0x5fd   : > { %v17650_v53 = vadd.f32 %v8733_v44, %v8460_v11  ;;  %v10080_v38 = vmul.f32 %v19302_v6, %v10048_v59  ;;  %v10049_v11 = vld [vmem:[#allocation4 + $0xa9] sm:$0xff]  ;;  %v10054_v44 = vld [vmem:[#allocation4 + $0xd1] sm:$0xff]  ;;  %v10088_v3 = vmul.f32 %v19306_v47, %v10056_v40  ;;  %v10055_v39 = vld [vmem:[#allocation4 + $0xd9] sm:$0xff] }
 0x5fe   : > { %v10105_v41 = vpack.c.bf16 %v10082_v0, %v10049_v11  ;;  %v10086_v50 = vmul.f32 %v19305_v60, %v10054_v44  ;;  %v10058_v48 = vld [vmem:[#allocation4 + $0xf1] sm:$0xff]  ;;  %v10057_v34 = vld [vmem:[#allocation4 + $0xe9] sm:$0xff]  ;;  %v10060_v59 = vld [vmem:[#allocation4 + $0x101] sm:$0xff] }
 0x5ff   : > { %v10104_v58 = vpack.c.bf16 %v10080_v38, %v10047_v23  ;;  %v10090_v14 = vmul.f32 %v19307_v20, %v10058_v48  ;;  %v19308_v9 = vld [vmem:[#allocation88_spill] sm:$0xff]  ;;  %v10064_v7 = vld [vmem:[#allocation4 + $0x121] sm:$0xff]  ;;  %v19313_v60 = vld [vmem:[#allocation27_spill] sm:$0xff] }
 0x600   : > { %v10092_v6 = vmul.f32 %v19308_v9, %v10060_v59  ;;  %v10059_v38 = vld [vmem:[#allocation4 + $0xf9] sm:$0xff]  ;;  %v19309_v23 = vld [vmem:[#allocation22_spill] sm:$0xff] }
 0x601   : > { %12554 = vmatmul.mubr.msk.bf16.gmra.mxu0 %vm3928_vm1, %v10100_v63  ;;  %v10106_v63 = vpack.c.bf16 %v10084_v25, %v10051_v10  ;;  %v19310_v11 = vld [vmem:[#allocation41_spill] sm:$0xff] }
 0x602   : > { %12557 = vmatprep.mubr.msk.bf16.mxu0 %vm3928_vm1, %v10101_v22  ;;  %v10107_v22 = vpack.c.bf16 %v10086_v50, %v10053_v4  ;;  %v10110_v0 = vpack.c.bf16 %v10092_v6, %v10059_v38  ;;  %v10063_v44 = vld [vmem:[#allocation4 + $0x119] sm:$0xff] }
 0x603   : > { %v19314_v4 = vld [vmem:[#allocation36_spill] sm:$0xff] }
 0x609   : > { %12558 = vmatmul.mubr.msk.bf16.gmra.mxu0 %vm3928_vm1, %v10102_v51  ;;  %v10108_v51 = vpack.c.bf16 %v10088_v3, %v10055_v39  ;;  %v8130_v3 = vadd.f32 %v17514_v33, %v17512_v35 }
 0x60a   : > { %12561 = vmatprep.mubr.msk.bf16.mxu0 %vm3928_vm1, %v10103_v32  ;;  %v10109_v32 = vpack.c.bf16 %v10090_v14, %v10057_v34  ;;  %v19315_v34 = vld [vmem:[#allocation74_spill] sm:$0xff] }
 0x611   : > { %12562 = vmatmul.mubr.msk.bf16.gmra.mxu0 %vm3928_vm1, %v10104_v58  ;;  %v10096_v58 = vmul.f32 %v19309_v23, %v10064_v7 }
 0x612   : > { %12565 = vmatprep.mubr.msk.bf16.mxu0 %vm3928_vm1, %v10105_v41  ;;  %v19311_v41 = vld [vmem:[#allocation23_spill] sm:$0xff] }
 0x613   : > { %v19312_v37 = vpack.c.bf16 %v19310_v11, %v19311_v41  ;;  %v10112_v12 = vpack.c.bf16 %v10096_v58, %v10063_v44  ;;  %v19317_v58 = vld [vmem:[#allocation30_spill] sm:$0xff] }
 0x619   : > { %12566 = vmatmul.mubr.msk.bf16.gmra.mxu0 %vm3928_vm1, %v10106_v63 }
 0x61a   : > { %12569 = vmatprep.mubr.msk.bf16.mxu0 %vm3928_vm1, %v10107_v22 }
 0x621   : > { %12570 = vmatmul.mubr.msk.bf16.gmra.mxu0 %vm3928_vm1, %v10108_v51 }
 0x622   : > { %12573 = vmatprep.mubr.msk.bf16.mxu0 %vm3928_vm1, %v10109_v32  ;;  %v19316_v32 = vld [vmem:[#allocation97_spill] sm:$0xff] }
 0x623   : > { %v8018_v59 = vadd.f32 %v19316_v32, %v19315_v34 }
 0x629   : > { %12574 = vmatmul.mubr.msk.bf16.gmra.mxu0 %vm3928_vm1, %v10110_v0  ;;  %v8436_v0 = vadd.f32 %v17529_v13, %v8018_v59 }
 0x62a   : > { %12577 = vmatprep.mubr.msk.bf16.mxu0 %vm3928_vm1, %v19312_v37 }
 0x631   : > { %v12375_v25 = vpop.f32.mrf.mxu0  ;;  %12578 = vmatmul.mubr.msk.bf16.gmra.mxu0 %vm3928_vm1, %v10112_v12  ;;  %v8762_v12 = vadd.f32 %v17531_v45, %v8436_v0  ;;  %v19320_v0 = vld [vmem:[#allocation21_spill] sm:$0xff] }
 0x632   : > { %v8465_v50 = vadd.f32 %v12375_v25, %v19313_v60 }
 0x633   : > { %v8420_v10 = vpop.f32.mrf.mxu0  ;;  %v12409_v63 = vpop.f32.mrf.mxu1 }
 0x634   : > { %v8463_v22 = vadd.f32 %v8420_v10, %v19314_v4  ;;  %v17683_v40 = vadd.f32 %v12409_v63, %v8465_v50  ;;  %v19318_v10 = vld [vmem:[#allocation15_spill] sm:$0xff] }
 0x635   : > { %v12376_v48 = vpop.f32.mrf.mxu0  ;;  %v8746_v47 = vpop.f32.mrf.mxu1  ;;  %v19319_v63 = vld [vmem:[#allocation19_spill] sm:$0xff] }
 0x636   : > { %v8466_v20 = vadd.f32 %v12376_v48, %v17509_v8  ;;  %v17688_v14 = vadd.f32 %v8746_v47, %v8463_v22  ;;  %v8034_v4 = vadd.f32 %v19319_v63, %v19318_v10 }
 0x637   : > { %v8423_v39 = vpop.f32.mrf.mxu0  ;;  %v12410_v51 = vpop.f32.mrf.mxu1 }
 0x638   : > { %v8464_v9 = vadd.f32 %v8423_v39, %v8130_v3  ;;  %v17692_v6 = vadd.f32 %v12410_v51, %v8466_v20  ;;  %v8440_v3 = vadd.f32 %v17548_v2, %v8034_v4  ;;  %v19321_v2 = vld [vmem:[#allocation29_spill] sm:$0xff] }
 0x639   : > { %v8749_v38 = vpop.f32.mrf.mxu1  ;;  %v12415_v7 = vpop.f32.mrf.mxu0  ;;  %v19322_v4 = vld [vmem:[#allocation25_spill] sm:$0xff] }
 0x63a   : > { %v17695_v23 = vadd.f32 %v8749_v38, %v8464_v9  ;;  %v9057_v35 = vadd.f32 %v12415_v7, %v19317_v58  ;;  %v8766_v59 = vadd.f32 %v17550_v15, %v8440_v3  ;;  %v8050_v58 = vadd.f32 %v19321_v2, %v19320_v0 }
 0x63b   : > { %v8928_v33 = vpop.f32.mrf.mxu0  ;;  %v12449_v8 = vpop.f32.mrf.mxu1 }
 0x63c   : > { %v9055_v11 = vadd.f32 %v8928_v33, %v17525_v26  ;;  %v17699_v41 = vadd.f32 %v12449_v8, %v9057_v35  ;;  %v8444_v8 = vadd.f32 %v17567_v18, %v8050_v58  ;;  %v19323_v18 = vld [vmem:[#allocation32_spill] sm:$0xff] }
 0x63d   : > { %v12416_v37 = vpop.f32.mrf.mxu0  ;;  %v9254_v44 = vpop.f32.mrf.mxu1 }
 0x63e   : > { %v9058_v25 = vadd.f32 %v12416_v37, %v17533_v49  ;;  %v17703_v60 = vadd.f32 %v9254_v44, %v9055_v11 }
 0x63f   : > { %v8931_v50 = vpop.f32.mrf.mxu0  ;;  %v12450_v13 = vpop.f32.mrf.mxu1 }
 0x640   : > { %v17707_v22 = vadd.f32 %v8931_v50, %v8762_v12  ;;  %v17709_v48 = vadd.f32 %v12450_v13, %v9058_v25  ;;  %v8770_v50 = vadd.f32 %v17569_v61, %v8444_v8 }
 0x641   : > { %v12419_v26 = vpop.f32.mrf.mxu0  ;;  %v17711_v47 = vpop.f32.mrf.mxu1 }
 0x642   : > { %v9061_v45 = vadd.f32 %v12419_v26, %v17539_v27  ;;  %v8066_v26 = vadd.f32 %v19323_v18, %v19322_v4 }
 0x643   : > { %v8944_v20 = vpop.f32.mrf.mxu0  ;;  %v12453_v49 = vpop.f32.mrf.mxu1 }
 0x644   : > { %v17716_v39 = vadd.f32 %v8944_v20, %v17544_v62  ;;  %v17718_v51 = vadd.f32 %v12453_v49, %v9061_v45  ;;  %v8448_v20 = vadd.f32 %v17586_v46, %v8066_v26 }
 0x645   : > { %v12420_v34 = vpop.f32.mrf.mxu0  ;;  %v17720_v32 = vpop.f32.mrf.mxu1 }
 0x646   : > { %v9062_v9 = vadd.f32 %v12420_v34, %v17552_v31 }
 0x647   : > { %v8947_v38 = vpop.f32.mrf.mxu0  ;;  %v12454_v7 = vpop.f32.mrf.mxu1 }
 0x648   : > { %v17726_v27 = vadd.f32 %v8947_v38, %v8766_v59  ;;  %v17728_v35 = vadd.f32 %v12454_v7, %v9062_v9  ;;  %v8774_v7 = vadd.f32 %v17588_v57, %v8448_v20 }
 0x649   : > { %v12423_v62 = vpop.f32.mrf.mxu0  ;;  %v17730_v33 = vpop.f32.mrf.mxu1 }
 0x64a   : > { %v9065_v11 = vadd.f32 %v12423_v62, %v17558_v56 }
 0x64b   : > { %v8960_v37 = vpop.f32.mrf.mxu0  ;;  %v12457_v15 = vpop.f32.mrf.mxu1 }
 0x64c   : > { %v17735_v31 = vadd.f32 %v8960_v37, %v17563_v43  ;;  %v17737_v44 = vadd.f32 %v12457_v15, %v9065_v11 }
 0x64d   : > { %v12424_v12 = vpop.f32.mrf.mxu0  ;;  %v17739_v25 = vpop.f32.mrf.mxu1 }
 0x64e   : > { %v9066_v13 = vadd.f32 %v12424_v12, %v17571_v24 }
 0x64f   : > { %v8963_v10 = vpop.f32.mrf.mxu0  ;;  %v12458_v63 = vpop.f32.mrf.mxu1 }
 0x650   : > { %v17745_v56 = vadd.f32 %v8963_v10, %v8770_v50  ;;  %v17747_v3 = vadd.f32 %v12458_v63, %v9066_v13  ;;  %v12660_v50 = vld [vmem:[%s18177_s7] sm:$0xff]  }
 0x651   : > { %v12427_v43 = vpop.f32.mrf.mxu0  ;;  %v17749_v45 = vpop.f32.mrf.mxu1  ;;  %12582 = vmatpush3.bf16.msra.mxu1 %v12660_v50 }
 0x652   : > { %v9069_v49 = vadd.f32 %v12427_v43, %v17577_v21 }
 0x653   : > { %v8976_v34 = vpop.f32.mrf.mxu0  ;;  %v12461_v61 = vpop.f32.mrf.mxu1 }
 0x654   : > { %v17754_v24 = vadd.f32 %v8976_v34, %v17582_v29  ;;  %v17756_v59 = vadd.f32 %v12461_v61, %v9069_v49 }
 0x655   : > { %v12428_v9 = vpop.f32.mrf.mxu0  ;;  %v17758_v38 = vpop.f32.mrf.mxu1 }
 0x656   : > { %v9070_v0 = vadd.f32 %v12428_v9, %v17590_v28 }
 0x657   : > { %v8979_v2 = vpop.f32.mrf.mxu0  ;;  %v12462_v58 = vpop.f32.mrf.mxu1 }
 0x658   : > { %v17762_v62 = vadd.f32 %v8979_v2, %v8774_v7  ;;  %v17764_v46 = vadd.f32 %v12462_v58, %v9070_v0 }
 0x659   : > { %v12431_v21 = vpop.f32.mrf.mxu0  ;;  %v17766_v8 = vpop.f32.mrf.mxu1 }
 0x65a   : > { %v9073_v29 = vadd.f32 %v12431_v21, %v17596_v36 }
 0x65b   : > { %v8992_v11 = vpop.f32.mrf.mxu0  ;;  %v12465_v37 = vpop.f32.mrf.mxu1 }
 0x65c   : > { %v17770_v15 = vadd.f32 %v8992_v11, %v17603_v42  ;;  %v17772_v12 = vadd.f32 %v12465_v37, %v9073_v29 }
 0x65d   : > { %v12432_v57 = vpop.f32.mrf.mxu0  ;;  %v17774_v28 = vpop.f32.mrf.mxu1 }
 0x65e   : > { %v9074_v13 = vadd.f32 %v12432_v57, %v17606_v5 }
 0x65f   : > { %v8995_v10 = vpop.f32.mrf.mxu0  ;;  %v12466_v63 = vpop.f32.mrf.mxu1 }
 0x660   : > { %v17781_v36 = vadd.f32 %v8995_v10, %v17609_v54  ;;  %v17783_v4 = vadd.f32 %v12466_v63, %v9074_v13 }
 0x661   : > { %v12435_v42 = vpop.f32.mrf.mxu0  ;;  %v17785_v18 = vpop.f32.mrf.mxu1 }
 0x662   : > { %v9077_v26 = vadd.f32 %v12435_v42, %v17618_v30 }
 0x663   : > { %v9008_v43 = vpop.f32.mrf.mxu0  ;;  %v12469_v20 = vpop.f32.mrf.mxu1 }
 0x664   : > { %v17789_v49 = vadd.f32 %v9008_v43, %v17626_v17  ;;  %v17791_v34 = vadd.f32 %v12469_v20, %v9077_v26 }
 0x665   : > { %v12436_v5 = vpop.f32.mrf.mxu0  ;;  %v17793_v61 = vpop.f32.mrf.mxu1 }
 0x666   : > { %19324 = vst [vmem:[#allocation33_spill] sm:$0xff] %v17789_v49  ;;  %19325 = vst [vmem:[#allocation109_spill] sm:$0xff] %v17793_v61  ;;  %v9078_v54 = vadd.f32 %v12436_v5, %v17629_v55 }
 0x667   : > { %v9011_v9 = vpop.f32.mrf.mxu0  ;;  %v12470_v7 = vpop.f32.mrf.mxu1 }
 0x668   : > { %v17797_v0 = vadd.f32 %v9011_v9, %v17632_v52  ;;  %v17799_v2 = vadd.f32 %v12470_v7, %v9078_v54 }
 0x669   : > { %v12439_v30 = vpop.f32.mrf.mxu0  ;;  %v17801_v58 = vpop.f32.mrf.mxu1 }
 0x66a   : > { %19326 = vst [vmem:[#allocation79_spill] sm:$0xff] %v17797_v0  ;;  %19327 = vst [vmem:[#allocation59_spill] sm:$0xff] %v17801_v58  ;;  %v9081_v17 = vadd.f32 %v12439_v30, %v17638_v1 }
 0x66b   : > { %v9024_v21 = vpop.f32.mrf.mxu0  ;;  %v12473_v29 = vpop.f32.mrf.mxu1 }
 0x66c   : > { %v17805_v11 = vadd.f32 %v9024_v21, %v17644_v19  ;;  %v17807_v37 = vadd.f32 %v12473_v29, %v9081_v17 }
 0x66d   : > { %v12440_v55 = vpop.f32.mrf.mxu0  ;;  %v17809_v57 = vpop.f32.mrf.mxu1 }
 0x66e   : > { %19328 = vst [vmem:[#allocation56_spill] sm:$0xff] %v17805_v11  ;;  %19329 = vst [vmem:[#allocation45_spill] sm:$0xff] %v17809_v57  ;;  %v9082_v52 = vadd.f32 %v12440_v55, %v17647_v16 }
 0x66f   : > { %v9027_v50 = vpop.f32.mrf.mxu0  ;;  %v12474_v13 = vpop.f32.mrf.mxu1 }
 0x670   : > { %v17813_v10 = vadd.f32 %v9027_v50, %v17650_v53  ;;  %v17815_v63 = vadd.f32 %v12474_v13, %v9082_v52 }
 0x671   : > { %v12443_v1 = vpop.f32.mrf.mxu0  ;;  %v17817_v42 = vpop.f32.mrf.mxu1 }
 0x672   : > { %19330 = vst [vmem:[#allocation37_spill] sm:$0xff] %v17813_v10  ;;  %19331 = vst [vmem:[#allocation8_spill] sm:$0xff] %v17817_v42  ;;  %v9085_v19 = vadd.f32 %v12443_v1, %v17683_v40 }
 0x673   : > { %v9040_v26 = vpop.f32.mrf.mxu0  ;;  %v12477_v43 = vpop.f32.mrf.mxu1 }
 0x674   : > { %v17821_v20 = vadd.f32 %v9040_v26, %v17688_v14  ;;  %v17823_v5 = vadd.f32 %v12477_v43, %v9085_v19 }
 0x675   : > { %v12444_v16 = vpop.f32.mrf.mxu0  ;;  %v17825_v54 = vpop.f32.mrf.mxu1 }
 0x676   : > { %19332 = vst [vmem:[#allocation100_spill] sm:$0xff] %v17821_v20  ;;  %19333 = vst [vmem:[#allocation34_spill] sm:$0xff] %v17825_v54  ;;  %v9086_v53 = vadd.f32 %v12444_v16, %v17692_v6 }
 0x677   : > { %v9043_v9 = vpop.f32.mrf.mxu0  ;;  %v12478_v7 = vpop.f32.mrf.mxu1 }
 0x678   : > { %v17829_v30 = vadd.f32 %v9043_v9, %v17695_v23  ;;  %v17831_v17 = vadd.f32 %v12478_v7, %v9086_v53 }
 0x679   : > { %v17833_v40 = vpop.f32.mrf.mxu1  ;;  %v12483_v21 = vpop.f32.mrf.mxu0 }
 0x67a   : > { %19334 = vst [vmem:[#allocation11_spill] sm:$0xff] %v17829_v30  ;;  %19335 = vst [vmem:[#allocation40_spill] sm:$0xff] %v17833_v40  ;;  %v17836_v14 = vadd.f32 %v12483_v21, %v17699_v41 }
 0x67b   : > { %v9580_v29 = vpop.f32.mrf.mxu0  ;;  %v17838_v55 = vpop.f32.mrf.mxu1 }
 0x67c   : > { %v17841_v52 = vadd.f32 %v9580_v29, %v17703_v60 }
 0x67d   : > { %v12484_v6 = vpop.f32.mrf.mxu0  ;;  %v17843_v50 = vpop.f32.mrf.mxu1 }
 0x67e   : > { %v17846_v23 = vadd.f32 %v12484_v6, %v17709_v48 }
 0x67f   : > { %v17848_v13 = vpop.f32.mrf.mxu0  ;;  %v17850_v1 = vpop.f32.mrf.mxu1 }
 0x681   : > { %v12487_v19 = vpop.f32.mrf.mxu0  ;;  %v17855_v26 = vpop.f32.mrf.mxu1 }
 0x682   : > { %v17853_v41 = vadd.f32 %v12487_v19, %v17718_v51 }
 0x683   : > { %v17857_v43 = vpop.f32.mrf.mxu0 }
 0x685   : > { %v12488_v60 = vpop.f32.mrf.mxu0  ;;  %v17859_v16 = vpop.f32.mrf.mxu1 }
 0x686   : > { %v17862_v53 = vadd.f32 %v12488_v60, %v17728_v35 }
 0x687   : > { %v17864_v48 = vpop.f32.mrf.mxu0  ;;  %v17866_v7 = vpop.f32.mrf.mxu1 }
 0x689   : > { %v12491_v9 = vpop.f32.mrf.mxu0  ;;  %v17873_v6 = vpop.f32.mrf.mxu1 }
 0x68a   : > { %v17869_v21 = vadd.f32 %v12491_v9, %v17737_v44  ;;  %v19336_v44 = vmov 0.0  }
 0x68b   : > { %v17871_v51 = vpop.f32.mrf.mxu0  ;;  %v17880_v60 = vpop.f32.mrf.mxu1  ;;  %12583 = vmatprep.mubr.msk.bf16.mxu1 %vm12858_vm6, %v19336_v44 }
 0x68d   : > { %v12492_v29 = vpop.f32.mrf.mxu0  ;;  %v17888_v20 = vpop.f32.mrf.mxu1 }
 0x68e   : > { %v17876_v19 = vadd.f32 %v12492_v29, %v17747_v3 }
 0x68f   : > { %v17878_v40 = vpop.f32.mrf.mxu0  ;;  %v17895_v10 = vpop.f32.mrf.mxu1 }
 0x691   : > { %v12495_v35 = vpop.f32.mrf.mxu0  ;;  %v17902_v11 = vpop.f32.mrf.mxu1 }
 0x692   : > { %v17883_v30 = vadd.f32 %v12495_v35, %v17756_v59 }
 0x693   : > { %v17885_v54 = vpop.f32.mrf.mxu0 }
 0x695   : > { %v12496_v9 = vpop.f32.mrf.mxu0 }
 0x696   : > { %v17891_v42 = vadd.f32 %v12496_v9, %v17764_v46  ;;  %v17909_v9 = vpop.f32.mrf.mxu1 }
 0x697   : > { %v17893_v3 = vpop.f32.mrf.mxu0 }
 0x699   : > { %v12499_v29 = vpop.f32.mrf.mxu0 }
 0x69a   : > { %v17898_v57 = vadd.f32 %v12499_v29, %v17772_v12  ;;  %v17916_v29 = vpop.f32.mrf.mxu1 }
 0x69b   : > { %v17900_v59 = vpop.f32.mrf.mxu0 }
 0x69c   : > { %19337 = vst [vmem:[#allocation84_spill] sm:$0xff] %v17898_v57 }
 0x69d   : > { %v12500_v35 = vpop.f32.mrf.mxu0 }
 0x69e   : > { %v17905_v44 = vadd.f32 %v12500_v35, %v17783_v4  ;;  %v17923_v35 = vpop.f32.mrf.mxu1 }
 0x69f   : > { %v17907_v58 = vpop.f32.mrf.mxu0 }
 0x6a0   : > { %19338 = vst [vmem:[#allocation38_spill] sm:$0xff] %v17905_v44  ;;  %19339 = vst [vmem:[#allocation72_spill] sm:$0xff] %v17907_v58 }
 0x6a1   : > { %v12503_v46 = vpop.f32.mrf.mxu0 }
 0x6a2   : > { %v17912_v0 = vadd.f32 %v12503_v46, %v17791_v34  ;;  %v17930_v46 = vpop.f32.mrf.mxu1 }
 0x6a3   : > { %v17914_v61 = vpop.f32.mrf.mxu0 }
 0x6a4   : > { %19340 = vst [vmem:[#allocation12_spill] sm:$0xff] %v17912_v0  ;;  %19341 = vst [vmem:[#allocation31_spill] sm:$0xff] %v17914_v61 }
 0x6a5   : > { %v12504_v12 = vpop.f32.mrf.mxu0 }
 0x6a6   : > { %v17919_v49 = vadd.f32 %v12504_v12, %v17799_v2  ;;  %v17937_v12 = vpop.f32.mrf.mxu1 }
 0x6a7   : > { %v17921_v57 = vpop.f32.mrf.mxu0 }
 0x6a8   : > { %19342 = vst [vmem:[#allocation17_spill] sm:$0xff] %v17919_v49  ;;  %19343 = vst [vmem:[#allocation43_spill] sm:$0xff] %v17921_v57 }
 0x6a9   : > { %v12507_v4 = vpop.f32.mrf.mxu0 }
 0x6aa   : > { %v17926_v44 = vadd.f32 %v12507_v4, %v17807_v37  ;;  %v17944_v4 = vpop.f32.mrf.mxu1 }
 0x6ab   : > { %v17928_v58 = vpop.f32.mrf.mxu0 }
 0x6ac   : > { %19344 = vst [vmem:[#allocation70_spill] sm:$0xff] %v17926_v44  ;;  %19345 = vst [vmem:[#allocation82_spill] sm:$0xff] %v17928_v58 }
 0x6ad   : > { %v12508_v34 = vpop.f32.mrf.mxu0 }
 0x6ae   : > { %v17933_v0 = vadd.f32 %v12508_v34, %v17815_v63  ;;  %v9382_v63 = vadd.f32 %v17711_v47, %v17707_v22  ;;  %v17967_v47 = vld [vmem:[%s18176_s6] ss:$0 sm:$0xff] }
 0x6af   : > { %v17935_v61 = vpop.f32.mrf.mxu0 }
 0x6b0   : > { %19346 = vst [vmem:[#allocation90_spill] sm:$0xff] %v17933_v0  ;;  %v10003_v0 = vadd.f32 %v17838_v55, %v17836_v14 }
 0x6b1   : > { %v12511_v2 = vpop.f32.mrf.mxu0 }
 0x6b2   : > { %v17940_v49 = vadd.f32 %v12511_v2, %v17823_v5  ;;  %v10001_v5 = vadd.f32 %v17843_v50, %v17841_v52  ;;  %v9708_v2 = vadd.f32 %v17848_v13, %v9382_v63 }
 0x6b3   : > { %v17942_v57 = vpop.f32.mrf.mxu0 }
 0x6b4   : > { %19347 = vst [vmem:[#allocation102_spill] sm:$0xff] %v17940_v49  ;;  %19348 = vst [vmem:[#allocation50_spill] sm:$0xff] %v17942_v57  ;;  %v17958_v49 = vpop.f32.mrf.mxu1  ;;  %v10002_v55 = vadd.f32 %v17855_v26, %v9708_v2  ;;  %v10007_v26 = vadd.f32 %v17859_v16, %v17853_v41 }
 0x6b5   : > { %v12512_v37 = vpop.f32.mrf.mxu0 }
 0x6b6   : > { %v17947_v44 = vadd.f32 %v12512_v37, %v17831_v17  ;;  %v9385_v17 = vadd.f32 %v17720_v32, %v17716_v39  ;;  %v10004_v37 = vadd.f32 %v17850_v1, %v17846_v23  ;;  %v17971_v50 = vpop.f32.mrf.mxu1  ;;  %v9386_v32 = vadd.f32 %v17730_v33, %v17726_v27 }
 0x6b7   : > { %v17949_v58 = vpop.f32.mrf.mxu0  ;;  %v9389_v27 = vadd.f32 %v17739_v25, %v17735_v31  ;;  %v10008_v33 = vadd.f32 %v17873_v6, %v17862_v53  ;;  %v9390_v6 = vadd.f32 %v17749_v45, %v17745_v56 }
 0x6b8   : > { %19349 = vst [vmem:[#allocation13_spill] sm:$0xff] %v17947_v44  ;;  %v9711_v52 = vadd.f32 %v17857_v43, %v9385_v17  ;;  %v9712_v1 = vadd.f32 %v17864_v48, %v9386_v32 }
 0x6b9   : > { %v12551_v34 = vpop.f32.mrf.mxu0 }
 0x6ba   : > { %v10329_v44 = vadd.f32 %v12551_v34, %v10003_v0  ;;  %v10005_v43 = vadd.f32 %v17866_v7, %v9711_v52  ;;  %v10006_v16 = vadd.f32 %v17880_v60, %v9712_v1  ;;  %v9715_v7 = vadd.f32 %v17871_v51, %v9389_v27 }
 0x6bb   : > { %v10200_v57 = vpop.f32.mrf.mxu0  ;;  %v9716_v1 = vadd.f32 %v17878_v40, %v9390_v6 }
 0x6bc   : > { %v10327_v22 = vadd.f32 %v10200_v57, %v10001_v5  ;;  %v10368_v57 = vadd.f32 %v17967_v47, %v10329_v44  ;;  %v17981_v5 = vpop.f32.mrf.mxu1 }
 0x6bd   : > { %v12552_v14 = vpop.f32.mrf.mxu0 }
 0x6be   : > { %v10366_v13 = vadd.f32 %v17967_v47, %v10327_v22  ;;  %v10330_v39 = vadd.f32 %v12552_v14, %v10004_v37  ;;  %v10400_v44 = vmax.f32 %v10368_v57, 0.0  ;;  %v17992_v52 = vpop.f32.mrf.mxu1 }
 0x6bf   : > { %v10203_v0 = vpop.f32.mrf.mxu0 }
 0x6c0   : > { %v10328_v23 = vadd.f32 %v10203_v0, %v10002_v55  ;;  %v10398_v63 = vmax.f32 %v10366_v13, 0.0  ;;  %v10369_v2 = vadd.f32 %v17967_v47, %v10330_v39  ;;  %v10434_v60 = vsel %vm10430_vm7, %v10400_v44, 0.0 }
 0x6c1   : > { %v12555_v34 = vpop.f32.mrf.mxu0 }
 0x6c2   : > { %v10367_v17 = vadd.f32 %v17967_v47, %v10328_v23  ;;  %v10333_v22 = vadd.f32 %v12555_v34, %v10007_v26  ;;  %v10431_v14 = vsel %vm10430_vm7, %v10398_v63, 0.0  ;;  %v10401_v13 = vmax.f32 %v10369_v2, 0.0 }
 0x6c3   : > { %v10216_v48 = vpop.f32.mrf.mxu0  ;;  %v10011_v23 = vadd.f32 %v17888_v20, %v17869_v21  ;;  %v10009_v26 = vadd.f32 %v17895_v10, %v9715_v7  ;;  %v10012_v20 = vadd.f32 %v17902_v11, %v17876_v19 }
 0x6c4   : > { %v10399_v37 = vmax.f32 %v10367_v17, 0.0  ;;  %v10331_v41 = vadd.f32 %v10216_v48, %v10005_v43  ;;  %v10372_v51 = vadd.f32 %v17967_v47, %v10333_v22  ;;  %v18004_v43 = vpop.f32.mrf.mxu1  ;;  %v10436_v56 = vsel %vm10430_vm7, %v10401_v13, 0.0 }
 0x6c5   : > { %v12556_v55 = vpop.f32.mrf.mxu0  ;;  %v9393_v17 = vadd.f32 %v17758_v38, %v17754_v24 }
 0x6c6   : > { %v10432_v31 = vsel %vm10430_vm7, %v10399_v37, 0.0  ;;  %v10370_v25 = vadd.f32 %v17967_v47, %v10331_v41  ;;  %v10334_v53 = vadd.f32 %v12556_v55, %v10008_v33  ;;  %v10404_v33 = vmax.f32 %v10372_v51, 0.0  ;;  %v18016_v7 = vpop.f32.mrf.mxu1 }
 0x6c7   : > { %v10433_v39 = vadd.f32 %v10432_v31, %v10431_v14  ;;  %v10219_v32 = vpop.f32.mrf.mxu0  ;;  %v10010_v37 = vadd.f32 %v17909_v9, %v9716_v1  ;;  %v9719_v22 = vadd.f32 %v17885_v54, %v9393_v17  ;;  %v9394_v14 = vadd.f32 %v17766_v8, %v17762_v62 }
 0x6c8   : > { %v10402_v0 = vmax.f32 %v10370_v25, 0.0  ;;  %v10332_v57 = vadd.f32 %v10219_v32, %v10006_v16  ;;  %v10373_v45 = vadd.f32 %v17967_v47, %v10334_v53  ;;  %v10442_v9 = vsel %vm10430_vm7, %v10404_v33, 0.0  ;;  %v18028_v51 = vpop.f32.mrf.mxu1 }
 0x6c9   : > { %v10435_v63 = vadd.f32 %v10434_v60, %v10433_v39  ;;  %v12559_v34 = vpop.f32.mrf.mxu0  ;;  %v10015_v53 = vadd.f32 %v17916_v29, %v17883_v30  ;;  %v9720_v6 = vadd.f32 %v17893_v3, %v9394_v14  ;;  %v10013_v60 = vadd.f32 %v17923_v35, %v9719_v22 }
 0x6ca   : > { %v10371_v2 = vadd.f32 %v17967_v47, %v10332_v57  ;;  %v10337_v40 = vadd.f32 %v12559_v34, %v10011_v23  ;;  %v10438_v10 = vsel %vm10430_vm7, %v10402_v0, 0.0  ;;  %v10405_v24 = vmax.f32 %v10373_v45, 0.0  ;;  %v18040_v17 = vpop.f32.mrf.mxu1 }
 0x6cb   : > { %v10437_v21 = vadd.f32 %v10436_v56, %v10435_v63  ;;  %v10232_v27 = vpop.f32.mrf.mxu0  ;;  %v9397_v57 = vadd.f32 %v17774_v28, %v17770_v15  ;;  %v10016_v30 = vadd.f32 %v17930_v46, %v17891_v42 }
 0x6cc   : > { %v10403_v48 = vmax.f32 %v10371_v2, 0.0  ;;  %v10335_v44 = vadd.f32 %v10232_v27, %v10009_v26  ;;  %v10376_v13 = vadd.f32 %v17967_v47, %v10337_v40  ;;  %v10444_v62 = vsel %vm10430_vm7, %v10405_v24, 0.0  ;;  %v18052_v24 = vpop.f32.mrf.mxu1 }
 0x6cd   : > { %v10439_v41 = vadd.f32 %v10438_v10, %v10437_v21  ;;  %v12560_v16 = vpop.f32.mrf.mxu0  ;;  %v10014_v26 = vadd.f32 %v17937_v12, %v9720_v6  ;;  %v9723_v56 = vadd.f32 %v17900_v59, %v9397_v57  ;;  %v19350_v10 = vld [vmem:[#allocation84_spill] sm:$0xff] }
 0x6ce   : > { %v10440_v38 = vsel %vm10430_vm7, %v10403_v48, 0.0  ;;  %v10374_v11 = vadd.f32 %v17967_v47, %v10335_v44  ;;  %v10338_v19 = vadd.f32 %v12560_v16, %v10012_v20  ;;  %v10408_v29 = vmax.f32 %v10376_v13, 0.0  ;;  %v19351_v44 = vld [vmem:[#allocation72_spill] sm:$0xff] }
 0x6cf   : > { %v10441_v55 = vadd.f32 %v10440_v38, %v10439_v41  ;;  %v10235_v31 = vpop.f32.mrf.mxu0  ;;  %v9398_v20 = vadd.f32 %v17785_v18, %v17781_v36  ;;  %v10019_v48 = vadd.f32 %v17944_v4, %v19350_v10  ;;  %v10017_v16 = vadd.f32 %v17958_v49, %v9723_v56  ;;  %v19358_v56 = vld [vmem:[#allocation12_spill] sm:$0xff]  ;;  %v19362_v10 = vld [vmem:[#allocation17_spill] sm:$0xff] }
 0x6d0   : > { %v10406_v54 = vmax.f32 %v10374_v11, 0.0  ;;  %v10336_v25 = vadd.f32 %v10235_v31, %v10010_v37  ;;  %v10377_v8 = vadd.f32 %v17967_v47, %v10338_v19  ;;  %v10450_v27 = vsel %vm10430_vm7, %v10408_v29, 0.0  ;;  %v19352_v11 = vld [vmem:[#allocation33_spill] sm:$0xff]  ;;  %v19356_v29 = vld [vmem:[#allocation79_spill] sm:$0xff] }
 0x6d1   : > { %v10443_v39 = vadd.f32 %v10442_v9, %v10441_v55  ;;  %v12563_v32 = vpop.f32.mrf.mxu0  ;;  %v9724_v37 = vadd.f32 %v19351_v44, %v9398_v20  ;;  %v19353_v19 = vld [vmem:[#allocation109_spill] sm:$0xff]  ;;  %v19354_v55 = vld [vmem:[#allocation38_spill] sm:$0xff] }
 0x6d2   : > { %v10375_v0 = vadd.f32 %v17967_v47, %v10336_v25  ;;  %v10446_v1 = vsel %vm10430_vm7, %v10406_v54, 0.0  ;;  %v10341_v63 = vadd.f32 %v12563_v32, %v10015_v53  ;;  %v10409_v15 = vmax.f32 %v10377_v8, 0.0  ;;  %v12542_v8 = vpop.f32.mrf.mxu1 }
 0x6d3   : > { %v10445_v3 = vadd.f32 %v10444_v62, %v10443_v39  ;;  %v10248_v23 = vpop.f32.mrf.mxu0  ;;  %v9401_v14 = vadd.f32 %v19353_v19, %v19352_v11  ;;  %v10020_v4 = vadd.f32 %v17971_v50, %v19354_v55  ;;  %v10018_v6 = vadd.f32 %v17981_v5, %v9724_v37  ;;  %v19355_v39 = vld [vmem:[#allocation31_spill] sm:$0xff] }
 0x6d4   : > { %v10407_v35 = vmax.f32 %v10375_v0, 0.0  ;;  %v10339_v34 = vadd.f32 %v10248_v23, %v10013_v60  ;;  %v10380_v12 = vadd.f32 %v17967_v47, %v10341_v63  ;;  %v10452_v36 = vsel %vm10430_vm7, %v10409_v15, 0.0  ;;  %v9973_v20 = vpop.f32.mrf.mxu1 }
 0x6d5   : > { %v10447_v45 = vadd.f32 %v10446_v1, %v10445_v3  ;;  %v12564_v2 = vpop.f32.mrf.mxu0  ;;  %v9727_v32 = vadd.f32 %v19355_v39, %v9401_v14  ;;  %v19357_v3 = vld [vmem:[#allocation59_spill] sm:$0xff] }
 0x6d6   : > { %v10448_v28 = vsel %vm10430_vm7, %v10407_v35, 0.0  ;;  %v10378_v42 = vadd.f32 %v17967_v47, %v10339_v34  ;;  %v10342_v46 = vadd.f32 %v12564_v2, %v10016_v30  ;;  %v10412_v54 = vmax.f32 %v10380_v12, 0.0  ;;  %v19359_v2 = vld [vmem:[#allocation43_spill] sm:$0xff]  ;;  %v19360_v12 = vld [vmem:[#allocation56_spill] sm:$0xff]  ;;  %v12545_v14 = vpop.f32.mrf.mxu1 }
 0x6d7   : > { %v10449_v21 = vadd.f32 %v10448_v28, %v10447_v45  ;;  %v10251_v40 = vpop.f32.mrf.mxu0  ;;  %v9402_v23 = vadd.f32 %v19357_v3, %v19356_v29  ;;  %v10023_v45 = vadd.f32 %v17992_v52, %v19358_v56 }
 0x6d8   : > { %v10410_v59 = vmax.f32 %v10378_v42, 0.0  ;;  %v10340_v33 = vadd.f32 %v10251_v40, %v10014_v26  ;;  %v10381_v18 = vadd.f32 %v17967_v47, %v10342_v46  ;;  %v10458_v5 = vsel %vm10430_vm7, %v10412_v54, 0.0 }
 0x6d9   : > { %v10451_v22 = vadd.f32 %v10450_v27, %v10449_v21  ;;  %v12567_v41 = vpop.f32.mrf.mxu0  ;;  %v9728_v15 = vadd.f32 %v19359_v2, %v9402_v23  ;;  %v10021_v46 = vadd.f32 %v18004_v43, %v9727_v32  ;;  %v19366_v32 = vld [vmem:[#allocation70_spill] sm:$0xff] }
 0x6da   : > { %v10379_v38 = vadd.f32 %v17967_v47, %v10340_v33  ;;  %v10345_v31 = vadd.f32 %v12567_v41, %v10019_v48  ;;  %v10454_v49 = vsel %vm10430_vm7, %v10410_v59, 0.0  ;;  %v10413_v0 = vmax.f32 %v10381_v18, 0.0  ;;  %v19361_v59 = vld [vmem:[#allocation45_spill] sm:$0xff]  ;;  %v19363_v18 = vld [vmem:[#allocation82_spill] sm:$0xff] }
 0x6db   : > { %v10453_v13 = vadd.f32 %v10452_v36, %v10451_v22  ;;  %v10264_v9 = vpop.f32.mrf.mxu0  ;;  %v9405_v33 = vadd.f32 %v19361_v59, %v19360_v12  ;;  %v10024_v48 = vadd.f32 %v18016_v7, %v19362_v10  ;;  %v10022_v36 = vadd.f32 %v18028_v51, %v9728_v15  ;;  %v19372_v10 = vld [vmem:[#allocation40_spill] sm:$0xff] }
 0x6dc   : > { %v10411_v25 = vmax.f32 %v10379_v38, 0.0  ;;  %v10343_v53 = vadd.f32 %v10264_v9, %v10017_v16  ;;  %v10384_v35 = vadd.f32 %v17967_v47, %v10345_v31  ;;  %v10460_v21 = vsel %vm10430_vm7, %v10413_v0, 0.0  ;;  %v19364_v31 = vld [vmem:[#allocation37_spill] sm:$0xff]  ;;  %v19365_v9 = vld [vmem:[#allocation8_spill] sm:$0xff] }
 0x6dd   : > { %v10455_v60 = vadd.f32 %v10454_v49, %v10453_v13  ;;  %v12568_v62 = vpop.f32.mrf.mxu0  ;;  %v9731_v38 = vadd.f32 %v19363_v18, %v9405_v33  ;;  %v9406_v54 = vadd.f32 %v19365_v9, %v19364_v31  ;;  %v19371_v33 = vld [vmem:[#allocation11_spill] sm:$0xff] }
 0x6de   : > { %v10456_v57 = vsel %vm10430_vm7, %v10411_v25, 0.0  ;;  %v10382_v50 = vadd.f32 %v17967_v47, %v10343_v53  ;;  %v10346_v30 = vadd.f32 %v12568_v62, %v10020_v4  ;;  %v10416_v52 = vmax.f32 %v10384_v35, 0.0  ;;  %v19368_v35 = vld [vmem:[#allocation34_spill] sm:$0xff] }
 0x6df   : > { %v10457_v1 = vadd.f32 %v10456_v57, %v10455_v60  ;;  %v10267_v63 = vpop.f32.mrf.mxu0  ;;  %v10027_v60 = vadd.f32 %v18040_v17, %v19366_v32  ;;  %v9732_v62 = vadd.f32 %v17935_v61, %v9406_v54 }
 0x6e0   : > { %v10414_v34 = vmax.f32 %v10382_v50, 0.0  ;;  %v10344_v26 = vadd.f32 %v10267_v63, %v10018_v6  ;;  %v10385_v40 = vadd.f32 %v17967_v47, %v10346_v30  ;;  %v10466_v53 = vsel %vm10430_vm7, %v10416_v52, 0.0  ;;  %v9986_v30 = vpop.f32.mrf.mxu1 }
 0x6e1   : > { %v10459_v28 = vadd.f32 %v10458_v5, %v10457_v1  ;;  %v12571_v42 = vpop.f32.mrf.mxu0  ;;  %v10025_v50 = vadd.f32 %v18052_v24, %v9731_v38  ;;  %v19367_v1 = vld [vmem:[#allocation100_spill] sm:$0xff]  ;;  %v19369_v5 = vld [vmem:[#allocation90_spill] sm:$0xff]  ;;  %v10026_v15 = vadd.f32 %v9973_v20, %v9732_v62 }
 0x6e2   : > { %v10383_v27 = vadd.f32 %v17967_v47, %v10344_v26  ;;  %v10462_v22 = vsel %vm10430_vm7, %v10414_v34, 0.0  ;;  %v10349_v43 = vadd.f32 %v12571_v42, %v10023_v45  ;;  %v10417_v55 = vmax.f32 %v10385_v40, 0.0  ;;  %v12546_v40 = vpop.f32.mrf.mxu1 }
 0x6e3   : > { %v10461_v44 = vadd.f32 %v10460_v21, %v10459_v28  ;;  %v10280_v37 = vpop.f32.mrf.mxu0  ;;  %v9409_v63 = vadd.f32 %v19368_v35, %v19367_v1  ;;  %v10028_v34 = vadd.f32 %v12542_v8, %v19369_v5  ;;  %v19370_v28 = vld [vmem:[#allocation50_spill] sm:$0xff] }
 0x6e4   : > { %v10415_v41 = vmax.f32 %v10383_v27, 0.0  ;;  %v10347_v16 = vadd.f32 %v10280_v37, %v10021_v46  ;;  %v10388_v51 = vadd.f32 %v17967_v47, %v10349_v43  ;;  %v10468_v29 = vsel %vm10430_vm7, %v10417_v55, 0.0  ;;  %v19373_v43 = vld [vmem:[#allocation102_spill] sm:$0xff] }
 0x6e5   : > { %v10463_v11 = vadd.f32 %v10462_v22, %v10461_v44  ;;  %v12572_v19 = vpop.f32.mrf.mxu0  ;;  %v9735_v42 = vadd.f32 %v19370_v28, %v9409_v63 }
 0x6e6   : > { %v10464_v4 = vsel %vm10430_vm7, %v10415_v41, 0.0  ;;  %v10386_v7 = vadd.f32 %v17967_v47, %v10347_v16  ;;  %v10350_v13 = vadd.f32 %v12572_v19, %v10024_v48  ;;  %v10420_v61 = vmax.f32 %v10388_v51, 0.0  ;;  %v9989_v19 = vpop.f32.mrf.mxu1 }
 0x6e7   : > { %v10465_v49 = vadd.f32 %v10464_v4, %v10463_v11  ;;  %v10283_v25 = vpop.f32.mrf.mxu0  ;;  %v9410_v48 = vadd.f32 %v19372_v10, %v19371_v33  ;;  %v10031_v16 = vadd.f32 %v12545_v14, %v19373_v43  ;;  %v10029_v11 = vadd.f32 %v9986_v30, %v9735_v42  ;;  %v10504_v10 = vld [vmem:[%s18178_s8] sm:$0x1] }
 0x6e8   : > { %v10418_v6 = vmax.f32 %v10386_v7, 0.0  ;;  %v10348_v39 = vadd.f32 %v10283_v25, %v10022_v36  ;;  %v10389_v3 = vadd.f32 %v17967_v47, %v10350_v13  ;;  %v10474_v20 = vsel %vm10430_vm7, %v10420_v61, 0.0  ;;  %v19374_v13 = vld [vmem:[#allocation13_spill] sm:$0xff] }
 0x6e9   : > { %v10467_v0 = vadd.f32 %v10466_v53, %v10465_v49  ;;  %v12575_v57 = vpop.f32.mrf.mxu0  ;;  %v9736_v36 = vadd.f32 %v17949_v58, %v9410_v48  ;;  %v10032_v31 = vadd.f32 %v12546_v40, %v19374_v13 }
 0x6ea   : > { %v10387_v23 = vadd.f32 %v17967_v47, %v10348_v39  ;;  %v10353_v17 = vadd.f32 %v12575_v57, %v10027_v60  ;;  %v10470_v45 = vsel %vm10430_vm7, %v10418_v6, 0.0  ;;  %v10421_v27 = vmax.f32 %v10389_v3, 0.0 }
 0x6eb   : > { %v10469_v26 = vadd.f32 %v10468_v29, %v10467_v0  ;;  %v10296_v56 = vpop.f32.mrf.mxu0  ;;  %v10030_v51 = vadd.f32 %v9989_v19, %v9736_v36 }
 0x6ec   : > { %v10419_v2 = vmax.f32 %v10387_v23, 0.0  ;;  %v10351_v24 = vadd.f32 %v10296_v56, %v10025_v50  ;;  %v10392_v44 = vadd.f32 %v17967_v47, %v10353_v17  ;;  %v10476_v55 = vsel %vm10430_vm7, %v10421_v27, 0.0 }
 0x6ed   : > { %v10471_v46 = vadd.f32 %v10470_v45, %v10469_v26  ;;  %v12576_v21 = vpop.f32.mrf.mxu0 }
 0x6ee   : > { %v10472_v12 = vsel %vm10430_vm7, %v10419_v2, 0.0  ;;  %v10390_v59 = vadd.f32 %v17967_v47, %v10351_v24  ;;  %v10354_v8 = vadd.f32 %v12576_v21, %v10028_v34  ;;  %v10424_v9 = vmax.f32 %v10392_v44, 0.0 }
 0x6ef   : > { %v10473_v52 = vadd.f32 %v10472_v12, %v10471_v46  ;;  %v10299_v37 = vpop.f32.mrf.mxu0 }
 0x6f0   : > { %v10422_v22 = vmax.f32 %v10390_v59, 0.0  ;;  %v10352_v41 = vadd.f32 %v10299_v37, %v10026_v15  ;;  %v10393_v4 = vadd.f32 %v17967_v47, %v10354_v8  ;;  %v10482_v30 = vsel %vm10430_vm7, %v10424_v9, 0.0 }
 0x6f1   : > { %v10475_v18 = vadd.f32 %v10474_v20, %v10473_v52  ;;  %v12579_v38 = vpop.f32.mrf.mxu0 }
 0x6f2   : > { %v10391_v7 = vadd.f32 %v17967_v47, %v10352_v41  ;;  %v10478_v25 = vsel %vm10430_vm7, %v10422_v22, 0.0  ;;  %v10357_v53 = vadd.f32 %v12579_v38, %v10031_v16  ;;  %v10425_v32 = vmax.f32 %v10393_v4, 0.0 }
 0x6f3   : > { %v10477_v54 = vadd.f32 %v10476_v55, %v10475_v18  ;;  %v10312_v49 = vpop.f32.mrf.mxu0 }
 0x6f4   : > { %v10423_v14 = vmax.f32 %v10391_v7, 0.0  ;;  %v10355_v58 = vadd.f32 %v10312_v49, %v10029_v11  ;;  %v10396_v29 = vadd.f32 %v17967_v47, %v10357_v53  ;;  %v10484_v35 = vsel %vm10430_vm7, %v10425_v32, 0.0 }
 0x6f5   : > { %v10479_v6 = vadd.f32 %v10478_v25, %v10477_v54  ;;  %v12580_v39 = vpop.f32.mrf.mxu0 }
 0x6f6   : > { %v10480_v60 = vsel %vm10430_vm7, %v10423_v14, 0.0  ;;  %v10394_v62 = vadd.f32 %v17967_v47, %v10355_v58  ;;  %v10358_v0 = vadd.f32 %v12580_v39, %v10032_v31  ;;  %v10428_v26 = vmax.f32 %v10396_v29, 0.0 }
 0x6f7   : > { %v10481_v57 = vadd.f32 %v10480_v60, %v10479_v6  ;;  %v10315_v50 = vpop.f32.mrf.mxu0 }
 0x6f8   : > { %v10426_v3 = vmax.f32 %v10394_v62, 0.0  ;;  %v10356_v23 = vadd.f32 %v10315_v50, %v10030_v51  ;;  %v10397_v63 = vadd.f32 %v17967_v47, %v10358_v0  ;;  %v10490_v15 = vsel %vm10430_vm7, %v10428_v26, 0.0 }
 0x6f9   : > { %v10483_v1 = vadd.f32 %v10482_v30, %v10481_v57 }
 0x6fa   : > { %v10395_v5 = vadd.f32 %v17967_v47, %v10356_v23  ;;  %v10486_v17 = vsel %vm10430_vm7, %v10426_v3, 0.0  ;;  %v10429_v45 = vmax.f32 %v10397_v63, 0.0 }
 0x6fb   : > { %v10485_v34 = vadd.f32 %v10484_v35, %v10483_v1 }
 0x6fc   : > { %v10427_v56 = vmax.f32 %v10395_v5, 0.0  ;;  %v10492_v42 = vsel %vm10430_vm7, %v10429_v45, 0.0 }
 0x6fd   : > { %v10487_v61 = vadd.f32 %v10486_v17, %v10485_v34 }
 0x6fe   : > { %v10488_v2 = vsel %vm10430_vm7, %v10427_v56, 0.0 }
 0x6ff   : > { %v10489_v24 = vadd.f32 %v10488_v2, %v10487_v61 }
 0x701   : > { %v10491_v28 = vadd.f32 %v10490_v15, %v10489_v24 }
 0x703   : > { %v10493_v46 = vadd.f32 %v10492_v42, %v10491_v28 }
 0x705   : > { %v10494_v21 = vrot.slane %v10493_v46, 4 }
 0x707   : > { %v10495_v40 = vadd.f32 %v10494_v21, %v10493_v46 }
 0x709   : > { %v10496_v27 = vrot.slane %v10495_v40, 2 }
 0x70b   : > { %v10497_v47 = vadd.f32 %v10496_v27, %v10495_v40 }
 0x70d   : > { %v10498_v12 = vrot.slane %v10497_v47, 1 }
 0x70f   : > { %v10499_v59 = vadd.f32 %v10498_v12, %v10497_v47 }
 0x711   : > { %v10500_v8 = vmul.f32 0.00390625, %v10499_v59 }
 0x713   : > { %v10501_v33 = vpack.c.bf16 %v10500_v8, %v10500_v8 }
 0x715   : > { %12584 = vmatmul.mubr.msk.bf16.vlgmr.msra.gmra.mxu1 %vm10430_vm7, %v10501_v33 }
 0x7d5   : > { %v10548_v48 = vpop.f32.mrf.mxu1 }
 0x7d6   : > { %v10549_v52 = vadd.f32 %v10548_v48, %v10504_v10 }
 0x7d7   : > { %v12585_v44 = vpop.f32.mrf.mxu1 }
 0x7d8   : > { %v11196_v37 = vmul.f32 -1.442695, %v10549_v52 }
 0x7d9   : > { %v10551_v20 = vpop.f32.mrf.mxu1 }
 0x7da   : > { %12789 = vpow2.f32 %v11196_v37 }
 0x7db   : > { %v12586_v22 = vpop.f32.mrf.mxu1 }
 0x7e7   : > { %v12790_v41 = vpop.eup %12789 }
 0x7e8   : > { %v10557_v43 = vadd.f32 1.0, %v12790_v41 }
 0x7ea   : > { %12791 = vrcp.f32 %v10557_v43 }
 0x7f7   : > { %v12792_v16 = vpop.eup %12791 }
 0x7f8   : > { %10561 = vst.msk [vmem:[%s352_s20] sm:$0x1] %vm10560_vm8, %v12792_v16 }
 0x7f9   : > { %12806 = shalt.err (!%p12803_p3)
}
 0x7fa   : > { %s12807_s21 = scalar_lea.hbm %s18135_s27, 16  ;;  %s12811_s25 = scalar_lea.hbm %s18179_s9, 32 }
 0x7fb   : > { %p12808_p4 = scmp.ne.s32.totalorder %s18135_s27, %s12807_s21  ;;  %p12812_p9 = scmp.lt.s32.totalorder %s18135_s27, %s18179_s9 }
 0x7fc   : > { %p12813_p10 = scmp.lt.s32.totalorder %s12811_s25, %s12807_s21 }
 0x7fd   : > { %p12809_p7 = pnand %p12808_p4, %p12953_p5 }
 0x7fe   : > { %p12814_p11 = por %p12813_p10, %p12812_p9 }
 0x7ff   : > { %p12810_p8 = pneg %p12809_p7 }
 0x801   : > { %p12815_p12 = pnand %p12814_p11, %p12810_p8 }
 0x803   : > { %12818 = shalt.err (!%p12815_p12)
}
 0x804   : > { %12617 = dma.vmem_to_hbm [thread:$0]  (%p12953_p5), %s10581_s28, 16, %s18135_s27, %s10563_s29  }
 0x805 PF: > { %p12623_p13 = scmp.ge.s32.totalorder %s12853_s16, 2  ;;  %s10595_s11 = sand.u32 1, %s12841_s13  }
 0x806   : > { %s10596_s30 = scalar_lea.sflag [#allocation6], %s10595_s11 }
 0x807   : > { %p12620_p0 = pnand %p12623_p13, %p12957_p6 }
 0x809   : > { %p12621_p1 = pneg %p12620_p0 }
 0x80b   : > { %12836 = dma.done.wait (%p12621_p1), %s10596_s30, 16  }
 0x80c   : > { %12838 = vsyncadd (%p12621_p1), %s10596_s30, 4294967280  ;;  %p21_p2 = scmp.ge.s32.totalorder %s12940_s19, 4   ;;  %s19375_s13 = smov %s12845_s14 }
 0x80d   : > { %s19376_s14 = smov %s12849_s15  ;;  %s19377_s15 = smov %s12951_s22 }
 0x80e   : > { %s19378_s16 = smov %s12940_s19  ;;  %23 = sbr.rel (!%p21_p2) target bundleno = 3 (0x3), region = 127 }
 0x813   :  { %10608 = vsyncpa [#allocation6], 1 }
 0x814   :  { %10610 = vsyncpa [#allocation6 + $0x1], 1 }

</bundles_post_ra>
